<compile_context>
chip_gen: v7x
topology: tpu7x:2x2x1
jax: 0.10.0
libtpu: 0.0.40
codegen_flags: <defaults>
</compile_context>

<pallas_src>
import functools

import jax
import jax.numpy as jnp
from jax import lax
from jax.experimental import pallas as pl
from jax.experimental.pallas import tpu as pltpu


def _round_up(x, m):
    return ((x + m - 1) // m) * m


# ----------------------------- Pallas kernel --------------------------------
def _resblock_kernel(x_ref, mask_ref, w1_ref, b1_ref, w2_ref, b2_ref,
                     wsa_ref, bsa_ref, o_ref, col_ref, can_ref, feat_ref,
                     *, K, d, K_sa, Wl, G, LS, L, C, Cp, res_scale):
    """Fused ResBlock forward for one batch element.

    x_ref    : (Cp, L)   f32   zero-margined, lane-aligned-row input canvas
    mask_ref : (1, LS)   f32   1.0 at interior columns of the compute window
    w1/w2    : (Cp, K*K*Cp) bf16  tap-stacked conv weights
    b1/b2    : (Cp, 1)   f32   biases
    wsa_ref  : (2*K_sa*K_sa,) f32 SMEM  SA conv weights [ch*49 + ki*7 + kj]
    bsa_ref  : (1,)      f32 SMEM
    o_ref    : (Cp, LS)  f32   output window (interior rows)
    col_ref  : (K*K*Cp, LS) bf16 VMEM  im2col scratch (shared by both convs)
    can_ref  : (Cp, L)  bf16 VMEM  conv1-output canvas
    feat_ref : (8,  L)  f32  VMEM  SA feature canvas (row0 = avg, row1 = max)
    """
    f32, bf16 = jnp.float32, jnp.bfloat16
    half = K // 2
    half_sa = K_sa // 2
    tail = L - G - LS
    mask = mask_ref[...]                                  # (1, LS), hoisted

    # Guard/margin bands of the scratch canvases are read as conv "zero
    # padding" by interior outputs, so they must be zero.  They are small
    # (two ~M-row bands); re-zeroing them every step stays correct even when
    # the parallel batch axis is split across TensorCores.
    can_ref[:, 0:G] = jnp.zeros((Cp, G), bf16)
    can_ref[:, G + LS:L] = jnp.zeros((Cp, tail), bf16)
    feat_ref[:, 0:G] = jnp.zeros((8, G), f32)
    feat_ref[:, G + LS:L] = jnp.zeros((8, tail), f32)

    def fill_col(src_ref, cast):
        # im2col: stack the K*K shifted (Cp, LS) windows along the contraction
        # axis of the VMEM scratch.  Each window is a ref-sliced copy, so no
        # value larger than one window is ever live.
        for ki in range(K):
            for kj in range(K):
                t = ki * K + kj
                off = (ki - half) * d * Wl + (kj - half) * d
                win = src_ref[:, G + off:G + off + LS]
                col_ref[t * Cp:(t + 1) * Cp, :] = (
                    win.astype(bf16) if cast else win)

    # ---- conv1 (single MXU dot, bf16 x bf16 -> f32) + bias + ReLU -----------
    fill_col(x_ref, cast=True)
    h1 = jnp.dot(w1_ref[...], col_ref[...], preferred_element_type=f32)
    h1 = jnp.maximum(h1 + b1_ref[...], 0.0) * mask        # zero margin columns
    can_ref[:, G:G + LS] = h1.astype(bf16)

    # ---- conv2 + bias, * res_scale -------------------------------------------
    fill_col(can_ref, cast=False)
    res = jnp.dot(w2_ref[...], col_ref[...], preferred_element_type=f32)
    res = res + b2_ref[...]
    if res_scale != 1.0:
        res = res * res_scale                             # (Cp, LS) f32

    # ---- SpatialAttention features: channel mean / max over the C real chans
    avg = jnp.sum(res, axis=0, keepdims=True) * (1.0 / C)   # padded chans == 0
    row_id = lax.broadcasted_iota(jnp.int32, (Cp, LS), 0)
    mx = jnp.max(jnp.where(row_id < C, res, -1e30), axis=0, keepdims=True)
    feat_ref[0:1, G:G + LS] = avg * mask
    feat_ref[1:2, G:G + LS] = mx * mask

    # ---- 7x7 SA conv on the VPU: 2*49 broadcast-scalar FMAs ------------------
    acc = jnp.zeros((1, LS), f32)
    for ki in range(K_sa):
        for kj in range(K_sa):
            t = ki * K_sa + kj
            s = G + (ki - half_sa) * Wl + (kj - half_sa)
            acc = acc + wsa_ref[t] * feat_ref[0:1, s:s + LS]
            acc = acc + wsa_ref[K_sa * K_sa + t] * feat_ref[1:2, s:s + LS]
    attn = jax.nn.sigmoid(acc + bsa_ref[0])               # (1, LS)

    # ---- out = res * attn + x (residual add in f32) ---------------------------
    o_ref[...] = (res * attn + x_ref[:, G:G + LS]).astype(o_ref.dtype)


# ------------------------------- wrapper -------------------------------------
def resblock_forward(x, w1, b1, w2, b2, wsa, bsa, *, res_scale=1.0, dilation=1):
    """ResBlock forward (conv->relu->conv, *res_scale, spatial attention, +x).

    x    : (N, C, H, W) float32 (NCHW, like PyTorch)
    w1,w2: (C, C, K, K), b1,b2: (C,)          -- body convs (bias applied)
    wsa  : (1, 2, Ksa, Ksa), bsa: (1,)        -- SpatialAttention 7x7 conv
    """
    N, C, H, W = x.shape
    K = w1.shape[-1]
    K_sa = wsa.shape[-1]
    d = int(dilation)

    pad_conv = (K // 2) * d
    pad_sa = K_sa // 2
    M = max(pad_conv, pad_sa)                 # zero margin = "same" conv padding
    Hc, Wc = H + 2 * M, W + 2 * M
    Wl = _round_up(Wc, 128)                   # lane-aligned canvas rows
    S = _round_up(M, 128)                     # head guard (>= M, lane aligned)
    LS = H * Wl                               # compute window: interior rows
    G = S + M * Wl                            # window start in the flat canvas
    L = S + Hc * Wl + 128                     # total flat canvas length
    Cp = _round_up(max(C, 16), 16)            # channel pad for bf16 (16,128) tiling
    KKC = K * K * Cp

    f32, bf16 = jnp.float32, jnp.bfloat16

    # Input canvas: zero margins + channel pad + lane-aligned rows + guards.
    # Kept f32 (residual add stays f32); MXU windows are cast to bf16 in-kernel.
    xp = jnp.pad(x.astype(f32), ((0, 0), (0, Cp - C), (M, M), (M, Wl - W - M)))
    xc = jnp.pad(xp.reshape(N, Cp, Hc * Wl),
                 ((0, 0), (0, 0), (S, L - S - Hc * Wl)))              # (N, Cp, L)

    # Column mask over the compute window (rows are always interior).
    colmask = jnp.zeros((Wl,), f32).at[M:M + W].set(1.0)
    mask = jnp.tile(colmask, H).reshape(1, LS)

    def pack_w_stacked(w, cp_out, cp_in):
        co, ci, k, _ = w.shape
        wp = jnp.pad(w.astype(f32),
                     ((0, cp_out - co), (0, cp_in - ci), (0, 0), (0, 0)))
        # (cp_out, cp_in, K, K) -> (cp_out, K, K, cp_in) -> (cp_out, K*K*cp_in)
        return jnp.transpose(wp, (0, 2, 3, 1)).reshape(
            cp_out, k * k * cp_in).astype(bf16)

    def pack_b(b, cp):
        return jnp.pad(b.astype(f32), (0, cp - b.shape[0])).reshape(cp, 1)

    w1s, b1p = pack_w_stacked(w1, Cp, Cp), pack_b(b1, Cp)
    w2s, b2p = pack_w_stacked(w2, Cp, Cp), pack_b(b2, Cp)
    wsa_flat = wsa.astype(f32).reshape(2 * K_sa * K_sa)   # [ch*49 + ki*7 + kj]
    bsa_flat = bsa.astype(f32).reshape(1)

    kernel = functools.partial(
        _resblock_kernel, K=K, d=d, K_sa=K_sa, Wl=Wl, G=G, LS=LS, L=L,
        C=C, Cp=Cp, res_scale=float(res_scale))

    # Per-generation VMEM budget (v5e/v6e: 128 MiB, v7x: 64 MiB per core).
    try:
        vmem_cap = int(pltpu.get_tpu_info().vmem_capacity_bytes)
    except Exception:
        vmem_cap = 64 * 1024 * 1024
    vmem_limit = max(32 * 1024 * 1024,
                     min(int(vmem_cap * 0.85), 112 * 1024 * 1024))

    flops = int(N * (2 * 2 * Cp * KKC * LS + 2 * 2 * 2 * K_sa * K_sa * LS))
    bytes_accessed = int(4 * (xc.size + N * Cp * LS + mask.size
                              + b1p.size + b2p.size + wsa_flat.size
                              + bsa_flat.size)
                         + 2 * (w1s.size + w2s.size))

    out_win = pl.pallas_call(
        kernel,
        out_shape=jax.ShapeDtypeStruct((N, Cp, LS), f32),
        grid_spec=pltpu.PrefetchScalarGridSpec(
            num_scalar_prefetch=0,
            grid=(N,),
            in_specs=[
                pl.BlockSpec((None, Cp, L), lambda n: (n, 0, 0)),      # x canvas
                pl.BlockSpec((1, LS), lambda n: (0, 0)),               # col mask
                pl.BlockSpec((Cp, KKC), lambda n: (0, 0)),             # w1 stacked
                pl.BlockSpec((Cp, 1), lambda n: (0, 0)),               # b1
                pl.BlockSpec((Cp, KKC), lambda n: (0, 0)),             # w2 stacked
                pl.BlockSpec((Cp, 1), lambda n: (0, 0)),               # b2
                pl.BlockSpec(memory_space=pltpu.MemorySpace.SMEM),     # w_sa
                pl.BlockSpec(memory_space=pltpu.MemorySpace.SMEM),     # b_sa
            ],
            out_specs=pl.BlockSpec((None, Cp, LS), lambda n: (n, 0, 0)),
            scratch_shapes=[
                pltpu.VMEM((KKC, LS), bf16),   # im2col buffer (both body convs)
                pltpu.VMEM((Cp, L), bf16),     # conv1-output canvas
                pltpu.VMEM((8, L), f32),       # SA feature canvas (avg, max)
            ],
        ),
        compiler_params=pltpu.CompilerParams(
            dimension_semantics=("parallel",),
            vmem_limit_bytes=vmem_limit,
        ),
        cost_estimate=pl.CostEstimate(
            flops=flops, transcendentals=int(N * LS),
            bytes_accessed=bytes_accessed),
    )(xc, mask, w1s, b1p, w2s, b2p, wsa_flat, bsa_flat)

    # Window index p -> (row p // Wl, col p % Wl); keep real channels/columns.
    out = out_win.reshape(N, Cp, H, Wl)[:, :C, :, M:M + W]
    return out


# --------------------------- pure-JAX reference -------------------------------
def _conv_ref(inp, w, b, pad, dil):
    y = lax.conv_general_dilated(
        inp, w, window_strides=(1, 1), padding=((pad, pad), (pad, pad)),
        rhs_dilation=(dil, dil), dimension_numbers=("NCHW", "OIHW", "NCHW"),
        precision=lax.Precision.HIGHEST)
    return y + b[None, :, None, None]


def resblock_ref(x, w1, b1, w2, b2, wsa, bsa, *, res_scale=1.0, dilation=1):
    K = w1.shape[-1]
    p = (K // 2) * dilation
    h = jnp.maximum(_conv_ref(x, w1, b1, p, dilation), 0.0)
    res = _conv_ref(h, w2, b2, p, dilation) * res_scale
    avg = jnp.mean(res, axis=1, keepdims=True)
    mx = jnp.max(res, axis=1, keepdims=True)
    feat = jnp.concatenate([avg, mx], axis=1)
    attn = jax.nn.sigmoid(_conv_ref(feat, wsa, bsa, wsa.shape[-1] // 2, 1))
    return res * attn + x


# --------------------------------- main ---------------------------------------
if __name__ == "__main__":
    key = jax.random.PRNGKey(0)
    ks = jax.random.split(key, 4)

    # Small shapes consistent with the module: batch=2, n_feats=4, spatial=16.
    N, C, H, W, K, K_sa = 2, 4, 16, 16, 3, 7

    x = jax.random.normal(ks[0], (N, C, H, W), dtype=jnp.float32)

    def init_conv(k, co, ci, kk):
        fan_in = ci * kk * kk
        kw, kb = jax.random.split(k)
        w = jax.random.normal(kw, (co, ci, kk, kk), jnp.float32) / jnp.sqrt(
            float(fan_in))
        b = jax.random.normal(kb, (co,), jnp.float32) * 0.1
        return w, b

    w1, b1 = init_conv(ks[1], C, C, K)          # body conv 1 (Bias=True)
    w2, b2 = init_conv(ks[2], C, C, K)          # body conv 2 (Bias=True)
    wsa, bsa = init_conv(ks[3], 1, 2, K_sa)     # SpatialAttention 7x7 conv
    res_scale = 1.0

    out = resblock_forward(x, w1, b1, w2, b2, wsa, bsa,
                           res_scale=res_scale, dilation=1)
    out = jax.block_until_ready(out)

    ref = resblock_ref(x, w1, b1, w2, b2, wsa, bsa,
                       res_scale=res_scale, dilation=1)

    assert out.shape == (N, C, H, W), out.shape
    max_err = float(jnp.max(jnp.abs(out - ref)))
    mean_err = float(jnp.mean(jnp.abs(out - ref)))
    # bf16 MXU operands (f32 accumulation) across two chained convs -> looser
    # tolerance than the previous all-f32 HIGHEST version.
    assert max_err < 1e-1 and mean_err < 1e-2, (max_err, mean_err)
    print("KERNEL_OK")
</pallas_src>

<mosaic_0001>
module attributes {stable_mosaic.version = 11 : i64} {
  func.func @_resblock_kernel(%arg0: i32, %arg1: memref<1x16x3072xf32, #tpu.memory_space<vmem>>, %arg2: memref<1x2048xf32, #tpu.memory_space<vmem>>, %arg3: memref<16x144xbf16, #tpu.memory_space<vmem>>, %arg4: memref<16x1xf32, #tpu.memory_space<vmem>>, %arg5: memref<16x144xbf16, #tpu.memory_space<vmem>>, %arg6: memref<16x1xf32, #tpu.memory_space<vmem>>, %arg7: memref<98xf32, #tpu.memory_space<smem>>, %arg8: memref<1xf32, #tpu.memory_space<smem>>, %arg9: memref<1x16x2048xf32, #tpu.memory_space<vmem>>, %arg10: memref<144x2048xbf16, #tpu.memory_space<vmem>>, %arg11: memref<16x3072xbf16, #tpu.memory_space<vmem>>, %arg12: memref<8x3072xf32, #tpu.memory_space<vmem>>) attributes {dimension_semantics = [#tpu.dimension_semantics<parallel>], iteration_bounds = array<i64: 2>, scalar_prefetch = 0 : i64, scratch_operands = 3 : i64, tpu.core_type = #tpu.core_type<tc>, window_params = [{transform_indices = @transform_0, window_bounds = array<i64: 1, 16, 3072>}, {pipeline_mode = #tpu.pipeline_mode<synchronous>, transform_indices = @transform_1, window_bounds = array<i64: 1, 2048>}, {pipeline_mode = #tpu.pipeline_mode<synchronous>, transform_indices = @transform_2, window_bounds = array<i64: 16, 144>}, {pipeline_mode = #tpu.pipeline_mode<synchronous>, transform_indices = @transform_3, window_bounds = array<i64: 16, 1>}, {pipeline_mode = #tpu.pipeline_mode<synchronous>, transform_indices = @transform_4, window_bounds = array<i64: 16, 144>}, {pipeline_mode = #tpu.pipeline_mode<synchronous>, transform_indices = @transform_5, window_bounds = array<i64: 16, 1>}, {transform_indices = @transform_6, window_bounds = array<i64: 98>}, {transform_indices = @transform_7, window_bounds = array<i64: 1>}, {transform_indices = @transform_8, window_bounds = array<i64: 1, 16, 2048>}]} {
    %c0 = arith.constant 0 : index
    %c0_0 = arith.constant 0 : index
    %0 = vector.load %arg2[%c0, %c0_0] : memref<1x2048xf32, #tpu.memory_space<vmem>>, vector<1x2048xf32>
    %cst = arith.constant 0.000000e+00 : bf16
    %1 = vector.broadcast %cst : bf16 to vector<16x512xbf16>
    %c0_1 = arith.constant 0 : index
    %c0_2 = arith.constant 0 : index
    %2 = vector.load %arg11[%c0_1, %c0_2] : memref<16x3072xbf16, #tpu.memory_space<vmem>>, vector<16x512xbf16>
    tpu.vector_store %arg11[%c0_1, %c0_2], %1 {strides = array<i32>} : memref<16x3072xbf16, #tpu.memory_space<vmem>>, vector<16x512xbf16>,
    %cst_3 = arith.constant 0.000000e+00 : bf16
    %3 = vector.broadcast %cst_3 : bf16 to vector<16x512xbf16>
    %c0_4 = arith.constant 0 : index
    %c2560 = arith.constant 2560 : index
    %4 = vector.load %arg11[%c0_4, %c2560] : memref<16x3072xbf16, #tpu.memory_space<vmem>>, vector<16x512xbf16>
    tpu.vector_store %arg11[%c0_4, %c2560], %3 {strides = array<i32>} : memref<16x3072xbf16, #tpu.memory_space<vmem>>, vector<16x512xbf16>,
    %cst_5 = arith.constant 0.000000e+00 : f32
    %5 = vector.broadcast %cst_5 : f32 to vector<8x512xf32>
    %c0_6 = arith.constant 0 : index
    %c0_7 = arith.constant 0 : index
    %6 = vector.load %arg12[%c0_6, %c0_7] : memref<8x3072xf32, #tpu.memory_space<vmem>>, vector<8x512xf32>
    tpu.vector_store %arg12[%c0_6, %c0_7], %5 {strides = array<i32>} : memref<8x3072xf32, #tpu.memory_space<vmem>>, vector<8x512xf32>,
    %cst_8 = arith.constant 0.000000e+00 : f32
    %7 = vector.broadcast %cst_8 : f32 to vector<8x512xf32>
    %c0_9 = arith.constant 0 : index
    %c2560_10 = arith.constant 2560 : index
    %8 = vector.load %arg12[%c0_9, %c2560_10] : memref<8x3072xf32, #tpu.memory_space<vmem>>, vector<8x512xf32>
    tpu.vector_store %arg12[%c0_9, %c2560_10], %7 {strides = array<i32>} : memref<8x3072xf32, #tpu.memory_space<vmem>>, vector<8x512xf32>,
    %c0_11 = arith.constant 0 : index
    %c0_12 = arith.constant 0 : index
    %c383 = arith.constant 383 : index
    %9 = vector.load %arg1[%c0_11, %c0_12, %c383] : memref<1x16x3072xf32, #tpu.memory_space<vmem>>, vector<1x16x2048xf32>
    %10 = vector.shape_cast %9 : vector<1x16x2048xf32> to vector<16x2048xf32>
    %11 = arith.truncf %10 : vector<16x2048xf32> to vector<16x2048xbf16>
    %c0_13 = arith.constant 0 : index
    %c0_14 = arith.constant 0 : index
    %12 = vector.load %arg10[%c0_13, %c0_14] : memref<144x2048xbf16, #tpu.memory_space<vmem>>, vector<16x2048xbf16>
    tpu.vector_store %arg10[%c0_13, %c0_14], %11 {strides = array<i32>} : memref<144x2048xbf16, #tpu.memory_space<vmem>>, vector<16x2048xbf16>,
    %c0_15 = arith.constant 0 : index
    %c0_16 = arith.constant 0 : index
    %c384 = arith.constant 384 : index
    %13 = vector.load %arg1[%c0_15, %c0_16, %c384] : memref<1x16x3072xf32, #tpu.memory_space<vmem>>, vector<1x16x2048xf32>
    %14 = vector.shape_cast %13 : vector<1x16x2048xf32> to vector<16x2048xf32>
    %15 = arith.truncf %14 : vector<16x2048xf32> to vector<16x2048xbf16>
    %c16 = arith.constant 16 : index
    %c0_17 = arith.constant 0 : index
    %16 = vector.load %arg10[%c16, %c0_17] : memref<144x2048xbf16, #tpu.memory_space<vmem>>, vector<16x2048xbf16>
    tpu.vector_store %arg10[%c16, %c0_17], %15 {strides = array<i32>} : memref<144x2048xbf16, #tpu.memory_space<vmem>>, vector<16x2048xbf16>,
    %c0_18 = arith.constant 0 : index
    %c0_19 = arith.constant 0 : index
    %c385 = arith.constant 385 : index
    %17 = vector.load %arg1[%c0_18, %c0_19, %c385] : memref<1x16x3072xf32, #tpu.memory_space<vmem>>, vector<1x16x2048xf32>
    %18 = vector.shape_cast %17 : vector<1x16x2048xf32> to vector<16x2048xf32>
    %19 = arith.truncf %18 : vector<16x2048xf32> to vector<16x2048xbf16>
    %c32 = arith.constant 32 : index
    %c0_20 = arith.constant 0 : index
    %20 = vector.load %arg10[%c32, %c0_20] : memref<144x2048xbf16, #tpu.memory_space<vmem>>, vector<16x2048xbf16>
    tpu.vector_store %arg10[%c32, %c0_20], %19 {strides = array<i32>} : memref<144x2048xbf16, #tpu.memory_space<vmem>>, vector<16x2048xbf16>,
    %c0_21 = arith.constant 0 : index
    %c0_22 = arith.constant 0 : index
    %c511 = arith.constant 511 : index
    %21 = vector.load %arg1[%c0_21, %c0_22, %c511] : memref<1x16x3072xf32, #tpu.memory_space<vmem>>, vector<1x16x2048xf32>
    %22 = vector.shape_cast %21 : vector<1x16x2048xf32> to vector<16x2048xf32>
    %23 = arith.truncf %22 : vector<16x2048xf32> to vector<16x2048xbf16>
    %c48 = arith.constant 48 : index
    %c0_23 = arith.constant 0 : index
    %24 = vector.load %arg10[%c48, %c0_23] : memref<144x2048xbf16, #tpu.memory_space<vmem>>, vector<16x2048xbf16>
    tpu.vector_store %arg10[%c48, %c0_23], %23 {strides = array<i32>} : memref<144x2048xbf16, #tpu.memory_space<vmem>>, vector<16x2048xbf16>,
    %c0_24 = arith.constant 0 : index
    %c0_25 = arith.constant 0 : index
    %c512 = arith.constant 512 : index
    %25 = vector.load %arg1[%c0_24, %c0_25, %c512] : memref<1x16x3072xf32, #tpu.memory_space<vmem>>, vector<1x16x2048xf32>
    %26 = vector.shape_cast %25 : vector<1x16x2048xf32> to vector<16x2048xf32>
    %27 = arith.truncf %26 : vector<16x2048xf32> to vector<16x2048xbf16>
    %c64 = arith.constant 64 : index
    %c0_26 = arith.constant 0 : index
    %28 = vector.load %arg10[%c64, %c0_26] : memref<144x2048xbf16, #tpu.memory_space<vmem>>, vector<16x2048xbf16>
    tpu.vector_store %arg10[%c64, %c0_26], %27 {strides = array<i32>} : memref<144x2048xbf16, #tpu.memory_space<vmem>>, vector<16x2048xbf16>,
    %c0_27 = arith.constant 0 : index
    %c0_28 = arith.constant 0 : index
    %c513 = arith.constant 513 : index
    %29 = vector.load %arg1[%c0_27, %c0_28, %c513] : memref<1x16x3072xf32, #tpu.memory_space<vmem>>, vector<1x16x2048xf32>
    %30 = vector.shape_cast %29 : vector<1x16x2048xf32> to vector<16x2048xf32>
    %31 = arith.truncf %30 : vector<16x2048xf32> to vector<16x2048xbf16>
    %c80 = arith.constant 80 : index
    %c0_29 = arith.constant 0 : index
    %32 = vector.load %arg10[%c80, %c0_29] : memref<144x2048xbf16, #tpu.memory_space<vmem>>, vector<16x2048xbf16>
    tpu.vector_store %arg10[%c80, %c0_29], %31 {strides = array<i32>} : memref<144x2048xbf16, #tpu.memory_space<vmem>>, vector<16x2048xbf16>,
    %c0_30 = arith.constant 0 : index
    %c0_31 = arith.constant 0 : index
    %c639 = arith.constant 639 : index
    %33 = vector.load %arg1[%c0_30, %c0_31, %c639] : memref<1x16x3072xf32, #tpu.memory_space<vmem>>, vector<1x16x2048xf32>
    %34 = vector.shape_cast %33 : vector<1x16x2048xf32> to vector<16x2048xf32>
    %35 = arith.truncf %34 : vector<16x2048xf32> to vector<16x2048xbf16>
    %c96 = arith.constant 96 : index
    %c0_32 = arith.constant 0 : index
    %36 = vector.load %arg10[%c96, %c0_32] : memref<144x2048xbf16, #tpu.memory_space<vmem>>, vector<16x2048xbf16>
    tpu.vector_store %arg10[%c96, %c0_32], %35 {strides = array<i32>} : memref<144x2048xbf16, #tpu.memory_space<vmem>>, vector<16x2048xbf16>,
    %c0_33 = arith.constant 0 : index
    %c0_34 = arith.constant 0 : index
    %c640 = arith.constant 640 : index
    %37 = vector.load %arg1[%c0_33, %c0_34, %c640] : memref<1x16x3072xf32, #tpu.memory_space<vmem>>, vector<1x16x2048xf32>
    %38 = vector.shape_cast %37 : vector<1x16x2048xf32> to vector<16x2048xf32>
    %39 = arith.truncf %38 : vector<16x2048xf32> to vector<16x2048xbf16>
    %c112 = arith.constant 112 : index
    %c0_35 = arith.constant 0 : index
    %40 = vector.load %arg10[%c112, %c0_35] : memref<144x2048xbf16, #tpu.memory_space<vmem>>, vector<16x2048xbf16>
    tpu.vector_store %arg10[%c112, %c0_35], %39 {strides = array<i32>} : memref<144x2048xbf16, #tpu.memory_space<vmem>>, vector<16x2048xbf16>,
    %c0_36 = arith.constant 0 : index
    %c0_37 = arith.constant 0 : index
    %c641 = arith.constant 641 : index
    %41 = vector.load %arg1[%c0_36, %c0_37, %c641] : memref<1x16x3072xf32, #tpu.memory_space<vmem>>, vector<1x16x2048xf32>
    %42 = vector.shape_cast %41 : vector<1x16x2048xf32> to vector<16x2048xf32>
    %43 = arith.truncf %42 : vector<16x2048xf32> to vector<16x2048xbf16>
    %c128 = arith.constant 128 : index
    %c0_38 = arith.constant 0 : index
    %44 = vector.load %arg10[%c128, %c0_38] : memref<144x2048xbf16, #tpu.memory_space<vmem>>, vector<16x2048xbf16>
    tpu.vector_store %arg10[%c128, %c0_38], %43 {strides = array<i32>} : memref<144x2048xbf16, #tpu.memory_space<vmem>>, vector<16x2048xbf16>,
    %c0_39 = arith.constant 0 : index
    %c0_40 = arith.constant 0 : index
    %45 = vector.load %arg3[%c0_39, %c0_40] : memref<16x144xbf16, #tpu.memory_space<vmem>>, vector<16x144xbf16>
    %c0_41 = arith.constant 0 : index
    %c0_42 = arith.constant 0 : index
    %46 = vector.load %arg10[%c0_41, %c0_42] : memref<144x2048xbf16, #tpu.memory_space<vmem>>, vector<144x2048xbf16>
    %cst_43 = arith.constant dense<0.000000e+00> : vector<16x2048xf32>
    %47 = tpu.matmul %45, %46, %cst_43 {dimension_numbers = #tpu.dot_dimension_numbers<[1], [0], [0], [1], [0, 0, 1, 1], [], []>} : vector<16x144xbf16>, vector<144x2048xbf16>, vector<16x2048xf32> -> vector<16x2048xf32>
    %c0_44 = arith.constant 0 : index
    %c0_45 = arith.constant 0 : index
    %48 = vector.load %arg4[%c0_44, %c0_45] : memref<16x1xf32, #tpu.memory_space<vmem>>, vector<16x1xf32>
    %49 = vector.broadcast %48 : vector<16x1xf32> to vector<16x2048xf32>
    %50 = arith.addf %47, %49 : vector<16x2048xf32>
    %cst_46 = arith.constant 0.000000e+00 : f32
    %51 = vector.broadcast %cst_46 : f32 to vector<16x2048xf32>
    %52 = arith.maximumf %50, %51 : vector<16x2048xf32>
    %53 = vector.broadcast %0 : vector<1x2048xf32> to vector<16x2048xf32>
    %54 = arith.mulf %52, %53 : vector<16x2048xf32>
    %55 = arith.truncf %54 : vector<16x2048xf32> to vector<16x2048xbf16>
    %c0_47 = arith.constant 0 : index
    %c512_48 = arith.constant 512 : index
    %56 = vector.load %arg11[%c0_47, %c512_48] : memref<16x3072xbf16, #tpu.memory_space<vmem>>, vector<16x2048xbf16>
    tpu.vector_store %arg11[%c0_47, %c512_48], %55 {strides = array<i32>} : memref<16x3072xbf16, #tpu.memory_space<vmem>>, vector<16x2048xbf16>,
    %c0_49 = arith.constant 0 : index
    %c383_50 = arith.constant 383 : index
    %57 = vector.load %arg11[%c0_49, %c383_50] : memref<16x3072xbf16, #tpu.memory_space<vmem>>, vector<16x2048xbf16>
    %c0_51 = arith.constant 0 : index
    %c0_52 = arith.constant 0 : index
    %58 = vector.load %arg10[%c0_51, %c0_52] : memref<144x2048xbf16, #tpu.memory_space<vmem>>, vector<16x2048xbf16>
    tpu.vector_store %arg10[%c0_51, %c0_52], %57 {strides = array<i32>} : memref<144x2048xbf16, #tpu.memory_space<vmem>>, vector<16x2048xbf16>,
    %c0_53 = arith.constant 0 : index
    %c384_54 = arith.constant 384 : index
    %59 = vector.load %arg11[%c0_53, %c384_54] : memref<16x3072xbf16, #tpu.memory_space<vmem>>, vector<16x2048xbf16>
    %c16_55 = arith.constant 16 : index
    %c0_56 = arith.constant 0 : index
    %60 = vector.load %arg10[%c16_55, %c0_56] : memref<144x2048xbf16, #tpu.memory_space<vmem>>, vector<16x2048xbf16>
    tpu.vector_store %arg10[%c16_55, %c0_56], %59 {strides = array<i32>} : memref<144x2048xbf16, #tpu.memory_space<vmem>>, vector<16x2048xbf16>,
    %c0_57 = arith.constant 0 : index
    %c385_58 = arith.constant 385 : index
    %61 = vector.load %arg11[%c0_57, %c385_58] : memref<16x3072xbf16, #tpu.memory_space<vmem>>, vector<16x2048xbf16>
    %c32_59 = arith.constant 32 : index
    %c0_60 = arith.constant 0 : index
    %62 = vector.load %arg10[%c32_59, %c0_60] : memref<144x2048xbf16, #tpu.memory_space<vmem>>, vector<16x2048xbf16>
    tpu.vector_store %arg10[%c32_59, %c0_60], %61 {strides = array<i32>} : memref<144x2048xbf16, #tpu.memory_space<vmem>>, vector<16x2048xbf16>,
    %c0_61 = arith.constant 0 : index
    %c511_62 = arith.constant 511 : index
    %63 = vector.load %arg11[%c0_61, %c511_62] : memref<16x3072xbf16, #tpu.memory_space<vmem>>, vector<16x2048xbf16>
    %c48_63 = arith.constant 48 : index
    %c0_64 = arith.constant 0 : index
    %64 = vector.load %arg10[%c48_63, %c0_64] : memref<144x2048xbf16, #tpu.memory_space<vmem>>, vector<16x2048xbf16>
    tpu.vector_store %arg10[%c48_63, %c0_64], %63 {strides = array<i32>} : memref<144x2048xbf16, #tpu.memory_space<vmem>>, vector<16x2048xbf16>,
    %c0_65 = arith.constant 0 : index
    %c512_66 = arith.constant 512 : index
    %65 = vector.load %arg11[%c0_65, %c512_66] : memref<16x3072xbf16, #tpu.memory_space<vmem>>, vector<16x2048xbf16>
    %c64_67 = arith.constant 64 : index
    %c0_68 = arith.constant 0 : index
    %66 = vector.load %arg10[%c64_67, %c0_68] : memref<144x2048xbf16, #tpu.memory_space<vmem>>, vector<16x2048xbf16>
    tpu.vector_store %arg10[%c64_67, %c0_68], %65 {strides = array<i32>} : memref<144x2048xbf16, #tpu.memory_space<vmem>>, vector<16x2048xbf16>,
    %c0_69 = arith.constant 0 : index
    %c513_70 = arith.constant 513 : index
    %67 = vector.load %arg11[%c0_69, %c513_70] : memref<16x3072xbf16, #tpu.memory_space<vmem>>, vector<16x2048xbf16>
    %c80_71 = arith.constant 80 : index
    %c0_72 = arith.constant 0 : index
    %68 = vector.load %arg10[%c80_71, %c0_72] : memref<144x2048xbf16, #tpu.memory_space<vmem>>, vector<16x2048xbf16>
    tpu.vector_store %arg10[%c80_71, %c0_72], %67 {strides = array<i32>} : memref<144x2048xbf16, #tpu.memory_space<vmem>>, vector<16x2048xbf16>,
    %c0_73 = arith.constant 0 : index
    %c639_74 = arith.constant 639 : index
    %69 = vector.load %arg11[%c0_73, %c639_74] : memref<16x3072xbf16, #tpu.memory_space<vmem>>, vector<16x2048xbf16>
    %c96_75 = arith.constant 96 : index
    %c0_76 = arith.constant 0 : index
    %70 = vector.load %arg10[%c96_75, %c0_76] : memref<144x2048xbf16, #tpu.memory_space<vmem>>, vector<16x2048xbf16>
    tpu.vector_store %arg10[%c96_75, %c0_76], %69 {strides = array<i32>} : memref<144x2048xbf16, #tpu.memory_space<vmem>>, vector<16x2048xbf16>,
    %c0_77 = arith.constant 0 : index
    %c640_78 = arith.constant 640 : index
    %71 = vector.load %arg11[%c0_77, %c640_78] : memref<16x3072xbf16, #tpu.memory_space<vmem>>, vector<16x2048xbf16>
    %c112_79 = arith.constant 112 : index
    %c0_80 = arith.constant 0 : index
    %72 = vector.load %arg10[%c112_79, %c0_80] : memref<144x2048xbf16, #tpu.memory_space<vmem>>, vector<16x2048xbf16>
    tpu.vector_store %arg10[%c112_79, %c0_80], %71 {strides = array<i32>} : memref<144x2048xbf16, #tpu.memory_space<vmem>>, vector<16x2048xbf16>,
    %c0_81 = arith.constant 0 : index
    %c641_82 = arith.constant 641 : index
    %73 = vector.load %arg11[%c0_81, %c641_82] : memref<16x3072xbf16, #tpu.memory_space<vmem>>, vector<16x2048xbf16>
    %c128_83 = arith.constant 128 : index
    %c0_84 = arith.constant 0 : index
    %74 = vector.load %arg10[%c128_83, %c0_84] : memref<144x2048xbf16, #tpu.memory_space<vmem>>, vector<16x2048xbf16>
    tpu.vector_store %arg10[%c128_83, %c0_84], %73 {strides = array<i32>} : memref<144x2048xbf16, #tpu.memory_space<vmem>>, vector<16x2048xbf16>,
    %c0_85 = arith.constant 0 : index
    %c0_86 = arith.constant 0 : index
    %75 = vector.load %arg5[%c0_85, %c0_86] : memref<16x144xbf16, #tpu.memory_space<vmem>>, vector<16x144xbf16>
    %c0_87 = arith.constant 0 : index
    %c0_88 = arith.constant 0 : index
    %76 = vector.load %arg10[%c0_87, %c0_88] : memref<144x2048xbf16, #tpu.memory_space<vmem>>, vector<144x2048xbf16>
    %cst_89 = arith.constant dense<0.000000e+00> : vector<16x2048xf32>
    %77 = tpu.matmul %75, %76, %cst_89 {dimension_numbers = #tpu.dot_dimension_numbers<[1], [0], [0], [1], [0, 0, 1, 1], [], []>} : vector<16x144xbf16>, vector<144x2048xbf16>, vector<16x2048xf32> -> vector<16x2048xf32>
    %c0_90 = arith.constant 0 : index
    %c0_91 = arith.constant 0 : index
    %78 = vector.load %arg6[%c0_90, %c0_91] : memref<16x1xf32, #tpu.memory_space<vmem>>, vector<16x1xf32>
    %79 = vector.broadcast %78 : vector<16x1xf32> to vector<16x2048xf32>
    %80 = arith.addf %77, %79 : vector<16x2048xf32>
    %cst_92 = arith.constant dense<0.000000e+00> : vector<2048xf32>
    %81 = vector.multi_reduction <add>, %80, %cst_92 [0] : vector<16x2048xf32> to vector<2048xf32>
    %82 = vector.shape_cast %81 : vector<2048xf32> to vector<1x2048xf32>
    %cst_93 = arith.constant 2.500000e-01 : f32
    %83 = vector.broadcast %cst_93 : f32 to vector<1x2048xf32>
    %84 = arith.mulf %82, %83 : vector<1x2048xf32>
    %85 = tpu.iota {dimensions = array<i32: 0>} : vector<16x2048xi32>
    %c4_i32 = arith.constant 4 : i32
    %86 = vector.broadcast %c4_i32 : i32 to vector<16x2048xi32>
    %87 = arith.cmpi slt, %85, %86 : vector<16x2048xi32>
    %cst_94 = arith.constant -1.000000e+30 : f32
    %88 = vector.broadcast %cst_94 : f32 to vector<16x2048xf32>
    %89 = arith.select %87, %80, %88 : vector<16x2048xi1>, vector<16x2048xf32>
    %cst_95 = arith.constant dense<0xFF800000> : vector<2048xf32>
    %90 = vector.multi_reduction <maximumf>, %89, %cst_95 [0] : vector<16x2048xf32> to vector<2048xf32>
    %91 = vector.shape_cast %90 : vector<2048xf32> to vector<1x2048xf32>
    %92 = arith.mulf %84, %0 : vector<1x2048xf32>
    %c0_96 = arith.constant 0 : index
    %c512_97 = arith.constant 512 : index
    %93 = vector.load %arg12[%c0_96, %c512_97] : memref<8x3072xf32, #tpu.memory_space<vmem>>, vector<1x2048xf32>
    tpu.vector_store %arg12[%c0_96, %c512_97], %92 {strides = array<i32>} : memref<8x3072xf32, #tpu.memory_space<vmem>>, vector<1x2048xf32>,
    %94 = arith.mulf %91, %0 : vector<1x2048xf32>
    %c1 = arith.constant 1 : index
    %c512_98 = arith.constant 512 : index
    %95 = vector.load %arg12[%c1, %c512_98] : memref<8x3072xf32, #tpu.memory_space<vmem>>, vector<1x2048xf32>
    tpu.vector_store %arg12[%c1, %c512_98], %94 {strides = array<i32>} : memref<8x3072xf32, #tpu.memory_space<vmem>>, vector<1x2048xf32>,
    %cst_99 = arith.constant 0.000000e+00 : f32
    %96 = vector.broadcast %cst_99 : f32 to vector<1x2048xf32>
    %c0_100 = arith.constant 0 : index
    %97 = memref.load %arg7[%c0_100] : memref<98xf32, #tpu.memory_space<smem>>
    %c0_101 = arith.constant 0 : index
    %c125 = arith.constant 125 : index
    %98 = vector.load %arg12[%c0_101, %c125] : memref<8x3072xf32, #tpu.memory_space<vmem>>, vector<1x2048xf32>
    %99 = vector.broadcast %97 : f32 to vector<1x2048xf32>
    %100 = arith.mulf %99, %98 : vector<1x2048xf32>
    %101 = arith.addf %96, %100 : vector<1x2048xf32>
    %c49 = arith.constant 49 : index
    %102 = memref.load %arg7[%c49] : memref<98xf32, #tpu.memory_space<smem>>
    %c1_102 = arith.constant 1 : index
    %c125_103 = arith.constant 125 : index
    %103 = vector.load %arg12[%c1_102, %c125_103] : memref<8x3072xf32, #tpu.memory_space<vmem>>, vector<1x2048xf32>
    %104 = vector.broadcast %102 : f32 to vector<1x2048xf32>
    %105 = arith.mulf %104, %103 : vector<1x2048xf32>
    %106 = arith.addf %101, %105 : vector<1x2048xf32>
    %c1_104 = arith.constant 1 : index
    %107 = memref.load %arg7[%c1_104] : memref<98xf32, #tpu.memory_space<smem>>
    %c0_105 = arith.constant 0 : index
    %c126 = arith.constant 126 : index
    %108 = vector.load %arg12[%c0_105, %c126] : memref<8x3072xf32, #tpu.memory_space<vmem>>, vector<1x2048xf32>
    %109 = vector.broadcast %107 : f32 to vector<1x2048xf32>
    %110 = arith.mulf %109, %108 : vector<1x2048xf32>
    %111 = arith.addf %106, %110 : vector<1x2048xf32>
    %c50 = arith.constant 50 : index
    %112 = memref.load %arg7[%c50] : memref<98xf32, #tpu.memory_space<smem>>
    %c1_106 = arith.constant 1 : index
    %c126_107 = arith.constant 126 : index
    %113 = vector.load %arg12[%c1_106, %c126_107] : memref<8x3072xf32, #tpu.memory_space<vmem>>, vector<1x2048xf32>
    %114 = vector.broadcast %112 : f32 to vector<1x2048xf32>
    %115 = arith.mulf %114, %113 : vector<1x2048xf32>
    %116 = arith.addf %111, %115 : vector<1x2048xf32>
    %c2 = arith.constant 2 : index
    %117 = memref.load %arg7[%c2] : memref<98xf32, #tpu.memory_space<smem>>
    %c0_108 = arith.constant 0 : index
    %c127 = arith.constant 127 : index
    %118 = vector.load %arg12[%c0_108, %c127] : memref<8x3072xf32, #tpu.memory_space<vmem>>, vector<1x2048xf32>
    %119 = vector.broadcast %117 : f32 to vector<1x2048xf32>
    %120 = arith.mulf %119, %118 : vector<1x2048xf32>
    %121 = arith.addf %116, %120 : vector<1x2048xf32>
    %c51 = arith.constant 51 : index
    %122 = memref.load %arg7[%c51] : memref<98xf32, #tpu.memory_space<smem>>
    %c1_109 = arith.constant 1 : index
    %c127_110 = arith.constant 127 : index
    %123 = vector.load %arg12[%c1_109, %c127_110] : memref<8x3072xf32, #tpu.memory_space<vmem>>, vector<1x2048xf32>
    %124 = vector.broadcast %122 : f32 to vector<1x2048xf32>
    %125 = arith.mulf %124, %123 : vector<1x2048xf32>
    %126 = arith.addf %121, %125 : vector<1x2048xf32>
    %c3 = arith.constant 3 : index
    %127 = memref.load %arg7[%c3] : memref<98xf32, #tpu.memory_space<smem>>
    %c0_111 = arith.constant 0 : index
    %c128_112 = arith.constant 128 : index
    %128 = vector.load %arg12[%c0_111, %c128_112] : memref<8x3072xf32, #tpu.memory_space<vmem>>, vector<1x2048xf32>
    %129 = vector.broadcast %127 : f32 to vector<1x2048xf32>
    %130 = arith.mulf %129, %128 : vector<1x2048xf32>
    %131 = arith.addf %126, %130 : vector<1x2048xf32>
    %c52 = arith.constant 52 : index
    %132 = memref.load %arg7[%c52] : memref<98xf32, #tpu.memory_space<smem>>
    %c1_113 = arith.constant 1 : index
    %c128_114 = arith.constant 128 : index
    %133 = vector.load %arg12[%c1_113, %c128_114] : memref<8x3072xf32, #tpu.memory_space<vmem>>, vector<1x2048xf32>
    %134 = vector.broadcast %132 : f32 to vector<1x2048xf32>
    %135 = arith.mulf %134, %133 : vector<1x2048xf32>
    %136 = arith.addf %131, %135 : vector<1x2048xf32>
    %c4 = arith.constant 4 : index
    %137 = memref.load %arg7[%c4] : memref<98xf32, #tpu.memory_space<smem>>
    %c0_115 = arith.constant 0 : index
    %c129 = arith.constant 129 : index
    %138 = vector.load %arg12[%c0_115, %c129] : memref<8x3072xf32, #tpu.memory_space<vmem>>, vector<1x2048xf32>
    %139 = vector.broadcast %137 : f32 to vector<1x2048xf32>
    %140 = arith.mulf %139, %138 : vector<1x2048xf32>
    %141 = arith.addf %136, %140 : vector<1x2048xf32>
    %c53 = arith.constant 53 : index
    %142 = memref.load %arg7[%c53] : memref<98xf32, #tpu.memory_space<smem>>
    %c1_116 = arith.constant 1 : index
    %c129_117 = arith.constant 129 : index
    %143 = vector.load %arg12[%c1_116, %c129_117] : memref<8x3072xf32, #tpu.memory_space<vmem>>, vector<1x2048xf32>
    %144 = vector.broadcast %142 : f32 to vector<1x2048xf32>
    %145 = arith.mulf %144, %143 : vector<1x2048xf32>
    %146 = arith.addf %141, %145 : vector<1x2048xf32>
    %c5 = arith.constant 5 : index
    %147 = memref.load %arg7[%c5] : memref<98xf32, #tpu.memory_space<smem>>
    %c0_118 = arith.constant 0 : index
    %c130 = arith.constant 130 : index
    %148 = vector.load %arg12[%c0_118, %c130] : memref<8x3072xf32, #tpu.memory_space<vmem>>, vector<1x2048xf32>
    %149 = vector.broadcast %147 : f32 to vector<1x2048xf32>
    %150 = arith.mulf %149, %148 : vector<1x2048xf32>
    %151 = arith.addf %146, %150 : vector<1x2048xf32>
    %c54 = arith.constant 54 : index
    %152 = memref.load %arg7[%c54] : memref<98xf32, #tpu.memory_space<smem>>
    %c1_119 = arith.constant 1 : index
    %c130_120 = arith.constant 130 : index
    %153 = vector.load %arg12[%c1_119, %c130_120] : memref<8x3072xf32, #tpu.memory_space<vmem>>, vector<1x2048xf32>
    %154 = vector.broadcast %152 : f32 to vector<1x2048xf32>
    %155 = arith.mulf %154, %153 : vector<1x2048xf32>
    %156 = arith.addf %151, %155 : vector<1x2048xf32>
    %c6 = arith.constant 6 : index
    %157 = memref.load %arg7[%c6] : memref<98xf32, #tpu.memory_space<smem>>
    %c0_121 = arith.constant 0 : index
    %c131 = arith.constant 131 : index
    %158 = vector.load %arg12[%c0_121, %c131] : memref<8x3072xf32, #tpu.memory_space<vmem>>, vector<1x2048xf32>
    %159 = vector.broadcast %157 : f32 to vector<1x2048xf32>
    %160 = arith.mulf %159, %158 : vector<1x2048xf32>
    %161 = arith.addf %156, %160 : vector<1x2048xf32>
    %c55 = arith.constant 55 : index
    %162 = memref.load %arg7[%c55] : memref<98xf32, #tpu.memory_space<smem>>
    %c1_122 = arith.constant 1 : index
    %c131_123 = arith.constant 131 : index
    %163 = vector.load %arg12[%c1_122, %c131_123] : memref<8x3072xf32, #tpu.memory_space<vmem>>, vector<1x2048xf32>
    %164 = vector.broadcast %162 : f32 to vector<1x2048xf32>
    %165 = arith.mulf %164, %163 : vector<1x2048xf32>
    %166 = arith.addf %161, %165 : vector<1x2048xf32>
    %c7 = arith.constant 7 : index
    %167 = memref.load %arg7[%c7] : memref<98xf32, #tpu.memory_space<smem>>
    %c0_124 = arith.constant 0 : index
    %c253 = arith.constant 253 : index
    %168 = vector.load %arg12[%c0_124, %c253] : memref<8x3072xf32, #tpu.memory_space<vmem>>, vector<1x2048xf32>
    %169 = vector.broadcast %167 : f32 to vector<1x2048xf32>
    %170 = arith.mulf %169, %168 : vector<1x2048xf32>
    %171 = arith.addf %166, %170 : vector<1x2048xf32>
    %c56 = arith.constant 56 : index
    %172 = memref.load %arg7[%c56] : memref<98xf32, #tpu.memory_space<smem>>
    %c1_125 = arith.constant 1 : index
    %c253_126 = arith.constant 253 : index
    %173 = vector.load %arg12[%c1_125, %c253_126] : memref<8x3072xf32, #tpu.memory_space<vmem>>, vector<1x2048xf32>
    %174 = vector.broadcast %172 : f32 to vector<1x2048xf32>
    %175 = arith.mulf %174, %173 : vector<1x2048xf32>
    %176 = arith.addf %171, %175 : vector<1x2048xf32>
    %c8 = arith.constant 8 : index
    %177 = memref.load %arg7[%c8] : memref<98xf32, #tpu.memory_space<smem>>
    %c0_127 = arith.constant 0 : index
    %c254 = arith.constant 254 : index
    %178 = vector.load %arg12[%c0_127, %c254] : memref<8x3072xf32, #tpu.memory_space<vmem>>, vector<1x2048xf32>
    %179 = vector.broadcast %177 : f32 to vector<1x2048xf32>
    %180 = arith.mulf %179, %178 : vector<1x2048xf32>
    %181 = arith.addf %176, %180 : vector<1x2048xf32>
    %c57 = arith.constant 57 : index
    %182 = memref.load %arg7[%c57] : memref<98xf32, #tpu.memory_space<smem>>
    %c1_128 = arith.constant 1 : index
    %c254_129 = arith.constant 254 : index
    %183 = vector.load %arg12[%c1_128, %c254_129] : memref<8x3072xf32, #tpu.memory_space<vmem>>, vector<1x2048xf32>
    %184 = vector.broadcast %182 : f32 to vector<1x2048xf32>
    %185 = arith.mulf %184, %183 : vector<1x2048xf32>
    %186 = arith.addf %181, %185 : vector<1x2048xf32>
    %c9 = arith.constant 9 : index
    %187 = memref.load %arg7[%c9] : memref<98xf32, #tpu.memory_space<smem>>
    %c0_130 = arith.constant 0 : index
    %c255 = arith.constant 255 : index
    %188 = vector.load %arg12[%c0_130, %c255] : memref<8x3072xf32, #tpu.memory_space<vmem>>, vector<1x2048xf32>
    %189 = vector.broadcast %187 : f32 to vector<1x2048xf32>
    %190 = arith.mulf %189, %188 : vector<1x2048xf32>
    %191 = arith.addf %186, %190 : vector<1x2048xf32>
    %c58 = arith.constant 58 : index
    %192 = memref.load %arg7[%c58] : memref<98xf32, #tpu.memory_space<smem>>
    %c1_131 = arith.constant 1 : index
    %c255_132 = arith.constant 255 : index
    %193 = vector.load %arg12[%c1_131, %c255_132] : memref<8x3072xf32, #tpu.memory_space<vmem>>, vector<1x2048xf32>
    %194 = vector.broadcast %192 : f32 to vector<1x2048xf32>
    %195 = arith.mulf %194, %193 : vector<1x2048xf32>
    %196 = arith.addf %191, %195 : vector<1x2048xf32>
    %c10 = arith.constant 10 : index
    %197 = memref.load %arg7[%c10] : memref<98xf32, #tpu.memory_space<smem>>
    %c0_133 = arith.constant 0 : index
    %c256 = arith.constant 256 : index
    %198 = vector.load %arg12[%c0_133, %c256] : memref<8x3072xf32, #tpu.memory_space<vmem>>, vector<1x2048xf32>
    %199 = vector.broadcast %197 : f32 to vector<1x2048xf32>
    %200 = arith.mulf %199, %198 : vector<1x2048xf32>
    %201 = arith.addf %196, %200 : vector<1x2048xf32>
    %c59 = arith.constant 59 : index
    %202 = memref.load %arg7[%c59] : memref<98xf32, #tpu.memory_space<smem>>
    %c1_134 = arith.constant 1 : index
    %c256_135 = arith.constant 256 : index
    %203 = vector.load %arg12[%c1_134, %c256_135] : memref<8x3072xf32, #tpu.memory_space<vmem>>, vector<1x2048xf32>
    %204 = vector.broadcast %202 : f32 to vector<1x2048xf32>
    %205 = arith.mulf %204, %203 : vector<1x2048xf32>
    %206 = arith.addf %201, %205 : vector<1x2048xf32>
    %c11 = arith.constant 11 : index
    %207 = memref.load %arg7[%c11] : memref<98xf32, #tpu.memory_space<smem>>
    %c0_136 = arith.constant 0 : index
    %c257 = arith.constant 257 : index
    %208 = vector.load %arg12[%c0_136, %c257] : memref<8x3072xf32, #tpu.memory_space<vmem>>, vector<1x2048xf32>
    %209 = vector.broadcast %207 : f32 to vector<1x2048xf32>
    %210 = arith.mulf %209, %208 : vector<1x2048xf32>
    %211 = arith.addf %206, %210 : vector<1x2048xf32>
    %c60 = arith.constant 60 : index
    %212 = memref.load %arg7[%c60] : memref<98xf32, #tpu.memory_space<smem>>
    %c1_137 = arith.constant 1 : index
    %c257_138 = arith.constant 257 : index
    %213 = vector.load %arg12[%c1_137, %c257_138] : memref<8x3072xf32, #tpu.memory_space<vmem>>, vector<1x2048xf32>
    %214 = vector.broadcast %212 : f32 to vector<1x2048xf32>
    %215 = arith.mulf %214, %213 : vector<1x2048xf32>
    %216 = arith.addf %211, %215 : vector<1x2048xf32>
    %c12 = arith.constant 12 : index
    %217 = memref.load %arg7[%c12] : memref<98xf32, #tpu.memory_space<smem>>
    %c0_139 = arith.constant 0 : index
    %c258 = arith.constant 258 : index
    %218 = vector.load %arg12[%c0_139, %c258] : memref<8x3072xf32, #tpu.memory_space<vmem>>, vector<1x2048xf32>
    %219 = vector.broadcast %217 : f32 to vector<1x2048xf32>
    %220 = arith.mulf %219, %218 : vector<1x2048xf32>
    %221 = arith.addf %216, %220 : vector<1x2048xf32>
    %c61 = arith.constant 61 : index
    %222 = memref.load %arg7[%c61] : memref<98xf32, #tpu.memory_space<smem>>
    %c1_140 = arith.constant 1 : index
    %c258_141 = arith.constant 258 : index
    %223 = vector.load %arg12[%c1_140, %c258_141] : memref<8x3072xf32, #tpu.memory_space<vmem>>, vector<1x2048xf32>
    %224 = vector.broadcast %222 : f32 to vector<1x2048xf32>
    %225 = arith.mulf %224, %223 : vector<1x2048xf32>
    %226 = arith.addf %221, %225 : vector<1x2048xf32>
    %c13 = arith.constant 13 : index
    %227 = memref.load %arg7[%c13] : memref<98xf32, #tpu.memory_space<smem>>
    %c0_142 = arith.constant 0 : index
    %c259 = arith.constant 259 : index
    %228 = vector.load %arg12[%c0_142, %c259] : memref<8x3072xf32, #tpu.memory_space<vmem>>, vector<1x2048xf32>
    %229 = vector.broadcast %227 : f32 to vector<1x2048xf32>
    %230 = arith.mulf %229, %228 : vector<1x2048xf32>
    %231 = arith.addf %226, %230 : vector<1x2048xf32>
    %c62 = arith.constant 62 : index
    %232 = memref.load %arg7[%c62] : memref<98xf32, #tpu.memory_space<smem>>
    %c1_143 = arith.constant 1 : index
    %c259_144 = arith.constant 259 : index
    %233 = vector.load %arg12[%c1_143, %c259_144] : memref<8x3072xf32, #tpu.memory_space<vmem>>, vector<1x2048xf32>
    %234 = vector.broadcast %232 : f32 to vector<1x2048xf32>
    %235 = arith.mulf %234, %233 : vector<1x2048xf32>
    %236 = arith.addf %231, %235 : vector<1x2048xf32>
    %c14 = arith.constant 14 : index
    %237 = memref.load %arg7[%c14] : memref<98xf32, #tpu.memory_space<smem>>
    %c0_145 = arith.constant 0 : index
    %c381 = arith.constant 381 : index
    %238 = vector.load %arg12[%c0_145, %c381] : memref<8x3072xf32, #tpu.memory_space<vmem>>, vector<1x2048xf32>
    %239 = vector.broadcast %237 : f32 to vector<1x2048xf32>
    %240 = arith.mulf %239, %238 : vector<1x2048xf32>
    %241 = arith.addf %236, %240 : vector<1x2048xf32>
    %c63 = arith.constant 63 : index
    %242 = memref.load %arg7[%c63] : memref<98xf32, #tpu.memory_space<smem>>
    %c1_146 = arith.constant 1 : index
    %c381_147 = arith.constant 381 : index
    %243 = vector.load %arg12[%c1_146, %c381_147] : memref<8x3072xf32, #tpu.memory_space<vmem>>, vector<1x2048xf32>
    %244 = vector.broadcast %242 : f32 to vector<1x2048xf32>
    %245 = arith.mulf %244, %243 : vector<1x2048xf32>
    %246 = arith.addf %241, %245 : vector<1x2048xf32>
    %c15 = arith.constant 15 : index
    %247 = memref.load %arg7[%c15] : memref<98xf32, #tpu.memory_space<smem>>
    %c0_148 = arith.constant 0 : index
    %c382 = arith.constant 382 : index
    %248 = vector.load %arg12[%c0_148, %c382] : memref<8x3072xf32, #tpu.memory_space<vmem>>, vector<1x2048xf32>
    %249 = vector.broadcast %247 : f32 to vector<1x2048xf32>
    %250 = arith.mulf %249, %248 : vector<1x2048xf32>
    %251 = arith.addf %246, %250 : vector<1x2048xf32>
    %c64_149 = arith.constant 64 : index
    %252 = memref.load %arg7[%c64_149] : memref<98xf32, #tpu.memory_space<smem>>
    %c1_150 = arith.constant 1 : index
    %c382_151 = arith.constant 382 : index
    %253 = vector.load %arg12[%c1_150, %c382_151] : memref<8x3072xf32, #tpu.memory_space<vmem>>, vector<1x2048xf32>
    %254 = vector.broadcast %252 : f32 to vector<1x2048xf32>
    %255 = arith.mulf %254, %253 : vector<1x2048xf32>
    %256 = arith.addf %251, %255 : vector<1x2048xf32>
    %c16_152 = arith.constant 16 : index
    %257 = memref.load %arg7[%c16_152] : memref<98xf32, #tpu.memory_space<smem>>
    %c0_153 = arith.constant 0 : index
    %c383_154 = arith.constant 383 : index
    %258 = vector.load %arg12[%c0_153, %c383_154] : memref<8x3072xf32, #tpu.memory_space<vmem>>, vector<1x2048xf32>
    %259 = vector.broadcast %257 : f32 to vector<1x2048xf32>
    %260 = arith.mulf %259, %258 : vector<1x2048xf32>
    %261 = arith.addf %256, %260 : vector<1x2048xf32>
    %c65 = arith.constant 65 : index
    %262 = memref.load %arg7[%c65] : memref<98xf32, #tpu.memory_space<smem>>
    %c1_155 = arith.constant 1 : index
    %c383_156 = arith.constant 383 : index
    %263 = vector.load %arg12[%c1_155, %c383_156] : memref<8x3072xf32, #tpu.memory_space<vmem>>, vector<1x2048xf32>
    %264 = vector.broadcast %262 : f32 to vector<1x2048xf32>
    %265 = arith.mulf %264, %263 : vector<1x2048xf32>
    %266 = arith.addf %261, %265 : vector<1x2048xf32>
    %c17 = arith.constant 17 : index
    %267 = memref.load %arg7[%c17] : memref<98xf32, #tpu.memory_space<smem>>
    %c0_157 = arith.constant 0 : index
    %c384_158 = arith.constant 384 : index
    %268 = vector.load %arg12[%c0_157, %c384_158] : memref<8x3072xf32, #tpu.memory_space<vmem>>, vector<1x2048xf32>
    %269 = vector.broadcast %267 : f32 to vector<1x2048xf32>
    %270 = arith.mulf %269, %268 : vector<1x2048xf32>
    %271 = arith.addf %266, %270 : vector<1x2048xf32>
    %c66 = arith.constant 66 : index
    %272 = memref.load %arg7[%c66] : memref<98xf32, #tpu.memory_space<smem>>
    %c1_159 = arith.constant 1 : index
    %c384_160 = arith.constant 384 : index
    %273 = vector.load %arg12[%c1_159, %c384_160] : memref<8x3072xf32, #tpu.memory_space<vmem>>, vector<1x2048xf32>
    %274 = vector.broadcast %272 : f32 to vector<1x2048xf32>
    %275 = arith.mulf %274, %273 : vector<1x2048xf32>
    %276 = arith.addf %271, %275 : vector<1x2048xf32>
    %c18 = arith.constant 18 : index
    %277 = memref.load %arg7[%c18] : memref<98xf32, #tpu.memory_space<smem>>
    %c0_161 = arith.constant 0 : index
    %c385_162 = arith.constant 385 : index
    %278 = vector.load %arg12[%c0_161, %c385_162] : memref<8x3072xf32, #tpu.memory_space<vmem>>, vector<1x2048xf32>
    %279 = vector.broadcast %277 : f32 to vector<1x2048xf32>
    %280 = arith.mulf %279, %278 : vector<1x2048xf32>
    %281 = arith.addf %276, %280 : vector<1x2048xf32>
    %c67 = arith.constant 67 : index
    %282 = memref.load %arg7[%c67] : memref<98xf32, #tpu.memory_space<smem>>
    %c1_163 = arith.constant 1 : index
    %c385_164 = arith.constant 385 : index
    %283 = vector.load %arg12[%c1_163, %c385_164] : memref<8x3072xf32, #tpu.memory_space<vmem>>, vector<1x2048xf32>
    %284 = vector.broadcast %282 : f32 to vector<1x2048xf32>
    %285 = arith.mulf %284, %283 : vector<1x2048xf32>
    %286 = arith.addf %281, %285 : vector<1x2048xf32>
    %c19 = arith.constant 19 : index
    %287 = memref.load %arg7[%c19] : memref<98xf32, #tpu.memory_space<smem>>
    %c0_165 = arith.constant 0 : index
    %c386 = arith.constant 386 : index
    %288 = vector.load %arg12[%c0_165, %c386] : memref<8x3072xf32, #tpu.memory_space<vmem>>, vector<1x2048xf32>
    %289 = vector.broadcast %287 : f32 to vector<1x2048xf32>
    %290 = arith.mulf %289, %288 : vector<1x2048xf32>
    %291 = arith.addf %286, %290 : vector<1x2048xf32>
    %c68 = arith.constant 68 : index
    %292 = memref.load %arg7[%c68] : memref<98xf32, #tpu.memory_space<smem>>
    %c1_166 = arith.constant 1 : index
    %c386_167 = arith.constant 386 : index
    %293 = vector.load %arg12[%c1_166, %c386_167] : memref<8x3072xf32, #tpu.memory_space<vmem>>, vector<1x2048xf32>
    %294 = vector.broadcast %292 : f32 to vector<1x2048xf32>
    %295 = arith.mulf %294, %293 : vector<1x2048xf32>
    %296 = arith.addf %291, %295 : vector<1x2048xf32>
    %c20 = arith.constant 20 : index
    %297 = memref.load %arg7[%c20] : memref<98xf32, #tpu.memory_space<smem>>
    %c0_168 = arith.constant 0 : index
    %c387 = arith.constant 387 : index
    %298 = vector.load %arg12[%c0_168, %c387] : memref<8x3072xf32, #tpu.memory_space<vmem>>, vector<1x2048xf32>
    %299 = vector.broadcast %297 : f32 to vector<1x2048xf32>
    %300 = arith.mulf %299, %298 : vector<1x2048xf32>
    %301 = arith.addf %296, %300 : vector<1x2048xf32>
    %c69 = arith.constant 69 : index
    %302 = memref.load %arg7[%c69] : memref<98xf32, #tpu.memory_space<smem>>
    %c1_169 = arith.constant 1 : index
    %c387_170 = arith.constant 387 : index
    %303 = vector.load %arg12[%c1_169, %c387_170] : memref<8x3072xf32, #tpu.memory_space<vmem>>, vector<1x2048xf32>
    %304 = vector.broadcast %302 : f32 to vector<1x2048xf32>
    %305 = arith.mulf %304, %303 : vector<1x2048xf32>
    %306 = arith.addf %301, %305 : vector<1x2048xf32>
    %c21 = arith.constant 21 : index
    %307 = memref.load %arg7[%c21] : memref<98xf32, #tpu.memory_space<smem>>
    %c0_171 = arith.constant 0 : index
    %c509 = arith.constant 509 : index
    %308 = vector.load %arg12[%c0_171, %c509] : memref<8x3072xf32, #tpu.memory_space<vmem>>, vector<1x2048xf32>
    %309 = vector.broadcast %307 : f32 to vector<1x2048xf32>
    %310 = arith.mulf %309, %308 : vector<1x2048xf32>
    %311 = arith.addf %306, %310 : vector<1x2048xf32>
    %c70 = arith.constant 70 : index
    %312 = memref.load %arg7[%c70] : memref<98xf32, #tpu.memory_space<smem>>
    %c1_172 = arith.constant 1 : index
    %c509_173 = arith.constant 509 : index
    %313 = vector.load %arg12[%c1_172, %c509_173] : memref<8x3072xf32, #tpu.memory_space<vmem>>, vector<1x2048xf32>
    %314 = vector.broadcast %312 : f32 to vector<1x2048xf32>
    %315 = arith.mulf %314, %313 : vector<1x2048xf32>
    %316 = arith.addf %311, %315 : vector<1x2048xf32>
    %c22 = arith.constant 22 : index
    %317 = memref.load %arg7[%c22] : memref<98xf32, #tpu.memory_space<smem>>
    %c0_174 = arith.constant 0 : index
    %c510 = arith.constant 510 : index
    %318 = vector.load %arg12[%c0_174, %c510] : memref<8x3072xf32, #tpu.memory_space<vmem>>, vector<1x2048xf32>
    %319 = vector.broadcast %317 : f32 to vector<1x2048xf32>
    %320 = arith.mulf %319, %318 : vector<1x2048xf32>
    %321 = arith.addf %316, %320 : vector<1x2048xf32>
    %c71 = arith.constant 71 : index
    %322 = memref.load %arg7[%c71] : memref<98xf32, #tpu.memory_space<smem>>
    %c1_175 = arith.constant 1 : index
    %c510_176 = arith.constant 510 : index
    %323 = vector.load %arg12[%c1_175, %c510_176] : memref<8x3072xf32, #tpu.memory_space<vmem>>, vector<1x2048xf32>
    %324 = vector.broadcast %322 : f32 to vector<1x2048xf32>
    %325 = arith.mulf %324, %323 : vector<1x2048xf32>
    %326 = arith.addf %321, %325 : vector<1x2048xf32>
    %c23 = arith.constant 23 : index
    %327 = memref.load %arg7[%c23] : memref<98xf32, #tpu.memory_space<smem>>
    %c0_177 = arith.constant 0 : index
    %c511_178 = arith.constant 511 : index
    %328 = vector.load %arg12[%c0_177, %c511_178] : memref<8x3072xf32, #tpu.memory_space<vmem>>, vector<1x2048xf32>
    %329 = vector.broadcast %327 : f32 to vector<1x2048xf32>
    %330 = arith.mulf %329, %328 : vector<1x2048xf32>
    %331 = arith.addf %326, %330 : vector<1x2048xf32>
    %c72 = arith.constant 72 : index
    %332 = memref.load %arg7[%c72] : memref<98xf32, #tpu.memory_space<smem>>
    %c1_179 = arith.constant 1 : index
    %c511_180 = arith.constant 511 : index
    %333 = vector.load %arg12[%c1_179, %c511_180] : memref<8x3072xf32, #tpu.memory_space<vmem>>, vector<1x2048xf32>
    %334 = vector.broadcast %332 : f32 to vector<1x2048xf32>
    %335 = arith.mulf %334, %333 : vector<1x2048xf32>
    %336 = arith.addf %331, %335 : vector<1x2048xf32>
    %c24 = arith.constant 24 : index
    %337 = memref.load %arg7[%c24] : memref<98xf32, #tpu.memory_space<smem>>
    %c0_181 = arith.constant 0 : index
    %c512_182 = arith.constant 512 : index
    %338 = vector.load %arg12[%c0_181, %c512_182] : memref<8x3072xf32, #tpu.memory_space<vmem>>, vector<1x2048xf32>
    %339 = vector.broadcast %337 : f32 to vector<1x2048xf32>
    %340 = arith.mulf %339, %338 : vector<1x2048xf32>
    %341 = arith.addf %336, %340 : vector<1x2048xf32>
    %c73 = arith.constant 73 : index
    %342 = memref.load %arg7[%c73] : memref<98xf32, #tpu.memory_space<smem>>
    %c1_183 = arith.constant 1 : index
    %c512_184 = arith.constant 512 : index
    %343 = vector.load %arg12[%c1_183, %c512_184] : memref<8x3072xf32, #tpu.memory_space<vmem>>, vector<1x2048xf32>
    %344 = vector.broadcast %342 : f32 to vector<1x2048xf32>
    %345 = arith.mulf %344, %343 : vector<1x2048xf32>
    %346 = arith.addf %341, %345 : vector<1x2048xf32>
    %c25 = arith.constant 25 : index
    %347 = memref.load %arg7[%c25] : memref<98xf32, #tpu.memory_space<smem>>
    %c0_185 = arith.constant 0 : index
    %c513_186 = arith.constant 513 : index
    %348 = vector.load %arg12[%c0_185, %c513_186] : memref<8x3072xf32, #tpu.memory_space<vmem>>, vector<1x2048xf32>
    %349 = vector.broadcast %347 : f32 to vector<1x2048xf32>
    %350 = arith.mulf %349, %348 : vector<1x2048xf32>
    %351 = arith.addf %346, %350 : vector<1x2048xf32>
    %c74 = arith.constant 74 : index
    %352 = memref.load %arg7[%c74] : memref<98xf32, #tpu.memory_space<smem>>
    %c1_187 = arith.constant 1 : index
    %c513_188 = arith.constant 513 : index
    %353 = vector.load %arg12[%c1_187, %c513_188] : memref<8x3072xf32, #tpu.memory_space<vmem>>, vector<1x2048xf32>
    %354 = vector.broadcast %352 : f32 to vector<1x2048xf32>
    %355 = arith.mulf %354, %353 : vector<1x2048xf32>
    %356 = arith.addf %351, %355 : vector<1x2048xf32>
    %c26 = arith.constant 26 : index
    %357 = memref.load %arg7[%c26] : memref<98xf32, #tpu.memory_space<smem>>
    %c0_189 = arith.constant 0 : index
    %c514 = arith.constant 514 : index
    %358 = vector.load %arg12[%c0_189, %c514] : memref<8x3072xf32, #tpu.memory_space<vmem>>, vector<1x2048xf32>
    %359 = vector.broadcast %357 : f32 to vector<1x2048xf32>
    %360 = arith.mulf %359, %358 : vector<1x2048xf32>
    %361 = arith.addf %356, %360 : vector<1x2048xf32>
    %c75 = arith.constant 75 : index
    %362 = memref.load %arg7[%c75] : memref<98xf32, #tpu.memory_space<smem>>
    %c1_190 = arith.constant 1 : index
    %c514_191 = arith.constant 514 : index
    %363 = vector.load %arg12[%c1_190, %c514_191] : memref<8x3072xf32, #tpu.memory_space<vmem>>, vector<1x2048xf32>
    %364 = vector.broadcast %362 : f32 to vector<1x2048xf32>
    %365 = arith.mulf %364, %363 : vector<1x2048xf32>
    %366 = arith.addf %361, %365 : vector<1x2048xf32>
    %c27 = arith.constant 27 : index
    %367 = memref.load %arg7[%c27] : memref<98xf32, #tpu.memory_space<smem>>
    %c0_192 = arith.constant 0 : index
    %c515 = arith.constant 515 : index
    %368 = vector.load %arg12[%c0_192, %c515] : memref<8x3072xf32, #tpu.memory_space<vmem>>, vector<1x2048xf32>
    %369 = vector.broadcast %367 : f32 to vector<1x2048xf32>
    %370 = arith.mulf %369, %368 : vector<1x2048xf32>
    %371 = arith.addf %366, %370 : vector<1x2048xf32>
    %c76 = arith.constant 76 : index
    %372 = memref.load %arg7[%c76] : memref<98xf32, #tpu.memory_space<smem>>
    %c1_193 = arith.constant 1 : index
    %c515_194 = arith.constant 515 : index
    %373 = vector.load %arg12[%c1_193, %c515_194] : memref<8x3072xf32, #tpu.memory_space<vmem>>, vector<1x2048xf32>
    %374 = vector.broadcast %372 : f32 to vector<1x2048xf32>
    %375 = arith.mulf %374, %373 : vector<1x2048xf32>
    %376 = arith.addf %371, %375 : vector<1x2048xf32>
    %c28 = arith.constant 28 : index
    %377 = memref.load %arg7[%c28] : memref<98xf32, #tpu.memory_space<smem>>
    %c0_195 = arith.constant 0 : index
    %c637 = arith.constant 637 : index
    %378 = vector.load %arg12[%c0_195, %c637] : memref<8x3072xf32, #tpu.memory_space<vmem>>, vector<1x2048xf32>
    %379 = vector.broadcast %377 : f32 to vector<1x2048xf32>
    %380 = arith.mulf %379, %378 : vector<1x2048xf32>
    %381 = arith.addf %376, %380 : vector<1x2048xf32>
    %c77 = arith.constant 77 : index
    %382 = memref.load %arg7[%c77] : memref<98xf32, #tpu.memory_space<smem>>
    %c1_196 = arith.constant 1 : index
    %c637_197 = arith.constant 637 : index
    %383 = vector.load %arg12[%c1_196, %c637_197] : memref<8x3072xf32, #tpu.memory_space<vmem>>, vector<1x2048xf32>
    %384 = vector.broadcast %382 : f32 to vector<1x2048xf32>
    %385 = arith.mulf %384, %383 : vector<1x2048xf32>
    %386 = arith.addf %381, %385 : vector<1x2048xf32>
    %c29 = arith.constant 29 : index
    %387 = memref.load %arg7[%c29] : memref<98xf32, #tpu.memory_space<smem>>
    %c0_198 = arith.constant 0 : index
    %c638 = arith.constant 638 : index
    %388 = vector.load %arg12[%c0_198, %c638] : memref<8x3072xf32, #tpu.memory_space<vmem>>, vector<1x2048xf32>
    %389 = vector.broadcast %387 : f32 to vector<1x2048xf32>
    %390 = arith.mulf %389, %388 : vector<1x2048xf32>
    %391 = arith.addf %386, %390 : vector<1x2048xf32>
    %c78 = arith.constant 78 : index
    %392 = memref.load %arg7[%c78] : memref<98xf32, #tpu.memory_space<smem>>
    %c1_199 = arith.constant 1 : index
    %c638_200 = arith.constant 638 : index
    %393 = vector.load %arg12[%c1_199, %c638_200] : memref<8x3072xf32, #tpu.memory_space<vmem>>, vector<1x2048xf32>
    %394 = vector.broadcast %392 : f32 to vector<1x2048xf32>
    %395 = arith.mulf %394, %393 : vector<1x2048xf32>
    %396 = arith.addf %391, %395 : vector<1x2048xf32>
    %c30 = arith.constant 30 : index
    %397 = memref.load %arg7[%c30] : memref<98xf32, #tpu.memory_space<smem>>
    %c0_201 = arith.constant 0 : index
    %c639_202 = arith.constant 639 : index
    %398 = vector.load %arg12[%c0_201, %c639_202] : memref<8x3072xf32, #tpu.memory_space<vmem>>, vector<1x2048xf32>
    %399 = vector.broadcast %397 : f32 to vector<1x2048xf32>
    %400 = arith.mulf %399, %398 : vector<1x2048xf32>
    %401 = arith.addf %396, %400 : vector<1x2048xf32>
    %c79 = arith.constant 79 : index
    %402 = memref.load %arg7[%c79] : memref<98xf32, #tpu.memory_space<smem>>
    %c1_203 = arith.constant 1 : index
    %c639_204 = arith.constant 639 : index
    %403 = vector.load %arg12[%c1_203, %c639_204] : memref<8x3072xf32, #tpu.memory_space<vmem>>, vector<1x2048xf32>
    %404 = vector.broadcast %402 : f32 to vector<1x2048xf32>
    %405 = arith.mulf %404, %403 : vector<1x2048xf32>
    %406 = arith.addf %401, %405 : vector<1x2048xf32>
    %c31 = arith.constant 31 : index
    %407 = memref.load %arg7[%c31] : memref<98xf32, #tpu.memory_space<smem>>
    %c0_205 = arith.constant 0 : index
    %c640_206 = arith.constant 640 : index
    %408 = vector.load %arg12[%c0_205, %c640_206] : memref<8x3072xf32, #tpu.memory_space<vmem>>, vector<1x2048xf32>
    %409 = vector.broadcast %407 : f32 to vector<1x2048xf32>
    %410 = arith.mulf %409, %408 : vector<1x2048xf32>
    %411 = arith.addf %406, %410 : vector<1x2048xf32>
    %c80_207 = arith.constant 80 : index
    %412 = memref.load %arg7[%c80_207] : memref<98xf32, #tpu.memory_space<smem>>
    %c1_208 = arith.constant 1 : index
    %c640_209 = arith.constant 640 : index
    %413 = vector.load %arg12[%c1_208, %c640_209] : memref<8x3072xf32, #tpu.memory_space<vmem>>, vector<1x2048xf32>
    %414 = vector.broadcast %412 : f32 to vector<1x2048xf32>
    %415 = arith.mulf %414, %413 : vector<1x2048xf32>
    %416 = arith.addf %411, %415 : vector<1x2048xf32>
    %c32_210 = arith.constant 32 : index
    %417 = memref.load %arg7[%c32_210] : memref<98xf32, #tpu.memory_space<smem>>
    %c0_211 = arith.constant 0 : index
    %c641_212 = arith.constant 641 : index
    %418 = vector.load %arg12[%c0_211, %c641_212] : memref<8x3072xf32, #tpu.memory_space<vmem>>, vector<1x2048xf32>
    %419 = vector.broadcast %417 : f32 to vector<1x2048xf32>
    %420 = arith.mulf %419, %418 : vector<1x2048xf32>
    %421 = arith.addf %416, %420 : vector<1x2048xf32>
    %c81 = arith.constant 81 : index
    %422 = memref.load %arg7[%c81] : memref<98xf32, #tpu.memory_space<smem>>
    %c1_213 = arith.constant 1 : index
    %c641_214 = arith.constant 641 : index
    %423 = vector.load %arg12[%c1_213, %c641_214] : memref<8x3072xf32, #tpu.memory_space<vmem>>, vector<1x2048xf32>
    %424 = vector.broadcast %422 : f32 to vector<1x2048xf32>
    %425 = arith.mulf %424, %423 : vector<1x2048xf32>
    %426 = arith.addf %421, %425 : vector<1x2048xf32>
    %c33 = arith.constant 33 : index
    %427 = memref.load %arg7[%c33] : memref<98xf32, #tpu.memory_space<smem>>
    %c0_215 = arith.constant 0 : index
    %c642 = arith.constant 642 : index
    %428 = vector.load %arg12[%c0_215, %c642] : memref<8x3072xf32, #tpu.memory_space<vmem>>, vector<1x2048xf32>
    %429 = vector.broadcast %427 : f32 to vector<1x2048xf32>
    %430 = arith.mulf %429, %428 : vector<1x2048xf32>
    %431 = arith.addf %426, %430 : vector<1x2048xf32>
    %c82 = arith.constant 82 : index
    %432 = memref.load %arg7[%c82] : memref<98xf32, #tpu.memory_space<smem>>
    %c1_216 = arith.constant 1 : index
    %c642_217 = arith.constant 642 : index
    %433 = vector.load %arg12[%c1_216, %c642_217] : memref<8x3072xf32, #tpu.memory_space<vmem>>, vector<1x2048xf32>
    %434 = vector.broadcast %432 : f32 to vector<1x2048xf32>
    %435 = arith.mulf %434, %433 : vector<1x2048xf32>
    %436 = arith.addf %431, %435 : vector<1x2048xf32>
    %c34 = arith.constant 34 : index
    %437 = memref.load %arg7[%c34] : memref<98xf32, #tpu.memory_space<smem>>
    %c0_218 = arith.constant 0 : index
    %c643 = arith.constant 643 : index
    %438 = vector.load %arg12[%c0_218, %c643] : memref<8x3072xf32, #tpu.memory_space<vmem>>, vector<1x2048xf32>
    %439 = vector.broadcast %437 : f32 to vector<1x2048xf32>
    %440 = arith.mulf %439, %438 : vector<1x2048xf32>
    %441 = arith.addf %436, %440 : vector<1x2048xf32>
    %c83 = arith.constant 83 : index
    %442 = memref.load %arg7[%c83] : memref<98xf32, #tpu.memory_space<smem>>
    %c1_219 = arith.constant 1 : index
    %c643_220 = arith.constant 643 : index
    %443 = vector.load %arg12[%c1_219, %c643_220] : memref<8x3072xf32, #tpu.memory_space<vmem>>, vector<1x2048xf32>
    %444 = vector.broadcast %442 : f32 to vector<1x2048xf32>
    %445 = arith.mulf %444, %443 : vector<1x2048xf32>
    %446 = arith.addf %441, %445 : vector<1x2048xf32>
    %c35 = arith.constant 35 : index
    %447 = memref.load %arg7[%c35] : memref<98xf32, #tpu.memory_space<smem>>
    %c0_221 = arith.constant 0 : index
    %c765 = arith.constant 765 : index
    %448 = vector.load %arg12[%c0_221, %c765] : memref<8x3072xf32, #tpu.memory_space<vmem>>, vector<1x2048xf32>
    %449 = vector.broadcast %447 : f32 to vector<1x2048xf32>
    %450 = arith.mulf %449, %448 : vector<1x2048xf32>
    %451 = arith.addf %446, %450 : vector<1x2048xf32>
    %c84 = arith.constant 84 : index
    %452 = memref.load %arg7[%c84] : memref<98xf32, #tpu.memory_space<smem>>
    %c1_222 = arith.constant 1 : index
    %c765_223 = arith.constant 765 : index
    %453 = vector.load %arg12[%c1_222, %c765_223] : memref<8x3072xf32, #tpu.memory_space<vmem>>, vector<1x2048xf32>
    %454 = vector.broadcast %452 : f32 to vector<1x2048xf32>
    %455 = arith.mulf %454, %453 : vector<1x2048xf32>
    %456 = arith.addf %451, %455 : vector<1x2048xf32>
    %c36 = arith.constant 36 : index
    %457 = memref.load %arg7[%c36] : memref<98xf32, #tpu.memory_space<smem>>
    %c0_224 = arith.constant 0 : index
    %c766 = arith.constant 766 : index
    %458 = vector.load %arg12[%c0_224, %c766] : memref<8x3072xf32, #tpu.memory_space<vmem>>, vector<1x2048xf32>
    %459 = vector.broadcast %457 : f32 to vector<1x2048xf32>
    %460 = arith.mulf %459, %458 : vector<1x2048xf32>
    %461 = arith.addf %456, %460 : vector<1x2048xf32>
    %c85 = arith.constant 85 : index
    %462 = memref.load %arg7[%c85] : memref<98xf32, #tpu.memory_space<smem>>
    %c1_225 = arith.constant 1 : index
    %c766_226 = arith.constant 766 : index
    %463 = vector.load %arg12[%c1_225, %c766_226] : memref<8x3072xf32, #tpu.memory_space<vmem>>, vector<1x2048xf32>
    %464 = vector.broadcast %462 : f32 to vector<1x2048xf32>
    %465 = arith.mulf %464, %463 : vector<1x2048xf32>
    %466 = arith.addf %461, %465 : vector<1x2048xf32>
    %c37 = arith.constant 37 : index
    %467 = memref.load %arg7[%c37] : memref<98xf32, #tpu.memory_space<smem>>
    %c0_227 = arith.constant 0 : index
    %c767 = arith.constant 767 : index
    %468 = vector.load %arg12[%c0_227, %c767] : memref<8x3072xf32, #tpu.memory_space<vmem>>, vector<1x2048xf32>
    %469 = vector.broadcast %467 : f32 to vector<1x2048xf32>
    %470 = arith.mulf %469, %468 : vector<1x2048xf32>
    %471 = arith.addf %466, %470 : vector<1x2048xf32>
    %c86 = arith.constant 86 : index
    %472 = memref.load %arg7[%c86] : memref<98xf32, #tpu.memory_space<smem>>
    %c1_228 = arith.constant 1 : index
    %c767_229 = arith.constant 767 : index
    %473 = vector.load %arg12[%c1_228, %c767_229] : memref<8x3072xf32, #tpu.memory_space<vmem>>, vector<1x2048xf32>
    %474 = vector.broadcast %472 : f32 to vector<1x2048xf32>
    %475 = arith.mulf %474, %473 : vector<1x2048xf32>
    %476 = arith.addf %471, %475 : vector<1x2048xf32>
    %c38 = arith.constant 38 : index
    %477 = memref.load %arg7[%c38] : memref<98xf32, #tpu.memory_space<smem>>
    %c0_230 = arith.constant 0 : index
    %c768 = arith.constant 768 : index
    %478 = vector.load %arg12[%c0_230, %c768] : memref<8x3072xf32, #tpu.memory_space<vmem>>, vector<1x2048xf32>
    %479 = vector.broadcast %477 : f32 to vector<1x2048xf32>
    %480 = arith.mulf %479, %478 : vector<1x2048xf32>
    %481 = arith.addf %476, %480 : vector<1x2048xf32>
    %c87 = arith.constant 87 : index
    %482 = memref.load %arg7[%c87] : memref<98xf32, #tpu.memory_space<smem>>
    %c1_231 = arith.constant 1 : index
    %c768_232 = arith.constant 768 : index
    %483 = vector.load %arg12[%c1_231, %c768_232] : memref<8x3072xf32, #tpu.memory_space<vmem>>, vector<1x2048xf32>
    %484 = vector.broadcast %482 : f32 to vector<1x2048xf32>
    %485 = arith.mulf %484, %483 : vector<1x2048xf32>
    %486 = arith.addf %481, %485 : vector<1x2048xf32>
    %c39 = arith.constant 39 : index
    %487 = memref.load %arg7[%c39] : memref<98xf32, #tpu.memory_space<smem>>
    %c0_233 = arith.constant 0 : index
    %c769 = arith.constant 769 : index
    %488 = vector.load %arg12[%c0_233, %c769] : memref<8x3072xf32, #tpu.memory_space<vmem>>, vector<1x2048xf32>
    %489 = vector.broadcast %487 : f32 to vector<1x2048xf32>
    %490 = arith.mulf %489, %488 : vector<1x2048xf32>
    %491 = arith.addf %486, %490 : vector<1x2048xf32>
    %c88 = arith.constant 88 : index
    %492 = memref.load %arg7[%c88] : memref<98xf32, #tpu.memory_space<smem>>
    %c1_234 = arith.constant 1 : index
    %c769_235 = arith.constant 769 : index
    %493 = vector.load %arg12[%c1_234, %c769_235] : memref<8x3072xf32, #tpu.memory_space<vmem>>, vector<1x2048xf32>
    %494 = vector.broadcast %492 : f32 to vector<1x2048xf32>
    %495 = arith.mulf %494, %493 : vector<1x2048xf32>
    %496 = arith.addf %491, %495 : vector<1x2048xf32>
    %c40 = arith.constant 40 : index
    %497 = memref.load %arg7[%c40] : memref<98xf32, #tpu.memory_space<smem>>
    %c0_236 = arith.constant 0 : index
    %c770 = arith.constant 770 : index
    %498 = vector.load %arg12[%c0_236, %c770] : memref<8x3072xf32, #tpu.memory_space<vmem>>, vector<1x2048xf32>
    %499 = vector.broadcast %497 : f32 to vector<1x2048xf32>
    %500 = arith.mulf %499, %498 : vector<1x2048xf32>
    %501 = arith.addf %496, %500 : vector<1x2048xf32>
    %c89 = arith.constant 89 : index
    %502 = memref.load %arg7[%c89] : memref<98xf32, #tpu.memory_space<smem>>
    %c1_237 = arith.constant 1 : index
    %c770_238 = arith.constant 770 : index
    %503 = vector.load %arg12[%c1_237, %c770_238] : memref<8x3072xf32, #tpu.memory_space<vmem>>, vector<1x2048xf32>
    %504 = vector.broadcast %502 : f32 to vector<1x2048xf32>
    %505 = arith.mulf %504, %503 : vector<1x2048xf32>
    %506 = arith.addf %501, %505 : vector<1x2048xf32>
    %c41 = arith.constant 41 : index
    %507 = memref.load %arg7[%c41] : memref<98xf32, #tpu.memory_space<smem>>
    %c0_239 = arith.constant 0 : index
    %c771 = arith.constant 771 : index
    %508 = vector.load %arg12[%c0_239, %c771] : memref<8x3072xf32, #tpu.memory_space<vmem>>, vector<1x2048xf32>
    %509 = vector.broadcast %507 : f32 to vector<1x2048xf32>
    %510 = arith.mulf %509, %508 : vector<1x2048xf32>
    %511 = arith.addf %506, %510 : vector<1x2048xf32>
    %c90 = arith.constant 90 : index
    %512 = memref.load %arg7[%c90] : memref<98xf32, #tpu.memory_space<smem>>
    %c1_240 = arith.constant 1 : index
    %c771_241 = arith.constant 771 : index
    %513 = vector.load %arg12[%c1_240, %c771_241] : memref<8x3072xf32, #tpu.memory_space<vmem>>, vector<1x2048xf32>
    %514 = vector.broadcast %512 : f32 to vector<1x2048xf32>
    %515 = arith.mulf %514, %513 : vector<1x2048xf32>
    %516 = arith.addf %511, %515 : vector<1x2048xf32>
    %c42 = arith.constant 42 : index
    %517 = memref.load %arg7[%c42] : memref<98xf32, #tpu.memory_space<smem>>
    %c0_242 = arith.constant 0 : index
    %c893 = arith.constant 893 : index
    %518 = vector.load %arg12[%c0_242, %c893] : memref<8x3072xf32, #tpu.memory_space<vmem>>, vector<1x2048xf32>
    %519 = vector.broadcast %517 : f32 to vector<1x2048xf32>
    %520 = arith.mulf %519, %518 : vector<1x2048xf32>
    %521 = arith.addf %516, %520 : vector<1x2048xf32>
    %c91 = arith.constant 91 : index
    %522 = memref.load %arg7[%c91] : memref<98xf32, #tpu.memory_space<smem>>
    %c1_243 = arith.constant 1 : index
    %c893_244 = arith.constant 893 : index
    %523 = vector.load %arg12[%c1_243, %c893_244] : memref<8x3072xf32, #tpu.memory_space<vmem>>, vector<1x2048xf32>
    %524 = vector.broadcast %522 : f32 to vector<1x2048xf32>
    %525 = arith.mulf %524, %523 : vector<1x2048xf32>
    %526 = arith.addf %521, %525 : vector<1x2048xf32>
    %c43 = arith.constant 43 : index
    %527 = memref.load %arg7[%c43] : memref<98xf32, #tpu.memory_space<smem>>
    %c0_245 = arith.constant 0 : index
    %c894 = arith.constant 894 : index
    %528 = vector.load %arg12[%c0_245, %c894] : memref<8x3072xf32, #tpu.memory_space<vmem>>, vector<1x2048xf32>
    %529 = vector.broadcast %527 : f32 to vector<1x2048xf32>
    %530 = arith.mulf %529, %528 : vector<1x2048xf32>
    %531 = arith.addf %526, %530 : vector<1x2048xf32>
    %c92 = arith.constant 92 : index
    %532 = memref.load %arg7[%c92] : memref<98xf32, #tpu.memory_space<smem>>
    %c1_246 = arith.constant 1 : index
    %c894_247 = arith.constant 894 : index
    %533 = vector.load %arg12[%c1_246, %c894_247] : memref<8x3072xf32, #tpu.memory_space<vmem>>, vector<1x2048xf32>
    %534 = vector.broadcast %532 : f32 to vector<1x2048xf32>
    %535 = arith.mulf %534, %533 : vector<1x2048xf32>
    %536 = arith.addf %531, %535 : vector<1x2048xf32>
    %c44 = arith.constant 44 : index
    %537 = memref.load %arg7[%c44] : memref<98xf32, #tpu.memory_space<smem>>
    %c0_248 = arith.constant 0 : index
    %c895 = arith.constant 895 : index
    %538 = vector.load %arg12[%c0_248, %c895] : memref<8x3072xf32, #tpu.memory_space<vmem>>, vector<1x2048xf32>
    %539 = vector.broadcast %537 : f32 to vector<1x2048xf32>
    %540 = arith.mulf %539, %538 : vector<1x2048xf32>
    %541 = arith.addf %536, %540 : vector<1x2048xf32>
    %c93 = arith.constant 93 : index
    %542 = memref.load %arg7[%c93] : memref<98xf32, #tpu.memory_space<smem>>
    %c1_249 = arith.constant 1 : index
    %c895_250 = arith.constant 895 : index
    %543 = vector.load %arg12[%c1_249, %c895_250] : memref<8x3072xf32, #tpu.memory_space<vmem>>, vector<1x2048xf32>
    %544 = vector.broadcast %542 : f32 to vector<1x2048xf32>
    %545 = arith.mulf %544, %543 : vector<1x2048xf32>
    %546 = arith.addf %541, %545 : vector<1x2048xf32>
    %c45 = arith.constant 45 : index
    %547 = memref.load %arg7[%c45] : memref<98xf32, #tpu.memory_space<smem>>
    %c0_251 = arith.constant 0 : index
    %c896 = arith.constant 896 : index
    %548 = vector.load %arg12[%c0_251, %c896] : memref<8x3072xf32, #tpu.memory_space<vmem>>, vector<1x2048xf32>
    %549 = vector.broadcast %547 : f32 to vector<1x2048xf32>
    %550 = arith.mulf %549, %548 : vector<1x2048xf32>
    %551 = arith.addf %546, %550 : vector<1x2048xf32>
    %c94 = arith.constant 94 : index
    %552 = memref.load %arg7[%c94] : memref<98xf32, #tpu.memory_space<smem>>
    %c1_252 = arith.constant 1 : index
    %c896_253 = arith.constant 896 : index
    %553 = vector.load %arg12[%c1_252, %c896_253] : memref<8x3072xf32, #tpu.memory_space<vmem>>, vector<1x2048xf32>
    %554 = vector.broadcast %552 : f32 to vector<1x2048xf32>
    %555 = arith.mulf %554, %553 : vector<1x2048xf32>
    %556 = arith.addf %551, %555 : vector<1x2048xf32>
    %c46 = arith.constant 46 : index
    %557 = memref.load %arg7[%c46] : memref<98xf32, #tpu.memory_space<smem>>
    %c0_254 = arith.constant 0 : index
    %c897 = arith.constant 897 : index
    %558 = vector.load %arg12[%c0_254, %c897] : memref<8x3072xf32, #tpu.memory_space<vmem>>, vector<1x2048xf32>
    %559 = vector.broadcast %557 : f32 to vector<1x2048xf32>
    %560 = arith.mulf %559, %558 : vector<1x2048xf32>
    %561 = arith.addf %556, %560 : vector<1x2048xf32>
    %c95 = arith.constant 95 : index
    %562 = memref.load %arg7[%c95] : memref<98xf32, #tpu.memory_space<smem>>
    %c1_255 = arith.constant 1 : index
    %c897_256 = arith.constant 897 : index
    %563 = vector.load %arg12[%c1_255, %c897_256] : memref<8x3072xf32, #tpu.memory_space<vmem>>, vector<1x2048xf32>
    %564 = vector.broadcast %562 : f32 to vector<1x2048xf32>
    %565 = arith.mulf %564, %563 : vector<1x2048xf32>
    %566 = arith.addf %561, %565 : vector<1x2048xf32>
    %c47 = arith.constant 47 : index
    %567 = memref.load %arg7[%c47] : memref<98xf32, #tpu.memory_space<smem>>
    %c0_257 = arith.constant 0 : index
    %c898 = arith.constant 898 : index
    %568 = vector.load %arg12[%c0_257, %c898] : memref<8x3072xf32, #tpu.memory_space<vmem>>, vector<1x2048xf32>
    %569 = vector.broadcast %567 : f32 to vector<1x2048xf32>
    %570 = arith.mulf %569, %568 : vector<1x2048xf32>
    %571 = arith.addf %566, %570 : vector<1x2048xf32>
    %c96_258 = arith.constant 96 : index
    %572 = memref.load %arg7[%c96_258] : memref<98xf32, #tpu.memory_space<smem>>
    %c1_259 = arith.constant 1 : index
    %c898_260 = arith.constant 898 : index
    %573 = vector.load %arg12[%c1_259, %c898_260] : memref<8x3072xf32, #tpu.memory_space<vmem>>, vector<1x2048xf32>
    %574 = vector.broadcast %572 : f32 to vector<1x2048xf32>
    %575 = arith.mulf %574, %573 : vector<1x2048xf32>
    %576 = arith.addf %571, %575 : vector<1x2048xf32>
    %c48_261 = arith.constant 48 : index
    %577 = memref.load %arg7[%c48_261] : memref<98xf32, #tpu.memory_space<smem>>
    %c0_262 = arith.constant 0 : index
    %c899 = arith.constant 899 : index
    %578 = vector.load %arg12[%c0_262, %c899] : memref<8x3072xf32, #tpu.memory_space<vmem>>, vector<1x2048xf32>
    %579 = vector.broadcast %577 : f32 to vector<1x2048xf32>
    %580 = arith.mulf %579, %578 : vector<1x2048xf32>
    %581 = arith.addf %576, %580 : vector<1x2048xf32>
    %c97 = arith.constant 97 : index
    %582 = memref.load %arg7[%c97] : memref<98xf32, #tpu.memory_space<smem>>
    %c1_263 = arith.constant 1 : index
    %c899_264 = arith.constant 899 : index
    %583 = vector.load %arg12[%c1_263, %c899_264] : memref<8x3072xf32, #tpu.memory_space<vmem>>, vector<1x2048xf32>
    %584 = vector.broadcast %582 : f32 to vector<1x2048xf32>
    %585 = arith.mulf %584, %583 : vector<1x2048xf32>
    %586 = arith.addf %581, %585 : vector<1x2048xf32>
    %c0_265 = arith.constant 0 : index
    %587 = memref.load %arg8[%c0_265] : memref<1xf32, #tpu.memory_space<smem>>
    %588 = vector.broadcast %587 : f32 to vector<1x2048xf32>
    %589 = arith.addf %586, %588 : vector<1x2048xf32>
    %590 = arith.negf %589 : vector<1x2048xf32>
    %591 = math.exp %590 : vector<1x2048xf32>
    %cst_266 = arith.constant 1.000000e+00 : f32
    %592 = vector.broadcast %cst_266 : f32 to vector<1x2048xf32>
    %593 = arith.addf %592, %591 : vector<1x2048xf32>
    %594 = arith.divf %592, %593 : vector<1x2048xf32>
    %595 = vector.broadcast %594 : vector<1x2048xf32> to vector<16x2048xf32>
    %596 = arith.mulf %80, %595 : vector<16x2048xf32>
    %c0_267 = arith.constant 0 : index
    %c0_268 = arith.constant 0 : index
    %c512_269 = arith.constant 512 : index
    %597 = vector.load %arg1[%c0_267, %c0_268, %c512_269] : memref<1x16x3072xf32, #tpu.memory_space<vmem>>, vector<1x16x2048xf32>
    %598 = vector.shape_cast %597 : vector<1x16x2048xf32> to vector<16x2048xf32>
    %599 = arith.addf %596, %598 : vector<16x2048xf32>
    %c0_270 = arith.constant 0 : index
    %c0_271 = arith.constant 0 : index
    %c0_272 = arith.constant 0 : index
    %600 = vector.load %arg9[%c0_270, %c0_271, %c0_272] : memref<1x16x2048xf32, #tpu.memory_space<vmem>>, vector<1x16x2048xf32>
    %601 = vector.shape_cast %600 : vector<1x16x2048xf32> to vector<16x2048xf32>
    %602 = vector.shape_cast %599 : vector<16x2048xf32> to vector<1x16x2048xf32>
    tpu.vector_store %arg9[%c0_270, %c0_271, %c0_272], %602 {strides = array<i32>} : memref<1x16x2048xf32, #tpu.memory_space<vmem>>, vector<1x16x2048xf32>,
    return
  }
  func.func @transform_0(%arg0: i32) -> (i32, i32, i32) {
    %c0_i32 = arith.constant 0 : i32
    %c0_i32_0 = arith.constant 0 : i32
    %c0_i32_1 = arith.constant 0 : i32
    return %arg0, %c0_i32, %c0_i32_0 : i32, i32, i32
  }
  func.func @transform_1(%arg0: i32) -> (i32, i32) {
    %c0_i32 = arith.constant 0 : i32
    %c0_i32_0 = arith.constant 0 : i32
    %c0_i32_1 = arith.constant 0 : i32
    return %c0_i32, %c0_i32_0 : i32, i32
  }
  func.func @transform_2(%arg0: i32) -> (i32, i32) {
    %c0_i32 = arith.constant 0 : i32
    %c0_i32_0 = arith.constant 0 : i32
    %c0_i32_1 = arith.constant 0 : i32
    return %c0_i32, %c0_i32_0 : i32, i32
  }
  func.func @transform_3(%arg0: i32) -> (i32, i32) {
    %c0_i32 = arith.constant 0 : i32
    %c0_i32_0 = arith.constant 0 : i32
    %c0_i32_1 = arith.constant 0 : i32
    return %c0_i32, %c0_i32_0 : i32, i32
  }
  func.func @transform_4(%arg0: i32) -> (i32, i32) {
    %c0_i32 = arith.constant 0 : i32
    %c0_i32_0 = arith.constant 0 : i32
    %c0_i32_1 = arith.constant 0 : i32
    return %c0_i32, %c0_i32_0 : i32, i32
  }
  func.func @transform_5(%arg0: i32) -> (i32, i32) {
    %c0_i32 = arith.constant 0 : i32
    %c0_i32_0 = arith.constant 0 : i32
    %c0_i32_1 = arith.constant 0 : i32
    return %c0_i32, %c0_i32_0 : i32, i32
  }
  func.func @transform_6(%arg0: i32) -> i32 {
    %c0_i32 = arith.constant 0 : i32
    %c0_i32_0 = arith.constant 0 : i32
    return %c0_i32 : i32
  }
  func.func @transform_7(%arg0: i32) -> i32 {
    %c0_i32 = arith.constant 0 : i32
    %c0_i32_0 = arith.constant 0 : i32
    return %c0_i32 : i32
  }
  func.func @transform_8(%arg0: i32) -> (i32, i32, i32) {
    %c0_i32 = arith.constant 0 : i32
    %c0_i32_0 = arith.constant 0 : i32
    %c0_i32_1 = arith.constant 0 : i32
    return %arg0, %c0_i32, %c0_i32_0 : i32, i32, i32
  }
}

</mosaic_0001>

<bundles_post_ra>
// kernel: tpu_custom_call.1
= control target key start
LH: loop header
LB: loop body
LE: loop exit
PB: predicated region body
PF: predicated region fallthrough
CT: control target
= control target key end

     0   :  { %s11857_s0 = inlined_call_operand.hbm [shape: f32[2,16,3072], index: 0, kind: input, shape index: {}]   ;;  %s11858_s1 = inlined_call_operand.vmem [shape: f32[1,2048], index: 1, kind: input, shape index: {}]   ;;  %s11859_s2 = inlined_call_operand.vmem [shape: bf16[16,144], index: 2, kind: input, shape index: {}]   ;;  %s11860_s3 = inlined_call_operand.vmem [shape: f32[16,1], index: 3, kind: input, shape index: {}]   ;;  %s11861_s4 = inlined_call_operand.vmem [shape: bf16[16,144], index: 4, kind: input, shape index: {}]   ;;  %s11862_s5 = inlined_call_operand.vmem [shape: f32[16,1], index: 5, kind: input, shape index: {}]   ;;  %s11863_s6 = inlined_call_operand.vmem [shape: f32[98], index: 6, kind: input, shape index: {}]   ;;  %s11864_s7 = inlined_call_operand.<no memory space> [shape: f32[1], index: 7, kind: input, shape index: {}]   ;;  %s11865_s8 = inlined_call_operand.hbm [shape: f32[2,16,2048], index: 8, kind: output, shape index: {}]  }
   0x1   :  { %12169 = sst [smem:[#allocation262_spill]] %s11857_s0 }
   0x2   :  { %12170 = sst [smem:[#allocation263_spill]] %s11858_s1 }
   0x3   :  { %12171 = sst [smem:[#allocation264_spill]] %s11859_s2 }
   0x4   :  { %12172 = sst [smem:[#allocation265_spill]] %s11860_s3 }
   0x5   :  { %12173 = sst [smem:[#allocation266_spill]] %s11861_s4 }
   0x6   :  { %12174 = sst [smem:[#allocation267_spill]] %s11862_s5 }
   0x7   :  { %12175 = sst [smem:[#allocation268_spill]] %s11863_s6 }
   0x8   :  { %12176 = sst [smem:[#allocation269_spill]] %s11865_s8 }
   0x9   :  { %13 = sst [smem:[#allocation5]] %s11864_s7 }
   0xa   :  { %14 = vsyncpa [#allocation7], 0 }
   0xb   :  { %16 = vsyncpa [#allocation7 + $0x1], 0 }
   0xc   :  { %17 = vsyncpa [#allocation9], 0 }
   0xd   :  { %18 = vsyncpa [#allocation8], 0 }
   0xe   :  { %20 = vsyncpa [#allocation8 + $0x1], 0  ;;  %s7328_s29 = smov 0   ;;  %s7330_s30 = smov 0  }
   0xf   :  { %s7332_s9 = smov 0   ;;  %s7334_s10 = smov 0  }
  0x10 LB: > { %12177 = sst [smem:[#allocation15_spill]] %s7248_s29  ;;  %s7349_s7 = sadd.s32 4294967295, %s7260_s10   ;;  %s7260_s10 = sphi %s7334_s10, %s12892_s10   ;;  %s7256_s9 = sphi %s7332_s9, %s12895_s9   ;;  %s7252_s30 = sphi %s7330_s30, %s12894_s30   ;;  %s7248_s29 = sphi %s7328_s29, %s12893_s29  }
  0x11   : > { %12178 = sst [smem:[#allocation16_spill]] %s7252_s30  ;;  %s6897_s11 = sadd.s32 4294967294, %s7260_s10  }
  0x12   : > { %12179 = sst [smem:[#allocation17_spill]] %s7256_s9  ;;  %s7353_s12 = sadd.s32 1, %s7260_s10  }
  0x13   : > { %12180 = sst [smem:[#allocation18_spill]] %s7260_s10  ;;  %s33_s13 = sadd.s32 1, %s7256_s9 }
  0x14   : > { %12181 = sst [smem:[#allocation19_spill]] %s7353_s12  ;;  %s30_s14 = ssub.s32 %s7260_s10, %s7353_s12 }
  0x15   : > { %p40_p0 = scmp.ne.s32.totalorder %s7256_s9, %s7252_s30  ;;  %p31_p1 = scmp.eq.s32.totalorder %s30_s14, 0 }
  0x16   : > { %p41_p2 = scmp.eq.s32.totalorder %s7260_s10, 0  ;;  %p46_p3 = scmp.ne.s32.totalorder %s7252_s30, %s7248_s29 }
  0x17   : > { %p11867_p4 = scmp.eq.s32.totalorder %s7349_s7, 0  ;;  %p217_p7 = scmp.eq.s32.totalorder %s7349_s7, 1 }
  0x18   : > { %s7365_s15 = scalar_select %p31_p1, %s7256_s9, %s33_s13  }
  0x19   : > { %p7367_p5 = por %p41_p2, %p40_p0  ;;  %p7373_p6 = por %p11867_p4, %p46_p3 }
  0x1a   : > { %12182 = sst [smem:[#allocation20_spill]] %s7365_s15  ;;  %p223_p8 = scmp.eq.s32.totalorder %s6897_s11, 1 }
  0x1b   : > { %s12184_s17 = scalar_select %p7373_p6, 1, 0 }
  0x1c   : > { %p6898_p9 = scmp.ge.s32.totalorder %s7260_s10, 1  ;;  %p230_p10 = scmp.lt.s32.totalorder %s7260_s10, 3 }
  0x1d   : > { %p7380_p11 = por %p217_p7, %p40_p0  ;;  %p7384_p12 = por %p223_p8, %p46_p3 }
  0x1e   : > { %p7388_p13 = pnand %p6898_p9, %p230_p10  ;;  %s12189_s6 = sld [smem:[#allocation268_spill]] }
  0x1f   : > { %s12185_s18 = scalar_select %p7380_p11, 1, 0 }
  0x20   : > { %s12186_s19 = scalar_select %p7384_p12, 1, 0 }
  0x21   : > { %p7042_p1 = pneg %p7388_p13  ;;  %p7055_p2 = scmp.lt.s32.totalorder %s7260_s10, 2 }
  0x22   : > { %12187 = sst [smem:[#allocation21_spill]] %s12186_s19  ;;  %s272_s25 = sand.u32 1, %s7256_s9  }
  0x23   : > { %p7401_p7 = pnand %p7042_p1, %p11867_p4  ;;  %p7408_p3 = pnand %p7055_p2, %p7367_p5 }
  0x24   : > { %s258_s23 = sshll.u32 %s12189_s6, 4  ;;  %s7031_s27 = smul.u32 384, %s272_s25  ;;  %s259_s23 = int_to_ptr.vmem [resolvable:$true] %s258_s23 }
  0x25   : > { %s7145_s28 = scalar_lea.vmem %s259_s23, 16  ;;  %p7147_p9 = pneg %p7401_p7 }
  0x26   : > { %p7146_p8 = scmp.ne.s32.totalorder %s259_s23, %s7145_s28  ;;  %p7153_p12 = scmp.lt.s32.totalorder %s259_s23, %s259_s23 }
  0x27   : > { %p7154_p11 = scmp.lt.s32.totalorder %s7145_s28, %s7145_s28 }
  0x28   : > { %p7148_p10 = pnand %p7147_p9, %p7146_p8 }
  0x29   : > { %p7155_p1 = por %p7154_p11, %p7153_p12 }
  0x2a   : > { %p7149_p0 = pneg %p7148_p10 }
  0x2c   : > { %p7156_p4 = pnand %p7155_p1, %p7149_p0 }
  0x2e   : > { %7159 = shalt.err (!%p7156_p4)
}
  0x2f   : > { %s7262_s11 = smov [#allocation10]   ;;  %s7032_s13 = smul.u32 6144, %s7260_s10 }
  0x30   : > { %7045 = dma.vmem_to_smem (!%p7401_p7), %s259_s23, 16, %s7262_s11, [#allocation9]  }
  0x31   : > { %s276_s14 = scalar_lea.vmem [#allocation6], %s7031_s27  ;;  %s12192_s0 = sld [smem:[#allocation262_spill]] }
  0x32   : > { %s283_s16 = sshll.u32 %s276_s14, 4  ;;  %s7424_s28 = scalar_lea.sflag [#allocation7], %s272_s25  ;;  %s7417_s16 = int_to_ptr.vmem [resolvable:$true] %s283_s16 }
  0x33   : > { %p7162_p5 = pneg %p7408_p3 }
  0x37   : > { %s7422_s6 = scalar_lea.hbm %s12192_s0, %s7032_s13  ;;  %s7165_s11 = scalar_lea.hbm %s12192_s0, 12288 }
  0x38   : > { %s7160_s24 = scalar_lea.hbm %s7422_s6, 6144  ;;  %p7166_p0 = scmp.lt.u32.totalorder %s7422_s6, %s12192_s0 }
  0x39   : > { %p7161_p4 = scmp.ne.s32.totalorder %s7422_s6, %s7160_s24  ;;  %p7167_p2 = scmp.lt.u32.totalorder %s7165_s11, %s7160_s24 }
  0x3a   : > { %p7169_p8 = scmp.lt.u32.totalorder %s7160_s24, %s7422_s6 }
  0x3b   : > { %p7163_p11 = pnand %p7162_p5, %p7161_p4  ;;  %p7168_p7 = por %p7167_p2, %p7166_p0 }
  0x3d   : > { %p7164_p12 = pneg %p7163_p11  ;;  %p7170_p9 = por %p7169_p8, %p7168_p7 }
  0x3f   : > { %p7171_p10 = pnand %p7170_p9, %p7164_p12 }
  0x41   : > { %7174 = shalt.err (!%p7171_p10)
}
  0x42   : > { %s7175_s25 = scalar_lea.vmem %s7417_s16, 6144  ;;  %s7263_s21 = smov [#allocation6]  }
  0x43   : > { %p7176_p1 = scmp.ne.s32.totalorder %s7417_s16, %s7175_s25  ;;  %s7180_s22 = sshll.u32 %s7263_s21, 4  ;;  %s7181_s22 = int_to_ptr.vmem [resolvable:$false] %s7180_s22 }
  0x44   : > { %s7182_s23 = scalar_lea.vmem %s7181_s22, 12288  ;;  %p7183_p6 = scmp.lt.s32.totalorder %s7417_s16, %s7181_s22 }
  0x45   : > { %p7178_p4 = pnand %p7176_p1, %p7162_p5  ;;  %p7184_p0 = scmp.lt.s32.totalorder %s7182_s23, %s7175_s25 }
  0x47   : > { %p7179_p11 = pneg %p7178_p4  ;;  %p7185_p2 = por %p7184_p0, %p7183_p6 }
  0x49   : > { %p7186_p7 = pnand %p7185_p2, %p7179_p11 }
  0x4b   : > { %7189 = shalt.err (!%p7186_p7)
}
  0x4c   : > { %s7264_s24 = smov 3072   ;;  %s7265_s27 = smov 192  }
  0x4d   : > { %7049 = dma.hbm_to_vmem [thread:$0]  (!%p7408_p3), %s7422_s6, 6144, %s7417_s16, %s7424_s28, %s7264_s24, %s7264_s24, %s7265_s27  }
  0x4e   : > { %295 = sbr.rel (%p7388_p13) target bundleno = 1766 (0x6e6), region = 52 }
  0x55   : > { %s7455_s11 = sand.u32 1, %s7252_s30   ;;  %p12193_p6 = scmp.ne.s32.totalorder %s12184_s17, 0 }
  0x56   : > { %s7033_s13 = smul.u32 384, %s7455_s11  ;;  %s298_s14 = scalar_lea.sflag [#allocation7], %s7455_s11 }
  0x58   : > { %s7459_s25 = scalar_lea.vmem [#allocation6], %s7033_s13 }
  0x59   : > { %7235 = dma.done.wait (%p12193_p6), %s298_s14, 6144  }
  0x5a   : > { %7237 = vsyncadd (%p12193_p6), %s298_s14, 4294961152  ;;  %p12194_p3 = scmp.eq.s32.totalorder %s7349_s7, 0 }
  0x5c   : > { %7239 = dma.done.wait (%p12194_p3), [#allocation9], 16   ;;  %p12195_p13 = pmov %p12194_p3 }
  0x5e   : > { %7241 = vsyncadd (%p12195_p13), [#allocation9], 4294967280 }
  0x5f   : > { %310 = sfence }
  0x60   : > { %v359_v0 = vld [vmem:[%s7459_s25 + $0x18] sm:$0xff]  ;;  %v358_v2 = vld [vmem:[%s7459_s25 + $0x10] sm:$0xff]  ;;  %v360_v5 = vld [vmem:[%s7459_s25 + $0x20] sm:$0xff]  ;;  %s7266_s6 = smov 1   ;;  %s11939_s17 = smov 127   ;;  %vm1619_vm0 = vcmask 130048  }
  0x61   : > { %v376_v1 = vld [vmem:[%s7459_s25 + $0xd8] sm:$0xff]  ;;  %v375_v4 = vld [vmem:[%s7459_s25 + $0xd0] sm:$0xff]  ;;  %v377_v6 = vld [vmem:[%s7459_s25 + $0xe0] sm:$0xff]  ;;  %s12196_s2 = sld [smem:[#allocation264_spill]]  ;;  %vm460_vm1 = vcmask 7168   ;;  %vm675_vm2 = vcmask 1039360  }
  0x62   : > { %v7472_v3 = vpack.c.bf16 %v376_v1, %v359_v0  ;;  %v392_v7 = vpack.c.bf16 %v375_v4, %v358_v2  ;;  %v7479_v8 = vpack.c.bf16 %v377_v6, %v360_v5  ;;  %v575_v9 = vld [vmem:[%s7459_s25 + $0x28] sm:$0xff]  ;;  %v362_v12 = vld [vmem:[%s7459_s25 + $0x30] sm:$0xff]  ;;  %v577_v15 = vld [vmem:[%s7459_s25 + $0x38] sm:$0xff]  ;;  %v11869_v49 = vmov 0   ;;  %s12197_s3 = sld [smem:[#allocation265_spill]]  ;;  %s12199_s1 = sld [smem:[#allocation263_spill]] }
  0x63   : > { %v592_v10 = vld [vmem:[%s7459_s25 + $0xe8] sm:$0xff]  ;;  %v379_v13 = vld [vmem:[%s7459_s25 + $0xf0] sm:$0xff]  ;;  %v594_v16 = vld [vmem:[%s7459_s25 + $0xf8] sm:$0xff]  ;;  %7107 = vset.pattern.permute.xlu1 %v11869_v49  ;;  %7106 = vset.pattern.permute.xlu0 %v11869_v49  ;;  %s12205_s4 = sld [smem:[#allocation266_spill]]  ;;  %s12209_s5 = sld [smem:[#allocation267_spill]]  ;;  %vm4170_vm4 = vcmask 1022976  }
  0x64   : > { %428 = vrot.lane.b32.xlu0 %v7472_v3, %s7266_s6  ;;  %426 = vrot.lane.b32.xlu1 %v392_v7, %s7266_s6  ;;  %v7486_v11 = vpack.c.bf16 %v592_v10, %v575_v9  ;;  %v7502_v14 = vpack.c.bf16 %v379_v13, %v362_v12  ;;  %v7516_v17 = vpack.c.bf16 %v594_v16, %v577_v15  ;;  %v364_v19 = vld [vmem:[%s7459_s25 + $0x40] sm:$0xff]  ;;  %v579_v22 = vld [vmem:[%s7459_s25 + $0x48] sm:$0xff]  ;;  %s6974_s27 = sld [smem:[#allocation10 + $0x19]]  ;;  %s6975_s13 = sld [smem:[#allocation10 + $0x4a]]  ;;  %vm4234_vm5 = vcmask 1014784  }
  0x65   : > { %v381_v20 = vld [vmem:[%s7459_s25 + $0x100] sm:$0xff]  ;;  %v596_v23 = vld [vmem:[%s7459_s25 + $0x108] sm:$0xff]  ;;  %v366_v25 = vld [vmem:[%s7459_s25 + $0x50] sm:$0xff]  ;;  %s6976_s14 = sld [smem:[#allocation10 + $0x1a]]  ;;  %s6977_s20 = sld [smem:[#allocation10 + $0x4b]]  ;;  %vm4295_vm6 = vcmask 1006592  }
  0x66   : > { %v7549_v21 = vpack.c.bf16 %v381_v20, %v364_v19  ;;  %v7565_v24 = vpack.c.bf16 %v596_v23, %v579_v22  ;;  %v383_v26 = vld [vmem:[%s7459_s25 + $0x110] sm:$0xff]  ;;  %v581_v28 = vld [vmem:[%s7459_s25 + $0x58] sm:$0xff]  ;;  %v368_v31 = vld [vmem:[%s7459_s25 + $0x60] sm:$0xff]  ;;  %s6978_s26 = sld [smem:[#allocation10 + $0x1b]]  ;;  %s11945_s16 = smov 124   ;;  %vm4348_vm7 = vcmask 998400  }
  0x67   : > { %v7529_v18 = vld [vmem:[%s12196_s2 + $0x4] ss:$8 sps:$4 sm:$0xff]   ;;  %v7581_v27 = vpack.c.bf16 %v383_v26, %v366_v25  ;;  %v598_v29 = vld [vmem:[%s7459_s25 + $0x118] sm:$0xff]  ;;  %v370_v38 = vld [vmem:[%s7459_s25 + $0x70] sm:$0xff]  ;;  %s6979_s28 = sld [smem:[#allocation10 + $0x4c]]  ;;  %s6982_s21 = sld [smem:[#allocation10 + $0x1d]] }
  0x68   : > { %430 = vrot.lane.b32.xlu0 %v7479_v8, %s7266_s6  ;;  %643 = vrot.lane.b32.xlu1 %v7479_v8, %s11939_s17  ;;  %v7593_v30 = vpack.c.bf16 %v598_v29, %v581_v28  ;;  %v385_v32 = vld [vmem:[%s7459_s25 + $0x120] sm:$0xff]  ;;  %v583_v34 = vld [vmem:[%s7459_s25 + $0x68] sm:$0xff]  ;;  %s6983_s22 = sld [smem:[#allocation10 + $0x4e]]  ;;  %s11941_s24 = smov 122   ;;  %vm4056_vm8 = vcmask 1046528   ;;  %vm4113_vm9 = vcmask 1031168  }
  0x69   : > { %6907 = vmatprep.mubr.msk.bf16.mxu0 %vm1619_vm0, %v7529_v18  ;;  %6908 = vmatprep.mubr.msk.bf16.mxu1 %vm1619_vm0, %v7529_v18  ;;  %v7613_v33 = vpack.c.bf16 %v385_v32, %v368_v31  ;;  %v600_v35 = vld [vmem:[%s7459_s25 + $0x128] sm:$0xff]  ;;  %v387_v39 = vld [vmem:[%s7459_s25 + $0x130] sm:$0xff]  ;;  %v585_v47 = vld [vmem:[%s7459_s25 + $0x78] sm:$0xff]  ;;  %s6984_s23 = sld [smem:[#allocation10 + $0x1e]]  ;;  %s9031_s0 = sld [smem:[#allocation10 + $0x3d]]  ;;  %vm4172_vm10 = vcmask 1040384  }
  0x6a   : > { %v7629_v36 = vpack.c.bf16 %v600_v35, %v583_v34  ;;  %v7645_v41 = vpack.c.bf16 %v387_v39, %v370_v38  ;;  %v602_v48 = vld [vmem:[%s7459_s25 + $0x138] sm:$0xff]  ;;  %v372_v1 = vld [vmem:[%s7459_s25 + $0x80] sm:$0xff]  ;;  %v587_v19 = vld [vmem:[%s7459_s25 + $0x88] sm:$0xff]  ;;  %s9052_s15 = sld [smem:[#allocation10 + $0x43]]  ;;  %s9065_s9 = sld [smem:[#allocation10 + $0x6]]  ;;  %vm6637_vm11 = vcmask 23552  }
  0x6b   : > { %v7664_v52 = vpack.c.bf16 %v602_v48, %v585_v47  ;;  %v389_v2 = vld [vmem:[%s7459_s25 + $0x140] sm:$0xff]  ;;  %v604_v20 = vld [vmem:[%s7459_s25 + $0x148] sm:$0xff]  ;;  %v374_v39 = vld [vmem:[%s7459_s25 + $0x90] sm:$0xff]  ;;  %s9067_s30 = sld [smem:[#allocation10 + $0x8]]  ;;  %s9071_s12 = sld [smem:[#allocation10 + $0x44]] }
  0x6c   : > { %645 = vrot.lane.b32.xlu0 %v7486_v11, %s11939_s17  ;;  %641 = vrot.lane.b32.xlu1 %v7472_v3, %s11939_s17  ;;  %v7703_v6 = vpack.c.bf16 %v389_v2, %v372_v1  ;;  %v7730_v25 = vpack.c.bf16 %v604_v20, %v587_v19  ;;  %s9087_s10 = sld [smem:[#allocation10 + $0xa]]  ;;  %s9089_s19 = sld [smem:[#allocation10 + $0xb]] }
  0x6d   : > { %s9103_s29 = sld [smem:[#allocation10 + $0xc]]  ;;  %s9105_s8 = sld [smem:[#allocation10 + $0x47]] }
  0x6e   : > { %p12886_p12 = scmp.ne.s32.totalorder %s12185_s18, 0 }
  0x70   : > { %794 = vrot.lane.b32.xlu0 %v7479_v8, %s7266_s6  ;;  %796 = vrot.lane.b32.xlu1 %v7486_v11, %s7266_s6 }
  0x74   : > { %792 = vrot.lane.b32.xlu0 %v7472_v3, %s7266_s6  ;;  %432 = vrot.lane.b32.xlu1 %v7486_v11, %s7266_s6 }
  0x78   : > { %434 = vrot.lane.b32.xlu0 %v7502_v14, %s7266_s6  ;;  %1008 = vrot.lane.b32.xlu1 %v7486_v11, %s11939_s17 }
  0x7c   : > { %1010 = vrot.lane.b32.xlu0 %v7502_v14, %s11939_s17  ;;  %1006 = vrot.lane.b32.xlu1 %v7479_v8, %s11939_s17 }
  0x80   : > { %647 = vrot.lane.b32.xlu0 %v7502_v14, %s11939_s17  ;;  %649 = vrot.lane.b32.xlu1 %v7516_v17, %s11939_s17 }
  0x84   : > { %1158 = vrot.lane.b32.xlu0 %v7486_v11, %s7266_s6  ;;  %1160 = vrot.lane.b32.xlu1 %v7502_v14, %s7266_s6 }
  0x88   : > { %1156 = vrot.lane.b32.xlu0 %v7479_v8, %s7266_s6  ;;  %798 = vrot.lane.b32.xlu1 %v7502_v14, %s7266_s6 }
  0x8c   : > { %800 = vrot.lane.b32.xlu0 %v7516_v17, %s7266_s6  ;;  %1372 = vrot.lane.b32.xlu1 %v7502_v14, %s11939_s17 }
  0x90   : > { %1374 = vrot.lane.b32.xlu0 %v7516_v17, %s11939_s17  ;;  %1370 = vrot.lane.b32.xlu1 %v7486_v11, %s11939_s17 }
  0x94   : > { %436 = vrot.lane.b32.xlu0 %v7516_v17, %s7266_s6  ;;  %438 = vrot.lane.b32.xlu1 %v7549_v21, %s7266_s6 }
  0x98   : > { %1012 = vrot.lane.b32.xlu0 %v7516_v17, %s11939_s17  ;;  %1014 = vrot.lane.b32.xlu1 %v7549_v21, %s11939_s17 }
  0x9c   : > { %1162 = vrot.lane.b32.xlu0 %v7516_v17, %s7266_s6  ;;  %1164 = vrot.lane.b32.xlu1 %v7549_v21, %s7266_s6 }
  0xa0   : > { %651 = vrot.lane.b32.xlu0 %v7549_v21, %s11939_s17  ;;  %653 = vrot.lane.b32.xlu1 %v7565_v24, %s11939_s17 }
  0xa4   : > { %802 = vrot.lane.b32.xlu0 %v7549_v21, %s7266_s6  ;;  %804 = vrot.lane.b32.xlu1 %v7565_v24, %s7266_s6 }
  0xa8   : > { %1376 = vrot.lane.b32.xlu0 %v7549_v21, %s11939_s17  ;;  %1378 = vrot.lane.b32.xlu1 %v7565_v24, %s11939_s17 }
  0xac   : > { %440 = vrot.lane.b32.xlu0 %v7565_v24, %s7266_s6  ;;  %442 = vrot.lane.b32.xlu1 %v7581_v27, %s7266_s6 }
  0xb0   : > { %1016 = vrot.lane.b32.xlu0 %v7565_v24, %s11939_s17  ;;  %1018 = vrot.lane.b32.xlu1 %v7581_v27, %s11939_s17 }
  0xb4   : > { %655 = vrot.lane.b32.xlu0 %v7581_v27, %s11939_s17  ;;  %657 = vrot.lane.b32.xlu1 %v7593_v30, %s11939_s17 }
  0xb8   : > { %1166 = vrot.lane.b32.xlu0 %v7565_v24, %s7266_s6  ;;  %1168 = vrot.lane.b32.xlu1 %v7581_v27, %s7266_s6 }
  0xbc   : > { %806 = vrot.lane.b32.xlu0 %v7581_v27, %s7266_s6  ;;  %808 = vrot.lane.b32.xlu1 %v7593_v30, %s7266_s6 }
  0xc0   : > { %1380 = vrot.lane.b32.xlu0 %v7581_v27, %s11939_s17  ;;  %1382 = vrot.lane.b32.xlu1 %v7593_v30, %s11939_s17 }
  0xc4   : > { %444 = vrot.lane.b32.xlu0 %v7593_v30, %s7266_s6  ;;  %446 = vrot.lane.b32.xlu1 %v7613_v33, %s7266_s6 }
  0xc8   : > { %1020 = vrot.lane.b32.xlu0 %v7593_v30, %s11939_s17  ;;  %1022 = vrot.lane.b32.xlu1 %v7613_v33, %s11939_s17 }
  0xcc   : > { %1170 = vrot.lane.b32.xlu0 %v7593_v30, %s7266_s6  ;;  %1172 = vrot.lane.b32.xlu1 %v7613_v33, %s7266_s6 }
  0xd0   : > { %659 = vrot.lane.b32.xlu0 %v7613_v33, %s11939_s17  ;;  %661 = vrot.lane.b32.xlu1 %v7629_v36, %s11939_s17 }
  0xd4   : > { %810 = vrot.lane.b32.xlu0 %v7613_v33, %s7266_s6  ;;  %812 = vrot.lane.b32.xlu1 %v7629_v36, %s7266_s6 }
  0xd6   : > { %v429_v37 = vpop.permute.xlu0 %428  ;;  %v427_v40 = vpop.permute.xlu1 %426 }
  0xd7   : > { %v461_v45 = vsel %vm460_vm1, %v427_v40, %v429_v37  ;;  %v391_v40 = vld [vmem:[%s7459_s25 + $0x150] sm:$0xff] }
  0xd8   : > { %1384 = vrot.lane.b32.xlu0 %v7613_v33, %s11939_s17  ;;  %1386 = vrot.lane.b32.xlu1 %v7629_v36, %s11939_s17 }
  0xda   : > { %v431_v42 = vpop.permute.xlu0 %430  ;;  %v644_v43 = vpop.permute.xlu1 %643 }
  0xdb   : > { %v462_v44 = vsel %vm460_vm1, %v429_v37, %v431_v42 }
  0xdc   : > { %448 = vrot.lane.b32.xlu0 %v7629_v36, %s7266_s6  ;;  %1623 = vmatprep.subr.bf16.mxu0 %v462_v44 }
  0xdd   : > { %450 = vrot.lane.b32.xlu1 %v7645_v41, %s7266_s6  ;;  %1624 = vmatpush1.bf16.msra.mxu0 %v461_v45 }
  0xde   : > { %v646_v46 = vpop.permute.xlu0 %645  ;;  %1625 = vmatprep.subr.bf16.mxu0 %v7479_v8  ;;  %v642_v50 = vpop.permute.xlu1 %641 }
  0xdf   : > { %v677_v51 = vsel %vm675_vm2, %v644_v43, %v646_v46  ;;  %v676_v55 = vsel %vm675_vm2, %v642_v50, %v644_v43 }
  0xe0   : > { %1024 = vrot.lane.b32.xlu0 %v7629_v36, %s11939_s17 }
  0xe1   : > { %1026 = vrot.lane.b32.xlu1 %v7645_v41, %s11939_s17  ;;  %1626 = vmatpush1.bf16.msra.mxu0 %v7472_v3 }
  0xe2   : > { %v795_v53 = vpop.permute.xlu0 %794  ;;  %1627 = vmatprep.subr.bf16.mxu0 %v677_v51  ;;  %v7666_v54 = vpop.permute.xlu1 %796  ;;  %v589_v51 = vld [vmem:[%s7459_s25 + $0x98] sm:$0xff] }
  0xe3   : > { %v827_v56 = vsel %vm460_vm1, %v795_v53, %v7666_v54 }
  0xe4   : > { %663 = vrot.lane.b32.xlu0 %v7645_v41, %s11939_s17 }
  0xe5   : > { %665 = vrot.lane.b32.xlu1 %v7664_v52, %s11939_s17  ;;  %1628 = vmatpush1.bf16.msra.mxu0 %v676_v55 }
  0xe6   : > { %v793_v57 = vpop.permute.xlu0 %792  ;;  %1629 = vmatprep.subr.bf16.mxu0 %v827_v56  ;;  %v433_v58 = vpop.permute.xlu1 %432 }
  0xe7   : > { %v826_v59 = vsel %vm460_vm1, %v793_v57, %v795_v53  ;;  %v463_v63 = vsel %vm460_vm1, %v431_v42, %v433_v58  ;;  %v606_v53 = vld [vmem:[%s7459_s25 + $0x158] sm:$0xff] }
  0xe8   : > { %1174 = vrot.lane.b32.xlu0 %v7629_v36, %s7266_s6  ;;  %v7801_v57 = vpack.c.bf16 %v606_v53, %v589_v51 }
  0xe9   : > { %1176 = vrot.lane.b32.xlu1 %v7645_v41, %s7266_s6  ;;  %1630 = vmatpush1.bf16.msra.mxu0 %v826_v59 }
  0xea   : > { %v7680_v60 = vpop.permute.xlu0 %434  ;;  %1631 = vmatprep.subr.bf16.mxu0 %v7486_v11  ;;  %v1009_v61 = vpop.permute.xlu1 %1008 }
  0xeb   : > { %v464_v62 = vsel %vm460_vm1, %v433_v58, %v7680_v60 }
  0xec   : > { %814 = vrot.lane.b32.xlu0 %v7645_v41, %s7266_s6  ;;  %1666 = vmatprep.subr.bf16.mxu1 %v464_v62 }
  0xed   : > { %816 = vrot.lane.b32.xlu1 %v7664_v52, %s7266_s6  ;;  %1632 = vmatpush1.bf16.msra.mxu0 %v7479_v8 }
  0xee   : > { %1667 = vmatpush1.bf16.msra.mxu1 %v463_v63  ;;  %v7691_v0 = vpop.permute.xlu0 %1010  ;;  %v1007_v3 = vpop.permute.xlu1 %1006 }
  0xef   : > { %v1041_v4 = vsel %vm675_vm2, %v1009_v61, %v7691_v0  ;;  %1668 = vmatprep.subr.bf16.mxu1 %v7502_v14  ;;  %v1040_v5 = vsel %vm675_vm2, %v1007_v3, %v1009_v61 }
  0xf0   : > { %1388 = vrot.lane.b32.xlu0 %v7645_v41, %s11939_s17  ;;  %1633 = vmatprep.subr.bf16.mxu0 %v1041_v4 }
  0xf1   : > { %1390 = vrot.lane.b32.xlu1 %v7664_v52, %s11939_s17  ;;  %1634 = vmatpush1.bf16.msra.mxu0 %v1040_v5 }
  0xf2   : > { %1669 = vmatpush1.bf16.msra.mxu1 %v7486_v11  ;;  %v648_v7 = vpop.permute.xlu0 %647  ;;  %v7706_v8 = vpop.permute.xlu1 %649 }
  0xf3   : > { %v678_v9 = vsel %vm675_vm2, %v646_v46, %v648_v7  ;;  %v679_v10 = vsel %vm675_vm2, %v648_v7, %v7706_v8  ;;  %v954_v7 = vld [vmem:[%s7459_s25 + $0xa0] sm:$0xff] }
  0xf4   : > { %452 = vrot.lane.b32.xlu0 %v7664_v52, %s7266_s6  ;;  %1670 = vmatprep.subr.bf16.mxu1 %v679_v10 }
  0xf5   : > { %454 = vrot.lane.b32.xlu1 %v7703_v6, %s7266_s6 }
  0xf6   : > { %1671 = vmatpush1.bf16.msra.mxu1 %v678_v9  ;;  %v1159_v12 = vpop.permute.xlu0 %1158  ;;  %v7715_v13 = vpop.permute.xlu1 %1160 }
  0xf7   : > { %v1191_v15 = vsel %vm460_vm1, %v1159_v12, %v7715_v13 }
  0xf8   : > { %1028 = vrot.lane.b32.xlu0 %v7664_v52, %s11939_s17  ;;  %1635 = vmatprep.subr.bf16.mxu0 %v1191_v15 }
  0xf9   : > { %1030 = vrot.lane.b32.xlu1 %v7703_v6, %s11939_s17 }
  0xfa   : > { %v1157_v16 = vpop.permute.xlu0 %1156  ;;  %v799_v22 = vpop.permute.xlu1 %798 }
  0xfb   : > { %v1190_v23 = vsel %vm460_vm1, %v1157_v16, %v1159_v12  ;;  %v828_v31 = vsel %vm460_vm1, %v7666_v54, %v799_v22 }
  0xfc   : > { %1178 = vrot.lane.b32.xlu0 %v7664_v52, %s7266_s6  ;;  %1636 = vmatpush1.bf16.msra.mxu0 %v1190_v23  ;;  %v1335_v23 = vld [vmem:[%s7459_s25 + $0x168] sm:$0xff] }
  0xfd   : > { %1180 = vrot.lane.b32.xlu1 %v7703_v6, %s7266_s6  ;;  %1637 = vmatprep.subr.bf16.mxu0 %v7502_v14 }
  0xfe   : > { %v7733_v26 = vpop.permute.xlu0 %800  ;;  %v1373_v28 = vpop.permute.xlu1 %1372 }
  0xff   : > { %v829_v29 = vsel %vm460_vm1, %v799_v22, %v7733_v26  ;;  %v1318_v22 = vld [vmem:[%s7459_s25 + $0xa8] sm:$0xff] }
 0x100   : > { %667 = vrot.lane.b32.xlu0 %v7703_v6, %s11939_s17  ;;  %1672 = vmatprep.subr.bf16.mxu1 %v829_v29 }
 0x101   : > { %669 = vrot.lane.b32.xlu1 %v7730_v25, %s11939_s17  ;;  %1638 = vmatpush1.bf16.msra.mxu0 %v7486_v11  ;;  %v7755_v11 = vld [vmem:[%s12196_s2] ss:$8 sps:$4 sm:$0xff]   ;;  %s9039_s2 = sld [smem:[#allocation10 + $0x40]] }
 0x102   : > { %1673 = vmatpush1.bf16.msra.mxu1 %v828_v31  ;;  %v7744_v32 = vpop.permute.xlu0 %1374  ;;  %v1371_v34 = vpop.permute.xlu1 %1370  ;;  %v1352_v31 = vpack.c.bf16 %v1335_v23, %v1318_v22 }
 0x103   : > { %v1405_v35 = vsel %vm675_vm2, %v1373_v28, %v7744_v32  ;;  %1674 = vmatprep.subr.bf16.mxu1 %v7516_v17  ;;  %v1404_v37 = vsel %vm675_vm2, %v1371_v34, %v1373_v28 }
 0x104   : > { %818 = vrot.lane.b32.xlu0 %v7703_v6, %s7266_s6  ;;  %1639 = vmatprep.subr.bf16.mxu0 %v1405_v35 }
 0x105   : > { %820 = vrot.lane.b32.xlu1 %v7730_v25, %s7266_s6  ;;  %1640 = vmatpush1.bf16.msra.mxu0 %v1404_v37 }
 0x106   : > { %v437_v38 = vpop.permute.xlu0 %436  ;;  %1675 = vmatpush1.bf16.msra.mxu1 %v7502_v14  ;;  %v7762_v42 = vpop.permute.xlu1 %438  ;;  %v7773_v14 = vpack.c.bf16 %v391_v40, %v374_v39  ;;  %v1599_v40 = vld [vmem:[%s12197_s3 + $0x8] sm:$0xff] }
 0x107   : > { %v465_v43 = vsel %vm460_vm1, %v7680_v60, %v437_v38  ;;  %v466_v44 = vsel %vm460_vm1, %v437_v38, %v7762_v42  ;;  %v1598_v38 = vld [vmem:[%s12197_s3] sm:$0xff]  ;;  %s12254_s3 = smov 124  }
 0x108   : > { %1392 = vrot.lane.b32.xlu0 %v7703_v6, %s11939_s17  ;;  %1656 = vmatmul.mubr.bf16.vlgmr.msra.gmra.mrb[0].mxu0 %v7755_v11 }
 0x109   : > { %1394 = vrot.lane.b32.xlu1 %v7730_v25, %s11939_s17  ;;  %1709 = vmatprep.subr.bf16.mxu0 %v466_v44 }
 0x10a   : > { %1710 = vmatpush1.bf16.msra.mxu0 %v465_v43  ;;  %v1013_v45 = vpop.permute.xlu0 %1012  ;;  %6909 = vmatprep.mubr.msk.bf16.mxu0 %vm1619_vm0, %v7529_v18  ;;  %v7777_v46 = vpop.permute.xlu1 %1014 }
 0x10b   : > { %v1042_v47 = vsel %vm675_vm2, %v7691_v0, %v1013_v45  ;;  %1711 = vmatprep.subr.bf16.mxu0 %v7549_v21  ;;  %v1043_v48 = vsel %vm675_vm2, %v1013_v45, %v7777_v46 }
 0x10c   : > { %456 = vrot.lane.b32.xlu0 %v7730_v25, %s7266_s6  ;;  %1676 = vmatprep.subr.bf16.mxu1 %v1043_v48 }
 0x10d   : > { %458 = vrot.lane.b32.xlu1 %v7773_v14, %s7266_s6  ;;  %1677 = vmatpush1.bf16.msra.mxu1 %v1042_v47 }
 0x10e   : > { %v1163_v50 = vpop.permute.xlu0 %1162  ;;  %1712 = vmatpush1.bf16.msra.mxu0 %v7516_v17  ;;  %v7791_v54 = vpop.permute.xlu1 %1164 }
 0x10f   : > { %v1192_v55 = vsel %vm460_vm1, %v7715_v13, %v1163_v50  ;;  %v1193_v56 = vsel %vm460_vm1, %v1163_v50, %v7791_v54 }
 0x110   : > { %1032 = vrot.lane.b32.xlu0 %v7730_v25, %s11939_s17  ;;  %1678 = vmatprep.subr.bf16.mxu1 %v1193_v56 }
 0x111   : > { %1034 = vrot.lane.b32.xlu1 %v7773_v14, %s11939_s17  ;;  %1679 = vmatpush1.bf16.msra.mxu1 %v1192_v55 }
 0x112   : > { %v652_v58 = vpop.permute.xlu0 %651  ;;  %v654_v59 = vpop.permute.xlu1 %653  ;;  %1680 = vmatprep.subr.bf16.mxu1 %v7549_v21 }
 0x113   : > { %v680_v60 = vsel %vm675_vm2, %v7706_v8, %v652_v58  ;;  %v681_v61 = vsel %vm675_vm2, %v652_v58, %v654_v59  ;;  %v971_v8 = vld [vmem:[%s7459_s25 + $0x160] sm:$0xff] }
 0x114   : > { %671 = vrot.lane.b32.xlu0 %v7773_v14, %s11939_s17  ;;  %1713 = vmatprep.subr.bf16.mxu0 %v681_v61  ;;  %v1244_v61 = vld [vmem:[%s7459_s25 + $0x58] sm:$0xff] }
 0x115   : > { %673 = vrot.lane.b32.xlu1 %v7801_v57, %s11939_s17  ;;  %1714 = vmatpush1.bf16.msra.mxu0 %v680_v60 }
 0x116   : > { %v803_v62 = vpop.permute.xlu0 %802  ;;  %1681 = vmatpush1.bf16.msra.mxu1 %v7516_v17  ;;  %v7812_v63 = vpop.permute.xlu1 %804 }
 0x117   : > { %v830_v0 = vsel %vm460_vm1, %v7733_v26, %v803_v62  ;;  %v831_v1 = vsel %vm460_vm1, %v803_v62, %v7812_v63  ;;  %v1260_v62 = vld [vmem:[%s7459_s25 + $0x118] sm:$0xff] }
 0x118   : > { %1182 = vrot.lane.b32.xlu0 %v7730_v25, %s7266_s6  ;;  %1715 = vmatprep.subr.bf16.mxu0 %v831_v1  ;;  %v1276_v1 = vpack.c.bf16 %v1260_v62, %v1244_v61 }
 0x119   : > { %1184 = vrot.lane.b32.xlu1 %v7773_v14, %s7266_s6  ;;  %1716 = vmatpush1.bf16.msra.mxu0 %v830_v0 }
 0x11a   : > { %v1377_v2 = vpop.permute.xlu0 %1376  ;;  %v7822_v17 = vpop.permute.xlu1 %1378  ;;  %1717 = vmatprep.subr.bf16.mxu0 %v7565_v24 }
 0x11b   : > { %v1406_v3 = vsel %vm675_vm2, %v7744_v32, %v1377_v2  ;;  %v1407_v4 = vsel %vm675_vm2, %v1377_v2, %v7822_v17 }
 0x11c   : > { %822 = vrot.lane.b32.xlu0 %v7773_v14, %s7266_s6  ;;  %1682 = vmatprep.subr.bf16.mxu1 %v1407_v4 }
 0x11d   : > { %824 = vrot.lane.b32.xlu1 %v7801_v57, %s7266_s6  ;;  %1683 = vmatpush1.bf16.msra.mxu1 %v1406_v3 }
 0x11e   : > { %v441_v5 = vpop.permute.xlu0 %440  ;;  %1718 = vmatpush1.bf16.msra.mxu0 %v7549_v21  ;;  %v7836_v9 = vpop.permute.xlu1 %442  ;;  %v7847_v21 = vpack.c.bf16 %v971_v8, %v954_v7 }
 0x11f   : > { %v468_v10 = vsel %vm460_vm1, %v441_v5, %v7836_v9  ;;  %v467_v12 = vsel %vm460_vm1, %v7762_v42, %v441_v5 }
 0x120   : > { %1396 = vrot.lane.b32.xlu0 %v7773_v14, %s11939_s17  ;;  %1699 = vmatmul.mubr.bf16.vlgmr.msra.gmra.mrb[0].mxu1 %v7755_v11 }
 0x121   : > { %1398 = vrot.lane.b32.xlu1 %v7801_v57, %s11939_s17  ;;  %1752 = vmatprep.subr.bf16.mxu1 %v468_v10 }
 0x122   : > { %v1017_v13 = vpop.permute.xlu0 %1016  ;;  %6910 = vmatprep.mubr.msk.bf16.mxu1 %vm1619_vm0, %v7529_v18  ;;  %1753 = vmatpush1.bf16.msra.mxu1 %v467_v12  ;;  %v1019_v15 = vpop.permute.xlu1 %1018 }
 0x123   : > { %v1044_v16 = vsel %vm675_vm2, %v7777_v46, %v1017_v13  ;;  %v1045_v19 = vsel %vm675_vm2, %v1017_v13, %v1019_v15  ;;  %1754 = vmatprep.subr.bf16.mxu1 %v7581_v27 }
 0x124   : > { %1036 = vrot.lane.b32.xlu0 %v7801_v57, %s11939_s17  ;;  %1719 = vmatprep.subr.bf16.mxu0 %v1045_v19 }
 0x125   : > { %1038 = vrot.lane.b32.xlu1 %v7847_v21, %s11939_s17  ;;  %1720 = vmatpush1.bf16.msra.mxu0 %v1044_v16 }
 0x126   : > { %v656_v20 = vpop.permute.xlu0 %655  ;;  %1755 = vmatpush1.bf16.msra.mxu1 %v7565_v24  ;;  %v7862_v26 = vpop.permute.xlu1 %657 }
 0x127   : > { %v683_v28 = vsel %vm675_vm2, %v656_v20, %v7862_v26  ;;  %v682_v29 = vsel %vm675_vm2, %v654_v59, %v656_v20 }
 0x128   : > { %1186 = vrot.lane.b32.xlu0 %v7801_v57, %s7266_s6  ;;  %1756 = vmatprep.subr.bf16.mxu1 %v683_v28 }
 0x129   : > { %1188 = vrot.lane.b32.xlu1 %v7847_v21, %s7266_s6 }
 0x12a   : > { %v1167_v32 = vpop.permute.xlu0 %1166  ;;  %1757 = vmatpush1.bf16.msra.mxu1 %v682_v29  ;;  %v1169_v34 = vpop.permute.xlu1 %1168 }
 0x12b   : > { %v1194_v35 = vsel %vm460_vm1, %v7791_v54, %v1167_v32  ;;  %v1195_v37 = vsel %vm460_vm1, %v1167_v32, %v1169_v34 }
 0x12c   : > { %1400 = vrot.lane.b32.xlu0 %v7847_v21, %s11939_s17  ;;  %1721 = vmatprep.subr.bf16.mxu0 %v1195_v37  ;;  %v1246_v37 = vld [vmem:[%s7459_s25 + $0x68] sm:$0xff] }
 0x12d   : > { %1402 = vrot.lane.b32.xlu1 %v1352_v31, %s11939_s17  ;;  %1722 = vmatpush1.bf16.msra.mxu0 %v1194_v35 }
 0x12e   : > { %v807_v39 = vpop.permute.xlu0 %806  ;;  %v809_v42 = vpop.permute.xlu1 %808  ;;  %1723 = vmatprep.subr.bf16.mxu0 %v7581_v27 }
 0x12f   : > { %v832_v43 = vsel %vm460_vm1, %v7812_v63, %v807_v39  ;;  %v833_v44 = vsel %vm460_vm1, %v807_v39, %v809_v42 }
 0x130   : > { %1602 = vperm.xlu0 %7106, %v1598_v38   ;;  %1758 = vmatprep.subr.bf16.mxu1 %v833_v44  ;;  %v1262_v38 = vld [vmem:[%s7459_s25 + $0x128] sm:$0xff]  ;;  %v884_v44 = vld [vmem:[%s7459_s25 + $0x70] sm:$0xff] }
 0x131   : > { %1607 = vperm.xlu1 %7107, %v1599_v40   ;;  %1724 = vmatpush1.bf16.msra.mxu0 %v7565_v24  ;;  %v1278_v40 = vpack.c.bf16 %v1262_v38, %v1246_v37 }
 0x132   : > { %1759 = vmatpush1.bf16.msra.mxu1 %v832_v43  ;;  %v1381_v45 = vpop.permute.xlu0 %1380  ;;  %v1383_v46 = vpop.permute.xlu1 %1382 }
 0x133   : > { %v1408_v47 = vsel %vm675_vm2, %v7822_v17, %v1381_v45  ;;  %1760 = vmatprep.subr.bf16.mxu1 %v7593_v30  ;;  %v1409_v48 = vsel %vm675_vm2, %v1381_v45, %v1383_v46  ;;  %v900_v45 = vld [vmem:[%s7459_s25 + $0x130] sm:$0xff] }
 0x134   : > { %2443 = vrot.lane.b32.xlu0 %v11869_v49, %s7266_s6  ;;  %1725 = vmatprep.subr.bf16.mxu0 %v1409_v48  ;;  %v916_v48 = vpack.c.bf16 %v900_v45, %v884_v44 }
 0x135   : > { %1726 = vmatpush1.bf16.msra.mxu0 %v1408_v47  ;;  %7109 = vrot.lane.b32.xlu1 %v11869_v49, %s7266_s6 }
 0x136   : > { %v445_v50 = vpop.permute.xlu0 %444  ;;  %1761 = vmatpush1.bf16.msra.mxu1 %v7581_v27  ;;  %v447_v51 = vpop.permute.xlu1 %446 }
 0x137   : > { %v469_v24 = vsel %vm460_vm1, %v7836_v9, %v445_v50  ;;  %v470_v53 = vsel %vm460_vm1, %v445_v50, %v447_v51 }
 0x138   : > { %1742 = vmatmul.mubr.bf16.vlgmr.msra.gmra.mrb[4].mxu0 %v7755_v11  ;;  %1795 = vmatprep.subr.bf16.mxu0 %v470_v53 }
 0x139   : > { %1796 = vmatpush1.bf16.msra.mxu0 %v469_v24  ;;  %6911 = vmatprep.mubr.msk.bf16.mxu0 %vm1619_vm0, %v7529_v18 }
 0x13a   : > { %v1021_v54 = vpop.permute.xlu0 %1020  ;;  %v1023_v55 = vpop.permute.xlu1 %1022  ;;  %1797 = vmatprep.subr.bf16.mxu0 %v7613_v33  ;;  %2327 = vrot.lane.b32.xlu1 %v11869_v49, %s11939_s17 }
 0x13b   : > { %v1046_v56 = vsel %vm675_vm2, %v1019_v15, %v1021_v54  ;;  %v1047_v27 = vsel %vm675_vm2, %v1021_v54, %v1023_v55 }
 0x13c   : > { %1762 = vmatprep.subr.bf16.mxu1 %v1047_v27 }
 0x13d   : > { %1763 = vmatpush1.bf16.msra.mxu1 %v1046_v56  ;;  %1798 = vmatpush1.bf16.msra.mxu0 %v7593_v30 }
 0x13e   : > { %v1171_v58 = vpop.permute.xlu0 %1170  ;;  %v1173_v59 = vpop.permute.xlu1 %1172 }
 0x13f   : > { %v1196_v60 = vsel %vm460_vm1, %v1169_v34, %v1171_v58  ;;  %v1197_v63 = vsel %vm460_vm1, %v1171_v58, %v1173_v59 }
 0x140   : > { %1764 = vmatprep.subr.bf16.mxu1 %v1197_v63  ;;  %v1248_v63 = vld [vmem:[%s7459_s25 + $0x78] sm:$0xff] }
 0x141   : > { %1765 = vmatpush1.bf16.msra.mxu1 %v1196_v60 }
 0x142   : > { %v660_v0 = vpop.permute.xlu0 %659  ;;  %v662_v2 = vpop.permute.xlu1 %661  ;;  %1766 = vmatprep.subr.bf16.mxu1 %v7613_v33 }
 0x143   : > { %v684_v17 = vsel %vm675_vm2, %v7862_v26, %v660_v0  ;;  %v685_v3 = vsel %vm675_vm2, %v660_v0, %v662_v2  ;;  %v1264_v0 = vld [vmem:[%s7459_s25 + $0x138] sm:$0xff] }
 0x144   : > { %1799 = vmatprep.subr.bf16.mxu0 %v685_v3 }
 0x145   : > { %1800 = vmatpush1.bf16.msra.mxu0 %v684_v17  ;;  %1767 = vmatpush1.bf16.msra.mxu1 %v1276_v1  ;;  %v1280_v17 = vpack.c.bf16 %v1264_v0, %v1248_v63 }
 0x146   : > { %v811_v30 = vpop.permute.xlu0 %810  ;;  %v813_v4 = vpop.permute.xlu1 %812 }
 0x147   : > { %v834_v5 = vsel %vm460_vm1, %v809_v42, %v811_v30  ;;  %v835_v7 = vsel %vm460_vm1, %v811_v30, %v813_v4 }
 0x148   : > { %1801 = vmatprep.subr.bf16.mxu0 %v835_v7 }
 0x149   : > { %1802 = vmatpush1.bf16.msra.mxu0 %v834_v5 }
 0x14a   : > { %v1385_v8 = vpop.permute.xlu0 %1384  ;;  %v1387_v9 = vpop.permute.xlu1 %1386  ;;  %1803 = vmatprep.subr.bf16.mxu0 %v7629_v36 }
 0x14b   : > { %v1410_v10 = vsel %vm675_vm2, %v1383_v46, %v1385_v8  ;;  %v1411_v12 = vsel %vm675_vm2, %v1385_v8, %v1387_v9 }
 0x14c   : > { %1768 = vmatprep.subr.bf16.mxu1 %v1411_v12 }
 0x14d   : > { %1769 = vmatpush1.bf16.msra.mxu1 %v1410_v10  ;;  %1804 = vmatpush1.bf16.msra.mxu0 %v7613_v33 }
 0x14e   : > { %v449_v13 = vpop.permute.xlu0 %448 }
 0x14f   : > { %v451_v15 = vpop.permute.xlu1 %450  ;;  %v471_v16 = vsel %vm460_vm1, %v447_v51, %v449_v13 }
 0x150   : > { %v472_v19 = vsel %vm460_vm1, %v449_v13, %v451_v15  ;;  %1785 = vmatmul.mubr.bf16.vlgmr.msra.gmra.mrb[4].mxu1 %v7755_v11 }
 0x151   : > { %1838 = vmatprep.subr.bf16.mxu1 %v472_v19  ;;  %6912 = vmatprep.mubr.msk.bf16.mxu1 %vm1619_vm0, %v7529_v18 }
 0x152   : > { %1839 = vmatpush1.bf16.msra.mxu1 %v471_v16  ;;  %v1025_v20 = vpop.permute.xlu0 %1024 }
 0x153   : > { %v1027_v22 = vpop.permute.xlu1 %1026  ;;  %1840 = vmatprep.subr.bf16.mxu1 %v7645_v41  ;;  %v1048_v33 = vsel %vm675_vm2, %v1023_v55, %v1025_v20 }
 0x154   : > { %v1049_v23 = vsel %vm675_vm2, %v1025_v20, %v1027_v22 }
 0x155   : > { %1805 = vmatprep.subr.bf16.mxu0 %v1049_v23 }
 0x156   : > { %1806 = vmatpush1.bf16.msra.mxu0 %v1048_v33  ;;  %1841 = vmatpush1.bf16.msra.mxu1 %v7629_v36  ;;  %v664_v26 = vpop.permute.xlu0 %663 }
 0x157   : > { %v7928_v28 = vpop.permute.xlu1 %665  ;;  %v686_v29 = vsel %vm675_vm2, %v662_v2, %v664_v26 }
 0x158   : > { %v687_v31 = vsel %vm675_vm2, %v664_v26, %v7928_v28 }
 0x159   : > { %1842 = vmatprep.subr.bf16.mxu1 %v687_v31 }
 0x15a   : > { %1843 = vmatpush1.bf16.msra.mxu1 %v686_v29  ;;  %v1175_v32 = vpop.permute.xlu0 %1174 }
 0x15b   : > { %v1177_v34 = vpop.permute.xlu1 %1176  ;;  %v1198_v35 = vsel %vm460_vm1, %v1173_v59, %v1175_v32 }
 0x15c   : > { %v1199_v36 = vsel %vm460_vm1, %v1175_v32, %v1177_v34 }
 0x15d   : > { %1807 = vmatprep.subr.bf16.mxu0 %v1199_v36 }
 0x15e   : > { %1808 = vmatpush1.bf16.msra.mxu0 %v1198_v35  ;;  %v815_v39 = vpop.permute.xlu0 %814 }
 0x15f   : > { %v817_v42 = vpop.permute.xlu1 %816  ;;  %1809 = vmatprep.subr.bf16.mxu0 %v7645_v41  ;;  %v836_v43 = vsel %vm460_vm1, %v813_v4, %v815_v39 }
 0x160   : > { %v837_v46 = vsel %vm460_vm1, %v815_v39, %v817_v42 }
 0x161   : > { %1844 = vmatprep.subr.bf16.mxu1 %v837_v46 }
 0x162   : > { %1810 = vmatpush1.bf16.msra.mxu0 %v1278_v40  ;;  %1845 = vmatpush1.bf16.msra.mxu1 %v836_v43  ;;  %v1389_v47 = vpop.permute.xlu0 %1388 }
 0x163   : > { %v1391_v50 = vpop.permute.xlu1 %1390  ;;  %v1412_v51 = vsel %vm675_vm2, %v1387_v9, %v1389_v47  ;;  %1846 = vmatprep.subr.bf16.mxu1 %v7664_v52 }
 0x164   : > { %v1413_v41 = vsel %vm675_vm2, %v1389_v47, %v1391_v50 }
 0x165   : > { %1811 = vmatprep.subr.bf16.mxu0 %v1413_v41 }
 0x166   : > { %1812 = vmatpush1.bf16.msra.mxu0 %v1412_v51  ;;  %v453_v24 = vpop.permute.xlu0 %452  ;;  %1847 = vmatpush1.bf16.msra.mxu1 %v916_v48 }
 0x167   : > { %v455_v53 = vpop.permute.xlu1 %454  ;;  %v473_v54 = vsel %vm460_vm1, %v451_v15, %v453_v24 }
 0x168   : > { %v474_v55 = vsel %vm460_vm1, %v453_v24, %v455_v53 }
 0x169   : > { %1828 = vmatmul.mubr.bf16.vlgmr.msra.gmra.mrb[8].mxu0 %v7755_v11  ;;  %1881 = vmatprep.subr.bf16.mxu0 %v474_v55  ;;  %v2001_v55 = vlaneseq }
 0x16a   : > { %1882 = vmatpush1.bf16.msra.mxu0 %v473_v54  ;;  %v1029_v56 = vpop.permute.xlu0 %1028  ;;  %6913 = vmatprep.mubr.msk.bf16.mxu0 %vm1619_vm0, %v7529_v18 }
 0x16b   : > { %v1031_v27 = vpop.permute.xlu1 %1030  ;;  %v1050_v58 = vsel %vm675_vm2, %v1027_v22, %v1029_v56  ;;  %1883 = vmatprep.subr.bf16.mxu0 %v7703_v6 }
 0x16c   : > { %v1051_v59 = vsel %vm675_vm2, %v1029_v56, %v1031_v27  ;;  %v8003_v56 = vshrl.u32 %v2001_v55, 7 }
 0x16d   : > { %1848 = vmatprep.subr.bf16.mxu1 %v1051_v59 }
 0x16e   : > { %1849 = vmatpush1.bf16.msra.mxu1 %v1050_v58  ;;  %v1179_v60 = vpop.permute.xlu0 %1178  ;;  %1884 = vmatpush1.bf16.msra.mxu0 %v7664_v52  ;;  %vm3582_vm3 = vcmp.lt.s32.totalorder %v8003_v56, 4 }
 0x16f   : > { %v1181_v61 = vpop.permute.xlu1 %1180  ;;  %v1200_v62 = vsel %vm460_vm1, %v1177_v34, %v1179_v60 }
 0x170   : > { %v1201_v1 = vsel %vm460_vm1, %v1179_v60, %v1181_v61 }
 0x171   : > { %1850 = vmatprep.subr.bf16.mxu1 %v1201_v1 }
 0x172   : > { %1851 = vmatpush1.bf16.msra.mxu1 %v1200_v62  ;;  %v668_v2 = vpop.permute.xlu0 %667 }
 0x173   : > { %v670_v3 = vpop.permute.xlu1 %669  ;;  %v688_v30 = vsel %vm675_vm2, %v7928_v28, %v668_v2  ;;  %1852 = vmatprep.subr.bf16.mxu1 %v7703_v6 }
 0x174   : > { %v689_v4 = vsel %vm675_vm2, %v668_v2, %v670_v3 }
 0x175   : > { %1885 = vmatprep.subr.bf16.mxu0 %v689_v4 }
 0x176   : > { %1886 = vmatpush1.bf16.msra.mxu0 %v688_v30  ;;  %v819_v52 = vpop.permute.xlu0 %818  ;;  %1853 = vmatpush1.bf16.msra.mxu1 %v1280_v17 }
 0x177   : > { %v821_v5 = vpop.permute.xlu1 %820  ;;  %v838_v7 = vsel %vm460_vm1, %v817_v42, %v819_v52 }
 0x178   : > { %v839_v8 = vsel %vm460_vm1, %v819_v52, %v821_v5 }
 0x179   : > { %1887 = vmatprep.subr.bf16.mxu0 %v839_v8 }
 0x17a   : > { %1888 = vmatpush1.bf16.msra.mxu0 %v838_v7  ;;  %v1393_v9 = vpop.permute.xlu0 %1392 }
 0x17b   : > { %v1395_v10 = vpop.permute.xlu1 %1394  ;;  %v1414_v12 = vsel %vm675_vm2, %v1391_v50, %v1393_v9  ;;  %1889 = vmatprep.subr.bf16.mxu0 %v7730_v25 }
 0x17c   : > { %v1415_v13 = vsel %vm675_vm2, %v1393_v9, %v1395_v10 }
 0x17d   : > { %1854 = vmatprep.subr.bf16.mxu1 %v1415_v13 }
 0x17e   : > { %1855 = vmatpush1.bf16.msra.mxu1 %v1414_v12  ;;  %v457_v15 = vpop.permute.xlu0 %456  ;;  %1890 = vmatpush1.bf16.msra.mxu0 %v7703_v6 }
 0x17f   : > { %v459_v16 = vpop.permute.xlu1 %458  ;;  %v475_v19 = vsel %vm460_vm1, %v455_v53, %v457_v15 }
 0x180   : > { %v476_v20 = vsel %vm460_vm1, %v457_v15, %v459_v16  ;;  %v8045_v15 = vsub.s32 2, %v8003_v56 }
 0x181   : > { %1871 = vmatmul.mubr.bf16.vlgmr.msra.gmra.mrb[8].mxu1 %v7755_v11  ;;  %1924 = vmatprep.subr.bf16.mxu1 %v476_v20 }
 0x182   : > { %1925 = vmatpush1.bf16.msra.mxu1 %v475_v19  ;;  %v1033_v22 = vpop.permute.xlu0 %1032  ;;  %6914 = vmatprep.mubr.msk.bf16.mxu1 %vm1619_vm0, %v7529_v18  ;;  %12201 = vst [vmem:[#allocation24_spill] sm:$0xff] %v8045_v15  ;;  %v8048_v19 = vsub.s32 3, %v8003_v56 }
 0x183   : > { %v1035_v33 = vpop.permute.xlu1 %1034  ;;  %1926 = vmatprep.subr.bf16.mxu1 %v7773_v14  ;;  %v1052_v23 = vsel %vm675_vm2, %v1031_v27, %v1033_v22  ;;  %v8006_v27 = vsub.s32 0, %v8003_v56 }
 0x184   : > { %v1053_v6 = vsel %vm675_vm2, %v1033_v22, %v1035_v33  ;;  %12202 = vst [vmem:[#allocation25_spill] sm:$0xff] %v8048_v19 }
 0x185   : > { %1891 = vmatprep.subr.bf16.mxu0 %v1053_v6  ;;  %12198 = vst [vmem:[#allocation22_spill] sm:$0xff] %v8006_v27 }
 0x186   : > { %1892 = vmatpush1.bf16.msra.mxu0 %v1052_v23  ;;  %1927 = vmatpush1.bf16.msra.mxu1 %v7730_v25  ;;  %v672_v26 = vpop.permute.xlu0 %671 }
 0x187   : > { %v674_v28 = vpop.permute.xlu1 %673  ;;  %v690_v29 = vsel %vm675_vm2, %v670_v3, %v672_v26 }
 0x188   : > { %v691_v31 = vsel %vm675_vm2, %v672_v26, %v674_v28 }
 0x189   : > { %1928 = vmatprep.subr.bf16.mxu1 %v691_v31 }
 0x18a   : > { %1929 = vmatpush1.bf16.msra.mxu1 %v690_v29  ;;  %v1183_v18 = vpop.permute.xlu0 %1182 }
 0x18b   : > { %v1185_v32 = vpop.permute.xlu1 %1184  ;;  %v1202_v34 = vsel %vm460_vm1, %v1181_v61, %v1183_v18 }
 0x18c   : > { %v1203_v35 = vsel %vm460_vm1, %v1183_v18, %v1185_v32 }
 0x18d   : > { %1893 = vmatprep.subr.bf16.mxu0 %v1203_v35 }
 0x18e   : > { %1894 = vmatpush1.bf16.msra.mxu0 %v1202_v34  ;;  %v823_v37 = vpop.permute.xlu0 %822 }
 0x18f   : > { %v825_v38 = vpop.permute.xlu1 %824  ;;  %1895 = vmatprep.subr.bf16.mxu0 %v7773_v14  ;;  %v840_v36 = vsel %vm460_vm1, %v821_v5, %v823_v37 }
 0x190   : > { %v841_v39 = vsel %vm460_vm1, %v823_v37, %v825_v38 }
 0x191   : > { %1930 = vmatprep.subr.bf16.mxu1 %v841_v39 }
 0x192   : > { %1896 = vmatpush1.bf16.msra.mxu0 %v7730_v25  ;;  %1931 = vmatpush1.bf16.msra.mxu1 %v840_v36  ;;  %v1397_v40 = vpop.permute.xlu0 %1396 }
 0x193   : > { %v1399_v42 = vpop.permute.xlu1 %1398  ;;  %1932 = vmatprep.subr.bf16.mxu1 %v7801_v57  ;;  %v1416_v43 = vsel %vm675_vm2, %v1395_v10, %v1397_v40 }
 0x194   : > { %v1417_v44 = vsel %vm675_vm2, %v1397_v40, %v1399_v42 }
 0x195   : > { %1897 = vmatprep.subr.bf16.mxu0 %v1417_v44 }
 0x196   : > { %1898 = vmatpush1.bf16.msra.mxu0 %v1416_v43  ;;  %1933 = vmatpush1.bf16.msra.mxu1 %v7773_v14  ;;  %v1037_v45 = vpop.permute.xlu0 %1036  ;;  %v8087_v43 = vsub.s32 4, %v8003_v56 }
 0x197   : > { %v1039_v46 = vpop.permute.xlu1 %1038  ;;  %v1054_v47 = vsel %vm675_vm2, %v1035_v33, %v1037_v45 }
 0x198   : > { %v1055_v48 = vsel %vm675_vm2, %v1037_v45, %v1039_v46  ;;  %12203 = vst [vmem:[#allocation26_spill] sm:$0xff] %v8087_v43  ;;  %v8090_v45 = vsub.s32 5, %v8003_v56 }
 0x199   : > { %1914 = vmatmul.mubr.bf16.vlgmr.msra.gmra.mrb[12].mxu0 %v7755_v11  ;;  %1934 = vmatprep.subr.bf16.mxu1 %v1055_v48 }
 0x19a   : > { %1935 = vmatpush1.bf16.msra.mxu1 %v1054_v47  ;;  %v1187_v25 = vpop.permute.xlu0 %1186  ;;  %12204 = vst [vmem:[#allocation27_spill] sm:$0xff] %v8090_v45 }
 0x19b   : > { %v1189_v50 = vpop.permute.xlu1 %1188  ;;  %v1204_v51 = vsel %vm460_vm1, %v1185_v32, %v1187_v25 }
 0x19c   : > { %v1205_v41 = vsel %vm460_vm1, %v1187_v25, %v1189_v50 }
 0x19d   : > { %1936 = vmatprep.subr.bf16.mxu1 %v1205_v41 }
 0x19e   : > { %1937 = vmatpush1.bf16.msra.mxu1 %v1204_v51  ;;  %v1401_v24 = vpop.permute.xlu0 %1400 }
 0x19f   : > { %1938 = vmatprep.subr.bf16.mxu1 %v7847_v21  ;;  %v1403_v14 = vpop.permute.xlu1 %1402  ;;  %v1418_v54 = vsel %vm675_vm2, %v1399_v42, %v1401_v24  ;;  %v8013_v21 = vld [vmem:[%s12199_s1] sm:$0xff] }
 0x1a0   : > { %v1419_v53 = vsel %vm675_vm2, %v1401_v24, %v1403_v14  ;;  %v8023_v62 = vrot.slane %v8013_v21, %v8006_v27  ;;  %v8054_v26 = vrot.slane %v8013_v21, %v8045_v15  ;;  %v8059_v18 = vrot.slane %v8013_v21, %v8048_v19 }
 0x1a1   : > { %v8096_v51 = vrot.slane %v8013_v21, %v8087_v43 }
 0x1a2   : > { %1939 = vmatpush1.bf16.msra.mxu1 %v7801_v57  ;;  %v8016_v57 = vsub.s32 1, %v8003_v56 }
 0x1a3   : > { %1940 = vmatprep.subr.bf16.mxu1 %v1419_v53  ;;  %v8105_v53 = vrot.slane %v8013_v21, %v8090_v45 }
 0x1a4   : > { %12200 = vst [vmem:[#allocation23_spill] sm:$0xff] %v8016_v57  ;;  %v8028_v1 = vrot.slane %v8013_v21, %v8016_v57 }
 0x1a6   : > { %1941 = vmatpush1.bf16.msra.mxu1 %v1418_v54 }
 0x1a9   : > { %1957 = vmatmul.mubr.bf16.vlgmr.msra.gmra.mrb[12].mxu1 %v7755_v11 }
 0x1af   : > { %v8008_v58 = vpop.permute.xlu0 %1602 }
 0x1b0   : > { %v8018_v60 = vpop.permute.xlu1 %1607 }
 0x1db   : > { %v1657_v59 = vpop.f32.mrb[0].mxu0 }
 0x1dc   : > { %v1659_v11 = vpop.f32.mrb[1].mxu0  ;;  %v1658_v61 = vadd.f32 %v1657_v59, %v8008_v58 }
 0x1dd   : > { %v1661_v63 = vpop.f32.mrb[2].mxu0  ;;  %v1660_v0 = vadd.f32 %v1659_v11, %v8008_v58 }
 0x1de   : > { %v1662_v2 = vadd.f32 %v1661_v63, %v8018_v60  ;;  %v1967_v17 = vmax.f32 %v1658_v61, 0.0  ;;  %v1663_v3 = vpop.f32.mrb[3].mxu0 }
 0x1df   : > { %v1664_v30 = vadd.f32 %v1663_v3, %v8018_v60  ;;  %v1968_v4 = vmax.f32 %v1660_v0, 0.0  ;;  %v8135_v3 = vld [vmem:[%s12205_s4 + $0x4] ss:$8 sps:$4 sm:$0xff]  }
 0x1e0   : > { %v1983_v52 = vmax.f32 %v1662_v2, 0.0  ;;  %v2081_v5 = vmul.f32 %v8023_v62, %v1967_v17  ;;  %6917 = vmatprep.mubr.msk.bf16.mxu0 %vm1619_vm0, %v8135_v3  ;;  %6918 = vmatprep.mubr.msk.bf16.mxu1 %vm1619_vm0, %v8135_v3 }
 0x1e1   : > { %v1984_v7 = vmax.f32 %v1664_v30, 0.0  ;;  %v2082_v8 = vmul.f32 %v8028_v1, %v1968_v4  ;;  %v8142_v30 = vsub.s32 6, %v8003_v56 }
 0x1e2   : > { %v2097_v9 = vmul.f32 %v8023_v62, %v1983_v52  ;;  %v8145_v52 = vsub.s32 7, %v8003_v56 }
 0x1e3   : > { %v2098_v10 = vmul.f32 %v8028_v1, %v1984_v7  ;;  %12206 = vst [vmem:[#allocation28_spill] sm:$0xff] %v8142_v30 }
 0x1e4   : > { %v8036_v12 = vpack.c.bf16 %v2097_v9, %v2081_v5  ;;  %12207 = vst [vmem:[#allocation29_spill] sm:$0xff] %v8145_v52 }
 0x1e5   : > { %v8038_v13 = vpack.c.bf16 %v2098_v10, %v2082_v8 }
 0x1e6   : > { %2183 = vrot.lane.b32.xlu0 %v8036_v12, %s7266_s6  ;;  %2329 = vrot.lane.b32.xlu1 %v8036_v12, %s11939_s17 }
 0x1f3   : > { %v1700_v16 = vpop.f32.mrb[0].mxu1 }
 0x1f4   : > { %v1701_v20 = vadd.f32 %v1700_v16, %v8008_v58  ;;  %v1702_v22 = vpop.f32.mrb[1].mxu1  ;;  %v8155_v16 = vrot.slane %v8013_v21, %v8142_v30 }
 0x1f5   : > { %v1703_v33 = vadd.f32 %v1702_v22, %v8008_v58  ;;  %v1704_v23 = vpop.f32.mrb[2].mxu1 }
 0x1f6   : > { %v1969_v6 = vmax.f32 %v1701_v20, 0.0  ;;  %v1705_v28 = vadd.f32 %v1704_v23, %v8018_v60  ;;  %v1706_v29 = vpop.f32.mrb[3].mxu1  ;;  %v8164_v23 = vrot.slane %v8013_v21, %v8145_v52 }
 0x1f7   : > { %v1970_v31 = vmax.f32 %v1703_v33, 0.0  ;;  %v1707_v32 = vadd.f32 %v1706_v29, %v8018_v60 }
 0x1f8   : > { %v1985_v34 = vmax.f32 %v1705_v28, 0.0  ;;  %v2083_v37 = vmul.f32 %v8054_v26, %v1969_v6 }
 0x1f9   : > { %v1986_v35 = vmax.f32 %v1707_v32, 0.0  ;;  %v2084_v36 = vmul.f32 %v8059_v18, %v1970_v31 }
 0x1fa   : > { %v2099_v38 = vmul.f32 %v8054_v26, %v1985_v34 }
 0x1fb   : > { %v2100_v39 = vmul.f32 %v8059_v18, %v1986_v35 }
 0x1fc   : > { %v8066_v40 = vpack.c.bf16 %v2099_v38, %v2083_v37  ;;  %v8198_v38 = vld [vmem:[%s12199_s1 + $0x8] sm:$0xff]  ;;  %s9037_s1 = sld [smem:[#allocation10 + $0x3e]] }
 0x1fd   : > { %v8068_v42 = vpack.c.bf16 %v2100_v39, %v2084_v36 }
 0x1fe   : > { %2333 = vrot.lane.b32.xlu1 %v8066_v40, %s11939_s17  ;;  %2187 = vrot.lane.b32.xlu0 %v8066_v40, %s7266_s6 }
 0x202   : > { %2591 = vrot.lane.b32.xlu1 %v8036_v12, %s11939_s17  ;;  %2445 = vrot.lane.b32.xlu0 %v8036_v12, %s7266_s6 }
 0x206   : > { %2711 = vrot.lane.b32.xlu1 %v8066_v40, %s7266_s6  ;;  %2449 = vrot.lane.b32.xlu0 %v8066_v40, %s7266_s6 }
 0x20a   : > { %2857 = vrot.lane.b32.xlu1 %v8066_v40, %s11939_s17  ;;  %2595 = vrot.lane.b32.xlu0 %v8066_v40, %s11939_s17 }
 0x20b   : > { %v1743_v44 = vpop.f32.mrb[4].mxu0 }
 0x20c   : > { %v1744_v46 = vadd.f32 %v1743_v44, %v8008_v58  ;;  %v1745_v47 = vpop.f32.mrb[5].mxu0 }
 0x20d   : > { %v1746_v48 = vadd.f32 %v1745_v47, %v8008_v58  ;;  %v1747_v25 = vpop.f32.mrb[6].mxu0 }
 0x20e   : > { %v1971_v50 = vmax.f32 %v1744_v46, 0.0  ;;  %v1748_v41 = vadd.f32 %v1747_v25, %v8018_v60  ;;  %v1749_v24 = vpop.f32.mrb[7].mxu0  ;;  %2185 = vrot.lane.b32.xlu1 %v8038_v13, %s7266_s6  ;;  %2707 = vrot.lane.b32.xlu0 %v8036_v12, %s7266_s6  ;;  %v8204_v25 = vrot.slane %v8198_v38, %v8006_v27 }
 0x20f   : > { %v1972_v14 = vmax.f32 %v1746_v48, 0.0  ;;  %v1750_v54 = vadd.f32 %v1749_v24, %v8018_v60 }
 0x210   : > { %v1987_v55 = vmax.f32 %v1748_v41, 0.0  ;;  %v2085_v11 = vmul.f32 %v8096_v51, %v1971_v50 }
 0x211   : > { %v1988_v59 = vmax.f32 %v1750_v54, 0.0  ;;  %v2086_v63 = vmul.f32 %v8105_v53, %v1972_v14  ;;  %v8213_v14 = vrot.slane %v8198_v38, %v8016_v57 }
 0x212   : > { %v2101_v61 = vmul.f32 %v8096_v51, %v1987_v55  ;;  %2447 = vrot.lane.b32.xlu1 %v8038_v13, %s7266_s6  ;;  %2331 = vrot.lane.b32.xlu0 %v8038_v13, %s11939_s17 }
 0x213   : > { %v2102_v0 = vmul.f32 %v8105_v53, %v1988_v59 }
 0x214   : > { %v8116_v2 = vpack.c.bf16 %v2101_v61, %v2085_v11 }
 0x215   : > { %v8118_v17 = vpack.c.bf16 %v2102_v0, %v2086_v63 }
 0x216   : > { %2451 = vrot.lane.b32.xlu1 %v8068_v42, %s7266_s6  ;;  %2335 = vrot.lane.b32.xlu0 %v8068_v42, %s11939_s17 }
 0x21a   : > { %2593 = vrot.lane.b32.xlu1 %v8038_v13, %s11939_s17  ;;  %2709 = vrot.lane.b32.xlu0 %v8038_v13, %s7266_s6 }
 0x21e   : > { %2597 = vrot.lane.b32.xlu1 %v8068_v42, %s11939_s17  ;;  %2713 = vrot.lane.b32.xlu0 %v8068_v42, %s7266_s6 }
 0x222   : > { %2855 = vrot.lane.b32.xlu1 %v8038_v13, %s11939_s17  ;;  %2859 = vrot.lane.b32.xlu0 %v8068_v42, %s11939_s17 }
 0x223   : > { %v1786_v4 = vpop.f32.mrb[4].mxu1 }
 0x224   : > { %v1787_v5 = vadd.f32 %v1786_v4, %v8008_v58  ;;  %v1788_v7 = vpop.f32.mrb[5].mxu1 }
 0x225   : > { %v1789_v8 = vadd.f32 %v1788_v7, %v8008_v58  ;;  %v1790_v9 = vpop.f32.mrb[6].mxu1  ;;  %v8240_v7 = vpop.permute.xlu0 %2443 }
 0x226   : > { %v1973_v10 = vmax.f32 %v1787_v5, 0.0  ;;  %v1791_v20 = vadd.f32 %v1790_v9, %v8018_v60  ;;  %v1792_v22 = vpop.f32.mrb[7].mxu1  ;;  %2715 = vrot.lane.b32.xlu1 %v8116_v2, %s7266_s6  ;;  %2189 = vrot.lane.b32.xlu0 %v8068_v42, %s7266_s6 }
 0x227   : > { %v1974_v33 = vmax.f32 %v1789_v8, 0.0  ;;  %v1793_v6 = vadd.f32 %v1792_v22, %v8018_v60  ;;  %v7110_v8 = vpop.permute.xlu1 %7109 }
 0x228   : > { %v1989_v28 = vmax.f32 %v1791_v20, 0.0  ;;  %v2087_v31 = vmul.f32 %v8155_v16, %v1973_v10  ;;  %v7112_v22 = vunpack.i.h.bf16 %v7110_v8 }
 0x229   : > { %v1990_v29 = vmax.f32 %v1793_v6, 0.0  ;;  %v2088_v34 = vmul.f32 %v8164_v23, %v1974_v33  ;;  %v7111_v33 = vunpack.i.l.bf16 %v7110_v8 }
 0x22a   : > { %v2103_v32 = vmul.f32 %v8155_v16, %v1989_v28  ;;  %2861 = vrot.lane.b32.xlu1 %v8116_v2, %s11939_s17  ;;  %2599 = vrot.lane.b32.xlu0 %v8116_v2, %s11939_s17 }
 0x22b   : > { %v2104_v35 = vmul.f32 %v8164_v23, %v1990_v29 }
 0x22c   : > { %v8175_v21 = vpack.c.bf16 %v2103_v32, %v2087_v31  ;;  %v8250_v31 = vrot.slane %v8198_v38, %v8045_v15 }
 0x22d   : > { %v8177_v37 = vpack.c.bf16 %v2104_v35, %v2088_v34 }
 0x22e   : > { %2191 = vrot.lane.b32.xlu1 %v8116_v2, %s7266_s6  ;;  %2337 = vrot.lane.b32.xlu0 %v8116_v2, %s11939_s17 }
 0x232   : > { %2195 = vrot.lane.b32.xlu1 %v8175_v21, %s7266_s6  ;;  %2341 = vrot.lane.b32.xlu0 %v8175_v21, %s11939_s17 }
 0x236   : > { %2603 = vrot.lane.b32.xlu1 %v8175_v21, %s11939_s17  ;;  %2453 = vrot.lane.b32.xlu0 %v8116_v2, %s7266_s6 }
 0x23a   : > { %2719 = vrot.lane.b32.xlu1 %v8175_v21, %s7266_s6  ;;  %2457 = vrot.lane.b32.xlu0 %v8175_v21, %s7266_s6 }
 0x23c   : > { %v1829_v36 = vpop.f32.mrb[8].mxu0 }
 0x23d   : > { %v1830_v39 = vadd.f32 %v1829_v36, %v8008_v58  ;;  %v1831_v44 = vpop.f32.mrb[9].mxu0  ;;  %v8259_v36 = vrot.slane %v8198_v38, %v8048_v19 }
 0x23e   : > { %v1832_v46 = vadd.f32 %v1831_v44, %v8008_v58  ;;  %v1833_v47 = vpop.f32.mrb[10].mxu0  ;;  %2339 = vrot.lane.b32.xlu1 %v8118_v17, %s11939_s17  ;;  %2865 = vrot.lane.b32.xlu0 %v8175_v21, %s11939_s17 }
 0x23f   : > { %v1975_v48 = vmax.f32 %v1830_v39, 0.0  ;;  %v1834_v50 = vadd.f32 %v1833_v47, %v8018_v60  ;;  %v1835_v41 = vpop.f32.mrb[11].mxu0 }
 0x240   : > { %v1976_v24 = vmax.f32 %v1832_v46, 0.0  ;;  %v1836_v54 = vadd.f32 %v1835_v41, %v8018_v60 }
 0x241   : > { %v1991_v55 = vmax.f32 %v1834_v50, 0.0  ;;  %v2089_v11 = vmul.f32 %v8204_v25, %v1975_v48  ;;  %v2213_v48 = vsel %vm460_vm1, %v7112_v22, %v7111_v33 }
 0x242   : > { %v1992_v59 = vmax.f32 %v1836_v54, 0.0  ;;  %2343 = vrot.lane.b32.xlu1 %v8177_v37, %s11939_s17  ;;  %2863 = vrot.lane.b32.xlu0 %v8118_v17, %s11939_s17  ;;  %v2090_v63 = vmul.f32 %v8213_v14, %v1976_v24 }
 0x243   : > { %v2105_v61 = vmul.f32 %v8204_v25, %v1991_v55 }
 0x244   : > { %v2106_v0 = vmul.f32 %v8213_v14, %v1992_v59 }
 0x245   : > { %v8224_v4 = vpack.c.bf16 %v2105_v61, %v2089_v11  ;;  %v8289_v61 = vpop.permute.xlu1 %2327 }
 0x246   : > { %v8226_v5 = vpack.c.bf16 %v2106_v0, %v2090_v63  ;;  %2455 = vrot.lane.b32.xlu1 %v8118_v17, %s7266_s6  ;;  %2193 = vrot.lane.b32.xlu0 %v8118_v17, %s7266_s6 }
 0x24a   : > { %2459 = vrot.lane.b32.xlu1 %v8177_v37, %s7266_s6  ;;  %2601 = vrot.lane.b32.xlu0 %v8118_v17, %s11939_s17 }
 0x24e   : > { %2867 = vrot.lane.b32.xlu1 %v8177_v37, %s11939_s17  ;;  %2605 = vrot.lane.b32.xlu0 %v8177_v37, %s11939_s17 }
 0x252   : > { %2607 = vrot.lane.b32.xlu1 %v8224_v4, %s11939_s17  ;;  %2717 = vrot.lane.b32.xlu0 %v8118_v17, %s7266_s6 }
 0x254   : > { %v1872_v9 = vpop.f32.mrb[8].mxu1 }
 0x255   : > { %v1873_v10 = vadd.f32 %v1872_v9, %v8008_v58  ;;  %v1874_v20 = vpop.f32.mrb[9].mxu1 }
 0x256   : > { %v1875_v6 = vadd.f32 %v1874_v20, %v8008_v58  ;;  %v1876_v28 = vpop.f32.mrb[10].mxu1  ;;  %2723 = vrot.lane.b32.xlu1 %v8224_v4, %s7266_s6  ;;  %2721 = vrot.lane.b32.xlu0 %v8177_v37, %s7266_s6 }
 0x257   : > { %v1977_v29 = vmax.f32 %v1873_v10, 0.0  ;;  %v1877_v32 = vadd.f32 %v1876_v28, %v8018_v60  ;;  %v1878_v34 = vpop.f32.mrb[11].mxu1 }
 0x258   : > { %v1978_v35 = vmax.f32 %v1875_v6, 0.0  ;;  %v1879_v39 = vadd.f32 %v1878_v34, %v8018_v60  ;;  %v8262_v44 = vpop.permute.xlu0 %2183  ;;  %v8299_v0 = vpop.permute.xlu1 %2329 }
 0x259   : > { %v1993_v46 = vmax.f32 %v1877_v32, 0.0  ;;  %v2214_v47 = vsel %vm460_vm1, %v7111_v33, %v8262_v44  ;;  %v2091_v41 = vmul.f32 %v8250_v31, %v1977_v29  ;;  %v8305_v33 = vrot.slane %v8198_v38, %v8087_v43 }
 0x25a   : > { %v1994_v50 = vmax.f32 %v1879_v39, 0.0  ;;  %3107 = vmatprep.subr.bf16.mxu0 %v2214_v47  ;;  %2199 = vrot.lane.b32.xlu1 %v8224_v4, %s7266_s6  ;;  %v2092_v54 = vmul.f32 %v8259_v36, %v1978_v35  ;;  %v8314_v32 = vrot.slane %v8198_v38, %v8090_v45 }
 0x25b   : > { %v2107_v24 = vmul.f32 %v8250_v31, %v1993_v46  ;;  %2197 = vrot.lane.b32.xlu0 %v8177_v37, %s7266_s6  ;;  %3108 = vmatpush1.bf16.msra.mxu0 %v2213_v48 }
 0x25c   : > { %v2108_v55 = vmul.f32 %v8259_v36, %v1994_v50  ;;  %3109 = vmatprep.subr.bf16.mxu0 %v8036_v12 }
 0x25d   : > { %v8275_v59 = vpack.c.bf16 %v2107_v24, %v2091_v41 }
 0x25e   : > { %v8278_v11 = vpack.c.bf16 %v2108_v55, %v2092_v54 }
 0x25f   : > { %2203 = vrot.lane.b32.xlu1 %v8275_v59, %s7266_s6  ;;  %2869 = vrot.lane.b32.xlu0 %v8224_v4, %s11939_s17 }
 0x260   : > { %3110 = vmatpush1.bf16.msra.mxu0 %v11869_v49 }
 0x263   : > { %2611 = vrot.lane.b32.xlu1 %v8275_v59, %s11939_s17  ;;  %2345 = vrot.lane.b32.xlu0 %v8224_v4, %s11939_s17 }
 0x267   : > { %2727 = vrot.lane.b32.xlu1 %v8275_v59, %s7266_s6  ;;  %2349 = vrot.lane.b32.xlu0 %v8275_v59, %s11939_s17 }
 0x26b   : > { %2871 = vrot.lane.b32.xlu1 %v8226_v5, %s11939_s17  ;;  %2461 = vrot.lane.b32.xlu0 %v8224_v4, %s7266_s6 }
 0x26c   : > { %v1915_v63 = vpop.f32.mrb[12].mxu0 }
 0x26d   : > { %v1916_v8 = vadd.f32 %v1915_v63, %v8008_v58  ;;  %v1917_v9 = vpop.f32.mrb[13].mxu0 }
 0x26e   : > { %v1918_v10 = vadd.f32 %v1917_v9, %v8008_v58  ;;  %v1919_v20 = vpop.f32.mrb[14].mxu0 }
 0x26f   : > { %v1979_v22 = vmax.f32 %v1916_v8, 0.0  ;;  %v1920_v6 = vadd.f32 %v1919_v20, %v8018_v60  ;;  %v1921_v28 = vpop.f32.mrb[15].mxu0  ;;  %2347 = vrot.lane.b32.xlu1 %v8226_v5, %s11939_s17  ;;  %2465 = vrot.lane.b32.xlu0 %v8275_v59, %s7266_s6 }
 0x270   : > { %v1980_v29 = vmax.f32 %v1918_v10, 0.0  ;;  %v1922_v34 = vadd.f32 %v1921_v28, %v8018_v60  ;;  %v8317_v39 = vpop.permute.xlu1 %2333  ;;  %v8319_v46 = vpop.permute.xlu0 %2187 }
 0x271   : > { %v1995_v35 = vmax.f32 %v1920_v6, 0.0  ;;  %v2093_v48 = vmul.f32 %v8305_v33, %v1979_v22 }
 0x272   : > { %v1996_v47 = vmax.f32 %v1922_v34, 0.0  ;;  %v2094_v41 = vmul.f32 %v8314_v32, %v1980_v29 }
 0x273   : > { %v2109_v50 = vmul.f32 %v8305_v33, %v1995_v35  ;;  %2351 = vrot.lane.b32.xlu1 %v8278_v11, %s11939_s17  ;;  %2873 = vrot.lane.b32.xlu0 %v8275_v59, %s11939_s17 }
 0x274   : > { %v2110_v24 = vmul.f32 %v8314_v32, %v1996_v47  ;;  %v8331_v55 = vpop.permute.xlu1 %2591  ;;  %v2446_v63 = vpop.permute.xlu0 %2445 }
 0x275   : > { %v8329_v54 = vpack.c.bf16 %v2109_v50, %v2093_v48  ;;  %v8355_v48 = vrot.slane %v8198_v38, %v8142_v30 }
 0x276   : > { %v8333_v8 = vpack.c.bf16 %v2110_v24, %v2094_v41 }
 0x277   : > { %2463 = vrot.lane.b32.xlu1 %v8226_v5, %s7266_s6  ;;  %2201 = vrot.lane.b32.xlu0 %v8226_v5, %s7266_s6 }
 0x278   : > { %v8339_v9 = vpop.permute.xlu1 %2711  ;;  %v8341_v10 = vpop.permute.xlu0 %2449 }
 0x27b   : > { %2467 = vrot.lane.b32.xlu1 %v8278_v11, %s7266_s6  ;;  %2609 = vrot.lane.b32.xlu0 %v8226_v5, %s11939_s17 }
 0x27c   : > { %v1958_v20 = vpop.f32.mrb[12].mxu1  ;;  %v8348_v28 = vpop.permute.xlu1 %2857 }
 0x27d   : > { %v1959_v22 = vadd.f32 %v1958_v20, %v8008_v58  ;;  %v1960_v6 = vpop.f32.mrb[13].mxu1  ;;  %v8351_v34 = vpop.permute.xlu0 %2595 }
 0x27e   : > { %v1961_v29 = vadd.f32 %v1960_v6, %v8008_v58  ;;  %v1962_v35 = vpop.f32.mrb[14].mxu1  ;;  %v8364_v58 = vrot.slane %v8198_v38, %v8145_v52 }
 0x27f   : > { %v1981_v47 = vmax.f32 %v1959_v22, 0.0  ;;  %v1963_v50 = vadd.f32 %v1962_v35, %v8018_v60  ;;  %v1964_v41 = vpop.f32.mrb[15].mxu1  ;;  %2875 = vrot.lane.b32.xlu1 %v8278_v11, %s11939_s17  ;;  %2613 = vrot.lane.b32.xlu0 %v8278_v11, %s11939_s17 }
 0x280   : > { %v1982_v24 = vmax.f32 %v1961_v29, 0.0  ;;  %v1965_v20 = vadd.f32 %v1964_v41, %v8018_v60  ;;  %v2186_v6 = vpop.permute.xlu1 %2185 }
 0x281   : > { %v1997_v22 = vmax.f32 %v1963_v50, 0.0  ;;  %v2708_v30 = vpop.permute.xlu0 %2707  ;;  %v2216_v35 = vsel %vm460_vm1, %v2186_v6, %v8319_v46  ;;  %v2215_v43 = vsel %vm460_vm1, %v8262_v44, %v2186_v6  ;;  %v2095_v45 = vmul.f32 %v8355_v48, %v1981_v47 }
 0x282   : > { %v1998_v49 = vmax.f32 %v1965_v20, 0.0  ;;  %v2096_v60 = vmul.f32 %v8364_v58, %v1982_v24  ;;  %3150 = vmatprep.subr.bf16.mxu1 %v2216_v35 }
 0x283   : > { %v2111_v29 = vmul.f32 %v8355_v48, %v1997_v22  ;;  %2615 = vrot.lane.b32.xlu1 %v8329_v54, %s11939_s17  ;;  %2725 = vrot.lane.b32.xlu0 %v8226_v5, %s7266_s6 }
 0x284   : > { %v2112_v38 = vmul.f32 %v8364_v58, %v1998_v49  ;;  %3151 = vmatpush1.bf16.msra.mxu1 %v2215_v43  ;;  %v2448_v41 = vpop.permute.xlu1 %2447  ;;  %v2361_v49 = vsel %vm675_vm2, %v8289_v61, %v8299_v0 }
 0x285   : > { %v8379_v50 = vpack.c.bf16 %v2111_v29, %v2095_v45  ;;  %3152 = vmatprep.subr.bf16.mxu1 %v8066_v40  ;;  %v2332_v47 = vpop.permute.xlu0 %2331  ;;  %v2478_v45 = vsel %vm460_vm1, %v2446_v63, %v2448_v41 }
 0x286   : > { %v8381_v44 = vpack.c.bf16 %v2112_v38, %v2096_v60  ;;  %v2362_v24 = vsel %vm675_vm2, %v8299_v0, %v2332_v47  ;;  %v2477_v0 = vsel %vm460_vm1, %v8240_v7, %v2446_v63  ;;  %v2363_v22 = vsel %vm675_vm2, %v2332_v47, %v8317_v39 }
 0x287   : > { %2731 = vrot.lane.b32.xlu1 %v8329_v54, %s7266_s6  ;;  %2729 = vrot.lane.b32.xlu0 %v8278_v11, %s7266_s6  ;;  %v2479_v7 = vsel %vm460_vm1, %v2448_v41, %v8341_v10 }
 0x288   : > { %3111 = vmatprep.subr.bf16.mxu0 %v2362_v24  ;;  %3153 = vmatpush1.bf16.msra.mxu1 %v8038_v13  ;;  %v8394_v43 = vpop.permute.xlu1 %2451 }
 0x289   : > { %3112 = vmatpush1.bf16.msra.mxu0 %v2361_v49  ;;  %v8397_v20 = vpop.permute.xlu0 %2335  ;;  %v2480_v35 = vsel %vm460_vm1, %v8341_v10, %v8394_v43 }
 0x28a   : > { %3113 = vmatprep.subr.bf16.mxu0 %v2478_v45  ;;  %v2364_v61 = vsel %vm675_vm2, %v8317_v39, %v8397_v20 }
 0x28b   : > { %2207 = vrot.lane.b32.xlu1 %v8329_v54, %s7266_s6  ;;  %2205 = vrot.lane.b32.xlu0 %v8278_v11, %s7266_s6 }
 0x28c   : > { %3154 = vmatprep.subr.bf16.mxu1 %v2364_v61  ;;  %v2594_v6 = vpop.permute.xlu1 %2593 }
 0x28d   : > { %3114 = vmatpush1.bf16.msra.mxu0 %v2477_v0  ;;  %3155 = vmatpush1.bf16.msra.mxu1 %v2363_v22  ;;  %v2710_v29 = vpop.permute.xlu0 %2709  ;;  %v2626_v63 = vsel %vm675_vm2, %v2594_v6, %v8351_v34  ;;  %v2625_v10 = vsel %vm675_vm2, %v8331_v55, %v2594_v6  ;;  %v8466_v0 = vld [vmem:[%s12205_s4] ss:$8 sps:$4 sm:$0xff]   ;;  %s9042_s4 = sld [smem:[#allocation10 + $0x41]] }
 0x28e   : > { %3115 = vmatprep.subr.bf16.mxu0 %v8038_v13  ;;  %3156 = vmatprep.subr.bf16.mxu1 %v2480_v35  ;;  %v2742_v38 = vsel %vm460_vm1, %v2710_v29, %v8339_v9  ;;  %v2741_v47 = vsel %vm460_vm1, %v2708_v30, %v2710_v29 }
 0x28f   : > { %2211 = vrot.lane.b32.xlu1 %v8379_v50, %s7266_s6  ;;  %2877 = vrot.lane.b32.xlu0 %v8329_v54, %s11939_s17 }
 0x290   : > { %v2598_v39 = vpop.permute.xlu1 %2597 }
 0x291   : > { %3116 = vmatpush1.bf16.msra.mxu0 %v8036_v12  ;;  %3157 = vmatpush1.bf16.msra.mxu1 %v2479_v7  ;;  %v2714_v60 = vpop.permute.xlu0 %2713  ;;  %v2627_v61 = vsel %vm675_vm2, %v8351_v34, %v2598_v39 }
 0x292   : > { %3117 = vmatprep.subr.bf16.mxu0 %v2626_v63  ;;  %3158 = vmatprep.subr.bf16.mxu1 %v8068_v42  ;;  %v12208_v63 = vmov 0  }
 0x293   : > { %2879 = vrot.lane.b32.xlu1 %v8333_v8, %s11939_s17  ;;  %2353 = vrot.lane.b32.xlu0 %v8329_v54, %s11939_s17 }
 0x294   : > { %v2856_v12 = vpop.permute.xlu1 %2855 }
 0x295   : > { %3118 = vmatpush1.bf16.msra.mxu0 %v2625_v10  ;;  %3159 = vmatpush1.bf16.msra.mxu1 %v8066_v40  ;;  %v8433_v41 = vpop.permute.xlu0 %2859 }
 0x296   : > { %3119 = vmatprep.subr.bf16.mxu0 %v2742_v38  ;;  %v2890_v45 = vsel %vm675_vm2, %v8348_v28, %v8433_v41 }
 0x297   : > { %2619 = vrot.lane.b32.xlu1 %v8379_v50, %s11939_s17  ;;  %2357 = vrot.lane.b32.xlu0 %v8379_v50, %s11939_s17 }
 0x298   : > { %v8440_v55 = vpop.permute.xlu1 %2715 }
 0x299   : > { %3120 = vmatpush1.bf16.msra.mxu0 %v2741_v47  ;;  %v2190_v24 = vpop.permute.xlu0 %2189  ;;  %v2744_v6 = vsel %vm460_vm1, %v2714_v60, %v8440_v55 }
 0x29a   : > { %3121 = vmatprep.subr.bf16.mxu0 %v8066_v40  ;;  %v2217_v34 = vsel %vm460_vm1, %v8319_v46, %v2190_v24 }
 0x29b   : > { %2355 = vrot.lane.b32.xlu1 %v8333_v8, %s11939_s17  ;;  %2209 = vrot.lane.b32.xlu0 %v8333_v8, %s7266_s6 }
 0x29c   : > { %v2862_v49 = vpop.permute.xlu1 %2861 }
 0x29d   : > { %3122 = vmatpush1.bf16.msra.mxu0 %v8038_v13  ;;  %v8451_v30 = vpop.permute.xlu0 %2599  ;;  %v2889_v13 = vsel %vm675_vm2, %v2856_v12, %v8348_v28  ;;  %v2743_v28 = vsel %vm460_vm1, %v8339_v9, %v2714_v60 }
 0x29e   : > { %3123 = vmatprep.subr.bf16.mxu0 %v2890_v45  ;;  %v2628_v40 = vsel %vm675_vm2, %v2598_v39, %v8451_v30 }
 0x29f   : > { %2359 = vrot.lane.b32.xlu1 %v8381_v44, %s11939_s17  ;;  %2469 = vrot.lane.b32.xlu0 %v8329_v54, %s7266_s6 }
 0x2a0   : > { %3160 = vmatprep.subr.bf16.mxu1 %v2628_v40  ;;  %v2192_v22 = vpop.permute.xlu1 %2191 }
 0x2a1   : > { %3124 = vmatpush1.bf16.msra.mxu0 %v2889_v13  ;;  %3161 = vmatpush1.bf16.msra.mxu1 %v2627_v61  ;;  %v2338_v35 = vpop.permute.xlu0 %2337  ;;  %v2218_v29 = vsel %vm460_vm1, %v2190_v24, %v2192_v22  ;;  %v2891_v13 = vsel %vm675_vm2, %v8433_v41, %v2862_v49 }
 0x2a2   : > { %3162 = vmatprep.subr.bf16.mxu1 %v2744_v6  ;;  %3193 = vmatprep.subr.bf16.mxu0 %v2218_v29  ;;  %v2365_v47 = vsel %vm675_vm2, %v8397_v20, %v2338_v35  ;;  %v3083_v20 = vld [vmem:[%s12209_s5] sm:$0xff] }
 0x2a3   : > { %2471 = vrot.lane.b32.xlu1 %v8333_v8, %s7266_s6  ;;  %2473 = vrot.lane.b32.xlu0 %v8379_v50, %s7266_s6 }
 0x2a4   : > { %3140 = vmatmul.mubr.bf16.vlgmr.msra.gmra.mrb[16].mxu0 %v8466_v0  ;;  %v8480_v7 = vpop.permute.xlu1 %2195 }
 0x2a5   : > { %3163 = vmatpush1.bf16.msra.mxu1 %v2743_v28  ;;  %3194 = vmatpush1.bf16.msra.mxu0 %v2217_v34  ;;  %v2342_v39 = vpop.permute.xlu0 %2341 }
 0x2a6   : > { %3164 = vmatprep.subr.bf16.mxu1 %v8116_v2  ;;  %3195 = vmatprep.subr.bf16.mxu0 %v8116_v2 }
 0x2a7   : > { %2475 = vrot.lane.b32.xlu1 %v8381_v44, %s7266_s6  ;;  %2617 = vrot.lane.b32.xlu0 %v8333_v8, %s11939_s17 }
 0x2a8   : > { %6919 = vmatprep.mubr.msk.bf16.mxu0 %vm1619_vm0, %v8135_v3  ;;  %v8492_v46 = vpop.permute.xlu1 %2603 }
 0x2a9   : > { %3165 = vmatpush1.bf16.msra.mxu1 %v8068_v42  ;;  %3196 = vmatpush1.bf16.msra.mxu0 %v8068_v42  ;;  %v2454_v9 = vpop.permute.xlu0 %2453 }
 0x2aa   : > { %v2481_v41 = vsel %vm460_vm1, %v8394_v43, %v2454_v9 }
 0x2ab   : > { %2623 = vrot.lane.b32.xlu1 %v12208_v63, %s11939_s17  ;;  %2621 = vrot.lane.b32.xlu0 %v8381_v44, %s11939_s17 }
 0x2ac   : > { %v8498_v60 = vpop.permute.xlu1 %2719 }
 0x2ad   : > { %v2458_v10 = vpop.permute.xlu0 %2457 }
 0x2af   : > { %2735 = vrot.lane.b32.xlu1 %v8379_v50, %s7266_s6  ;;  %2733 = vrot.lane.b32.xlu0 %v8333_v8, %s7266_s6 }
 0x2b0   : > { %v2340_v12 = vpop.permute.xlu1 %2339 }
 0x2b1   : > { %v8504_v42 = vpop.permute.xlu0 %2865  ;;  %v2366_v38 = vsel %vm675_vm2, %v2338_v35, %v2340_v12 }
 0x2b2   : > { %3197 = vmatprep.subr.bf16.mxu0 %v2366_v38 }
 0x2b3   : > { %2739 = vrot.lane.b32.xlu1 %v12208_v63, %s7266_s6  ;;  %2737 = vrot.lane.b32.xlu0 %v8381_v44, %s7266_s6  ;;  %s11943_s6 = smov 123  }
 0x2b4   : > { %3198 = vmatpush1.bf16.msra.mxu0 %v2365_v47  ;;  %v8513_v24 = vpop.permute.xlu1 %2343 }
 0x2b5   : > { %v8515_v45 = vpop.permute.xlu0 %2863 }
 0x2b6   : > { %v2892_v40 = vsel %vm675_vm2, %v2862_v49, %v8515_v45  ;;  %v3084_v49 = vld [vmem:[%s12209_s5 + $0x8] sm:$0xff]  ;;  %s9050_s5 = sld [smem:[#allocation10 + $0x5]] }
 0x2b7   : > { %2883 = vrot.lane.b32.xlu1 %v8381_v44, %s11939_s17  ;;  %2881 = vrot.lane.b32.xlu0 %v8379_v50, %s11939_s17 }
 0x2b8   : > { %3166 = vmatprep.subr.bf16.mxu1 %v2892_v40  ;;  %v2456_v61 = vpop.permute.xlu1 %2455 }
 0x2b9   : > { %3167 = vmatpush1.bf16.msra.mxu1 %v2891_v13  ;;  %v2194_v6 = vpop.permute.xlu0 %2193  ;;  %v2482_v35 = vsel %vm460_vm1, %v2454_v9, %v2456_v61  ;;  %v2368_v9 = vsel %vm675_vm2, %v2342_v39, %v8513_v24  ;;  %v2367_v13 = vsel %vm675_vm2, %v2340_v12, %v2342_v39 }
 0x2ba   : > { %v2220_v29 = vsel %vm460_vm1, %v2194_v6, %v8480_v7  ;;  %v2219_v28 = vsel %vm460_vm1, %v2192_v22, %v2194_v6  ;;  %3199 = vmatprep.subr.bf16.mxu0 %v2482_v35 }
 0x2bb   : > { %3087 = vperm.xlu1 %7107, %v3083_v20   ;;  %7114 = vrot.lane.b32.xlu0 %v12208_v63, %s11939_s17 }
 0x2bc   : > { %3183 = vmatmul.mubr.bf16.vlgmr.msra.gmra.mrb[16].mxu1 %v8466_v0  ;;  %3236 = vmatprep.subr.bf16.mxu1 %v2220_v29  ;;  %v8540_v34 = vpop.permute.xlu1 %2459 }
 0x2bd   : > { %3200 = vmatpush1.bf16.msra.mxu0 %v2481_v41  ;;  %3237 = vmatpush1.bf16.msra.mxu1 %v2219_v28  ;;  %v2602_v38 = vpop.permute.xlu0 %2601 }
 0x2be   : > { %3201 = vmatprep.subr.bf16.mxu0 %v8118_v17  ;;  %3238 = vmatprep.subr.bf16.mxu1 %v8175_v21  ;;  %v2630_v22 = vsel %vm675_vm2, %v2602_v38, %v8492_v46  ;;  %v2629_v40 = vsel %vm675_vm2, %v8451_v30, %v2602_v38  ;;  %v2483_v30 = vsel %vm460_vm1, %v2456_v61, %v2458_v10 }
 0x2bf   : > { %3092 = vperm.xlu0 %7106, %v3084_v49   ;;  %6920 = vmatprep.mubr.msk.bf16.mxu1 %vm1619_vm0, %v8135_v3  ;;  %v2893_v61 = vsel %vm675_vm2, %v8515_v45, %v8504_v42 }
 0x2c0   : > { %v2868_v43 = vpop.permute.xlu1 %2867 }
 0x2c1   : > { %3202 = vmatpush1.bf16.msra.mxu0 %v8116_v2  ;;  %3239 = vmatpush1.bf16.msra.mxu1 %v8118_v17  ;;  %v2606_v47 = vpop.permute.xlu0 %2605  ;;  %v2484_v2 = vsel %vm460_vm1, %v2458_v10, %v8540_v34  ;;  %v2894_v41 = vsel %vm675_vm2, %v8504_v42, %v2868_v43 }
 0x2c2   : > { %3203 = vmatprep.subr.bf16.mxu0 %v2630_v22  ;;  %3240 = vmatprep.subr.bf16.mxu1 %v2368_v9 }
 0x2c4   : > { %v8555_v20 = vpop.permute.xlu1 %2607 }
 0x2c5   : > { %3204 = vmatpush1.bf16.msra.mxu0 %v2629_v40  ;;  %3241 = vmatpush1.bf16.msra.mxu1 %v2367_v13  ;;  %v2718_v6 = vpop.permute.xlu0 %2717 }
 0x2c6   : > { %3242 = vmatprep.subr.bf16.mxu1 %v2484_v2  ;;  %v2746_v35 = vsel %vm460_vm1, %v2718_v6, %v8498_v60  ;;  %v2745_v29 = vsel %vm460_vm1, %v8440_v55, %v2718_v6  ;;  %v2632_v55 = vsel %vm675_vm2, %v2606_v47, %v8555_v20 }
 0x2c7   : > { %3205 = vmatprep.subr.bf16.mxu0 %v2746_v35 }
 0x2c8   : > { %v8564_v28 = vpop.permute.xlu1 %2723 }
 0x2c9   : > { %3206 = vmatpush1.bf16.msra.mxu0 %v2745_v29  ;;  %3243 = vmatpush1.bf16.msra.mxu1 %v2483_v30  ;;  %v2722_v39 = vpop.permute.xlu0 %2721 }
 0x2ca   : > { %3207 = vmatprep.subr.bf16.mxu0 %v8175_v21  ;;  %3244 = vmatprep.subr.bf16.mxu1 %v8177_v37  ;;  %v2747_v45 = vsel %vm460_vm1, %v8498_v60, %v2722_v39 }
 0x2cc   : > { %v2200_v12 = vpop.permute.xlu1 %2199 }
 0x2cd   : > { %3208 = vmatpush1.bf16.msra.mxu0 %v8118_v17  ;;  %3245 = vmatpush1.bf16.msra.mxu1 %v8175_v21  ;;  %v2198_v10 = vpop.permute.xlu0 %2197  ;;  %v2631_v17 = vsel %vm675_vm2, %v8492_v46, %v2606_v47  ;;  %v2748_v21 = vsel %vm460_vm1, %v2722_v39, %v8564_v28 }
 0x2ce   : > { %3209 = vmatprep.subr.bf16.mxu0 %v2894_v41  ;;  %3246 = vmatprep.subr.bf16.mxu1 %v2632_v55  ;;  %v2222_v38 = vsel %vm460_vm1, %v2198_v10, %v2200_v12  ;;  %v2221_v42 = vsel %vm460_vm1, %v8480_v7, %v2198_v10 }
 0x2d1   : > { %3210 = vmatpush1.bf16.msra.mxu0 %v2893_v61  ;;  %v8579_v49 = vpop.permute.xlu1 %2203  ;;  %3247 = vmatpush1.bf16.msra.mxu1 %v2631_v17  ;;  %v2870_v22 = vpop.permute.xlu0 %2869 }
 0x2d2   : > { %3279 = vmatprep.subr.bf16.mxu0 %v2222_v38  ;;  %3248 = vmatprep.subr.bf16.mxu1 %v2748_v21  ;;  %v2895_v2 = vsel %vm675_vm2, %v2868_v43, %v2870_v22 }
 0x2d4   : > { %3226 = vmatmul.mubr.bf16.vlgmr.msra.gmra.mrb[20].mxu0 %v8466_v0 }
 0x2d5   : > { %3280 = vmatpush1.bf16.msra.mxu0 %v2221_v42  ;;  %v8589_v46 = vpop.permute.xlu1 %2611  ;;  %6921 = vmatprep.mubr.msk.bf16.mxu0 %vm1619_vm0, %v8135_v3  ;;  %v2346_v9 = vpop.permute.xlu0 %2345 }
 0x2d6   : > { %3249 = vmatpush1.bf16.msra.mxu1 %v2747_v45  ;;  %3281 = vmatprep.subr.bf16.mxu0 %v8224_v4 }
 0x2d7   : > { %3250 = vmatprep.subr.bf16.mxu1 %v8224_v4 }
 0x2d9   : > { %3282 = vmatpush1.bf16.msra.mxu0 %v8177_v37  ;;  %v8596_v47 = vpop.permute.xlu1 %2727  ;;  %v2350_v7 = vpop.permute.xlu0 %2349 }
 0x2da   : > { %3251 = vmatpush1.bf16.msra.mxu1 %v8177_v37  ;;  %v2369_v37 = vsel %vm675_vm2, %v8513_v24, %v2346_v9 }
 0x2dd   : > { %v8599_v60 = vpop.permute.xlu1 %2871  ;;  %v2462_v40 = vpop.permute.xlu0 %2461 }
 0x2de   : > { %v2896_v13 = vsel %vm675_vm2, %v2870_v22, %v8599_v60  ;;  %v2485_v61 = vsel %vm460_vm1, %v8540_v34, %v2462_v40 }
 0x2df   : > { %3252 = vmatprep.subr.bf16.mxu1 %v2896_v13 }
 0x2e0   : > { %3253 = vmatpush1.bf16.msra.mxu1 %v2895_v2 }
 0x2e1   : > { %v2348_v6 = vpop.permute.xlu1 %2347  ;;  %v2466_v35 = vpop.permute.xlu0 %2465 }
 0x2e2   : > { %v2370_v29 = vsel %vm675_vm2, %v2346_v9, %v2348_v6  ;;  %v2371_v45 = vsel %vm675_vm2, %v2348_v6, %v2350_v7 }
 0x2e3   : > { %3269 = vmatmul.mubr.bf16.vlgmr.msra.gmra.mrb[20].mxu1 %v8466_v0  ;;  %3283 = vmatprep.subr.bf16.mxu0 %v2370_v29 }
 0x2e4   : > { %3284 = vmatpush1.bf16.msra.mxu0 %v2369_v37  ;;  %6922 = vmatprep.mubr.msk.bf16.mxu1 %vm1619_vm0, %v8135_v3 }
 0x2e5   : > { %v8610_v30 = vpop.permute.xlu1 %2351  ;;  %v2874_v39 = vpop.permute.xlu0 %2873 }
 0x2e9   : > { %v2464_v41 = vpop.permute.xlu1 %2463  ;;  %v2202_v43 = vpop.permute.xlu0 %2201 }
 0x2ea   : > { %v2486_v55 = vsel %vm460_vm1, %v2462_v40, %v2464_v41  ;;  %v2224_v10 = vsel %vm460_vm1, %v2202_v43, %v8579_v49  ;;  %v2223_v24 = vsel %vm460_vm1, %v2200_v12, %v2202_v43  ;;  %v2372_v12 = vsel %vm675_vm2, %v2350_v7, %v8610_v30 }
 0x2eb   : > { %3285 = vmatprep.subr.bf16.mxu0 %v2486_v55  ;;  %3322 = vmatprep.subr.bf16.mxu1 %v2224_v10 }
 0x2ec   : > { %3286 = vmatpush1.bf16.msra.mxu0 %v2485_v61  ;;  %3323 = vmatpush1.bf16.msra.mxu1 %v2223_v24 }
 0x2ed   : > { %v8618_v17 = vpop.permute.xlu1 %2467  ;;  %3287 = vmatprep.subr.bf16.mxu0 %v8226_v5  ;;  %3324 = vmatprep.subr.bf16.mxu1 %v8275_v59  ;;  %v2610_v38 = vpop.permute.xlu0 %2609 }
 0x2ee   : > { %v2634_v21 = vsel %vm675_vm2, %v2610_v38, %v8589_v46  ;;  %v2633_v42 = vsel %vm675_vm2, %v8555_v20, %v2610_v38  ;;  %v2488_v9 = vsel %vm460_vm1, %v2466_v35, %v8618_v17  ;;  %v2487_v20 = vsel %vm460_vm1, %v2464_v41, %v2466_v35 }
 0x2ef   : > { %v2897_v41 = vsel %vm675_vm2, %v8599_v60, %v2874_v39 }
 0x2f0   : > { %3288 = vmatpush1.bf16.msra.mxu0 %v8224_v4  ;;  %3325 = vmatpush1.bf16.msra.mxu1 %v8226_v5 }
 0x2f1   : > { %v2876_v34 = vpop.permute.xlu1 %2875  ;;  %3289 = vmatprep.subr.bf16.mxu0 %v2634_v21  ;;  %3326 = vmatprep.subr.bf16.mxu1 %v2372_v12  ;;  %v2614_v22 = vpop.permute.xlu0 %2613 }
 0x2f2   : > { %v2898_v37 = vsel %vm675_vm2, %v2874_v39, %v2876_v34  ;;  %v2635_v43 = vsel %vm675_vm2, %v8589_v46, %v2614_v22 }
 0x2f4   : > { %3290 = vmatpush1.bf16.msra.mxu0 %v2633_v42  ;;  %3327 = vmatpush1.bf16.msra.mxu1 %v2371_v45 }
 0x2f5   : > { %v8631_v4 = vpop.permute.xlu1 %2615  ;;  %3328 = vmatprep.subr.bf16.mxu1 %v2488_v9  ;;  %v2726_v40 = vpop.permute.xlu0 %2725 }
 0x2f6   : > { %v2750_v13 = vsel %vm460_vm1, %v2726_v40, %v8596_v47  ;;  %v2749_v2 = vsel %vm460_vm1, %v8564_v28, %v2726_v40  ;;  %v2636_v28 = vsel %vm675_vm2, %v2614_v22, %v8631_v4 }
 0x2f7   : > { %3291 = vmatprep.subr.bf16.mxu0 %v2750_v13 }
 0x2f8   : > { %3292 = vmatpush1.bf16.msra.mxu0 %v2749_v2  ;;  %3329 = vmatpush1.bf16.msra.mxu1 %v2487_v20 }
 0x2f9   : > { %v8640_v7 = vpop.permute.xlu1 %2731  ;;  %3293 = vmatprep.subr.bf16.mxu0 %v8275_v59  ;;  %3330 = vmatprep.subr.bf16.mxu1 %v8278_v11  ;;  %v2730_v6 = vpop.permute.xlu0 %2729 }
 0x2fa   : > { %v2751_v61 = vsel %vm460_vm1, %v8596_v47, %v2730_v6 }
 0x2fc   : > { %3294 = vmatpush1.bf16.msra.mxu0 %v8226_v5  ;;  %3331 = vmatpush1.bf16.msra.mxu1 %v8275_v59  ;;  %v2752_v59 = vsel %vm460_vm1, %v2730_v6, %v8640_v7 }
 0x2fd   : > { %v2208_v29 = vpop.permute.xlu1 %2207  ;;  %3295 = vmatprep.subr.bf16.mxu0 %v2898_v37  ;;  %3332 = vmatprep.subr.bf16.mxu1 %v2636_v28  ;;  %v2206_v35 = vpop.permute.xlu0 %2205 }
 0x2fe   : > { %v2226_v55 = vsel %vm460_vm1, %v2206_v35, %v2208_v29  ;;  %v2225_v60 = vsel %vm460_vm1, %v8579_v49, %v2206_v35 }
 0x300   : > { %3296 = vmatpush1.bf16.msra.mxu0 %v2897_v41  ;;  %3333 = vmatpush1.bf16.msra.mxu1 %v2635_v43 }
 0x301   : > { %v2212_v5 = vpop.permute.xlu1 %2211  ;;  %3334 = vmatprep.subr.bf16.mxu1 %v2752_v59  ;;  %3365 = vmatprep.subr.bf16.mxu0 %v2226_v55  ;;  %v2878_v10 = vpop.permute.xlu0 %2877 }
 0x302   : > { %v2899_v38 = vsel %vm675_vm2, %v2876_v34, %v2878_v10 }
 0x303   : > { %3312 = vmatmul.mubr.bf16.vlgmr.msra.gmra.mrb[24].mxu0 %v8466_v0 }
 0x304   : > { %3335 = vmatpush1.bf16.msra.mxu1 %v2751_v61  ;;  %3366 = vmatpush1.bf16.msra.mxu0 %v2225_v60 }
 0x305   : > { %v8661_v46 = vpop.permute.xlu1 %2879  ;;  %3336 = vmatprep.subr.bf16.mxu1 %v8329_v54  ;;  %3367 = vmatprep.subr.bf16.mxu0 %v8329_v54  ;;  %v2354_v39 = vpop.permute.xlu0 %2353 }
 0x306   : > { %6923 = vmatprep.mubr.msk.bf16.mxu0 %vm1619_vm0, %v8135_v3  ;;  %v2900_v49 = vsel %vm675_vm2, %v2878_v10, %v8661_v46 }
 0x308   : > { %3337 = vmatpush1.bf16.msra.mxu1 %v8278_v11  ;;  %3368 = vmatpush1.bf16.msra.mxu0 %v8278_v11  ;;  %v2373_v11 = vsel %vm675_vm2, %v8610_v30, %v2354_v39 }
 0x309   : > { %v2620_v47 = vpop.permute.xlu1 %2619  ;;  %3338 = vmatprep.subr.bf16.mxu1 %v2900_v49  ;;  %v2358_v24 = vpop.permute.xlu0 %2357 }
 0x30c   : > { %3339 = vmatpush1.bf16.msra.mxu1 %v2899_v38 }
 0x30d   : > { %v2356_v21 = vpop.permute.xlu1 %2355  ;;  %v2210_v12 = vpop.permute.xlu0 %2209 }
 0x30e   : > { %v2374_v22 = vsel %vm675_vm2, %v2354_v39, %v2356_v21  ;;  %v2228_v42 = vsel %vm460_vm1, %v2210_v12, %v2212_v5  ;;  %v2227_v45 = vsel %vm460_vm1, %v2208_v29, %v2210_v12  ;;  %v2375_v6 = vsel %vm675_vm2, %v2356_v21, %v2358_v24 }
 0x30f   : > { %3369 = vmatprep.subr.bf16.mxu0 %v2374_v22  ;;  %3355 = vmatmul.mubr.bf16.vlgmr.msra.gmra.mrb[24].mxu1 %v8466_v0 }
 0x310   : > { %3408 = vmatprep.subr.bf16.mxu1 %v2228_v42  ;;  %3370 = vmatpush1.bf16.msra.mxu0 %v2373_v11  ;;  %v7269_v42 = vmov 0.0  }
 0x311   : > { %3409 = vmatpush1.bf16.msra.mxu1 %v2227_v45  ;;  %v2360_v9 = vpop.permute.xlu1 %2359  ;;  %v2470_v34 = vpop.permute.xlu0 %2469  ;;  %6924 = vmatprep.mubr.msk.bf16.mxu1 %vm1619_vm0, %v8135_v3  ;;  %354 = vst [vmem:[#allocation4 + $0xa0] sm:$0xff] %v7269_v42  ;;  %350 = vst [vmem:[#allocation4] sm:$0xff] %v7269_v42  ;;  %v8716_v45 = vstv %s6975_s13  ;;  %s6988_s13 = sld [smem:[#allocation10 + $0x20]] }
 0x312   : > { %3410 = vmatprep.subr.bf16.mxu1 %v8379_v50  ;;  %v2376_v13 = vsel %vm675_vm2, %v2358_v24, %v2360_v9  ;;  %v2489_v30 = vsel %vm460_vm1, %v8618_v17, %v2470_v34  ;;  %351 = vst [vmem:[#allocation4 + $0x8] sm:$0xff] %v7269_v42  ;;  %352 = vst [vmem:[#allocation4 + $0x10] sm:$0xff] %v7269_v42 }
 0x313   : > { %353 = vst [vmem:[#allocation4 + $0x18] sm:$0xff] %v7269_v42  ;;  %355 = vst [vmem:[#allocation4 + $0xa8] sm:$0xff] %v7269_v42 }
 0x314   : > { %356 = vst [vmem:[#allocation4 + $0xb0] sm:$0xff] %v7269_v42  ;;  %357 = vst [vmem:[#allocation4 + $0xb8] sm:$0xff] %v7269_v42 }
 0x315   : > { %3411 = vmatpush1.bf16.msra.mxu1 %v8333_v8  ;;  %v2472_v40 = vpop.permute.xlu1 %2471  ;;  %v2474_v2 = vpop.permute.xlu0 %2473 }
 0x316   : > { %3412 = vmatprep.subr.bf16.mxu1 %v2376_v13  ;;  %v2490_v20 = vsel %vm460_vm1, %v2470_v34, %v2472_v40  ;;  %v2491_v28 = vsel %vm460_vm1, %v2472_v40, %v2474_v2  ;;  %v8724_v34 = vstv %s6977_s20  ;;  %s6990_s20 = sld [smem:[#allocation10 + $0x21]] }
 0x317   : > { %3371 = vmatprep.subr.bf16.mxu0 %v2490_v20 }
 0x318   : > { %3372 = vmatpush1.bf16.msra.mxu0 %v2489_v30  ;;  %v8733_v30 = vstv %s6979_s28  ;;  %s6991_s28 = sld [smem:[#allocation10 + $0x52]] }
 0x319   : > { %3413 = vmatpush1.bf16.msra.mxu1 %v2375_v6  ;;  %v2476_v29 = vpop.permute.xlu1 %2475  ;;  %3373 = vmatprep.subr.bf16.mxu0 %v8333_v8  ;;  %v2618_v3 = vpop.permute.xlu0 %2617  ;;  %12213 = vst [vmem:[#allocation33_spill] sm:$0xff] %v8733_v30 }
 0x31a   : > { %v2492_v37 = vsel %vm460_vm1, %v2474_v2, %v2476_v29  ;;  %v2638_v35 = vsel %vm675_vm2, %v2618_v3, %v2620_v47  ;;  %v2637_v43 = vsel %vm675_vm2, %v8631_v4, %v2618_v3  ;;  %v8730_v2 = vstv %s6978_s26  ;;  %s11949_s26 = smov 126  }
 0x31b   : > { %3414 = vmatprep.subr.bf16.mxu1 %v2492_v37  ;;  %12212 = vst [vmem:[#allocation32_spill] sm:$0xff] %v8730_v2  ;;  %v8738_v29 = vstv %s6982_s21  ;;  %v8741_v37 = vstv %s6983_s22  ;;  %s6992_s21 = sld [smem:[#allocation10 + $0x22]]  ;;  %s6993_s22 = sld [smem:[#allocation10 + $0x53]] }
 0x31c   : > { %3374 = vmatpush1.bf16.msra.mxu0 %v8329_v54  ;;  %12214 = vst [vmem:[#allocation34_spill] sm:$0xff] %v8738_v29  ;;  %12215 = vst [vmem:[#allocation35_spill] sm:$0xff] %v8741_v37 }
 0x31d   : > { %3415 = vmatpush1.bf16.msra.mxu1 %v2491_v28  ;;  %v2624_v41 = vpop.permute.xlu1 %2623  ;;  %3375 = vmatprep.subr.bf16.mxu0 %v2638_v35  ;;  %v2622_v17 = vpop.permute.xlu0 %2621  ;;  %v8746_v35 = vstv %s6984_s23  ;;  %s6996_s23 = sld [smem:[#allocation10 + $0x24]] }
 0x31e   : > { %3416 = vmatprep.subr.bf16.mxu1 %v8381_v44  ;;  %v2640_v59 = vsel %vm675_vm2, %v2622_v17, %v2624_v41  ;;  %v2639_v61 = vsel %vm675_vm2, %v2620_v47, %v2622_v17  ;;  %12216 = vst [vmem:[#allocation36_spill] sm:$0xff] %v8746_v35 }
 0x320   : > { %3376 = vmatpush1.bf16.msra.mxu0 %v2637_v43 }
 0x321   : > { %3417 = vmatpush1.bf16.msra.mxu1 %v8379_v50  ;;  %v2736_v5 = vpop.permute.xlu1 %2735  ;;  %v2734_v54 = vpop.permute.xlu0 %2733 }
 0x322   : > { %3418 = vmatprep.subr.bf16.mxu1 %v2640_v59  ;;  %v2754_v55 = vsel %vm460_vm1, %v2734_v54, %v2736_v5  ;;  %v2753_v10 = vsel %vm460_vm1, %v8640_v7, %v2734_v54  ;;  %v8754_v59 = vstv %s6988_s13  ;;  %v5667_v54 = vld [vmem:[#allocation4 + $0xa9] ss:$8 sm:$0x1]  ;;  %s6998_s13 = sld [smem:[#allocation10 + $0x25]] }
 0x323   : > { %3377 = vmatprep.subr.bf16.mxu0 %v2754_v55  ;;  %12218 = vst [vmem:[#allocation38_spill] sm:$0xff] %v8754_v59 }
 0x324   : > { %3378 = vmatpush1.bf16.msra.mxu0 %v2753_v10 }
 0x325   : > { %3419 = vmatpush1.bf16.msra.mxu1 %v2639_v61  ;;  %v2740_v60 = vpop.permute.xlu1 %2739  ;;  %3379 = vmatprep.subr.bf16.mxu0 %v8379_v50  ;;  %v2738_v4 = vpop.permute.xlu0 %2737 }
 0x326   : > { %v2756_v39 = vsel %vm460_vm1, %v2738_v4, %v2740_v60  ;;  %v2755_v49 = vsel %vm460_vm1, %v2736_v5, %v2738_v4  ;;  %v5633_v5 = vld [vmem:[#allocation4 + $0xa8] ss:$8 sm:$0x1]  ;;  %v8762_v60 = vstv %s6990_s20  ;;  %s8927_s20 = sld [smem:[#allocation10 + $0x34]] }
 0x327   : > { %3420 = vmatprep.subr.bf16.mxu1 %v2756_v39  ;;  %v5637_v10 = vmul.f32 %v8754_v59, %v5633_v5  ;;  %12220 = vst [vmem:[#allocation40_spill] sm:$0xff] %v8762_v60  ;;  %v5697_v4 = vmul.f32 %v8762_v60, %v5633_v5  ;;  %v8765_v39 = vstv %s6991_s28  ;;  %s6927_s28 = sld [smem:[#allocation10 + $0x32]] }
 0x328   : > { %3380 = vmatpush1.bf16.msra.mxu0 %v8333_v8  ;;  %12221 = vst [vmem:[#allocation41_spill] sm:$0xff] %v8765_v39 }
 0x329   : > { %3421 = vmatpush1.bf16.msra.mxu1 %v2755_v49  ;;  %v2884_v24 = vpop.permute.xlu1 %2883  ;;  %v2882_v38 = vpop.permute.xlu0 %2881  ;;  %v5723_v49 = vmul.f32 %v8765_v39, %v5667_v54 }
 0x32a   : > { %3422 = vmatprep.subr.bf16.mxu1 %v12208_v63  ;;  %v2902_v7 = vsel %vm675_vm2, %v2882_v38, %v2884_v24  ;;  %v2901_v47 = vsel %vm675_vm2, %v8661_v46, %v2882_v38  ;;  %v8714_v63 = vstv %s6974_s27  ;;  %v5313_v46 = vld [vmem:[#allocation4 + $0xa1] ss:$8 sm:$0x1]  ;;  %s6985_s27 = sld [smem:[#allocation10 + $0x4f]]  ;;  %v8772_v38 = vstv %s6993_s22  ;;  %s6929_s22 = sld [smem:[#allocation10 + $0x33]] }
 0x32b   : > { %3381 = vmatprep.subr.bf16.mxu0 %v2902_v7  ;;  %12210 = vst [vmem:[#allocation30_spill] sm:$0xff] %v8714_v63  ;;  %v5317_v9 = vmul.f32 %v8716_v45, %v5313_v46  ;;  %v5369_v13 = vmul.f32 %v8724_v34, %v5313_v46  ;;  %v5421_v6 = vmul.f32 %v8733_v30, %v5313_v46  ;;  %12223 = vst [vmem:[#allocation43_spill] sm:$0xff] %v8772_v38 }
 0x32c   : > { %3382 = vmatpush1.bf16.msra.mxu0 %v2901_v47  ;;  %v5490_v28 = vmul.f32 %v8741_v37, %v5313_v46  ;;  %v5775_v47 = vmul.f32 %v8772_v38, %v5667_v54 }
 0x32d   : > { %3423 = vmatpush1.bf16.msra.mxu1 %v8381_v44  ;;  %v7115_v50 = vpop.permute.xlu0 %7114  ;;  %v5279_v44 = vld [vmem:[#allocation4 + $0xa0] ss:$8 sm:$0x1]  ;;  %5325 = vrot.lane.b32.xlu0 %v5317_v9, %s11945_s16 }
 0x32e   : > { %v7117_v21 = vunpack.i.h.bf16 %v7115_v50  ;;  %v7116_v12 = vunpack.i.l.bf16 %v7115_v50  ;;  %v5283_v11 = vmul.f32 %v8714_v63, %v5279_v44  ;;  %v5395_v20 = vmul.f32 %v8730_v2, %v5279_v44 }
 0x32f   : > { %3398 = vmatmul.mubr.bf16.vlgmr.msra.gmra.mrb[28].mxu0 %v8466_v0  ;;  %v5463_v3 = vmul.f32 %v8738_v29, %v5279_v44  ;;  %v5517_v41 = vmul.f32 %v8746_v35, %v5279_v44  ;;  %v8778_v50 = vstv %s6996_s23  ;;  %s8937_s23 = sld [smem:[#allocation10 + $0x42]] }
 0x330   : > { %v2904_v8 = vsel %vm675_vm2, %v7116_v12, %v7117_v21  ;;  %v2903_v22 = vsel %vm675_vm2, %v2884_v24, %v7116_v12  ;;  %5291 = vrot.lane.b32.xlu1 %v5283_v11, %s11945_s16  ;;  %v8749_v17 = vstv %s6985_s27  ;;  %s6997_s27 = sld [smem:[#allocation10 + $0x55]]  ;;  %v8770_v24 = vstv %s6992_s21  ;;  %12224 = vst [vmem:[#allocation44_spill] sm:$0xff] %v8778_v50  ;;  %s8932_s21 = sld [smem:[#allocation10 + $0x3b]] }
 0x331   : > { %3424 = vmatprep.subr.bf16.mxu1 %v2904_v8  ;;  %5377 = vrot.lane.b32.xlu0 %v5369_v13, %s11943_s6  ;;  %12217 = vst [vmem:[#allocation37_spill] sm:$0xff] %v8749_v17  ;;  %v5544_v43 = vmul.f32 %v8749_v17, %v5313_v46  ;;  %12222 = vst [vmem:[#allocation42_spill] sm:$0xff] %v8770_v24  ;;  %v5749_v7 = vmul.f32 %v8770_v24, %v5633_v5 }
 0x332   : > { %3425 = vmatpush1.bf16.msra.mxu1 %v2903_v22  ;;  %v5817_v12 = vmul.f32 %v8778_v50, %v5633_v5  ;;  %v8786_v22 = vstv %s6998_s13  ;;  %s11947_s13 = smov 125  }
 0x333   : > { %12226 = vst [vmem:[#allocation46_spill] sm:$0xff] %v8786_v22 }
 0x335   : > { %3441 = vmatmul.mubr.bf16.vlgmr.msra.gmra.mrb[28].mxu1 %v8466_v0  ;;  %v8722_v0 = vstv %s6976_s14  ;;  %5429 = vrot.lane.b32.xlu0 %v5421_v6, %s11941_s24  ;;  %s6989_s14 = sld [smem:[#allocation10 + $0x51]] }
 0x336   : > { %12211 = vst [vmem:[#allocation31_spill] sm:$0xff] %v8722_v0  ;;  %v5343_v40 = vmul.f32 %v8722_v0, %v5279_v44  ;;  %v8780_v21 = vstv %s6997_s27  ;;  %v5871_v44 = vmul.f32 %v8786_v22, %v5633_v5  ;;  %s8947_s27 = sld [smem:[#allocation10 + $0x35]] }
 0x337   : > { %12225 = vst [vmem:[#allocation45_spill] sm:$0xff] %v8780_v21  ;;  %v5844_v8 = vmul.f32 %v8780_v21, %v5667_v54 }
 0x338   : > { %5351 = vrot.lane.b32.xlu1 %v5343_v40, %s11943_s6 }
 0x339   : > { %5498 = vrot.lane.b32.xlu0 %v5490_v28, %s11939_s17 }
 0x33a   : > { %v8794_v6 = vpop.permute.xlu1 %3087 }
 0x33b   : > { %v8756_v55 = vstv %s6989_s14  ;;  %s6999_s14 = sld [smem:[#allocation10 + $0x56]] }
 0x33c   : > { %5403 = vrot.lane.b32.xlu1 %v5395_v20, %s11941_s24  ;;  %12219 = vst [vmem:[#allocation39_spill] sm:$0xff] %v8756_v55  ;;  %v5671_v61 = vmul.f32 %v8756_v55, %v5667_v54 }
 0x33d   : > { %5552 = vrot.lane.b32.xlu0 %v5544_v43, %s11949_s26 }
 0x340   : > { %5471 = vrot.lane.b32.xlu1 %v5463_v3, %s11939_s17 }
 0x341   : > { %5679 = vrot.lane.b32.xlu0 %v5671_v61, %s11945_s16  ;;  %v8788_v42 = vstv %s6999_s14  ;;  %s8969_s14 = sld [smem:[#allocation10 + $0x49]] }
 0x342   : > { %12227 = vst [vmem:[#allocation47_spill] sm:$0xff] %v8788_v42  ;;  %v5898_v46 = vmul.f32 %v8788_v42, %v5667_v54  ;;  %v8803_v54 = vpop.permute.xlu0 %3092 }
 0x344   : > { %5525 = vrot.lane.b32.xlu1 %v5517_v41, %s11949_s26 }
 0x345   : > { %5731 = vrot.lane.b32.xlu0 %v5723_v49, %s11943_s6 }
 0x348   : > { %5645 = vrot.lane.b32.xlu1 %v5637_v10, %s11945_s16  ;;  %s9010_s16 = sld [smem:[#allocation10 + $0x3c]] }
 0x349   : > { %5783 = vrot.lane.b32.xlu0 %v5775_v47, %s11941_s24 }
 0x34c   : > { %5705 = vrot.lane.b32.xlu1 %v5697_v4, %s11943_s6  ;;  %s9002_s6 = sld [smem:[#allocation10 + $0x1]] }
 0x34d   : > { %5852 = vrot.lane.b32.xlu0 %v5844_v8, %s11939_s17 }
 0x350   : > { %5757 = vrot.lane.b32.xlu1 %v5749_v7, %s11941_s24  ;;  %s8991_s24 = sld [smem:[#allocation10 + $0x3a]] }
 0x351   : > { %5906 = vrot.lane.b32.xlu0 %v5898_v46, %s11949_s26 }
 0x354   : > { %5825 = vrot.lane.b32.xlu1 %v5817_v12, %s11939_s17 }
 0x358   : > { %5879 = vrot.lane.b32.xlu1 %v5871_v44, %s11949_s26 }
 0x377   : > { %v3141_v11 = vpop.f32.mrb[16].mxu0 }
 0x378   : > { %v3143_v9 = vpop.f32.mrb[17].mxu0  ;;  %v8797_v28 = vadd.f32 %v3141_v11, %v8794_v6 }
 0x379   : > { %v3145_v40 = vpop.f32.mrb[18].mxu0  ;;  %v8801_v43 = vadd.f32 %v3143_v9, %v8794_v6 }
 0x37a   : > { %v3147_v13 = vpop.f32.mrb[19].mxu0  ;;  %12228 = vst [vmem:[#allocation48_spill] sm:$0xff] %v8797_v28  ;;  %v3584_v10 = vsel %vm3582_vm3, %v8797_v28, -1e+30  ;;  %v8809_v61 = vadd.f32 %v3145_v40, %v8803_v54 }
 0x37b   : > { %12229 = vst [vmem:[#allocation49_spill] sm:$0xff] %v8801_v43  ;;  %v3585_v4 = vsel %vm3582_vm3, %v8801_v43, -1e+30  ;;  %v3616_v49 = vmax.f32 %v3584_v10, -1e+30  ;;  %v8815_v7 = vadd.f32 %v3147_v13, %v8803_v54 }
 0x37c   : > { %12230 = vst [vmem:[#allocation50_spill] sm:$0xff] %v8809_v61  ;;  %v3623_v47 = vmax.f32 %v3585_v4, -1e+30  ;;  %v3451_v12 = vadd.f32 %v8809_v61, %v8797_v28 }
 0x37d   : > { %12231 = vst [vmem:[#allocation51_spill] sm:$0xff] %v8815_v7  ;;  %v3617_v46 = vrot.slane %v3616_v49, 4  ;;  %v3458_v11 = vadd.f32 %v8815_v7, %v8801_v43 }
 0x37e   : > { %v3624_v9 = vrot.slane %v3623_v47, 4  ;;  %v3452_v40 = vrot.slane %v3451_v12, 4 }
 0x37f   : > { %v3618_v4 = vmax.f32 %v3616_v49, %v3617_v46  ;;  %v3459_v61 = vrot.slane %v3458_v11, 4 }
 0x380   : > { %v3625_v28 = vmax.f32 %v3623_v47, %v3624_v9  ;;  %v3453_v7 = vadd.f32 %v3452_v40, %v3451_v12 }
 0x381   : > { %v3619_v19 = vrot.slane %v3618_v4, 2  ;;  %v3460_v27 = vadd.f32 %v3459_v61, %v3458_v11 }
 0x382   : > { %v3626_v57 = vrot.slane %v3625_v28, 2  ;;  %v3454_v22 = vrot.slane %v3453_v7, 2 }
 0x383   : > { %v3620_v46 = vmax.f32 %v3618_v4, %v3619_v19  ;;  %v3461_v47 = vrot.slane %v3460_v27, 2 }
 0x384   : > { %v3627_v40 = vmax.f32 %v3625_v28, %v3626_v57 }
 0x386   : > { %v3628_v59 = vrot.slane %v3627_v40, 1 }
 0x388   : > { %v3629_v29 = vmax.f32 %v3627_v40, %v3628_v59 }
 0x38f   : > { %v3184_v20 = vpop.f32.mrb[16].mxu1 }
 0x390   : > { %v3186_v3 = vpop.f32.mrb[17].mxu1  ;;  %v8820_v8 = vadd.f32 %v3184_v20, %v8794_v6 }
 0x391   : > { %v3188_v41 = vpop.f32.mrb[18].mxu1  ;;  %v8823_v44 = vadd.f32 %v3186_v3, %v8794_v6 }
 0x392   : > { %v3190_v5 = vpop.f32.mrb[19].mxu1  ;;  %12232 = vst [vmem:[#allocation52_spill] sm:$0xff] %v8820_v8  ;;  %v3586_v13 = vsel %vm3582_vm3, %v8820_v8, -1e+30  ;;  %v8831_v10 = vadd.f32 %v3188_v41, %v8803_v54 }
 0x393   : > { %12233 = vst [vmem:[#allocation53_spill] sm:$0xff] %v8823_v44  ;;  %v3587_v20 = vsel %vm3582_vm3, %v8823_v44, -1e+30  ;;  %v8837_v3 = vadd.f32 %v3190_v5, %v8803_v54  ;;  %v3630_v43 = vmax.f32 %v3586_v13, -1e+30  ;;  %v3455_v13 = vadd.f32 %v3454_v22, %v3453_v7 }
 0x394   : > { %12234 = vst [vmem:[#allocation54_spill] sm:$0xff] %v8831_v10  ;;  %v3637_v52 = vmax.f32 %v3587_v20, -1e+30  ;;  %v3465_v15 = vadd.f32 %v8831_v10, %v8820_v8  ;;  %v3621_v22 = vrot.slane %v3620_v46, 1 }
 0x395   : > { %12235 = vst [vmem:[#allocation55_spill] sm:$0xff] %v8837_v3  ;;  %v3472_v41 = vadd.f32 %v8837_v3, %v8823_v44  ;;  %v3631_v50 = vrot.slane %v3630_v43, 4 }
 0x396   : > { %v3638_v24 = vrot.slane %v3637_v52, 4  ;;  %v3466_v5 = vrot.slane %v3465_v15, 4 }
 0x397   : > { %v3473_v60 = vrot.slane %v3472_v41, 4  ;;  %v3632_v20 = vmax.f32 %v3630_v43, %v3631_v50  ;;  %v3462_v43 = vadd.f32 %v3461_v47, %v3460_v27  ;;  %v3622_v27 = vmax.f32 %v3620_v46, %v3621_v22 }
 0x398   : > { %v3639_v11 = vmax.f32 %v3637_v52, %v3638_v24  ;;  %v3467_v44 = vadd.f32 %v3466_v5, %v3465_v15  ;;  %v7274_v52 = vmov 1966171168  }
 0x399   : > { %v3765_v15 = vunpack.c.l.s4 %v7274_v52  ;;  %v3633_v7 = vrot.slane %v3632_v20, 2  ;;  %v3463_v47 = vrot.slane %v3462_v43, 1 }
 0x39b   : > { %v3766_v39 = vunpack.c.0.s8 %v3765_v15  ;;  %v3634_v55 = vmax.f32 %v3632_v20, %v3633_v7  ;;  %v3464_v20 = vadd.f32 %v3463_v47, %v3462_v43 }
 0x39d   : > { %v8866_v17 = vsub.s32 %v3766_v39, %v8003_v56  ;;  %v3635_v37 = vrot.slane %v3634_v55, 1  ;;  %v3564_v30 = vmul.f32 0.25, %v3464_v20 }
 0x39f   : > { %v3636_v43 = vmax.f32 %v3634_v55, %v3635_v37 }
 0x3a7   : > { %v3227_v49 = vpop.f32.mrb[20].mxu0 }
 0x3a8   : > { %v8844_v12 = vadd.f32 %v3227_v49, %v8794_v6  ;;  %v3229_v9 = vpop.f32.mrb[21].mxu0  ;;  %v3474_v49 = vadd.f32 %v3473_v60, %v3472_v41  ;;  %v3468_v41 = vrot.slane %v3467_v44, 2 }
 0x3a9   : > { %v8847_v3 = vadd.f32 %v3229_v9, %v8794_v6  ;;  %v3231_v61 = vpop.f32.mrb[22].mxu0 }
 0x3aa   : > { %12236 = vst [vmem:[#allocation56_spill] sm:$0xff] %v8844_v12  ;;  %v3588_v10 = vsel %vm3582_vm3, %v8844_v12, -1e+30  ;;  %v8853_v19 = vadd.f32 %v3231_v61, %v8803_v54  ;;  %v3233_v4 = vpop.f32.mrb[23].mxu0  ;;  %v3475_v42 = vrot.slane %v3474_v49, 2  ;;  %v3469_v35 = vadd.f32 %v3468_v41, %v3467_v44 }
 0x3ab   : > { %12237 = vst [vmem:[#allocation57_spill] sm:$0xff] %v8847_v3  ;;  %v3644_v8 = vmax.f32 %v3588_v10, -1e+30  ;;  %v3589_v57 = vsel %vm3582_vm3, %v8847_v3, -1e+30  ;;  %v8859_v50 = vadd.f32 %v3233_v4, %v8803_v54  ;;  %v3640_v10 = vrot.slane %v3639_v11, 2 }
 0x3ac   : > { %12238 = vst [vmem:[#allocation58_spill] sm:$0xff] %v8853_v19  ;;  %v3651_v24 = vmax.f32 %v3589_v57, -1e+30  ;;  %v3479_v28 = vadd.f32 %v8853_v19, %v8844_v12  ;;  %v3456_v4 = vrot.slane %v3455_v13, 1  ;;  %v3470_v46 = vrot.slane %v3469_v35, 1 }
 0x3ad   : > { %12239 = vst [vmem:[#allocation59_spill] sm:$0xff] %v8859_v50  ;;  %v3645_v5 = vrot.slane %v3644_v8, 4  ;;  %v3486_v60 = vadd.f32 %v8859_v50, %v8847_v3  ;;  %v3641_v12 = vmax.f32 %v3639_v11, %v3640_v10  ;;  %v3476_v3 = vadd.f32 %v3475_v42, %v3474_v49 }
 0x3ae   : > { %v3652_v9 = vrot.slane %v3651_v24, 4  ;;  %v3480_v61 = vrot.slane %v3479_v28, 4  ;;  %v3457_v50 = vadd.f32 %v3456_v4, %v3455_v13  ;;  %v8872_v44 = vmul.f32 %v3629_v29, %v8028_v1 }
 0x3af   : > { %v3487_v21 = vrot.slane %v3486_v60, 4  ;;  %v3646_v38 = vmax.f32 %v3644_v8, %v3645_v5  ;;  %v3477_v42 = vrot.slane %v3476_v3, 1  ;;  %v3471_v10 = vadd.f32 %v3470_v46, %v3469_v35 }
 0x3b0   : > { %v3653_v52 = vmax.f32 %v3651_v24, %v3652_v9  ;;  %v3481_v57 = vadd.f32 %v3480_v61, %v3479_v28  ;;  %v8869_v24 = vmul.f32 %v3622_v27, %v8023_v62  ;;  %v8874_v59 = vmul.f32 0.25, %v3457_v50 }
 0x3b1   : > { %v3488_v19 = vadd.f32 %v3487_v21, %v3486_v60  ;;  %v3647_v2 = vrot.slane %v3646_v38, 2  ;;  %v3642_v21 = vrot.slane %v3641_v12, 1  ;;  %v3565_v27 = vmul.f32 0.25, %v3471_v10 }
 0x3b2   : > { %v3654_v0 = vrot.slane %v3653_v52, 2  ;;  %v3482_v63 = vrot.slane %v3481_v57, 2  ;;  %v3898_v20 = vcombine.low %v8869_v24, %v8872_v44 }
 0x3b3   : > { %v3489_v8 = vrot.slane %v3488_v19, 2  ;;  %v3648_v13 = vmax.f32 %v3646_v38, %v3647_v2  ;;  %v3643_v60 = vmax.f32 %v3641_v12, %v3642_v21 }
 0x3b4   : > { %v3655_v11 = vmax.f32 %v3653_v52, %v3654_v0  ;;  %v3483_v49 = vadd.f32 %v3482_v63, %v3481_v57  ;;  %v3478_v0 = vadd.f32 %v3477_v42, %v3476_v3  ;;  %v3868_v57 = vmul.f32 %v3636_v43, %v8054_v26 }
 0x3b5   : > { %v3490_v7 = vadd.f32 %v3489_v8, %v3488_v19  ;;  %v3649_v38 = vrot.slane %v3648_v13, 1  ;;  %v3869_v3 = vmul.f32 %v3643_v60, %v8059_v18  ;;  %v3730_v43 = vmul.f32 %v3565_v27, %v8054_v26 }
 0x3b6   : > { %v3270_v22 = vpop.f32.mrb[20].mxu1  ;;  %v3656_v19 = vrot.slane %v3655_v11, 1  ;;  %v3484_v9 = vrot.slane %v3483_v49, 1  ;;  %v3566_v8 = vmul.f32 0.25, %v3478_v0  ;;  %v3728_v26 = vmul.f32 %v8874_v59, %v8023_v62 }
 0x3b7   : > { %v8877_v40 = vadd.f32 %v3270_v22, %v8794_v6  ;;  %v3272_v39 = vpop.f32.mrb[21].mxu1  ;;  %v3491_v4 = vrot.slane %v3490_v7, 1  ;;  %v3650_v42 = vmax.f32 %v3648_v13, %v3649_v38 }
 0x3b8   : > { %v8880_v15 = vadd.f32 %v3272_v39, %v8794_v6  ;;  %v3274_v28 = vpop.f32.mrb[22].mxu1  ;;  %v3657_v39 = vmax.f32 %v3655_v11, %v3656_v19  ;;  %v3731_v60 = vmul.f32 %v3566_v8, %v8059_v18  ;;  %v3729_v18 = vmul.f32 %v3564_v30, %v8028_v1 }
 0x3b9   : > { %12240 = vst [vmem:[#allocation60_spill] sm:$0xff] %v8877_v40  ;;  %v3590_v29 = vsel %vm3582_vm3, %v8877_v40, -1e+30  ;;  %v8886_v50 = vadd.f32 %v3274_v28, %v8803_v54  ;;  %v3276_v5 = vpop.f32.mrb[23].mxu1  ;;  %v3485_v28 = vadd.f32 %v3484_v9, %v3483_v49  ;;  %v3908_v1 = vrot.slane %v3898_v20, %v8866_v17 }
 0x3ba   : > { %12241 = vst [vmem:[#allocation61_spill] sm:$0xff] %v8880_v15  ;;  %v3658_v41 = vmax.f32 %v3590_v29, -1e+30  ;;  %v3591_v63 = vsel %vm3582_vm3, %v8880_v15, -1e+30  ;;  %v8894_v55 = vadd.f32 %v3276_v5, %v8803_v54  ;;  %v3492_v5 = vadd.f32 %v3491_v4, %v3490_v7 }
 0x3bb   : > { %12242 = vst [vmem:[#allocation62_spill] sm:$0xff] %v8886_v50  ;;  %v3665_v2 = vmax.f32 %v3591_v63, -1e+30  ;;  %v3493_v37 = vadd.f32 %v8886_v50, %v8877_v40  ;;  %v3871_v13 = vmul.f32 %v3657_v39, %v8105_v53  ;;  %v3567_v11 = vmul.f32 0.25, %v3485_v28 }
 0x3bc   : > { %12243 = vst [vmem:[#allocation63_spill] sm:$0xff] %v8894_v55  ;;  %v3659_v61 = vrot.slane %v3658_v41, 4  ;;  %v3500_v52 = vadd.f32 %v8894_v55, %v8880_v15  ;;  %v3899_v55 = vcombine.low %v3868_v57, %v3869_v3  ;;  %v3568_v7 = vmul.f32 0.25, %v3492_v5 }
 0x3bd   : > { %v3666_v12 = vrot.slane %v3665_v2, 4  ;;  %v3494_v35 = vrot.slane %v3493_v37, 4  ;;  %v3732_v57 = vmul.f32 %v3567_v11, %v8096_v51  ;;  %v3760_v30 = vcombine.low %v3728_v26, %v3729_v18 }
 0x3be   : > { %v3660_v47 = vmax.f32 %v3658_v41, %v3659_v61  ;;  %v3501_v22 = vrot.slane %v3500_v52, 4  ;;  %v3915_v9 = vrot.slane %v3899_v55, %v8866_v17  ;;  %v3733_v3 = vmul.f32 %v3568_v7, %v8105_v53 }
 0x3bf   : > { %v3667_v21 = vmax.f32 %v3665_v2, %v3666_v12  ;;  %v3495_v46 = vadd.f32 %v3494_v35, %v3493_v37  ;;  %v3870_v2 = vmul.f32 %v3650_v42, %v8096_v51  ;;  %v3761_v35 = vcombine.low %v3730_v43, %v3731_v60 }
 0x3c0   : > { %v3661_v29 = vrot.slane %v3660_v47, 2  ;;  %v3502_v40 = vadd.f32 %v3501_v22, %v3500_v52  ;;  %v3930_v27 = vcombine.low %v3908_v1, %v3915_v9  ;;  %v3762_v8 = vcombine.low %v3732_v57, %v3733_v3 }
 0x3c1   : > { %v3668_v63 = vrot.slane %v3667_v21, 2  ;;  %v3496_v50 = vrot.slane %v3495_v46, 2  ;;  %v3900_v52 = vcombine.low %v3870_v2, %v3871_v13  ;;  %v11962_v20 = vstv %s8927_s20 }
 0x3c2   : > { %v3662_v15 = vmax.f32 %v3660_v47, %v3661_v29  ;;  %v3503_v0 = vrot.slane %v3502_v40, 2  ;;  %v3777_v47 = vrot.slane %v3761_v35, %v8866_v17  ;;  %v3938_v39 = vrot.slane %v3930_v27, %v8866_v17 }
 0x3c3   : > { %v3669_v10 = vmax.f32 %v3667_v21, %v3668_v63  ;;  %v3497_v41 = vadd.f32 %v3496_v50, %v3495_v46  ;;  %v3922_v51 = vrot.slane %v3900_v52, %v8866_v17  ;;  %v3770_v46 = vrot.slane %v3760_v30, %v8866_v17 }
 0x3c4   : > { %v3663_v49 = vrot.slane %v3662_v15, 1  ;;  %v3504_v19 = vadd.f32 %v3503_v0, %v3502_v40 }
 0x3c5   : > { %v3670_v37 = vrot.slane %v3669_v10, 1  ;;  %v3498_v38 = vrot.slane %v3497_v41, 1  ;;  %v3792_v28 = vcombine.low %v3770_v46, %v3777_v47 }
 0x3c6   : > { %v3664_v50 = vmax.f32 %v3662_v15, %v3663_v49  ;;  %v3505_v12 = vrot.slane %v3504_v19, 1 }
 0x3c7   : > { %v3671_v61 = vmax.f32 %v3669_v10, %v3670_v37  ;;  %v3499_v4 = vadd.f32 %v3498_v38, %v3497_v41  ;;  %v3800_v60 = vrot.slane %v3792_v28, %v8866_v17  ;;  %v4023_v37 = vld [vmem:[#allocation4 + $0x1] ss:$8 sm:$0xf]  ;;  %v11960_v28 = vstv %s8937_s23 }
 0x3c8   : > { %v3872_v40 = vmul.f32 %v3664_v50, %v8155_v16  ;;  %v3506_v62 = vadd.f32 %v3505_v12, %v3504_v19  ;;  %v8945_v50 = vstv %s6927_s28  ;;  %s8972_s28 = sld [smem:[#allocation10 + $0x36]] }
 0x3c9   : > { %v3873_v24 = vmul.f32 %v3671_v61, %v8164_v23  ;;  %v3569_v44 = vmul.f32 0.25, %v3499_v4 }
 0x3ca   : > { %v3570_v55 = vmul.f32 0.25, %v3506_v62 }
 0x3cb   : > { %v3901_v59 = vcombine.low %v3872_v40, %v3873_v24  ;;  %v3734_v15 = vmul.f32 %v3569_v44, %v8155_v16  ;;  %v3784_v16 = vrot.slane %v3762_v8, %v8866_v17  ;;  %v11961_v24 = vstv %s8932_s21 }
 0x3cc   : > { %v3735_v53 = vmul.f32 %v3570_v55, %v8164_v23 }
 0x3cd   : > { %v3929_v21 = vrot.slane %v3901_v59, %v8866_v17  ;;  %v8967_v59 = vstv %s6929_s22  ;;  %s8981_s22 = sld [smem:[#allocation10 + $0x37]] }
 0x3ce   : > { %v3763_v42 = vcombine.low %v3734_v15, %v3735_v53 }
 0x3cf   : > { %v3931_v22 = vcombine.low %v3922_v51, %v3929_v21 }
 0x3d0   : > { %v3791_v5 = vrot.slane %v3763_v42, %v8866_v17 }
 0x3d1   : > { %v3945_v29 = vrot.slane %v3931_v22, %v8866_v17 }
 0x3d2   : > { %v3793_v43 = vcombine.low %v3784_v16, %v3791_v5 }
 0x3d3   : > { %v3946_v63 = vcombine.low %v3938_v39, %v3945_v29 }
 0x3d4   : > { %v3807_v23 = vrot.slane %v3793_v43, %v8866_v17 }
 0x3d5   : > { %3999 = vst [vmem:[#allocation4 + $0x21] ss:$8 sm:$0xf] %v3946_v63  ;;  %4000 = vst [vmem:[#allocation4 + $0x21] ss:$8 sm:$0xf0] %v3946_v63 }
 0x3d6   : > { %v3808_v10 = vcombine.low %v3800_v60, %v3807_v23  ;;  %v3313_v41 = vpop.f32.mrb[24].mxu0 }
 0x3d7   : > { %v3315_v0 = vpop.f32.mrb[25].mxu0  ;;  %v8930_v2 = vadd.f32 %v3313_v41, %v8794_v6 }
 0x3d8   : > { %3861 = vst [vmem:[#allocation4 + $0x20] ss:$8 sm:$0xf] %v3808_v10  ;;  %3862 = vst [vmem:[#allocation4 + $0x20] ss:$8 sm:$0xf0] %v3808_v10  ;;  %v8935_v49 = vadd.f32 %v3315_v0, %v8794_v6 }
 0x3d9   : > { %12244 = vst [vmem:[#allocation64_spill] sm:$0xff] %v8930_v2  ;;  %v3317_v13 = vpop.f32.mrb[26].mxu0  ;;  %v8942_v38 = vsel %vm3582_vm3, %v8930_v2, -1e+30 }
 0x3da   : > { %v3319_v11 = vpop.f32.mrb[27].mxu0  ;;  %12245 = vst [vmem:[#allocation65_spill] sm:$0xff] %v8935_v49  ;;  %v3593_v9 = vsel %vm3582_vm3, %v8935_v49, -1e+30  ;;  %v3672_v12 = vmax.f32 %v8942_v38, -1e+30  ;;  %v8956_v35 = vadd.f32 %v3317_v13, %v8803_v54 }
 0x3db   : > { %v3679_v1 = vmax.f32 %v3593_v9, -1e+30  ;;  %v8964_v30 = vadd.f32 %v3319_v11, %v8803_v54  ;;  %v9015_v11 = vstv %s8947_s27  ;;  %s12253_s27 = smov 125  }
 0x3dc   : > { %v4183_v7 = vld [vmem:[#allocation4 + $0x9] ss:$8 sm:$0xf]  ;;  %12246 = vst [vmem:[#allocation66_spill] sm:$0xff] %v8956_v35  ;;  %v3507_v27 = vadd.f32 %v8956_v35, %v8930_v2  ;;  %v3673_v46 = vrot.slane %v3672_v12, 4 }
 0x3dd   : > { %v4184_v19 = vld [vmem:[#allocation4 + $0x9] ss:$8 sm:$0xf0]  ;;  %12247 = vst [vmem:[#allocation67_spill] sm:$0xff] %v8964_v30  ;;  %v3680_v16 = vrot.slane %v3679_v1, 4  ;;  %v3514_v29 = vadd.f32 %v8964_v30, %v8935_v49 }
 0x3de   : > { %v4185_v26 = vor.u32 %v4184_v19, %v4183_v7  ;;  %v4024_v18 = vld [vmem:[#allocation4 + $0x1] ss:$8 sm:$0xf0]  ;;  %v3508_v41 = vrot.slane %v3507_v27, 4 }
 0x3df   : > { %v8952_v61 = vor.u32 %v4024_v18, %v4023_v37  ;;  %v4540_v4 = vld [vmem:[#allocation4 + $0x11] ss:$8 sm:$0xf]  ;;  %v3681_v18 = vmax.f32 %v3679_v1, %v3680_v16  ;;  %v3515_v9 = vrot.slane %v3514_v29, 4  ;;  %v9055_v16 = vstv %s8981_s22  ;;  %s12257_s22 = smov 123  }
 0x3e0   : > { %v4191_v52 = vmul.f32 %v11962_v20, %v4185_v26  ;;  %v4541_v57 = vld [vmem:[#allocation4 + $0x11] ss:$8 sm:$0xf0]  ;;  %v3674_v26 = vmax.f32 %v3672_v12, %v3673_v46  ;;  %v9120_v20 = vstv %s9050_s5  ;;  %s9302_s5 = sld [smem:[#allocation10 + $0x48]] }
 0x3e1   : > { %v4070_v40 = vmul.f32 %v8945_v50, %v8952_v61  ;;  %v4542_v3 = vor.u32 %v4541_v57, %v4540_v4  ;;  %v4894_v44 = vld [vmem:[#allocation4 + $0x19] ss:$8 sm:$0xf]  ;;  %v4125_v39 = vmul.f32 %v8967_v59, %v8952_v61  ;;  %12267 = vst [vmem:[#allocation82_spill] sm:$0xff] %v9120_v20 }
 0x3e2   : > { %v4895_v62 = vld [vmem:[#allocation4 + $0x19] ss:$8 sm:$0xf0]  ;;  %4195 = vrot.lane.b32.xlu1 %v4191_v52, %s11947_s13  ;;  %v3356_v15 = vpop.f32.mrb[24].mxu1 }
 0x3e3   : > { %4076 = vrot.lane.b32.xlu0 %v4070_v40, %s11939_s17  ;;  %v4246_v55 = vld [vmem:[#allocation4 + $0x9] ss:$8 sm:$0xf]  ;;  %v8977_v47 = vadd.f32 %v3356_v15, %v8794_v6  ;;  %v3358_v51 = vpop.f32.mrb[25].mxu1  ;;  %v4548_v8 = vmul.f32 %v11961_v24, %v4542_v3  ;;  %v4896_v21 = vor.u32 %v4895_v62, %v4894_v44  ;;  %s8989_s17 = sld [smem:[#allocation10 + $0x39]]  ;;  %v3509_v44 = vadd.f32 %v3508_v41, %v3507_v27 }
 0x3e4   : > { %v4247_v53 = vld [vmem:[#allocation4 + $0x9] ss:$8 sm:$0xf0]  ;;  %v8984_v22 = vadd.f32 %v3358_v51, %v8794_v6  ;;  %v3360_v42 = vpop.f32.mrb[26].mxu1  ;;  %v11959_v62 = vstv %s8969_s14  ;;  %v9035_v15 = vstv %s8972_s28  ;;  %v3675_v27 = vrot.slane %v3674_v26, 2  ;;  %s9044_s28 = sld [smem:[#allocation10 + $0x4]] }
 0x3e5   : > { %12248 = vst [vmem:[#allocation68_spill] sm:$0xff] %v8977_v47  ;;  %v3594_v5 = vsel %vm3582_vm3, %v8977_v47, -1e+30  ;;  %v8999_v63 = vadd.f32 %v3360_v42, %v8803_v54  ;;  %v3362_v43 = vpop.f32.mrb[27].mxu1  ;;  %v9008_v10 = vor.u32 %v4247_v53, %v4246_v55  ;;  %v4902_v13 = vmul.f32 %v11960_v28, %v4896_v21 }
 0x3e6   : > { %12249 = vst [vmem:[#allocation69_spill] sm:$0xff] %v8984_v22  ;;  %4552 = vrot.lane.b32.xlu1 %v4548_v8, %s11947_s13  ;;  %v3686_v60 = vmax.f32 %v3594_v5, -1e+30  ;;  %v3595_v23 = vsel %vm3582_vm3, %v8984_v22, -1e+30  ;;  %s9017_s13 = sld [smem:[#allocation10 + $0x2]]  ;;  %v9022_v38 = vadd.f32 %v3362_v43, %v8803_v54  ;;  %v3516_v53 = vadd.f32 %v3515_v9, %v3514_v29 }
 0x3e7   : > { %12250 = vst [vmem:[#allocation70_spill] sm:$0xff] %v8999_v63  ;;  %4131 = vrot.lane.b32.xlu0 %v4125_v39, %s11949_s26  ;;  %12251 = vst [vmem:[#allocation71_spill] sm:$0xff] %v9008_v10  ;;  %v3693_v0 = vmax.f32 %v3595_v23, -1e+30  ;;  %v3521_v37 = vadd.f32 %v8999_v63, %v8977_v47  ;;  %s9024_s26 = sld [smem:[#allocation10 + $0x3]]  ;;  %v4255_v40 = vmul.f32 %v9015_v11, %v9008_v10  ;;  %v3682_v21 = vrot.slane %v3681_v18, 2 }
 0x3e8   : > { %v3687_v7 = vrot.slane %v3686_v60, 4  ;;  %12252 = vst [vmem:[#allocation72_spill] sm:$0xff] %v9022_v38  ;;  %v5245_v19 = vld [vmem:[#allocation4 + $0x21] ss:$8 sm:$0xf]  ;;  %v3528_v57 = vadd.f32 %v9022_v38, %v8984_v22  ;;  %v4308_v39 = vmul.f32 %v9035_v15, %v9008_v10  ;;  %v9060_v43 = vstv %s9002_s6  ;;  %s9075_s6 = sld [smem:[#allocation10 + $0x45]] }
 0x3e9   : > { %v3694_v4 = vrot.slane %v3693_v0, 4  ;;  %v5246_v52 = vld [vmem:[#allocation4 + $0x21] ss:$8 sm:$0xf0]  ;;  %v3522_v55 = vrot.slane %v3521_v37, 4  ;;  %12255 = vst [vmem:[#allocation73_spill] sm:$0xff] %v9060_v43 }
 0x3ea   : > { %4906 = vrot.lane.b32.xlu1 %v4902_v13, %s12253_s27  ;;  %v4005_v3 = vld [vmem:[#allocation4] ss:$8 sm:$0xf]  ;;  %v3688_v12 = vmax.f32 %v3686_v60, %v3687_v7  ;;  %v5247_v51 = vor.u32 %v5246_v52, %v5245_v19  ;;  %v3529_v46 = vrot.slane %v3528_v57, 4  ;;  %v9063_v60 = vstv %s8989_s17  ;;  %s9073_s17 = sld [smem:[#allocation10 + $0x9]] }
 0x3eb   : > { %v3695_v1 = vmax.f32 %v3693_v0, %v3694_v4  ;;  %4261 = vrot.lane.b32.xlu0 %v4255_v40, %s12254_s3  ;;  %v4006_v8 = vld [vmem:[#allocation4] ss:$8 sm:$0xf0]  ;;  %12256 = vst [vmem:[#allocation74_spill] sm:$0xff] %v9063_v60  ;;  %v3510_v29 = vrot.slane %v3509_v44, 2  ;;  %v3523_v0 = vadd.f32 %v3522_v55, %v3521_v37  ;;  %v3676_v13 = vmax.f32 %v3674_v26, %v3675_v27 }
 0x3ec   : > { %v5252_v42 = vmul.f32 %v11959_v62, %v5247_v51  ;;  %v9057_v5 = vor.u32 %v4006_v8, %v4005_v3  ;;  %v3689_v23 = vrot.slane %v3688_v12, 2  ;;  %v3683_v7 = vmax.f32 %v3681_v18, %v3682_v21  ;;  %v4152_v26 = vld [vmem:[#allocation4 + $0x8] ss:$8 sm:$0xf] }
 0x3ed   : > { %v3696_v41 = vrot.slane %v3695_v1, 2  ;;  %v3517_v19 = vrot.slane %v3516_v53, 2  ;;  %v3530_v9 = vadd.f32 %v3529_v46, %v3528_v57  ;;  %v4361_v37 = vmul.f32 %v9055_v16, %v9008_v10  ;;  %v4153_v18 = vld [vmem:[#allocation4 + $0x8] ss:$8 sm:$0xf0] }
 0x3ee   : > { %5256 = vrot.lane.b32.xlu1 %v5252_v42, %s12253_s27  ;;  %v4041_v4 = vmul.f32 %v9060_v43, %v9057_v5  ;;  %v9082_v52 = vstv %s9017_s13  ;;  %v9085_v40 = vstv %s8991_s24  ;;  %v9093_v3 = vstv %s9010_s16  ;;  %s12263_s24 = smov 122   ;;  %s12264_s13 = smov 127   ;;  %v4212_v28 = vld [vmem:[#allocation4 + $0x8] ss:$8 sm:$0xf0] }
 0x3ef   : > { %4314 = vrot.lane.b32.xlu0 %v4308_v39, %s12257_s22  ;;  %12258 = vst [vmem:[#allocation75_spill] sm:$0xff] %v9082_v52  ;;  %12259 = vst [vmem:[#allocation76_spill] sm:$0xff] %v9085_v40  ;;  %v9096_v55 = vstv %s9031_s0  ;;  %v9099_v51 = vstv %s9037_s1  ;;  %v3511_v8 = vadd.f32 %v3510_v29, %v3509_v44  ;;  %v3690_v27 = vmax.f32 %v3688_v12, %v3689_v23  ;;  %s9107_s0 = sld [smem:[#allocation10 + $0x31]]  ;;  %v4602_v23 = vld [vmem:[#allocation4 + $0x11] ss:$8 sm:$0xf] }
 0x3f0   : > { %12260 = vst [vmem:[#allocation77_spill] sm:$0xff] %v9093_v3  ;;  %12261 = vst [vmem:[#allocation78_spill] sm:$0xff] %v9096_v55  ;;  %v3697_v21 = vmax.f32 %v3695_v1, %v3696_v41  ;;  %v3524_v46 = vrot.slane %v3523_v0, 2  ;;  %v3677_v42 = vrot.slane %v3676_v13, 1  ;;  %v3684_v39 = vrot.slane %v3683_v7, 1  ;;  %s12270_s1 = smov 126  }
 0x3f1   : > { %12262 = vst [vmem:[#allocation79_spill] sm:$0xff] %v9099_v51  ;;  %v3518_v62 = vadd.f32 %v3517_v19, %v3516_v53  ;;  %v3531_v44 = vrot.slane %v3530_v9, 2  ;;  %v4430_v12 = vmul.f32 %v9063_v60, %v9008_v10  ;;  %v4097_v1 = vmul.f32 %v9082_v52, %v9057_v5  ;;  %v4603_v41 = vld [vmem:[#allocation4 + $0x11] ss:$8 sm:$0xf0]  ;;  %s6970_s16 = sld [smem:[#allocation10 + $0x17]] }
 0x3f2   : > { %4047 = vrot.lane.b32.xlu1 %v4041_v4, %s12264_s13  ;;  %v4154_v29 = vor.u32 %v4153_v18, %v4152_v26  ;;  %v4211_v4 = vld [vmem:[#allocation4 + $0x8] ss:$8 sm:$0xf]  ;;  %v9117_v24 = vstv %s9044_s28  ;;  %v9123_v53 = vstv %s9042_s4  ;;  %v9126_v19 = vstv %s9052_s15  ;;  %s9132_s4 = sld [smem:[#allocation10 + $0xd]]  ;;  %s6964_s15 = sld [smem:[#allocation10 + $0x14]] }
 0x3f3   : > { %4367 = vrot.lane.b32.xlu0 %v4361_v37, %s12263_s24  ;;  %v9114_v37 = vstv %s9039_s2  ;;  %12266 = vst [vmem:[#allocation81_spill] sm:$0xff] %v9117_v24  ;;  %12268 = vst [vmem:[#allocation83_spill] sm:$0xff] %v9123_v53  ;;  %v3512_v57 = vrot.slane %v3511_v8, 1  ;;  %v3691_v38 = vrot.slane %v3690_v27, 1  ;;  %v3698_v26 = vrot.slane %v3697_v21, 1  ;;  %s9130_s2 = sld [smem:[#allocation10]] }
 0x3f4   : > { %12265 = vst [vmem:[#allocation80_spill] sm:$0xff] %v9114_v37  ;;  %12269 = vst [vmem:[#allocation84_spill] sm:$0xff] %v9126_v19  ;;  %v3525_v18 = vadd.f32 %v3524_v46, %v3523_v0  ;;  %v3678_v22 = vmax.f32 %v3676_v13, %v3677_v42  ;;  %v3685_v63 = vmax.f32 %v3683_v7, %v3684_v39  ;;  %v3519_v30 = vrot.slane %v3518_v62, 1  ;;  %v9230_v43 = vld [vmem:[#allocation4 + $0x10] ss:$8 sm:$0xf0] }
 0x3f5   : > { %v3532_v47 = vadd.f32 %v3531_v44, %v3530_v9  ;;  %v4484_v49 = vmul.f32 %v9085_v40, %v9008_v10  ;;  %v12271_v35 = vstv %s9024_s26  ;;  %v9138_v0 = vor.u32 %v4603_v41, %v4602_v23  ;;  %s9444_s28 = sld [smem:[#allocation10 + $0x18]] }
 0x3f6   : > { %4103 = vrot.lane.b32.xlu1 %v4097_v1, %s12270_s1  ;;  %v4160_v2 = vmul.f32 %v12271_v35, %v4154_v29  ;;  %v9140_v46 = vor.u32 %v4212_v28, %v4211_v4  ;;  %v9146_v1 = vstv %s9067_s30  ;;  %v9149_v13 = vstv %s9073_s17  ;;  %v4957_v4 = vld [vmem:[#allocation4 + $0x19] ss:$8 sm:$0xf0]  ;;  %s9362_s30 = sld [smem:[#allocation10 + $0x11]]  ;;  %s7011_s17 = sld [smem:[#allocation10 + $0x5c]] }
 0x3f7   : > { %4436 = vrot.lane.b32.xlu0 %v4430_v12, %s12264_s13  ;;  %12272 = vst [vmem:[#allocation85_spill] sm:$0xff] %v9138_v0  ;;  %v9143_v12 = vstv %s9065_s9  ;;  %12275 = vst [vmem:[#allocation88_spill] sm:$0xff] %v9146_v1  ;;  %v9152_v7 = vstv %s9071_s12  ;;  %v3692_v9 = vmax.f32 %v3690_v27, %v3691_v38  ;;  %v3699_v42 = vmax.f32 %v3697_v21, %v3698_v26  ;;  %s9374_s9 = sld [smem:[#allocation10 + $0x12]]  ;;  %s6962_s12 = sld [smem:[#allocation10 + $0x13]] }
 0x3f8   : > { %12273 = vst [vmem:[#allocation86_spill] sm:$0xff] %v9140_v46  ;;  %12274 = vst [vmem:[#allocation87_spill] sm:$0xff] %v9143_v12  ;;  %v3526_v35 = vrot.slane %v3525_v18, 1  ;;  %v9158_v39 = vmul.f32 %v3678_v22, %v8204_v25  ;;  %v3513_v44 = vadd.f32 %v3512_v57, %v3511_v8  ;;  %v3533_v29 = vrot.slane %v3532_v47, 1 }
 0x3f9   : > { %12276 = vst [vmem:[#allocation89_spill] sm:$0xff] %v9149_v13  ;;  %v9161_v23 = vstv %s9107_s0  ;;  %v9164_v41 = vmul.f32 %v3685_v63, %v8213_v14  ;;  %v3520_v38 = vadd.f32 %v3519_v30, %v3518_v62  ;;  %v4611_v27 = vmul.f32 %v9093_v3, %v9138_v0  ;;  %v4956_v62 = vld [vmem:[#allocation4 + $0x19] ss:$8 sm:$0xf]  ;;  %s7007_s0 = sld [smem:[#allocation10 + $0x5a]] }
 0x3fa   : > { %4164 = vrot.lane.b32.xlu1 %v4160_v2, %s12253_s27  ;;  %12277 = vst [vmem:[#allocation90_spill] sm:$0xff] %v9161_v23  ;;  %v4220_v2 = vmul.f32 %v9117_v24, %v9140_v46  ;;  %v9174_v22 = vstv %s9075_s6  ;;  %v9177_v57 = vstv %s9103_s29  ;;  %v9180_v8 = vstv %s9105_s8  ;;  %s9313_s8 = sld [smem:[#allocation10 + $0xf]]  ;;  %s9335_s29 = sld [smem:[#allocation10 + $0x10]] }
 0x3fb   : > { %4490 = vrot.lane.b32.xlu0 %v4484_v49, %s12270_s1  ;;  %v9171_v49 = vstv %s9089_s19  ;;  %v9183_v21 = vmul.f32 %v3692_v9, %v8250_v31  ;;  %v9186_v30 = vmul.f32 %v3699_v42, %v8259_v36  ;;  %v3527_v63 = vadd.f32 %v3526_v35, %v3525_v18  ;;  %v4568_v42 = vld [vmem:[#allocation4 + $0x10] ss:$8 sm:$0xf]  ;;  %s6968_s19 = sld [smem:[#allocation10 + $0x16]]  ;;  %s7013_s6 = sld [smem:[#allocation10 + $0x5d]] }
 0x3fc   : > { %v9191_v26 = vstv %s9130_s2  ;;  %v9193_v28 = vmul.f32 0.25, %v3513_v44  ;;  %v3534_v10 = vadd.f32 %v3533_v29, %v3532_v47  ;;  %v9196_v24 = vstv %s9132_s4  ;;  %s7002_s2 = sld [smem:[#allocation10 + $0x27]]  ;;  %s7006_s4 = sld [smem:[#allocation10 + $0x29]] }
 0x3fd   : > { %12278 = vst [vmem:[#allocation91_spill] sm:$0xff] %v9191_v26  ;;  %v4033_v9 = vmul.f32 %v9161_v23, %v8952_v61  ;;  %v9202_v18 = vmul.f32 0.25, %v3520_v38  ;;  %v4663_v35 = vmul.f32 %v9096_v55, %v9138_v0  ;;  %v4715_v29 = vmul.f32 %v9099_v51, %v9138_v0 }
 0x3fe   : > { %4226 = vrot.lane.b32.xlu1 %v4220_v2, %s12254_s3  ;;  %v9213_v61 = vor.u32 %v4957_v4, %v4956_v62  ;;  %v4015_v38 = vmul.f32 %v9191_v26, %v9057_v5  ;;  %v9219_v52 = vmul.f32 0.25, %v3527_v63  ;;  %v4334_v62 = vmul.f32 %v9143_v12, %v9140_v46  ;;  %v9228_v4 = vld [vmem:[#allocation4 + $0x10] ss:$8 sm:$0xf] }
 0x3ff   : > { %4617 = vrot.lane.b32.xlu0 %v4611_v27, %s12254_s3  ;;  %v4281_v27 = vmul.f32 %v9120_v20, %v9140_v46  ;;  %v9232_v5 = vmul.f32 0.25, %v3534_v10  ;;  %v4403_v55 = vmul.f32 %v9146_v1, %v9140_v46  ;;  %v4838_v23 = vmul.f32 %v9123_v53, %v9138_v0 }
 0x400   : > { %v9254_v26 = vadd.f32 %v4033_v9, %v4015_v38 }
 0x402   : > { %v3399_v2 = vpop.f32.mrb[28].mxu0  ;;  %4287 = vrot.lane.b32.xlu1 %v4281_v27, %s12257_s22  ;;  %12283 = vst [vmem:[#allocation96_spill] sm:$0xff] %v9254_v26 }
 0x403   : > { %v9209_v44 = vadd.f32 %v3399_v2, %v8794_v6  ;;  %v3401_v47 = vpop.f32.mrb[29].mxu0  ;;  %4669 = vrot.lane.b32.xlu0 %v4663_v35, %s12257_s22 }
 0x404   : > { %v9224_v2 = vadd.f32 %v3401_v47, %v8794_v6  ;;  %v3403_v20 = vpop.f32.mrb[30].mxu0  ;;  %v4784_v47 = vmul.f32 %v9114_v37, %v9138_v0  ;;  %v4569_v37 = vld [vmem:[#allocation4 + $0x10] ss:$8 sm:$0xf0] }
 0x405   : > { %12279 = vst [vmem:[#allocation92_spill] sm:$0xff] %v9209_v44  ;;  %v3596_v63 = vsel %vm3582_vm3, %v9209_v44, -1e+30  ;;  %v9238_v35 = vadd.f32 %v3403_v20, %v8803_v54  ;;  %v3405_v27 = vpop.f32.mrb[31].mxu0  ;;  %v9272_v1 = vor.u32 %v4569_v37, %v4568_v42 }
 0x406   : > { %12280 = vst [vmem:[#allocation93_spill] sm:$0xff] %v9224_v2  ;;  %v3700_v51 = vmax.f32 %v3596_v63, -1e+30  ;;  %v3597_v12 = vsel %vm3582_vm3, %v9224_v2, -1e+30  ;;  %v9246_v10 = vadd.f32 %v3405_v27, %v8803_v54  ;;  %4340 = vrot.lane.b32.xlu1 %v4334_v62, %s12263_s24 }
 0x407   : > { %12281 = vst [vmem:[#allocation94_spill] sm:$0xff] %v9238_v35  ;;  %v3707_v3 = vmax.f32 %v3597_v12, -1e+30  ;;  %v3535_v20 = vadd.f32 %v9238_v35, %v9209_v44  ;;  %4721 = vrot.lane.b32.xlu0 %v4715_v29, %s12263_s24  ;;  %v4457_v12 = vmul.f32 %v9149_v13, %v9140_v46  ;;  %v4965_v35 = vmul.f32 %v9126_v19, %v9213_v61 }
 0x408   : > { %12282 = vst [vmem:[#allocation95_spill] sm:$0xff] %v9246_v10  ;;  %v3701_v63 = vrot.slane %v3700_v51, 4  ;;  %v3542_v27 = vadd.f32 %v9246_v10, %v9224_v2  ;;  %v3442_v40 = vpop.f32.mrb[28].mxu1  ;;  %v4513_v29 = vor.u32 %v9230_v43, %v9228_v4 }
 0x409   : > { %v3708_v44 = vrot.slane %v3707_v3, 4  ;;  %v3536_v0 = vrot.slane %v3535_v20, 4  ;;  %v9265_v9 = vadd.f32 %v3442_v40, %v8794_v6  ;;  %v3444_v38 = vpop.f32.mrb[29].mxu1 }
 0x40a   : > { %v3702_v26 = vmax.f32 %v3700_v51, %v3701_v63  ;;  %v3543_v10 = vrot.slane %v3542_v27, 4  ;;  %v9270_v62 = vadd.f32 %v3444_v38, %v8794_v6  ;;  %v3446_v2 = vpop.f32.mrb[30].mxu1  ;;  %4409 = vrot.lane.b32.xlu1 %v4403_v55, %s12264_s13 }
 0x40b   : > { %12284 = vst [vmem:[#allocation97_spill] sm:$0xff] %v9265_v9  ;;  %v3709_v46 = vmax.f32 %v3707_v3, %v3708_v44  ;;  %v3537_v13 = vadd.f32 %v3536_v0, %v3535_v20  ;;  %v3598_v19 = vsel %vm3582_vm3, %v9265_v9, -1e+30  ;;  %v9278_v40 = vadd.f32 %v3446_v2, %v8803_v54  ;;  %v3448_v53 = vpop.f32.mrb[31].mxu1  ;;  %4790 = vrot.lane.b32.xlu0 %v4784_v47, %s12264_s13 }
 0x40c   : > { %12285 = vst [vmem:[#allocation98_spill] sm:$0xff] %v9270_v62  ;;  %v3703_v60 = vrot.slane %v3702_v26, 2  ;;  %v3544_v43 = vadd.f32 %v3543_v10, %v3542_v27  ;;  %v3714_v51 = vmax.f32 %v3598_v19, -1e+30  ;;  %v3599_v6 = vsel %vm3582_vm3, %v9270_v62, -1e+30 }
 0x40d   : > { %12286 = vst [vmem:[#allocation99_spill] sm:$0xff] %v9278_v40  ;;  %v3710_v3 = vrot.slane %v3709_v46, 2  ;;  %v3538_v37 = vrot.slane %v3537_v13, 2  ;;  %v3721_v0 = vmax.f32 %v3599_v6, -1e+30  ;;  %v3549_v42 = vadd.f32 %v9278_v40, %v9265_v9 }
 0x40e   : > { %v3704_v44 = vmax.f32 %v3702_v26, %v3703_v60  ;;  %v3545_v2 = vrot.slane %v3544_v43, 2  ;;  %v3715_v4 = vrot.slane %v3714_v51, 4  ;;  %v9288_v10 = vadd.f32 %v3448_v53, %v8803_v54  ;;  %4463 = vrot.lane.b32.xlu1 %v4457_v12, %s12270_s1 }
 0x40f   : > { %v3711_v19 = vmax.f32 %v3709_v46, %v3710_v3  ;;  %v3539_v47 = vadd.f32 %v3538_v37, %v3537_v13  ;;  %v3722_v55 = vrot.slane %v3721_v0, 4  ;;  %v3550_v20 = vrot.slane %v3549_v42, 4  ;;  %4844 = vrot.lane.b32.xlu0 %v4838_v23, %s12270_s1 }
 0x410   : > { %12287 = vst [vmem:[#allocation100_spill] sm:$0xff] %v9288_v10  ;;  %v3705_v63 = vrot.slane %v3704_v44, 1  ;;  %v3546_v56 = vadd.f32 %v3545_v2, %v3544_v43  ;;  %v3716_v27 = vmax.f32 %v3714_v51, %v3715_v4  ;;  %v3556_v38 = vadd.f32 %v9288_v10, %v9270_v62 }
 0x411   : > { %v3712_v60 = vrot.slane %v3711_v19, 1  ;;  %v3540_v26 = vrot.slane %v3539_v47, 1  ;;  %v3723_v6 = vmax.f32 %v3721_v0, %v3722_v55  ;;  %v3551_v54 = vadd.f32 %v3550_v20, %v3549_v42  ;;  %v9310_v20 = vpop.permute.xlu1 %5291 }
 0x412   : > { %v3547_v53 = vrot.slane %v3546_v56, 1  ;;  %v3717_v46 = vrot.slane %v3716_v27, 2  ;;  %v3557_v13 = vrot.slane %v3556_v38, 4  ;;  %v12288_v3 = vstv %s9087_s10  ;;  %12289 = vst [vmem:[#allocation101_spill] sm:$0xff] %v9310_v20  ;;  %v12327_v20 = vld [vmem:[#allocation77_spill] sm:$0xff] }
 0x413   : > { %v4519_v37 = vmul.f32 %v12288_v3, %v4513_v29  ;;  %v3706_v40 = vmax.f32 %v3704_v44, %v3705_v63  ;;  %v3713_v9 = vmax.f32 %v3711_v19, %v3712_v60  ;;  %v3724_v43 = vrot.slane %v3723_v6, 2  ;;  %4971 = vrot.lane.b32.xlu0 %v4965_v35, %s12254_s3 }
 0x414   : > { %v3552_v51 = vrot.slane %v3551_v54, 2  ;;  %v3541_v2 = vadd.f32 %v3540_v26, %v3539_v47  ;;  %v3548_v4 = vadd.f32 %v3547_v53, %v3546_v56  ;;  %v3718_v10 = vmax.f32 %v3716_v27, %v3717_v46 }
 0x415   : > { %v3558_v62 = vadd.f32 %v3557_v13, %v3556_v38  ;;  %v3738_v23 = vmul.f32 %v9219_v52, %v8250_v31  ;;  %v3725_v12 = vmax.f32 %v3723_v6, %v3724_v43  ;;  %4523 = vrot.lane.b32.xlu1 %v4519_v37, %s12253_s27  ;;  %v5017_v29 = vmul.f32 %v9152_v7, %v9213_v61 }
 0x416   : > { %v3553_v0 = vadd.f32 %v3552_v51, %v3551_v54  ;;  %v3739_v42 = vmul.f32 %v9232_v5, %v8259_v36  ;;  %v3719_v44 = vrot.slane %v3718_v10, 1  ;;  %v4577_v35 = vmul.f32 %v9171_v49, %v9272_v1  ;;  %v9315_v36 = vpop.permute.xlu0 %5325  ;;  %v9345_v51 = vpop.permute.xlu1 %5351 }
 0x417   : > { %v3559_v19 = vrot.slane %v3558_v62, 2  ;;  %v3878_v47 = vmul.f32 %v3706_v40, %v8305_v33  ;;  %v3879_v31 = vmul.f32 %v3713_v9, %v8314_v32  ;;  %v3726_v52 = vrot.slane %v3725_v12, 1  ;;  %5023 = vrot.lane.b32.xlu0 %v5017_v29, %s12257_s22  ;;  %12290 = vst [vmem:[#allocation102_spill] sm:$0xff] %v9315_v36  ;;  %12293 = vst [vmem:[#allocation103_spill] sm:$0xff] %v9345_v51 }
 0x418   : > { %v3554_v55 = vrot.slane %v3553_v0, 1  ;;  %v3575_v63 = vmul.f32 0.25, %v3541_v2  ;;  %v3576_v56 = vmul.f32 0.25, %v3548_v4  ;;  %v3720_v27 = vmax.f32 %v3718_v10, %v3719_v44  ;;  %v5306_v29 = vld [vmem:[#allocation4 + $0x21] ss:$8 sm:$0xf] }
 0x419   : > { %v3560_v38 = vadd.f32 %v3559_v19, %v3558_v62  ;;  %v3736_v5 = vmul.f32 %v9193_v28, %v8204_v25  ;;  %v3737_v9 = vmul.f32 %v9202_v18, %v8213_v14  ;;  %v3727_v40 = vmax.f32 %v3725_v12, %v3726_v52  ;;  %4583 = vrot.lane.b32.xlu1 %v4577_v35, %s12254_s3 }
 0x41a   : > { %v3555_v60 = vadd.f32 %v3554_v55, %v3553_v0  ;;  %v12291_v62 = vcombine.low %v9183_v21, %v9186_v30  ;;  %v3880_v26 = vmul.f32 %v3720_v27, %v8355_v48  ;;  %v5069_v54 = vmul.f32 %v9174_v22, %v9213_v61 }
 0x41b   : > { %v3561_v6 = vrot.slane %v3560_v38, 1  ;;  %v3949_v25 = vcombine.low %v3878_v47, %v3879_v31  ;;  %v3881_v28 = vmul.f32 %v3727_v40, %v8364_v58  ;;  %v4637_v18 = vmul.f32 %v9177_v57, %v9272_v1 }
 0x41c   : > { %v3964_v10 = vrot.slane %v12291_v62, %v8866_v17  ;;  %v3577_v14 = vmul.f32 0.25, %v3555_v60  ;;  %v3810_v53 = vcombine.low %v3738_v23, %v3739_v42  ;;  %v3740_v46 = vmul.f32 %v3575_v63, %v8305_v33  ;;  %5075 = vrot.lane.b32.xlu0 %v5069_v54, %s12263_s24  ;;  %v9350_v23 = vpop.permute.xlu0 %5377  ;;  %v5307_v42 = vld [vmem:[#allocation4 + $0x21] ss:$8 sm:$0xf0] }
 0x41d   : > { %v3741_v21 = vmul.f32 %v3576_v56, %v8314_v32  ;;  %v3562_v30 = vadd.f32 %v3561_v6, %v3560_v38  ;;  %v12292_v13 = vcombine.low %v9158_v39, %v9164_v41  ;;  %v3950_v37 = vcombine.low %v3880_v26, %v3881_v28  ;;  %4643 = vrot.lane.b32.xlu1 %v4637_v18, %s12257_s22  ;;  %v9376_v38 = vpop.permute.xlu1 %5403  ;;  %v4865_v62 = vld [vmem:[#allocation4 + $0x18] ss:$8 sm:$0xf] }
 0x41e   : > { %v9343_v43 = vstv %s9302_s5  ;;  %v3809_v33 = vcombine.low %v3736_v5, %v3737_v9  ;;  %v3742_v32 = vmul.f32 %v3577_v14, %v8355_v48  ;;  %v5138_v4 = vmul.f32 %v9180_v8, %v9213_v61  ;;  %12294 = vst [vmem:[#allocation104_spill] sm:$0xff] %v9350_v23  ;;  %12295 = vst [vmem:[#allocation105_spill] sm:$0xff] %v9376_v38  ;;  %v12322_v38 = vld [vmem:[#allocation34_spill] sm:$0xff]  ;;  %s7010_s5 = sld [smem:[#allocation10 + $0x2b]] }
 0x41f   : > { %v3957_v3 = vrot.slane %v12292_v13, %v8866_v17  ;;  %v3578_v2 = vmul.f32 0.25, %v3562_v30  ;;  %v3971_v39 = vrot.slane %v3949_v25, %v8866_v17  ;;  %v3978_v41 = vrot.slane %v3950_v37, %v8866_v17  ;;  %v4923_v30 = vld [vmem:[#allocation4 + $0x18] ss:$8 sm:$0xf0] }
 0x420   : > { %v4689_v0 = vmul.f32 %v9196_v24, %v9272_v1  ;;  %v3826_v44 = vrot.slane %v3810_v53, %v8866_v17  ;;  %v3811_v19 = vcombine.low %v3740_v46, %v3741_v21  ;;  %5144 = vrot.lane.b32.xlu0 %v5138_v4, %s12264_s13  ;;  %v9360_v35 = vstv %s9313_s8  ;;  %v9384_v26 = vpop.permute.xlu0 %5429  ;;  %v4922_v21 = vld [vmem:[#allocation4 + $0x18] ss:$8 sm:$0xf]  ;;  %s7017_s8 = sld [smem:[#allocation10 + $0x5f]] }
 0x421   : > { %v3979_v12 = vcombine.low %v3957_v3, %v3964_v10  ;;  %v3743_v48 = vmul.f32 %v3578_v2, %v8364_v58  ;;  %v3980_v47 = vcombine.low %v3971_v39, %v3978_v41  ;;  %v3819_v31 = vrot.slane %v3809_v33, %v8866_v17  ;;  %v4866_v10 = vld [vmem:[#allocation4 + $0x18] ss:$8 sm:$0xf0]  ;;  %12296 = vst [vmem:[#allocation106_spill] sm:$0xff] %v9384_v26  ;;  %v9396_v13 = vpop.permute.xlu1 %5471 }
 0x422   : > { %4695 = vrot.lane.b32.xlu1 %v4689_v0, %s12263_s24  ;;  %v5192_v55 = vmul.f32 %v9343_v43, %v9213_v61  ;;  %v9368_v63 = vor.u32 %v5307_v42, %v5306_v29  ;;  %v4757_v27 = vmul.f32 %v9360_v35, %v9272_v1  ;;  %v3833_v9 = vrot.slane %v3811_v19, %v8866_v17  ;;  %v12299_v4 = vld [vmem:[#allocation33_spill] sm:$0xff]  ;;  %v12302_v42 = vld [vmem:[#allocation35_spill] sm:$0xff] }
 0x423   : > { %v3812_v52 = vcombine.low %v3742_v32, %v3743_v48  ;;  %v3987_v58 = vrot.slane %v3979_v12, %v8866_v17  ;;  %v3994_v56 = vrot.slane %v3980_v47, %v8866_v17  ;;  %v3841_v5 = vcombine.low %v3819_v31, %v3826_v44  ;;  %12297 = vst [vmem:[#allocation107_spill] sm:$0xff] %v9396_v13  ;;  %v12304_v31 = vld [vmem:[#allocation37_spill] sm:$0xff]  ;;  %v12462_v13 = vld [vmem:[#allocation86_spill] sm:$0xff] }
 0x424   : > { %5198 = vrot.lane.b32.xlu0 %v5192_v55, %s12270_s1  ;;  %v9382_v60 = vstv %s9335_s29  ;;  %v5315_v25 = vmul.f32 %v8716_v45, %v9368_v63  ;;  %v4867_v14 = vor.u32 %v4866_v10, %v4865_v62  ;;  %v12017_v46 = vstv %s9362_s30  ;;  %v9400_v33 = vpop.permute.xlu0 %5498  ;;  %v5218_v10 = vld [vmem:[#allocation4 + $0x20] ss:$8 sm:$0xf]  ;;  %s10049_s29 = sld [smem:[#allocation10 + $0x38]] }
 0x425   : > { %v3840_v40 = vrot.slane %v3812_v52, %v8866_v17  ;;  %v3995_v6 = vcombine.low %v3987_v58, %v3994_v56  ;;  %v4811_v28 = vmul.f32 %v9382_v60, %v9272_v1  ;;  %v3849_v18 = vrot.slane %v3841_v5, %v8866_v17  ;;  %12298 = vst [vmem:[#allocation108_spill] sm:$0xff] %v9400_v33  ;;  %v9415_v41 = vpop.permute.xlu1 %5525 }
 0x426   : > { %4763 = vrot.lane.b32.xlu1 %v4757_v27, %s12264_s13  ;;  %v5367_v37 = vmul.f32 %v8724_v34, %v9368_v63  ;;  %v4873_v32 = vmul.f32 %v12017_v46, %v4867_v14  ;;  %v9404_v2 = vor.u32 %v4923_v30, %v4922_v21  ;;  %v5419_v12 = vmul.f32 %v12299_v4, %v9368_v63  ;;  %v5272_v21 = vld [vmem:[#allocation4 + $0x20] ss:$8 sm:$0xf] }
 0x427   : > { %v3842_v54 = vcombine.low %v3833_v9, %v3840_v40  ;;  %4002 = vst [vmem:[#allocation4 + $0x61] ss:$8 sm:$0xf] %v3995_v6  ;;  %4003 = vst [vmem:[#allocation4 + $0x61] ss:$8 sm:$0xf0] %v3995_v6  ;;  %v9418_v0 = vstv %s6962_s12  ;;  %v5488_v44 = vmul.f32 %v12302_v42, %v9368_v63  ;;  %v9428_v48 = vstv %s6964_s15 }
 0x428   : > { %5321 = vrot.lane.b32.xlu0 %v5315_v25, %s12254_s3  ;;  %12300 = vst [vmem:[#allocation33_spill] sm:$0xff] %v9415_v41  ;;  %v9420_v29 = vpop.permute.xlu0 %5552  ;;  %v4991_v19 = vmul.f32 %v9418_v0, %v9404_v2  ;;  %v5542_v52 = vmul.f32 %v12304_v31, %v9368_v63  ;;  %v5043_v58 = vmul.f32 %v9428_v48, %v9404_v2  ;;  %v9442_v27 = vstv %s6968_s19  ;;  %v5219_v6 = vld [vmem:[#allocation4 + $0x20] ss:$8 sm:$0xf0]  ;;  %s10061_s12 = sld [smem:[#allocation10 + $0xe]]  ;;  %s10069_s19 = sld [smem:[#allocation10 + $0x15]] }
 0x429   : > { %v3856_v53 = vrot.slane %v3842_v54, %v8866_v17  ;;  %v9408_v17 = vstv %s9374_s9  ;;  %12301 = vst [vmem:[#allocation109_spill] sm:$0xff] %v9420_v29  ;;  %v9431_v47 = vpop.permute.xlu1 %5645  ;;  %v5111_v9 = vmul.f32 %v9442_v27, %v9404_v2  ;;  %v9454_v62 = vstv %s6970_s16  ;;  %v5273_v30 = vld [vmem:[#allocation4 + $0x20] ss:$8 sm:$0xf0]  ;;  %s10056_s9 = sld [smem:[#allocation10 + $0x3f]]  ;;  %s10063_s15 = sld [smem:[#allocation10 + $0x46]] }
 0x42a   : > { %4817 = vrot.lane.b32.xlu1 %v4811_v28, %s12270_s1  ;;  %v4931_v39 = vmul.f32 %v9408_v17, %v9404_v2  ;;  %12303 = vst [vmem:[#allocation35_spill] sm:$0xff] %v9431_v47  ;;  %v5165_v28 = vmul.f32 %v9454_v62, %v9404_v2  ;;  %v5220_v14 = vor.u32 %v5219_v6, %v5218_v10  ;;  %v12313_v10 = vld [vmem:[#allocation31_spill] sm:$0xff]  ;;  %v12318_v46 = vld [vmem:[#allocation32_spill] sm:$0xff]  ;;  %v9502_v47 = vstv %s7013_s6  ;;  %s10071_s16 = sld [smem:[#allocation10 + $0x4d]]  ;;  %s10081_s6 = sld [smem:[#allocation10 + $0x2c]] }
 0x42b   : > { %v3857_v3 = vcombine.low %v3849_v18, %v3856_v53  ;;  %v12016_v53 = vstv %s9444_s28 }
 0x42c   : > { %5373 = vrot.lane.b32.xlu0 %v5367_v37, %s12257_s22  ;;  %v9435_v55 = vpop.permute.xlu0 %5679 }
 0x42d   : > { %3864 = vst [vmem:[#allocation4 + $0x60] ss:$8 sm:$0xf] %v3857_v3  ;;  %3865 = vst [vmem:[#allocation4 + $0x60] ss:$8 sm:$0xf0] %v3857_v3  ;;  %v9451_v40 = vpop.permute.xlu1 %5705 }
 0x42e   : > { %4877 = vrot.lane.b32.xlu1 %v4873_v32, %s12253_s27  ;;  %12305 = vst [vmem:[#allocation37_spill] sm:$0xff] %v9435_v55  ;;  %v9439_v56 = vld [vmem:[#allocation4 + $0x81] ss:$8 sm:$0x1]  ;;  %12306 = vst [vmem:[#allocation110_spill] sm:$0xff] %v9451_v40  ;;  %v9500_v40 = vstv %s7011_s17  ;;  %s10078_s17 = sld [smem:[#allocation10 + $0x1c]] }
 0x42f   : > { %v4072_v5 = vmul.f32 %v8945_v50, %v9439_v56  ;;  %v4127_v25 = vmul.f32 %v8967_v59, %v9439_v56  ;;  %v4253_v18 = vld [vmem:[#allocation4 + $0x89] ss:$8 sm:$0x1] }
 0x430   : > { %5425 = vrot.lane.b32.xlu0 %v5419_v12, %s12263_s24  ;;  %v9456_v54 = vpop.permute.xlu0 %5731  ;;  %v4257_v37 = vmul.f32 %v9015_v11, %v4253_v18  ;;  %v5225_v12 = vmul.f32 %v12016_v53, %v5220_v14  ;;  %v4009_v53 = vld [vmem:[#allocation4 + $0x40] ss:$8 sm:$0xf]  ;;  %v10168_v33 = vstv %s10081_s6 }
 0x431   : > { %12307 = vst [vmem:[#allocation111_spill] sm:$0xff] %v9456_v54  ;;  %v9466_v3 = vpop.permute.xlu1 %5757  ;;  %v12319_v54 = vld [vmem:[#allocation76_spill] sm:$0xff] }
 0x432   : > { %4937 = vrot.lane.b32.xlu1 %v4931_v39, %s12254_s3  ;;  %12308 = vst [vmem:[#allocation112_spill] sm:$0xff] %v9466_v3  ;;  %v9473_v39 = vor.u32 %v5273_v30, %v5272_v21  ;;  %v12315_v30 = vld [vmem:[#allocation74_spill] sm:$0xff]  ;;  %v4486_v55 = vmul.f32 %v12319_v54, %v4253_v18 }
 0x434   : > { %5494 = vrot.lane.b32.xlu0 %v5488_v44, %s12264_s13  ;;  %v9469_v32 = vpop.permute.xlu0 %5783  ;;  %v4310_v44 = vmul.f32 %v9035_v15, %v4253_v18  ;;  %v5341_v6 = vmul.f32 %v12313_v10, %v9473_v39  ;;  %v4010_v14 = vld [vmem:[#allocation4 + $0x40] ss:$8 sm:$0xf0]  ;;  %v5393_v3 = vmul.f32 %v12318_v46, %v9473_v39 }
 0x435   : > { %12309 = vst [vmem:[#allocation113_spill] sm:$0xff] %v9469_v32  ;;  %v9521_v26 = vld [vmem:[#allocation4 + $0x80] ss:$8 sm:$0x1] }
 0x436   : > { %4997 = vrot.lane.b32.xlu1 %v4991_v19, %s12257_s22  ;;  %v12310_v19 = vld [vmem:[#allocation30_spill] sm:$0xff] }
 0x438   : > { %5548 = vrot.lane.b32.xlu0 %v5542_v52, %s12270_s1  ;;  %v5281_v52 = vmul.f32 %v12310_v19, %v9473_v39  ;;  %v4250_v19 = vld [vmem:[#allocation4 + $0x49] ss:$8 sm:$0xf0] }
 0x43a   : > { %5049 = vrot.lane.b32.xlu1 %v5043_v58, %s12263_s24  ;;  %v9480_v58 = vpop.permute.xlu1 %5825 }
 0x43b   : > { %12311 = vst [vmem:[#allocation114_spill] sm:$0xff] %v9480_v58 }
 0x43c   : > { %4080 = vrot.lane.b32.xlu0 %v4072_v5, %s12264_s13  ;;  %v9483_v5 = vpop.permute.xlu0 %5852 }
 0x43d   : > { %12312 = vst [vmem:[#allocation115_spill] sm:$0xff] %v9483_v5  ;;  %v5275_v5 = vld [vmem:[#allocation4 + $0x60] ss:$8 sm:$0xf] }
 0x43e   : > { %5117 = vrot.lane.b32.xlu1 %v5111_v9, %s12264_s13  ;;  %v4363_v9 = vmul.f32 %v9055_v16, %v4253_v18  ;;  %v9491_v21 = vpop.permute.xlu1 %5879 }
 0x43f   : > { %12314 = vst [vmem:[#allocation116_spill] sm:$0xff] %v9491_v21  ;;  %v6307_v21 = vld [vmem:[#allocation4 + $0x39] ss:$8 sm:$0xf0] }
 0x440   : > { %4135 = vrot.lane.b32.xlu0 %v4127_v25, %s12270_s1  ;;  %v6017_v25 = vld [vmem:[#allocation4 + $0x71] ss:$8 sm:$0xf] }
 0x442   : > { %5171 = vrot.lane.b32.xlu1 %v5165_v28, %s12270_s1  ;;  %v6018_v28 = vld [vmem:[#allocation4 + $0x71] ss:$8 sm:$0xf0] }
 0x444   : > { %4265 = vrot.lane.b32.xlu0 %v4257_v37, %s12254_s3  ;;  %v4432_v37 = vmul.f32 %v12315_v30, %v4253_v18 }
 0x446   : > { %5229 = vrot.lane.b32.xlu1 %v5225_v12, %s12253_s27  ;;  %v9494_v12 = vpop.permute.xlu0 %5906 }
 0x447   : > { %12316 = vst [vmem:[#allocation74_spill] sm:$0xff] %v9494_v12 }
 0x448   : > { %4318 = vrot.lane.b32.xlu0 %v4310_v44, %s12257_s22  ;;  %v4028_v44 = vld [vmem:[#allocation4 + $0x41] ss:$8 sm:$0xf0] }
 0x44a   : > { %5287 = vrot.lane.b32.xlu1 %v5281_v52, %s12254_s3  ;;  %v9496_v52 = vor.u32 %v6018_v28, %v6017_v25 }
 0x44c   : > { %4371 = vrot.lane.b32.xlu0 %v4363_v9, %s12263_s24  ;;  %12317 = vst [vmem:[#allocation117_spill] sm:$0xff] %v9496_v52  ;;  %v9504_v9 = vor.u32 %v4010_v14, %v4009_v53  ;;  %v9511_v25 = vmul.f32 %v9500_v40, %v9496_v52  ;;  %v9515_v28 = vmul.f32 %v9502_v47, %v9496_v52 }
 0x44d   : > { %v5461_v53 = vmul.f32 %v12322_v38, %v9473_v39 }
 0x44e   : > { %5347 = vrot.lane.b32.xlu1 %v5341_v6, %s12257_s22  ;;  %v4027_v6 = vld [vmem:[#allocation4 + $0x41] ss:$8 sm:$0xf]  ;;  %12320 = vst [vmem:[#allocation76_spill] sm:$0xff] %v9511_v25  ;;  %12321 = vst [vmem:[#allocation118_spill] sm:$0xff] %v9515_v28 }
 0x44f   : > { %v4029_v32 = vor.u32 %v4028_v44, %v4027_v6  ;;  %v12326_v6 = vld [vmem:[#allocation90_spill] sm:$0xff]  ;;  %v12328_v25 = vld [vmem:[#allocation36_spill] sm:$0xff] }
 0x450   : > { %4440 = vrot.lane.b32.xlu0 %v4432_v37, %s12264_s13  ;;  %v4609_v37 = vld [vmem:[#allocation4 + $0x91] ss:$8 sm:$0x1]  ;;  %v4035_v36 = vmul.f32 %v12326_v6, %v9439_v56  ;;  %v5515_v38 = vmul.f32 %v12328_v25, %v9473_v39 }
 0x451   : > { %v4034_v51 = vmul.f32 %v12326_v6, %v4029_v32  ;;  %v4613_v23 = vmul.f32 %v12327_v20, %v4609_v37  ;;  %v4071_v6 = vmul.f32 %v8945_v50, %v4029_v32  ;;  %v4249_v25 = vld [vmem:[#allocation4 + $0x49] ss:$8 sm:$0xf] }
 0x452   : > { %5399 = vrot.lane.b32.xlu1 %v5393_v3, %s12263_s24  ;;  %v12324_v3 = vld [vmem:[#allocation91_spill] sm:$0xff] }
 0x453   : > { %v4016_v44 = vmul.f32 %v12324_v3, %v9504_v9  ;;  %v4017_v28 = vmul.f32 %v12324_v3, %v9521_v26 }
 0x454   : > { %v9519_v14 = vpop.permute.xlu1 %4195  ;;  %4494 = vrot.lane.b32.xlu0 %v4486_v55, %s12270_s1 }
 0x455   : > { %12323 = vst [vmem:[#allocation119_spill] sm:$0xff] %v9519_v14  ;;  %v9526_v18 = vpop.permute.xlu0 %4076  ;;  %v9539_v55 = vadd.f32 %v4034_v51, %v4016_v44  ;;  %v9544_v10 = vadd.f32 %v4035_v36, %v4017_v28  ;;  %v4126_v36 = vmul.f32 %v8967_v59, %v4029_v32  ;;  %v9557_v28 = vor.u32 %v4250_v19, %v4249_v25  ;;  %v12340_v19 = vld [vmem:[#allocation83_spill] sm:$0xff] }
 0x456   : > { %12325 = vst [vmem:[#allocation91_spill] sm:$0xff] %v9526_v18  ;;  %5467 = vrot.lane.b32.xlu1 %v5461_v53, %s12264_s13  ;;  %v12333_v18 = vld [vmem:[#allocation78_spill] sm:$0xff]  ;;  %v4840_v25 = vmul.f32 %v12340_v19, %v4609_v37 }
 0x457   : > { %12330 = vst [vmem:[#allocation77_spill] sm:$0xff] %v9539_v55  ;;  %12332 = vst [vmem:[#allocation121_spill] sm:$0xff] %v9544_v10  ;;  %v4665_v56 = vmul.f32 %v12333_v18, %v4609_v37 }
 0x458   : > { %v9537_v46 = vpop.permute.xlu1 %4552  ;;  %4621 = vrot.lane.b32.xlu0 %v4613_v23, %s12254_s3  ;;  %v12335_v23 = vld [vmem:[#allocation79_spill] sm:$0xff] }
 0x459   : > { %12329 = vst [vmem:[#allocation90_spill] sm:$0xff] %v9537_v46  ;;  %v9542_v53 = vpop.permute.xlu0 %4131  ;;  %v4717_v44 = vmul.f32 %v12335_v23, %v4609_v37 }
 0x45a   : > { %12331 = vst [vmem:[#allocation120_spill] sm:$0xff] %v9542_v53  ;;  %5521 = vrot.lane.b32.xlu1 %v5515_v38, %s12270_s1 }
 0x45c   : > { %4673 = vrot.lane.b32.xlu0 %v4665_v56, %s12257_s22  ;;  %v9550_v3 = vpop.permute.xlu1 %4906  ;;  %v12337_v56 = vld [vmem:[#allocation80_spill] sm:$0xff] }
 0x45d   : > { %12334 = vst [vmem:[#allocation78_spill] sm:$0xff] %v9550_v3  ;;  %v9553_v51 = vpop.permute.xlu0 %4261  ;;  %v4786_v55 = vmul.f32 %v12337_v56, %v4609_v37 }
 0x45e   : > { %4078 = vrot.lane.b32.xlu1 %v4071_v6, %s12264_s13  ;;  %v4256_v6 = vmul.f32 %v9015_v11, %v9557_v28 }
 0x460   : > { %4725 = vrot.lane.b32.xlu0 %v4717_v44, %s12263_s24  ;;  %v9561_v50 = vpop.permute.xlu1 %5256  ;;  %v4309_v44 = vmul.f32 %v9035_v15, %v9557_v28 }
 0x461   : > { %12336 = vst [vmem:[#allocation79_spill] sm:$0xff] %v9561_v50  ;;  %v9563_v38 = vpop.permute.xlu0 %4314 }
 0x462   : > { %4133 = vrot.lane.b32.xlu1 %v4126_v36, %s12270_s1  ;;  %v4963_v36 = vld [vmem:[#allocation4 + $0x99] ss:$8 sm:$0x1] }
 0x464   : > { %4794 = vrot.lane.b32.xlu0 %v4786_v55, %s12264_s13  ;;  %v9570_v59 = vpop.permute.xlu1 %4047  ;;  %v12343_v55 = vld [vmem:[#allocation84_spill] sm:$0xff] }
 0x465   : > { %12338 = vst [vmem:[#allocation80_spill] sm:$0xff] %v9570_v59  ;;  %v9572_v32 = vpop.permute.xlu0 %4367  ;;  %v4362_v59 = vmul.f32 %v9055_v16, %v9557_v28 }
 0x466   : > { %4263 = vrot.lane.b32.xlu1 %v4256_v6, %s12254_s3  ;;  %12339 = vst [vmem:[#allocation122_spill] sm:$0xff] %v9572_v32  ;;  %v4967_v6 = vmul.f32 %v12343_v55, %v4963_v36  ;;  %v4188_v32 = vld [vmem:[#allocation4 + $0x49] ss:$8 sm:$0xf0] }
 0x468   : > { %4848 = vrot.lane.b32.xlu0 %v4840_v25, %s12270_s1  ;;  %v9579_v10 = vpop.permute.xlu1 %4103  ;;  %v5019_v25 = vmul.f32 %v9152_v7, %v4963_v36 }
 0x469   : > { %12341 = vst [vmem:[#allocation83_spill] sm:$0xff] %v9579_v10  ;;  %v9581_v11 = vpop.permute.xlu0 %4436  ;;  %v4606_v10 = vld [vmem:[#allocation4 + $0x51] ss:$8 sm:$0xf0] }
 0x46a   : > { %4316 = vrot.lane.b32.xlu1 %v4309_v44, %s12257_s22  ;;  %12342 = vst [vmem:[#allocation123_spill] sm:$0xff] %v9581_v11  ;;  %v4431_v44 = vmul.f32 %v12315_v30, %v9557_v28  ;;  %v4605_v11 = vld [vmem:[#allocation4 + $0x51] ss:$8 sm:$0xf] }
 0x46c   : > { %4975 = vrot.lane.b32.xlu0 %v4967_v6, %s12254_s3  ;;  %v9588_v37 = vpop.permute.xlu1 %4164 }
 0x46d   : > { %12344 = vst [vmem:[#allocation84_spill] sm:$0xff] %v9588_v37  ;;  %v9590_v15 = vpop.permute.xlu0 %4490  ;;  %v9604_v37 = vor.u32 %v4606_v10, %v4605_v11  ;;  %v5194_v11 = vmul.f32 %v9343_v43, %v4963_v36 }
 0x46e   : > { %4369 = vrot.lane.b32.xlu1 %v4362_v59, %s12263_s24  ;;  %12345 = vst [vmem:[#allocation124_spill] sm:$0xff] %v9590_v15  ;;  %v5071_v59 = vmul.f32 %v9174_v22, %v4963_v36  ;;  %v4485_v15 = vmul.f32 %v12319_v54, %v9557_v28 }
 0x470   : > { %5027 = vrot.lane.b32.xlu0 %v5019_v25, %s12257_s22  ;;  %v9597_v16 = vpop.permute.xlu1 %4226 }
 0x471   : > { %12346 = vst [vmem:[#allocation125_spill] sm:$0xff] %v9597_v16  ;;  %v9599_v6 = vpop.permute.xlu0 %4617  ;;  %v4187_v16 = vld [vmem:[#allocation4 + $0x49] ss:$8 sm:$0xf] }
 0x472   : > { %4438 = vrot.lane.b32.xlu1 %v4431_v44, %s12264_s13  ;;  %12347 = vst [vmem:[#allocation126_spill] sm:$0xff] %v9599_v6  ;;  %v5140_v44 = vmul.f32 %v9180_v8, %v4963_v36  ;;  %v4612_v6 = vmul.f32 %v12327_v20, %v9604_v37  ;;  %v4545_v20 = vld [vmem:[#allocation4 + $0x51] ss:$8 sm:$0xf0] }
 0x473   : > { %v4898_v36 = vld [vmem:[#allocation4 + $0x59] ss:$8 sm:$0xf] }
 0x474   : > { %5079 = vrot.lane.b32.xlu0 %v5071_v59, %s12263_s24  ;;  %v9608_v30 = vpop.permute.xlu1 %4287  ;;  %v4664_v59 = vmul.f32 %v12333_v18, %v9604_v37 }
 0x475   : > { %12348 = vst [vmem:[#allocation127_spill] sm:$0xff] %v9608_v30  ;;  %v9610_v25 = vpop.permute.xlu0 %4669 }
 0x476   : > { %4492 = vrot.lane.b32.xlu1 %v4485_v15, %s12270_s1  ;;  %12349 = vst [vmem:[#allocation128_spill] sm:$0xff] %v9610_v25  ;;  %v4189_v15 = vor.u32 %v4188_v32, %v4187_v16  ;;  %v4544_v25 = vld [vmem:[#allocation4 + $0x51] ss:$8 sm:$0xf]  ;;  %v4716_v32 = vmul.f32 %v12335_v23, %v9604_v37 }
 0x477   : > { %v4899_v16 = vld [vmem:[#allocation4 + $0x59] ss:$8 sm:$0xf0] }
 0x478   : > { %5148 = vrot.lane.b32.xlu0 %v5140_v44, %s12264_s13  ;;  %v9617_v54 = vpop.permute.xlu1 %4340  ;;  %v5248_v23 = vld [vmem:[#allocation4 + $0x61] ss:$8 sm:$0xf] }
 0x479   : > { %12350 = vst [vmem:[#allocation129_spill] sm:$0xff] %v9617_v54  ;;  %v9619_v10 = vpop.permute.xlu0 %4721  ;;  %v12354_v54 = vstv %s8927_s20  ;;  %s9642_s20 = sld [smem:[#allocation10 + $0x50]] }
 0x47a   : > { %4619 = vrot.lane.b32.xlu1 %v4612_v6, %s12254_s3  ;;  %12351 = vst [vmem:[#allocation130_spill] sm:$0xff] %v9619_v10  ;;  %v4192_v30 = vmul.f32 %v12354_v54, %v4189_v15  ;;  %v4546_v10 = vor.u32 %v4545_v20, %v4544_v25  ;;  %v4785_v25 = vmul.f32 %v12337_v56, %v9604_v37  ;;  %v5249_v54 = vld [vmem:[#allocation4 + $0x61] ss:$8 sm:$0xf0] }
 0x47b   : > { %v4960_v15 = vld [vmem:[#allocation4 + $0x59] ss:$8 sm:$0xf0]  ;;  %v4839_v56 = vmul.f32 %v12340_v19, %v9604_v37 }
 0x47c   : > { %5202 = vrot.lane.b32.xlu0 %v5194_v11, %s12270_s1  ;;  %v9626_v44 = vpop.permute.xlu1 %4409 }
 0x47d   : > { %12352 = vst [vmem:[#allocation131_spill] sm:$0xff] %v9626_v44  ;;  %v9628_v6 = vpop.permute.xlu0 %4790 }
 0x47e   : > { %4671 = vrot.lane.b32.xlu1 %v4664_v59, %s12257_s22  ;;  %12353 = vst [vmem:[#allocation132_spill] sm:$0xff] %v9628_v6  ;;  %v12357_v59 = vstv %s8932_s21  ;;  %v4900_v6 = vor.u32 %v4899_v16, %v4898_v36  ;;  %v5250_v36 = vor.u32 %v5249_v54, %v5248_v23  ;;  %s9715_s21 = sld [smem:[#allocation10 + $0x57]] }
 0x47f   : > { %v4549_v44 = vmul.f32 %v12357_v59, %v4546_v10  ;;  %v12036_v19 = vstv %s9642_s20 }
 0x480   : > { %4197 = vrot.lane.b32.xlu0 %v4192_v30, %s12253_s27  ;;  %v9636_v18 = vpop.permute.xlu1 %4463  ;;  %v4959_v30 = vld [vmem:[#allocation4 + $0x59] ss:$8 sm:$0xf] }
 0x481   : > { %12355 = vst [vmem:[#allocation133_spill] sm:$0xff] %v9636_v18  ;;  %v9638_v11 = vpop.permute.xlu0 %4844  ;;  %v9656_v59 = vor.u32 %v4960_v15, %v4959_v30  ;;  %v12362_v18 = vstv %s8969_s14  ;;  %v5663_v30 = vld [vmem:[#allocation4 + $0x69] ss:$8 sm:$0xf]  ;;  %s7005_s14 = sld [smem:[#allocation10 + $0x59]] }
 0x482   : > { %4723 = vrot.lane.b32.xlu1 %v4716_v32, %s12263_s24  ;;  %12356 = vst [vmem:[#allocation134_spill] sm:$0xff] %v9638_v11  ;;  %v12359_v32 = vstv %s8937_s23  ;;  %v5602_v11 = vld [vmem:[#allocation4 + $0x69] ss:$8 sm:$0xf]  ;;  %s7003_s23 = sld [smem:[#allocation10 + $0x58]] }
 0x483   : > { %v4903_v10 = vmul.f32 %v12359_v32, %v4900_v6  ;;  %v4966_v54 = vmul.f32 %v12343_v55, %v9656_v59  ;;  %v5664_v15 = vld [vmem:[#allocation4 + $0x69] ss:$8 sm:$0xf0] }
 0x484   : > { %4554 = vrot.lane.b32.xlu0 %v4549_v44, %s12253_s27  ;;  %v5603_v44 = vld [vmem:[#allocation4 + $0x69] ss:$8 sm:$0xf0] }
 0x485   : > { %v9648_v20 = vpop.permute.xlu0 %4971  ;;  %v5604_v6 = vor.u32 %v5603_v44, %v5602_v11  ;;  %v5018_v11 = vmul.f32 %v9152_v7, %v9656_v59  ;;  %v12370_v7 = vld [vmem:[#allocation41_spill] sm:$0xff] }
 0x486   : > { %4792 = vrot.lane.b32.xlu1 %v4785_v25, %s12264_s13  ;;  %12358 = vst [vmem:[#allocation135_spill] sm:$0xff] %v9648_v20  ;;  %v5253_v20 = vmul.f32 %v12362_v18, %v5250_v36 }
 0x487   : > { %v9652_v16 = vpop.permute.xlu1 %4523 }
 0x488   : > { %12360 = vst [vmem:[#allocation136_spill] sm:$0xff] %v9652_v16  ;;  %4908 = vrot.lane.b32.xlu0 %v4903_v10, %s12253_s27  ;;  %v5607_v10 = vmul.f32 %v12036_v19, %v5604_v6  ;;  %v5070_v6 = vmul.f32 %v9174_v22, %v9656_v59  ;;  %v5309_v19 = vld [vmem:[#allocation4 + $0x61] ss:$8 sm:$0xf] }
 0x489   : > { %v9660_v25 = vpop.permute.xlu0 %5023  ;;  %v5660_v22 = vld [vmem:[#allocation4 + $0x29] ss:$8 sm:$0xf]  ;;  %v5221_v16 = vld [vmem:[#allocation4 + $0x60] ss:$8 sm:$0xf] }
 0x48a   : > { %4846 = vrot.lane.b32.xlu1 %v4839_v56, %s12270_s1  ;;  %12361 = vst [vmem:[#allocation137_spill] sm:$0xff] %v9660_v25  ;;  %v9675_v56 = vor.u32 %v5664_v15, %v5663_v30 }
 0x48b   : > { %v9664_v23 = vpop.permute.xlu1 %4583 }
 0x48c   : > { %12363 = vst [vmem:[#allocation138_spill] sm:$0xff] %v9664_v23  ;;  %5258 = vrot.lane.b32.xlu0 %v5253_v20, %s12253_s27  ;;  %v12367_v20 = vld [vmem:[#allocation39_spill] sm:$0xff]  ;;  %v5722_v30 = vmul.f32 %v12370_v7, %v9675_v56 }
 0x48d   : > { %v5670_v36 = vmul.f32 %v12367_v20, %v9675_v56 }
 0x48e   : > { %4973 = vrot.lane.b32.xlu1 %v4966_v54, %s12254_s3  ;;  %v9671_v32 = vpop.permute.xlu0 %5075 }
 0x48f   : > { %12364 = vst [vmem:[#allocation139_spill] sm:$0xff] %v9671_v32  ;;  %v9677_v18 = vpop.permute.xlu1 %4643  ;;  %v12048_v32 = vstv %s9715_s21 }
 0x490   : > { %12365 = vst [vmem:[#allocation140_spill] sm:$0xff] %v9677_v18  ;;  %5612 = vrot.lane.b32.xlu0 %v5607_v10, %s12253_s27  ;;  %v5139_v10 = vmul.f32 %v9180_v8, %v9656_v59  ;;  %v5193_v8 = vmul.f32 %v9343_v43, %v9656_v59 }
 0x492   : > { %5025 = vrot.lane.b32.xlu1 %v5018_v11, %s12257_s22  ;;  %v9683_v55 = vpop.permute.xlu0 %5144  ;;  %v5661_v11 = vld [vmem:[#allocation4 + $0x29] ss:$8 sm:$0xf0] }
 0x493   : > { %12366 = vst [vmem:[#allocation141_spill] sm:$0xff] %v9683_v55  ;;  %v5310_v55 = vld [vmem:[#allocation4 + $0x61] ss:$8 sm:$0xf0] }
 0x494   : > { %v9687_v44 = vpop.permute.xlu1 %4695  ;;  %5677 = vrot.lane.b32.xlu0 %v5670_v36, %s12254_s3 }
 0x495   : > { %12368 = vst [vmem:[#allocation39_spill] sm:$0xff] %v9687_v44  ;;  %v9707_v44 = vor.u32 %v5661_v11, %v5660_v22 }
 0x496   : > { %5077 = vrot.lane.b32.xlu1 %v5070_v6, %s12263_s24  ;;  %v9693_v54 = vpop.permute.xlu0 %5198  ;;  %v12373_v6 = vld [vmem:[#allocation43_spill] sm:$0xff] }
 0x497   : > { %12369 = vst [vmem:[#allocation142_spill] sm:$0xff] %v9693_v54  ;;  %v5774_v54 = vmul.f32 %v12373_v6, %v9675_v56  ;;  %12374 = vst [vmem:[#allocation43_spill] sm:$0xff] %v9707_v44 }
 0x498   : > { %v9697_v15 = vpop.permute.xlu1 %4763  ;;  %5729 = vrot.lane.b32.xlu0 %v5722_v30, %s12257_s22 }
 0x499   : > { %12371 = vst [vmem:[#allocation41_spill] sm:$0xff] %v9697_v15  ;;  %v9713_v15 = vor.u32 %v5310_v55, %v5309_v19  ;;  %v5956_v19 = vld [vmem:[#allocation4 + $0x71] ss:$8 sm:$0xf] }
 0x49a   : > { %5146 = vrot.lane.b32.xlu1 %v5139_v10, %s12264_s13  ;;  %v9703_v36 = vpop.permute.xlu0 %5321  ;;  %v12377_v10 = vld [vmem:[#allocation45_spill] sm:$0xff] }
 0x49b   : > { %12372 = vst [vmem:[#allocation143_spill] sm:$0xff] %v9703_v36  ;;  %v5842_v11 = vmul.f32 %v12377_v10, %v9707_v44  ;;  %v5316_v43 = vmul.f32 %v8716_v45, %v9713_v15  ;;  %v5957_v55 = vld [vmem:[#allocation4 + $0x71] ss:$8 sm:$0xf0] }
 0x49c   : > { %v9709_v18 = vpop.permute.xlu1 %4817  ;;  %5781 = vrot.lane.b32.xlu0 %v5774_v54, %s12263_s24 }
 0x49d   : > { %12375 = vst [vmem:[#allocation144_spill] sm:$0xff] %v9709_v18  ;;  %v5958_v18 = vor.u32 %v5957_v55, %v5956_v19  ;;  %v9748_v19 = vstv %s7003_s23  ;;  %v5489_v55 = vmul.f32 %v12302_v42, %v9713_v15  ;;  %s10099_s23 = sld [smem:[#allocation10 + $0x1f]] }
 0x49e   : > { %5200 = vrot.lane.b32.xlu1 %v5193_v8, %s12270_s1  ;;  %v9719_v30 = vpop.permute.xlu0 %5373  ;;  %v12380_v8 = vld [vmem:[#allocation47_spill] sm:$0xff] }
 0x49f   : > { %12376 = vst [vmem:[#allocation145_spill] sm:$0xff] %v9719_v30  ;;  %v5896_v30 = vmul.f32 %v12380_v8, %v9707_v44 }
 0x4a0   : > { %v9723_v22 = vpop.permute.xlu1 %4877  ;;  %5848 = vrot.lane.b32.xlu0 %v5842_v11, %s12264_s13  ;;  %v5961_v11 = vmul.f32 %v12048_v32, %v5958_v18  ;;  %v5598_v32 = vld [vmem:[#allocation4 + $0x29] ss:$8 sm:$0xf] }
 0x4a1   : > { %12378 = vst [vmem:[#allocation45_spill] sm:$0xff] %v9723_v22  ;;  %v5368_v22 = vmul.f32 %v8724_v34, %v9713_v15  ;;  %v9752_v34 = vld [vmem:[#allocation4 + $0xb1] ss:$8 sm:$0x1] }
 0x4a2   : > { %5323 = vrot.lane.b32.xlu1 %v5316_v43, %s12254_s3  ;;  %v9729_v54 = vpop.permute.xlu0 %5425 }
 0x4a3   : > { %12379 = vst [vmem:[#allocation146_spill] sm:$0xff] %v9729_v54  ;;  %v5420_v54 = vmul.f32 %v12299_v4, %v9713_v15  ;;  %v6025_v4 = vmul.f32 %v9748_v19, %v9752_v34 }
 0x4a4   : > { %v9733_v36 = vpop.permute.xlu1 %4937  ;;  %5902 = vrot.lane.b32.xlu0 %v5896_v30, %s12270_s1 }
 0x4a5   : > { %12381 = vst [vmem:[#allocation47_spill] sm:$0xff] %v9733_v36  ;;  %v12390_v36 = vstv %s9642_s20  ;;  %s10089_s20 = sld [smem:[#allocation10 + $0x2e]] }
 0x4a6   : > { %5375 = vrot.lane.b32.xlu1 %v5368_v22, %s12257_s22  ;;  %v9740_v45 = vpop.permute.xlu0 %5494  ;;  %v6024_v22 = vmul.f32 %v9748_v19, %v9496_v52 }
 0x4a7   : > { %12382 = vst [vmem:[#allocation147_spill] sm:$0xff] %v9740_v45  ;;  %v5543_v45 = vmul.f32 %v12304_v31, %v9713_v15 }
 0x4a8   : > { %v9744_v43 = vpop.permute.xlu1 %4997  ;;  %5966 = vrot.lane.b32.xlu0 %v5961_v11, %s12253_s27  ;;  %v5599_v11 = vld [vmem:[#allocation4 + $0x29] ss:$8 sm:$0xf0] }
 0x4a9   : > { %12383 = vst [vmem:[#allocation148_spill] sm:$0xff] %v9744_v43  ;;  %v5600_v42 = vor.u32 %v5599_v11, %v5598_v32  ;;  %v9794_v11 = vstv %s7007_s0  ;;  %s10104_s0 = sld [smem:[#allocation10 + $0x26]] }
 0x4aa   : > { %5427 = vrot.lane.b32.xlu1 %v5420_v54, %s12263_s24  ;;  %v9754_v30 = vpop.permute.xlu0 %5548 }
 0x4ab   : > { %12384 = vst [vmem:[#allocation149_spill] sm:$0xff] %v9754_v30 }
 0x4ac   : > { %v9758_v18 = vpop.permute.xlu1 %5049  ;;  %6031 = vrot.lane.b32.xlu0 %v6024_v22, %s12254_s3 }
 0x4ad   : > { %12385 = vst [vmem:[#allocation150_spill] sm:$0xff] %v9758_v18  ;;  %v9772_v18 = vstv %s7005_s14  ;;  %s10101_s14 = sld [smem:[#allocation10 + $0x2f]] }
 0x4ae   : > { %5496 = vrot.lane.b32.xlu1 %v5489_v55, %s12264_s13  ;;  %v9766_v54 = vpop.permute.xlu0 %4080  ;;  %v6076_v55 = vmul.f32 %v9772_v18, %v9496_v52  ;;  %v6077_v31 = vmul.f32 %v9772_v18, %v9752_v34 }
 0x4af   : > { %12386 = vst [vmem:[#allocation151_spill] sm:$0xff] %v9766_v54 }
 0x4b0   : > { %v9768_v30 = vpop.permute.xlu1 %5117  ;;  %6033 = vrot.lane.b32.xlu0 %v6025_v4, %s12254_s3 }
 0x4b1   : > { %12387 = vst [vmem:[#allocation152_spill] sm:$0xff] %v9768_v30  ;;  %v5606_v30 = vmul.f32 %v12390_v36, %v5600_v42  ;;  %v6128_v42 = vmul.f32 %v9794_v11, %v9496_v52 }
 0x4b2   : > { %5550 = vrot.lane.b32.xlu1 %v5543_v45, %s12270_s1  ;;  %v9776_v22 = vpop.permute.xlu0 %4135  ;;  %v5669_v45 = vmul.f32 %v12367_v20, %v9707_v44  ;;  %v6129_v20 = vmul.f32 %v9794_v11, %v9752_v34 }
 0x4b3   : > { %12388 = vst [vmem:[#allocation153_spill] sm:$0xff] %v9776_v22  ;;  %v10182_v12 = vstv %s10101_s14 }
 0x4b4   : > { %v9780_v43 = vpop.permute.xlu1 %5171  ;;  %6083 = vrot.lane.b32.xlu0 %v6076_v55, %s12257_s22 }
 0x4b5   : > { %12389 = vst [vmem:[#allocation154_spill] sm:$0xff] %v9780_v43  ;;  %v6015_v43 = vld [vmem:[#allocation4 + $0x31] ss:$8 sm:$0xf0] }
 0x4b6   : > { %5610 = vrot.lane.b32.xlu1 %v5606_v30, %s12253_s27  ;;  %v9788_v32 = vpop.permute.xlu0 %4265  ;;  %v5721_v30 = vmul.f32 %v12370_v7, %v9707_v44 }
 0x4b7   : > { %12391 = vst [vmem:[#allocation155_spill] sm:$0xff] %v9788_v32 }
 0x4b8   : > { %v9790_v4 = vpop.permute.xlu1 %5229  ;;  %6085 = vrot.lane.b32.xlu0 %v6077_v31, %s12257_s22  ;;  %v6014_v31 = vld [vmem:[#allocation4 + $0x31] ss:$8 sm:$0xf] }
 0x4b9   : > { %12392 = vst [vmem:[#allocation156_spill] sm:$0xff] %v9790_v4  ;;  %v9812_v4 = vor.u32 %v6015_v43, %v6014_v31  ;;  %v5843_v43 = vmul.f32 %v12377_v10, %v9675_v56  ;;  %v5953_v31 = vld [vmem:[#allocation4 + $0x31] ss:$8 sm:$0xf0] }
 0x4ba   : > { %5675 = vrot.lane.b32.xlu1 %v5669_v45, %s12254_s3  ;;  %v9798_v36 = vpop.permute.xlu0 %4318 }
 0x4bb   : > { %12393 = vst [vmem:[#allocation157_spill] sm:$0xff] %v9798_v36  ;;  %12396 = vst [vmem:[#allocation160_spill] sm:$0xff] %v9812_v4 }
 0x4bc   : > { %v9802_v55 = vpop.permute.xlu1 %5287  ;;  %6135 = vrot.lane.b32.xlu0 %v6128_v42, %s12263_s24  ;;  %v6196_v42 = vmul.f32 %v9500_v40, %v9812_v4 }
 0x4bd   : > { %12394 = vst [vmem:[#allocation158_spill] sm:$0xff] %v9802_v55  ;;  %v5773_v55 = vmul.f32 %v12373_v6, %v9707_v44  ;;  %v6198_v6 = vmul.f32 %v9500_v40, %v9752_v34  ;;  %v6250_v40 = vmul.f32 %v9502_v47, %v9812_v4 }
 0x4be   : > { %5727 = vrot.lane.b32.xlu1 %v5721_v30, %s12257_s22  ;;  %v9810_v45 = vpop.permute.xlu0 %4371 }
 0x4bf   : > { %12395 = vst [vmem:[#allocation159_spill] sm:$0xff] %v9810_v45  ;;  %v4215_v45 = vld [vmem:[#allocation4 + $0x48] ss:$8 sm:$0xf0] }
 0x4c0   : > { %v9814_v36 = vpop.permute.xlu1 %5347  ;;  %6137 = vrot.lane.b32.xlu0 %v6129_v20, %s12263_s24  ;;  %v5952_v20 = vld [vmem:[#allocation4 + $0x31] ss:$8 sm:$0xf] }
 0x4c1   : > { %12397 = vst [vmem:[#allocation161_spill] sm:$0xff] %v9814_v36 }
 0x4c2   : > { %5779 = vrot.lane.b32.xlu1 %v5773_v55, %s12263_s24  ;;  %v9820_v7 = vpop.permute.xlu0 %4440 }
 0x4c3   : > { %12398 = vst [vmem:[#allocation162_spill] sm:$0xff] %v9820_v7  ;;  %v5954_v7 = vor.u32 %v5953_v31, %v5952_v20  ;;  %v4156_v20 = vld [vmem:[#allocation4 + $0x48] ss:$8 sm:$0xf] }
 0x4c4   : > { %v9824_v30 = vpop.permute.xlu1 %5399  ;;  %6202 = vrot.lane.b32.xlu0 %v6196_v42, %s12264_s13 }
 0x4c5   : > { %12399 = vst [vmem:[#allocation163_spill] sm:$0xff] %v9824_v30  ;;  %v5897_v30 = vmul.f32 %v12380_v8, %v9675_v56  ;;  %v12406_v8 = vld [vmem:[#allocation73_spill] sm:$0xff] }
 0x4c6   : > { %5850 = vrot.lane.b32.xlu1 %v5843_v43, %s12264_s13  ;;  %v9832_v55 = vpop.permute.xlu0 %4494  ;;  %v12404_v43 = vstv %s9715_s21  ;;  %s10091_s21 = sld [smem:[#allocation10 + $0x60]] }
 0x4c7   : > { %12400 = vst [vmem:[#allocation164_spill] sm:$0xff] %v9832_v55  ;;  %v5960_v55 = vmul.f32 %v12404_v43, %v5954_v7 }
 0x4c8   : > { %v9834_v36 = vpop.permute.xlu1 %5467  ;;  %6206 = vrot.lane.b32.xlu0 %v6198_v6, %s12264_s13  ;;  %v4042_v6 = vmul.f32 %v12406_v8, %v9504_v9 }
 0x4c9   : > { %12401 = vst [vmem:[#allocation165_spill] sm:$0xff] %v9834_v36 }
 0x4ca   : > { %5904 = vrot.lane.b32.xlu1 %v5897_v30, %s12270_s1  ;;  %v9840_v10 = vpop.permute.xlu0 %4621  ;;  %v6023_v30 = vmul.f32 %v9748_v19, %v9812_v4  ;;  %v4214_v19 = vld [vmem:[#allocation4 + $0x48] ss:$8 sm:$0xf] }
 0x4cb   : > { %12402 = vst [vmem:[#allocation166_spill] sm:$0xff] %v9840_v10  ;;  %v4157_v10 = vld [vmem:[#allocation4 + $0x48] ss:$8 sm:$0xf0]  ;;  %v9876_v23 = vor.u32 %v4215_v45, %v4214_v19 }
 0x4cc   : > { %v9844_v42 = vpop.permute.xlu1 %5521  ;;  %6256 = vrot.lane.b32.xlu0 %v6250_v40, %s12270_s1  ;;  %v4158_v43 = vor.u32 %v4157_v10, %v4156_v20 }
 0x4cd   : > { %12403 = vst [vmem:[#allocation167_spill] sm:$0xff] %v9844_v42 }
 0x4ce   : > { %5964 = vrot.lane.b32.xlu1 %v5960_v55, %s12253_s27  ;;  %v9850_v36 = vpop.permute.xlu0 %4673  ;;  %v12409_v55 = vld [vmem:[#allocation75_spill] sm:$0xff] }
 0x4cf   : > { %12405 = vst [vmem:[#allocation168_spill] sm:$0xff] %v9850_v36  ;;  %v4098_v40 = vmul.f32 %v12409_v55, %v9504_v9  ;;  %v4043_v36 = vmul.f32 %v12406_v8, %v9521_v26  ;;  %v4099_v10 = vmul.f32 %v12409_v55, %v9521_v26  ;;  %v9883_v8 = vstv %s7002_s2  ;;  %s10106_s2 = sld [smem:[#allocation10 + $0x61]] }
 0x4d0   : > { %v9854_v31 = vpop.permute.xlu1 %4078  ;;  %4049 = vrot.lane.b32.xlu0 %v4042_v6, %s12264_s13 }
 0x4d1   : > { %12407 = vst [vmem:[#allocation73_spill] sm:$0xff] %v9854_v31 }
 0x4d2   : > { %6029 = vrot.lane.b32.xlu1 %v6023_v30, %s12254_s3  ;;  %v9860_v7 = vpop.permute.xlu0 %4725  ;;  %v12412_v30 = vstv %s9024_s26  ;;  %s7004_s26 = sld [smem:[#allocation10 + $0x28]] }
 0x4d3   : > { %12408 = vst [vmem:[#allocation169_spill] sm:$0xff] %v9860_v7  ;;  %v4161_v32 = vmul.f32 %v12412_v30, %v4158_v43  ;;  %v9874_v7 = vld [vmem:[#allocation4 + $0xb0] ss:$8 sm:$0x1]  ;;  %v6075_v30 = vmul.f32 %v9772_v18, %v9812_v4  ;;  %v6252_v18 = vmul.f32 %v9502_v47, %v9752_v34 }
 0x4d4   : > { %v9864_v42 = vpop.permute.xlu1 %4133  ;;  %4105 = vrot.lane.b32.xlu0 %v4098_v40, %s12270_s1  ;;  %v12415_v40 = vld [vmem:[#allocation81_spill] sm:$0xff]  ;;  %v6225_v53 = vmul.f32 %v10168_v33, %v9874_v7 }
 0x4d5   : > { %12410 = vst [vmem:[#allocation75_spill] sm:$0xff] %v9864_v42  ;;  %v4221_v45 = vmul.f32 %v12415_v40, %v9876_v23  ;;  %v4515_v34 = vld [vmem:[#allocation4 + $0x50] ss:$8 sm:$0xf] }
 0x4d6   : > { %4051 = vrot.lane.b32.xlu1 %v4043_v36, %s12264_s13  ;;  %v9870_v6 = vpop.permute.xlu0 %4794  ;;  %v5991_v36 = vmul.f32 %v9883_v8, %v9874_v7  ;;  %v6372_v42 = vld [vmem:[#allocation4 + $0x39] ss:$8 sm:$0xf0] }
 0x4d7   : > { %12411 = vst [vmem:[#allocation170_spill] sm:$0xff] %v9870_v6 }
 0x4d8   : > { %v9878_v9 = vpop.permute.xlu1 %4263  ;;  %4166 = vrot.lane.b32.xlu0 %v4161_v32, %s12253_s27  ;;  %v12418_v32 = vld [vmem:[#allocation82_spill] sm:$0xff] }
 0x4d9   : > { %12413 = vst [vmem:[#allocation171_spill] sm:$0xff] %v9878_v9  ;;  %v4282_v55 = vmul.f32 %v12418_v32, %v9876_v23 }
 0x4da   : > { %4107 = vrot.lane.b32.xlu1 %v4099_v10, %s12270_s1  ;;  %v9888_v20 = vpop.permute.xlu0 %4848  ;;  %v9905_v10 = vld [vmem:[#allocation4 + $0x88] ss:$8 sm:$0x1] }
 0x4db   : > { %12414 = vst [vmem:[#allocation172_spill] sm:$0xff] %v9888_v20  ;;  %v4222_v6 = vmul.f32 %v12415_v40, %v9905_v10  ;;  %v12426_v40 = vld [vmem:[#allocation88_spill] sm:$0xff] }
 0x4dc   : > { %v9892_v43 = vpop.permute.xlu1 %4316  ;;  %4228 = vrot.lane.b32.xlu0 %v4221_v45, %s12254_s3 }
 0x4dd   : > { %12416 = vst [vmem:[#allocation81_spill] sm:$0xff] %v9892_v43 }
 0x4de   : > { %5999 = vrot.lane.b32.xlu1 %v5991_v36, %s12254_s3  ;;  %v9896_v26 = vpop.permute.xlu0 %4975  ;;  %v12421_v36 = vld [vmem:[#allocation87_spill] sm:$0xff] }
 0x4df   : > { %12417 = vst [vmem:[#allocation173_spill] sm:$0xff] %v9896_v26  ;;  %v4335_v45 = vmul.f32 %v12421_v36, %v9876_v23  ;;  %v4336_v47 = vmul.f32 %v12421_v36, %v9905_v10  ;;  %v4571_v36 = vld [vmem:[#allocation4 + $0x50] ss:$8 sm:$0xf] }
 0x4e0   : > { %v9900_v19 = vpop.permute.xlu1 %4369  ;;  %4289 = vrot.lane.b32.xlu0 %v4282_v55, %s12257_s22 }
 0x4e1   : > { %12419 = vst [vmem:[#allocation82_spill] sm:$0xff] %v9900_v19 }
 0x4e2   : > { %6081 = vrot.lane.b32.xlu1 %v6075_v30, %s12257_s22  ;;  %v9908_v20 = vpop.permute.xlu0 %5027 }
 0x4e3   : > { %12420 = vst [vmem:[#allocation174_spill] sm:$0xff] %v9908_v20  ;;  %v4283_v20 = vmul.f32 %v12418_v32, %v9905_v10 }
 0x4e4   : > { %v9912_v26 = vpop.permute.xlu1 %4438  ;;  %4342 = vrot.lane.b32.xlu0 %v4335_v45, %s12263_s24  ;;  %v4404_v45 = vmul.f32 %v12426_v40, %v9876_v23 }
 0x4e5   : > { %12422 = vst [vmem:[#allocation87_spill] sm:$0xff] %v9912_v26 }
 0x4e6   : > { %4230 = vrot.lane.b32.xlu1 %v4222_v6, %s12254_s3  ;;  %v9920_v55 = vpop.permute.xlu0 %5079  ;;  %v4516_v6 = vld [vmem:[#allocation4 + $0x50] ss:$8 sm:$0xf0] }
 0x4e7   : > { %12423 = vst [vmem:[#allocation175_spill] sm:$0xff] %v9920_v55 }
 0x4e8   : > { %v9922_v30 = vpop.permute.xlu1 %4492  ;;  %6260 = vrot.lane.b32.xlu0 %v6252_v18, %s12270_s1 }
 0x4e9   : > { %12424 = vst [vmem:[#allocation176_spill] sm:$0xff] %v9922_v30  ;;  %v4572_v30 = vld [vmem:[#allocation4 + $0x50] ss:$8 sm:$0xf0] }
 0x4ea   : > { %4291 = vrot.lane.b32.xlu1 %v4283_v20, %s12257_s22  ;;  %v9928_v26 = vpop.permute.xlu0 %5148  ;;  %v12429_v20 = vld [vmem:[#allocation89_spill] sm:$0xff] }
 0x4eb   : > { %12425 = vst [vmem:[#allocation177_spill] sm:$0xff] %v9928_v26  ;;  %v4458_v18 = vmul.f32 %v12429_v20, %v9876_v23  ;;  %v4517_v26 = vor.u32 %v4516_v6, %v4515_v34  ;;  %v4459_v34 = vmul.f32 %v12429_v20, %v9905_v10 }
 0x4ec   : > { %v9932_v19 = vpop.permute.xlu1 %4619  ;;  %4411 = vrot.lane.b32.xlu0 %v4404_v45, %s12264_s13 }
 0x4ed   : > { %12427 = vst [vmem:[#allocation88_spill] sm:$0xff] %v9932_v19  ;;  %v4405_v19 = vmul.f32 %v12426_v40, %v9905_v10  ;;  %v9959_v40 = vstv %s7004_s26  ;;  %s10115_s26 = sld [smem:[#allocation10 + $0x2d]] }
 0x4ee   : > { %4344 = vrot.lane.b32.xlu1 %v4336_v47, %s12263_s24  ;;  %v9938_v32 = vpop.permute.xlu0 %5202  ;;  %v12432_v47 = vstv %s9087_s10  ;;  %s9970_s10 = sld [smem:[#allocation10 + $0x5e]] }
 0x4ef   : > { %12428 = vst [vmem:[#allocation178_spill] sm:$0xff] %v9938_v32  ;;  %v4520_v43 = vmul.f32 %v12432_v47, %v4517_v26  ;;  %v9952_v32 = vor.u32 %v4572_v30, %v4571_v36  ;;  %v6127_v36 = vmul.f32 %v9794_v11, %v9812_v4  ;;  %v6310_v47 = vld [vmem:[#allocation4 + $0x79] ss:$8 sm:$0xf] }
 0x4f0   : > { %v9942_v55 = vpop.permute.xlu1 %4671  ;;  %4465 = vrot.lane.b32.xlu0 %v4458_v18, %s12270_s1  ;;  %v6371_v4 = vld [vmem:[#allocation4 + $0x39] ss:$8 sm:$0xf] }
 0x4f1   : > { %12430 = vst [vmem:[#allocation89_spill] sm:$0xff] %v9942_v55  ;;  %v4578_v26 = vmul.f32 %v9171_v49, %v9952_v32  ;;  %v4638_v20 = vmul.f32 %v9177_v57, %v9952_v32 }
 0x4f2   : > { %4413 = vrot.lane.b32.xlu1 %v4405_v19, %s12264_s13  ;;  %v9948_v45 = vpop.permute.xlu0 %4197  ;;  %v6051_v19 = vmul.f32 %v9959_v40, %v9874_v7 }
 0x4f3   : > { %12431 = vst [vmem:[#allocation179_spill] sm:$0xff] %v9948_v45  ;;  %v10195_v45 = vstv %s10106_s2 }
 0x4f4   : > { %v9954_v25 = vpop.permute.xlu1 %4723  ;;  %4525 = vrot.lane.b32.xlu0 %v4520_v43, %s12253_s27  ;;  %v12081_v11 = vstv %s9970_s10  ;;  %12466 = vst [vmem:[#allocation208_spill] sm:$0xff] %v10195_v45 }
 0x4f5   : > { %12433 = vst [vmem:[#allocation180_spill] sm:$0xff] %v9954_v25 }
 0x4f6   : > { %4467 = vrot.lane.b32.xlu1 %v4459_v34, %s12270_s1  ;;  %v9964_v6 = vpop.permute.xlu0 %4554  ;;  %v6311_v34 = vld [vmem:[#allocation4 + $0x79] ss:$8 sm:$0xf0] }
 0x4f7   : > { %12434 = vst [vmem:[#allocation181_spill] sm:$0xff] %v9964_v6  ;;  %v10178_v6 = vstv %s10091_s21 }
 0x4f8   : > { %v9968_v30 = vpop.permute.xlu1 %4792  ;;  %4585 = vrot.lane.b32.xlu0 %v4578_v26, %s12254_s3  ;;  %v4690_v26 = vmul.f32 %v9196_v24, %v9952_v32  ;;  %12461 = vst [vmem:[#allocation207_spill] sm:$0xff] %v10178_v6 }
 0x4f9   : > { %12435 = vst [vmem:[#allocation182_spill] sm:$0xff] %v9968_v30  ;;  %v9983_v30 = vld [vmem:[#allocation4 + $0x90] ss:$8 sm:$0x1] }
 0x4fa   : > { %6059 = vrot.lane.b32.xlu1 %v6051_v19, %s12257_s22  ;;  %v9974_v43 = vpop.permute.xlu0 %4908 }
 0x4fb   : > { %12436 = vst [vmem:[#allocation183_spill] sm:$0xff] %v9974_v43  ;;  %v6312_v43 = vor.u32 %v6311_v34, %v6310_v47 }
 0x4fc   : > { %v9978_v18 = vpop.permute.xlu1 %4846  ;;  %4645 = vrot.lane.b32.xlu0 %v4638_v20, %s12257_s22 }
 0x4fd   : > { %12437 = vst [vmem:[#allocation184_spill] sm:$0xff] %v9978_v18  ;;  %v4579_v18 = vmul.f32 %v9171_v49, %v9983_v30  ;;  %v4758_v49 = vmul.f32 %v9360_v35, %v9952_v32 }
 0x4fe   : > { %6133 = vrot.lane.b32.xlu1 %v6127_v36, %s12263_s24  ;;  %v9986_v19 = vpop.permute.xlu0 %5258  ;;  %v6315_v36 = vmul.f32 %v12081_v11, %v6312_v43  ;;  %v4869_v43 = vld [vmem:[#allocation4 + $0x58] ss:$8 sm:$0xf] }
 0x4ff   : > { %12438 = vst [vmem:[#allocation185_spill] sm:$0xff] %v9986_v19  ;;  %v4639_v19 = vmul.f32 %v9177_v57, %v9983_v30 }
 0x500   : > { %v9990_v25 = vpop.permute.xlu1 %4973  ;;  %4697 = vrot.lane.b32.xlu0 %v4690_v26, %s12263_s24  ;;  %v4870_v26 = vld [vmem:[#allocation4 + $0x58] ss:$8 sm:$0xf0] }
 0x501   : > { %12439 = vst [vmem:[#allocation186_spill] sm:$0xff] %v9990_v25 }
 0x502   : > { %4587 = vrot.lane.b32.xlu1 %v4579_v18, %s12254_s3  ;;  %v9997_v20 = vpop.permute.xlu0 %5612  ;;  %v4691_v18 = vmul.f32 %v9196_v24, %v9983_v30  ;;  %v4925_v24 = vld [vmem:[#allocation4 + $0x58] ss:$8 sm:$0xf] }
 0x503   : > { %12440 = vst [vmem:[#allocation187_spill] sm:$0xff] %v9997_v20  ;;  %v4759_v20 = vmul.f32 %v9360_v35, %v9983_v30  ;;  %v10038_v35 = vstv %s7006_s4  ;;  %s10117_s4 = sld [smem:[#allocation10 + $0x30]] }
 0x504   : > { %v10001_v55 = vpop.permute.xlu1 %5025  ;;  %6320 = vrot.lane.b32.xlu0 %v6315_v36, %s12253_s27  ;;  %v4871_v36 = vor.u32 %v4870_v26, %v4869_v43  ;;  %v4813_v43 = vmul.f32 %v9382_v60, %v9983_v30 }
 0x505   : > { %12441 = vst [vmem:[#allocation188_spill] sm:$0xff] %v10001_v55 }
 0x506   : > { %4647 = vrot.lane.b32.xlu1 %v4639_v19, %s12257_s22  ;;  %v10007_v47 = vpop.permute.xlu0 %5677  ;;  %v4812_v19 = vmul.f32 %v9382_v60, %v9952_v32  ;;  %v10052_v60 = vstv %s7010_s5  ;;  %s10141_s5 = sld [smem:[#allocation10 + $0x23]] }
 0x507   : > { %12442 = vst [vmem:[#allocation189_spill] sm:$0xff] %v10007_v47  ;;  %v4926_v47 = vld [vmem:[#allocation4 + $0x58] ss:$8 sm:$0xf0] }
 0x508   : > { %v10011_v34 = vpop.permute.xlu1 %5077  ;;  %4765 = vrot.lane.b32.xlu0 %v4758_v49, %s12264_s13 }
 0x509   : > { %12443 = vst [vmem:[#allocation190_spill] sm:$0xff] %v10011_v34  ;;  %v10031_v34 = vor.u32 %v4926_v47, %v4925_v24 }
 0x50a   : > { %4699 = vrot.lane.b32.xlu1 %v4691_v18, %s12263_s24  ;;  %v10017_v57 = vpop.permute.xlu0 %5729  ;;  %v12447_v18 = vstv %s9362_s30  ;;  %s10054_s30 = sld [smem:[#allocation10 + $0x7]] }
 0x50b   : > { %12444 = vst [vmem:[#allocation191_spill] sm:$0xff] %v10017_v57  ;;  %v4874_v57 = vmul.f32 %v12447_v18, %v4871_v36  ;;  %v4932_v47 = vmul.f32 %v9408_v17, %v10031_v34  ;;  %v4992_v24 = vmul.f32 %v9418_v0, %v10031_v34  ;;  %v5112_v29 = vmul.f32 %v9442_v27, %v10031_v34 }
 0x50c   : > { %v10021_v11 = vpop.permute.xlu1 %5146  ;;  %4819 = vrot.lane.b32.xlu0 %v4812_v19, %s12270_s1  ;;  %v5166_v9 = vmul.f32 %v9454_v62, %v10031_v34  ;;  %v10233_v44 = vstv %s10141_s5 }
 0x50d   : > { %12445 = vst [vmem:[#allocation192_spill] sm:$0xff] %v10021_v11  ;;  %12476 = vst [vmem:[#allocation216_spill] sm:$0xff] %v10233_v44 }
 0x50e   : > { %4767 = vrot.lane.b32.xlu1 %v4759_v20, %s12264_s13  ;;  %v10027_v49 = vpop.permute.xlu0 %5781  ;;  %v6103_v20 = vmul.f32 %v10038_v35, %v9874_v7 }
 0x50f   : > { %12446 = vst [vmem:[#allocation193_spill] sm:$0xff] %v10027_v49 }
 0x510   : > { %v10033_v55 = vpop.permute.xlu1 %5200  ;;  %4879 = vrot.lane.b32.xlu0 %v4874_v57, %s12253_s27  ;;  %v6171_v57 = vmul.f32 %v10052_v60, %v9874_v7 }
 0x511   : > { %12448 = vst [vmem:[#allocation194_spill] sm:$0xff] %v10033_v55  ;;  %v10149_v55 = vstv %s10078_s17 }
 0x512   : > { %4821 = vrot.lane.b32.xlu1 %v4813_v43, %s12270_s1  ;;  %v10043_v26 = vpop.permute.xlu0 %5848  ;;  %v6375_v43 = vld [vmem:[#allocation4 + $0x79] ss:$8 sm:$0xf]  ;;  %12457 = vst [vmem:[#allocation203_spill] sm:$0xff] %v10149_v55  ;;  %v10230_v52 = vmul.f32 %v10149_v55, %v9473_v39 }
 0x513   : > { %12449 = vst [vmem:[#allocation195_spill] sm:$0xff] %v10043_v26  ;;  %v5044_v26 = vmul.f32 %v9428_v48, %v10031_v34 }
 0x514   : > { %v10047_v19 = vpop.permute.xlu1 %5323  ;;  %4939 = vrot.lane.b32.xlu0 %v4932_v47, %s12254_s3  ;;  %v10076_v47 = vld [vmem:[#allocation4 + $0x98] ss:$8 sm:$0x1]  ;;  %12475 = vst [vmem:[#allocation215_spill] sm:$0xff] %v10230_v52 }
 0x515   : > { %12450 = vst [vmem:[#allocation196_spill] sm:$0xff] %v10047_v19  ;;  %v4993_v25 = vmul.f32 %v9418_v0, %v10076_v47  ;;  %v10152_v19 = vstv %s10071_s16  ;;  %v10171_v0 = vstv %s10089_s20  ;;  %v5045_v41 = vmul.f32 %v9428_v48, %v10076_v47 }
 0x516   : > { %6111 = vrot.lane.b32.xlu1 %v6103_v20, %s12263_s24  ;;  %v10065_v36 = vpop.permute.xlu0 %5902  ;;  %v6376_v20 = vld [vmem:[#allocation4 + $0x79] ss:$8 sm:$0xf0]  ;;  %12458 = vst [vmem:[#allocation204_spill] sm:$0xff] %v10152_v19 }
 0x517   : > { %12451 = vst [vmem:[#allocation197_spill] sm:$0xff] %v10065_v36  ;;  %v10087_v49 = vor.u32 %v6376_v20, %v6375_v43  ;;  %v10110_v43 = vstv %s10054_s30  ;;  %v10113_v20 = vstv %s10049_s29  ;;  %s10154_s29 = sld [smem:[#allocation10 + $0x2a]]  ;;  %s10156_s30 = sld [smem:[#allocation10 + $0x5b]] }
 0x518   : > { %v10073_v18 = vpop.permute.xlu1 %5375  ;;  %4999 = vrot.lane.b32.xlu0 %v4992_v24, %s12257_s22 }
 0x519   : > { %12452 = vst [vmem:[#allocation198_spill] sm:$0xff] %v10073_v18  ;;  %v10097_v18 = vstv %s7017_s8  ;;  %s10143_s8 = sld [smem:[#allocation10 + $0x54]] }
 0x51a   : > { %6179 = vrot.lane.b32.xlu1 %v6171_v57, %s12264_s13  ;;  %v10083_v36 = vpop.permute.xlu0 %5966  ;;  %v4933_v57 = vmul.f32 %v9408_v17, %v10076_v47 }
 0x51b   : > { %12453 = vst [vmem:[#allocation199_spill] sm:$0xff] %v10083_v36  ;;  %v10124_v36 = vstv %s10061_s12 }
 0x51c   : > { %v10093_v24 = vpop.permute.xlu1 %5427  ;;  %5051 = vrot.lane.b32.xlu0 %v5044_v26, %s12263_s24  ;;  %v6382_v26 = vmul.f32 %v10097_v18, %v10087_v49  ;;  %v10200_v22 = vmul.f32 %v10124_v36, %v9272_v1  ;;  %v5573_v1 = vld [vmem:[#allocation4 + $0x68] ss:$8 sm:$0xf] }
 0x51d   : > { %12454 = vst [vmem:[#allocation200_spill] sm:$0xff] %v10093_v24  ;;  %v10127_v24 = vstv %s10056_s9  ;;  %s12884_s9 = sld [smem:[#allocation269_spill]] }
 0x51e   : > { %4941 = vrot.lane.b32.xlu1 %v4933_v57, %s12254_s3  ;;  %v10119_v17 = vpop.permute.xlu0 %6031  ;;  %v10130_v57 = vstv %s10063_s15  ;;  %12467 = vst [vmem:[#allocation209_spill] sm:$0xff] %v10200_v22  ;;  %v5570_v22 = vld [vmem:[#allocation4 + $0x28] ss:$8 sm:$0xf0] }
 0x51f   : > { %12455 = vst [vmem:[#allocation201_spill] sm:$0xff] %v10119_v17  ;;  %v10139_v17 = vstv %s10069_s19  ;;  %s7277_s19 = smov [#allocation11]  }
 0x520   : > { %v10134_v11 = vpop.permute.xlu1 %5496  ;;  %6389 = vrot.lane.b32.xlu0 %v6382_v26, %s12254_s3  ;;  %s7194_s16 = sshll.u32 %s7277_s19, 4  ;;  %s7195_s16 = int_to_ptr.vmem [resolvable:$false] %s7194_s16 }
 0x521   : > { %12456 = vst [vmem:[#allocation202_spill] sm:$0xff] %v10134_v11  ;;  %v10187_v11 = vmul.f32 %v10110_v43, %v12462_v13  ;;  %v10220_v13 = vmul.f32 %v10130_v57, %v9213_v61  ;;  %v5629_v61 = vld [vmem:[#allocation4 + $0x68] ss:$8 sm:$0xf]  ;;  %s7196_s17 = scalar_lea.vmem %s7195_s16, 8192 }
 0x522   : > { %5001 = vrot.lane.b32.xlu1 %v4993_v25, %s12257_s22  ;;  %v10163_v26 = vpop.permute.xlu0 %6033  ;;  %v5222_v25 = vld [vmem:[#allocation4 + $0x60] ss:$8 sm:$0xf0] }
 0x523   : > { %12459 = vst [vmem:[#allocation205_spill] sm:$0xff] %v10163_v26  ;;  %v5276_v26 = vld [vmem:[#allocation4 + $0x60] ss:$8 sm:$0xf0]  ;;  %12463 = vst [vmem:[#allocation86_spill] sm:$0xff] %v10187_v11  ;;  %v10208_v11 = vstv %s10117_s4  ;;  %s12885_s12 = smov %s12884_s9 }
 0x524   : > { %v10173_v58 = vpop.permute.xlu1 %5550  ;;  %5119 = vrot.lane.b32.xlu0 %v5112_v29, %s12264_s13  ;;  %v12468_v29 = vld [vmem:[#allocation85_spill] sm:$0xff]  ;;  %12470 = vst [vmem:[#allocation210_spill] sm:$0xff] %v10208_v11  ;;  %12473 = vst [vmem:[#allocation213_spill] sm:$0xff] %v10220_v13  ;;  %v10251_v13 = vor.u32 %v6372_v42, %v6371_v4  ;;  %v12487_v42 = vld [vmem:[#allocation30_spill] sm:$0xff] }
 0x525   : > { %12460 = vst [vmem:[#allocation206_spill] sm:$0xff] %v10173_v58  ;;  %v12464_v58 = vld [vmem:[#allocation71_spill] sm:$0xff]  ;;  %v10204_v54 = vmul.f32 %v10127_v24, %v12468_v29  ;;  %v10216_v29 = vmul.f32 %v10139_v17, %v9404_v2 }
 0x526   : > { %v10191_v48 = vmul.f32 %v10113_v20, %v12464_v58  ;;  %5053 = vrot.lane.b32.xlu1 %v5045_v41, %s12263_s24  ;;  %v10210_v58 = vpop.permute.xlu0 %6083  ;;  %v6306_v41 = vld [vmem:[#allocation4 + $0x39] ss:$8 sm:$0xf]  ;;  %v5630_v2 = vld [vmem:[#allocation4 + $0x68] ss:$8 sm:$0xf0] }
 0x527   : > { %12469 = vst [vmem:[#allocation85_spill] sm:$0xff] %v10204_v54  ;;  %12471 = vst [vmem:[#allocation211_spill] sm:$0xff] %v10210_v58  ;;  %v5574_v54 = vld [vmem:[#allocation4 + $0x68] ss:$8 sm:$0xf0]  ;;  %v6308_v52 = vor.u32 %v6307_v21, %v6306_v41  ;;  %v10268_v21 = vmul.f32 %v10127_v24, %v9604_v37 }
 0x528   : > { %12465 = vst [vmem:[#allocation71_spill] sm:$0xff] %v10191_v48  ;;  %v5223_v48 = vor.u32 %v5222_v25, %v5221_v16  ;;  %12472 = vst [vmem:[#allocation212_spill] sm:$0xff] %v10216_v29  ;;  %v10222_v58 = vpop.permute.xlu1 %5610  ;;  %v5113_v16 = vmul.f32 %v9442_v27, %v10076_v47  ;;  %v10226_v25 = vor.u32 %v5276_v26, %v5275_v5  ;;  %5173 = vrot.lane.b32.xlu0 %v5166_v9, %s12270_s1  ;;  %v5627_v9 = vld [vmem:[#allocation4 + $0x28] ss:$8 sm:$0xf0] }
 0x529   : > { %12474 = vst [vmem:[#allocation214_spill] sm:$0xff] %v10222_v58  ;;  %v10238_v58 = vmul.f32 %v10152_v19, %v9368_v63  ;;  %v10241_v27 = vstv %s10143_s8  ;;  %v10244_v5 = vstv %s10154_s29  ;;  %v10247_v26 = vstv %s10156_s30  ;;  %12485 = vst [vmem:[#allocation224_spill] sm:$0xff] %v10268_v21  ;;  %v5927_v21 = vld [vmem:[#allocation4 + $0x70] ss:$8 sm:$0xf] }
 0x52a   : > { %12478 = vst [vmem:[#allocation218_spill] sm:$0xff] %v10241_v27  ;;  %12479 = vst [vmem:[#allocation219_spill] sm:$0xff] %v10244_v5  ;;  %5121 = vrot.lane.b32.xlu1 %v5113_v16, %s12264_s13  ;;  %v10255_v29 = vmul.f32 %v10113_v20, %v9557_v28  ;;  %v10257_v63 = vpop.permute.xlu0 %6085  ;;  %v12483_v5 = vstv %s9444_s28  ;;  %v7136_v27 = vld [vmem:[#allocation4 + $0x89] ss:$8 sm:$0x1]  ;;  %v5575_v41 = vor.u32 %v5574_v54, %v5573_v1  ;;  %v12493_v1 = vstv %s9970_s10 }
 0x52b   : > { %12477 = vst [vmem:[#allocation217_spill] sm:$0xff] %v10238_v58  ;;  %12480 = vst [vmem:[#allocation220_spill] sm:$0xff] %v10247_v26  ;;  %v5167_v58 = vmul.f32 %v9454_v62, %v10076_v47  ;;  %v5226_v31 = vmul.f32 %v12483_v5, %v5223_v48  ;;  %v5569_v26 = vld [vmem:[#allocation4 + $0x28] ss:$8 sm:$0xf]  ;;  %v10264_v39 = vmul.f32 %v7136_v27, %v10113_v20 }
 0x52c   : > { %12481 = vst [vmem:[#allocation221_spill] sm:$0xff] %v10255_v29  ;;  %12482 = vst [vmem:[#allocation222_spill] sm:$0xff] %v10257_v63  ;;  %v10271_v28 = vpop.permute.xlu1 %5675  ;;  %v5282_v62 = vmul.f32 %v12487_v42, %v10226_v25  ;;  %v5571_v48 = vor.u32 %v5570_v22, %v5569_v26  ;;  %v5626_v16 = vld [vmem:[#allocation4 + $0x28] ss:$8 sm:$0xf]  ;;  %v10279_v27 = vor.u32 %v5630_v2, %v5629_v61  ;;  %v12498_v63 = vrot.slane %v9537_v46, 7 }
 0x52d   : > { %12484 = vst [vmem:[#allocation223_spill] sm:$0xff] %v10264_v39  ;;  %12486 = vst [vmem:[#allocation225_spill] sm:$0xff] %v10271_v28  ;;  %v12488_v5 = vld [vmem:[#allocation91_spill] sm:$0xff]  ;;  %5231 = vrot.lane.b32.xlu0 %v5226_v31, %s12253_s27  ;;  %v10281_v4 = vor.u32 %v5627_v9, %v5626_v16  ;;  %v12490_v28 = vrot.slane %v9519_v14, 7  ;;  %v12492_v22 = vld [vmem:[#allocation32_spill] sm:$0xff]  ;;  %v10296_v61 = vmul.f32 %v12493_v1, %v6308_v52  ;;  %v12501_v39 = vstv %s10099_s23 }
 0x52e   : > { %v12489_v20 = vld [vmem:[#allocation31_spill] sm:$0xff]  ;;  %5175 = vrot.lane.b32.xlu1 %v5167_v58, %s12270_s1  ;;  %v10292_v31 = vmul.f32 %v12492_v22, %v10226_v25  ;;  %v10300_v2 = vmul.f32 %v10097_v18, %v10251_v13  ;;  %v12495_v16 = vld [vmem:[#allocation34_spill] sm:$0xff]  ;;  %v10315_v52 = vmul.f32 %v10178_v6, %v10251_v13  ;;  %v10321_v42 = vsel %vm4170_vm4, %v12498_v63, %v9537_v46 }
 0x52f   : > { %v5342_v37 = vmul.f32 %v12489_v20, %v10226_v25  ;;  %v10287_v54 = vsel %vm4170_vm4, %v12490_v28, %v9519_v14  ;;  %v5928_v26 = vld [vmem:[#allocation4 + $0x70] ss:$8 sm:$0xf0]  ;;  %v10303_v28 = vpop.permute.xlu0 %6135  ;;  %v10307_v58 = vmul.f32 %v12495_v16, %v10226_v25  ;;  %12499 = vst [vmem:[#allocation32_spill] sm:$0xff] %v10321_v42  ;;  %v10327_v16 = vmul.f32 %v12501_v39, %v5575_v41 }
 0x530   : > { %12491 = vst [vmem:[#allocation30_spill] sm:$0xff] %v10287_v54  ;;  %v5924_v9 = vld [vmem:[#allocation4 + $0x30] ss:$8 sm:$0xf0]  ;;  %12494 = vst [vmem:[#allocation91_spill] sm:$0xff] %v10303_v28  ;;  %v10323_v28 = vpop.permute.xlu1 %5727  ;;  %v12502_v29 = vmov %v12501_v39  ;;  %v5929_v46 = vor.u32 %v5928_v26, %v5927_v21  ;;  %v10378_v26 = vmul.f32 %v10178_v6, %v10087_v49  ;;  %v10420_v6 = vmul.f32 %v10124_v36, %v9952_v32 }
 0x531   : > { %v12496_v20 = vld [vmem:[#allocation36_spill] sm:$0xff]  ;;  %12497 = vst [vmem:[#allocation31_spill] sm:$0xff] %v10315_v52  ;;  %12500 = vst [vmem:[#allocation34_spill] sm:$0xff] %v10323_v28  ;;  %v10331_v14 = vmul.f32 %v12502_v29, %v5571_v48  ;;  %5289 = vrot.lane.b32.xlu0 %v5282_v62, %s12254_s3  ;;  %v12505_v63 = vld [vmem:[#allocation38_spill] sm:$0xff] }
 0x532   : > { %v10311_v22 = vmul.f32 %v12496_v20, %v10226_v25  ;;  %v5983_v1 = vld [vmem:[#allocation4 + $0x70] ss:$8 sm:$0xf]  ;;  %v10335_v20 = vmul.f32 %v10110_v43, %v9876_v23  ;;  %v10341_v28 = vmul.f32 %v12505_v63, %v10279_v27  ;;  %v10345_v39 = vmul.f32 %v12505_v63, %v10281_v4  ;;  %12523 = vst [vmem:[#allocation230_spill] sm:$0xff] %v10420_v6 }
 0x533   : > { %12503 = vst [vmem:[#allocation36_spill] sm:$0xff] %v10331_v14  ;;  %v5984_v54 = vld [vmem:[#allocation4 + $0x70] ss:$8 sm:$0xf0] }
 0x534   : > { %12504 = vst [vmem:[#allocation226_spill] sm:$0xff] %v10335_v20  ;;  %v5981_v52 = vld [vmem:[#allocation4 + $0x30] ss:$8 sm:$0xf0]  ;;  %12506 = vst [vmem:[#allocation38_spill] sm:$0xff] %v10341_v28  ;;  %v10366_v28 = vor.u32 %v5984_v54, %v5983_v1  ;;  %v10370_v7 = vpop.permute.xlu1 %5779  ;;  %v10386_v54 = vmul.f32 %v10110_v43, %v9905_v10 }
 0x535   : > { %12507 = vst [vmem:[#allocation227_spill] sm:$0xff] %v10345_v39  ;;  %v12508_v29 = vld [vmem:[#allocation40_spill] sm:$0xff]  ;;  %v10360_v39 = vpop.permute.xlu0 %6137  ;;  %5349 = vrot.lane.b32.xlu0 %v5342_v37, %s12257_s22  ;;  %v12518_v63 = vld [vmem:[#allocation46_spill] sm:$0xff] }
 0x536   : > { %v10349_v41 = vmul.f32 %v12508_v29, %v10279_v27  ;;  %v5923_v23 = vld [vmem:[#allocation4 + $0x30] ss:$8 sm:$0xf]  ;;  %v10357_v62 = vmul.f32 %v12508_v29, %v10281_v4  ;;  %v10405_v10 = vmul.f32 %v12518_v63, %v10281_v4 }
 0x537   : > { %v12510_v48 = vld [vmem:[#allocation76_spill] sm:$0xff]  ;;  %v5925_v42 = vor.u32 %v5924_v9, %v5923_v23 }
 0x538   : > { %12509 = vst [vmem:[#allocation40_spill] sm:$0xff] %v10349_v41  ;;  %6204 = vrot.lane.b32.xlu1 %v12510_v48, %s12264_s13  ;;  %v5980_v20 = vld [vmem:[#allocation4 + $0x30] ss:$8 sm:$0xf]  ;;  %12511 = vst [vmem:[#allocation76_spill] sm:$0xff] %v10360_v39  ;;  %v10401_v39 = vmul.f32 %v12518_v63, %v10279_v27  ;;  %v10424_v63 = vmul.f32 %v10195_v45, %v10251_v13  ;;  %v10448_v6 = vpop.permute.xlu1 %5850 }
 0x539   : > { %v12512_v41 = vld [vmem:[#allocation42_spill] sm:$0xff]  ;;  %v10368_v48 = vor.u32 %v5981_v52, %v5980_v20  ;;  %v12514_v9 = vld [vmem:[#allocation44_spill] sm:$0xff]  ;;  %v12516_v20 = vrot.slane %v9550_v3, 7  ;;  %12519 = vst [vmem:[#allocation46_spill] sm:$0xff] %v10405_v10  ;;  %12529 = vst [vmem:[#allocation235_spill] sm:$0xff] %v10448_v6  ;;  %5401 = vrot.lane.b32.xlu0 %v10292_v31, %s12263_s24 }
 0x53a   : > { %v10364_v14 = vmul.f32 %v12512_v41, %v10281_v4  ;;  %12513 = vst [vmem:[#allocation42_spill] sm:$0xff] %v10370_v7  ;;  %v10374_v21 = vmul.f32 %v12512_v41, %v10279_v27  ;;  %v10382_v29 = vmul.f32 %v12514_v9, %v10279_v27  ;;  %12515 = vst [vmem:[#allocation44_spill] sm:$0xff] %v10386_v54  ;;  %v6281_v52 = vld [vmem:[#allocation4 + $0x78] ss:$8 sm:$0xf] }
 0x53b   : > { %v6282_v1 = vld [vmem:[#allocation4 + $0x78] ss:$8 sm:$0xf0]  ;;  %v10392_v41 = vsel %vm4170_vm4, %v12516_v20, %v9550_v3  ;;  %v10397_v23 = vmul.f32 %v12514_v9, %v10281_v4  ;;  %v10408_v20 = vld [vmem:[#allocation4 + $0xb9] ss:$8 sm:$0x1]  ;;  %v12520_v3 = vstv %s10104_s0  ;;  %v10440_v32 = vmul.f32 %v9883_v8, %v10368_v48 }
 0x53c   : > { %12517 = vst [vmem:[#allocation228_spill] sm:$0xff] %v10392_v41  ;;  %v6278_v43 = vld [vmem:[#allocation4 + $0x38] ss:$8 sm:$0xf0]  ;;  %6233 = vrot.lane.b32.xlu1 %v6225_v53, %s12270_s1  ;;  %v10412_v37 = vmul.f32 %v12520_v3, %v5929_v46  ;;  %v12521_v41 = vmov %v12520_v3  ;;  %12524 = vst [vmem:[#allocation231_spill] sm:$0xff] %v10424_v63  ;;  %v12525_v53 = vrot.slane %v9553_v51, 7  ;;  %v10432_v46 = vpop.permute.xlu0 %6202  ;;  %v10436_v3 = vmul.f32 %v9883_v8, %v10366_v28 }
 0x53d   : > { %v6339_v7 = vld [vmem:[#allocation4 + $0x78] ss:$8 sm:$0xf]  ;;  %v10416_v9 = vmul.f32 %v12521_v41, %v5925_v42  ;;  %12526 = vst [vmem:[#allocation232_spill] sm:$0xff] %v10432_v46  ;;  %12527 = vst [vmem:[#allocation233_spill] sm:$0xff] %v10440_v32  ;;  %v10444_v13 = vmul.f32 %v9959_v40, %v10368_v48  ;;  %v10452_v46 = vmul.f32 %v9959_v40, %v10366_v28 }
 0x53e   : > { %v6340_v10 = vld [vmem:[#allocation4 + $0x78] ss:$8 sm:$0xf0]  ;;  %v10430_v54 = vsel %vm4234_vm5, %v12525_v53, %v9553_v51  ;;  %v10456_v63 = vmul.f32 %v10038_v35, %v10368_v48  ;;  %v6383_v32 = vmul.f32 %v10097_v18, %v10408_v20  ;;  %v6283_v41 = vor.u32 %v6282_v1, %v6281_v52  ;;  %v10502_v52 = vpop.permute.xlu1 %5904 }
 0x53f   : > { %12522 = vst [vmem:[#allocation229_spill] sm:$0xff] %v10416_v9  ;;  %12528 = vst [vmem:[#allocation234_spill] sm:$0xff] %v10444_v13  ;;  %v6336_v42 = vld [vmem:[#allocation4 + $0x38] ss:$8 sm:$0xf0]  ;;  %v6341_v53 = vor.u32 %v6340_v10, %v6339_v7  ;;  %v10466_v40 = vmul.f32 %v10038_v35, %v10366_v28  ;;  %v10474_v31 = vmul.f32 %v10052_v60, %v10368_v48 }
 0x540   : > { %12530 = vst [vmem:[#allocation236_spill] sm:$0xff] %v10452_v46  ;;  %v6277_v8 = vld [vmem:[#allocation4 + $0x38] ss:$8 sm:$0xf]  ;;  %v10470_v46 = vmul.f32 %v10052_v60, %v10366_v28  ;;  %v10477_v1 = vpop.permute.xlu0 %6206  ;;  %v10485_v35 = vmul.f32 %v10124_v36, %v9983_v30  ;;  %v12539_v60 = vrot.slane %v9561_v50, 7  ;;  %12542 = vst [vmem:[#allocation242_spill] sm:$0xff] %v10502_v52  ;;  %v10506_v30 = vmul.f32 %v10168_v33, %v10368_v48 }
 0x541   : > { %v6279_v13 = vor.u32 %v6278_v43, %v6277_v8  ;;  %v6335_v9 = vld [vmem:[#allocation4 + $0x38] ss:$8 sm:$0xf]  ;;  %12533 = vst [vmem:[#allocation237_spill] sm:$0xff] %v10474_v31  ;;  %v10510_v36 = vmul.f32 %v10139_v17, %v10031_v34  ;;  %6391 = vrot.lane.b32.xlu0 %v6383_v32, %s12254_s3  ;;  %v10525_v52 = vmul.f32 %v10182_v12, %v6341_v53 }
 0x542   : > { %v12531_v6 = vld [vmem:[#allocation118_spill] sm:$0xff]  ;;  %v6337_v18 = vor.u32 %v6336_v42, %v6335_v9  ;;  %12537 = vst [vmem:[#allocation239_spill] sm:$0xff] %v10485_v35  ;;  %v7137_v10 = vld [vmem:[#allocation4 + $0x91] ss:$8 sm:$0x1]  ;;  %v10494_v9 = vsel %vm4170_vm4, %v12539_v60, %v9561_v50  ;;  %v12541_v42 = vrot.slane %v9563_v38, 7 }
 0x543   : > { %6258 = vrot.lane.b32.xlu1 %v12531_v6, %s12270_s1  ;;  %12532 = vst [vmem:[#allocation118_spill] sm:$0xff] %v10470_v46  ;;  %v12534_v7 = vld [vmem:[#allocation122_spill] sm:$0xff]  ;;  %v10481_v6 = vmul.f32 %v10168_v33, %v10366_v28  ;;  %v10488_v43 = vmul.f32 %v7137_v10, %v10127_v24  ;;  %12540 = vst [vmem:[#allocation241_spill] sm:$0xff] %v10494_v9  ;;  %v12545_v24 = vstv %s10115_s26  ;;  %v12551_v33 = vld [vmem:[#allocation80_spill] sm:$0xff] }
 0x544   : > { %12535 = vst [vmem:[#allocation122_spill] sm:$0xff] %v10477_v1  ;;  %v10500_v8 = vsel %vm4295_vm6, %v12541_v42, %v9563_v38  ;;  %12543 = vst [vmem:[#allocation243_spill] sm:$0xff] %v10506_v30  ;;  %v10515_v10 = vmul.f32 %v12545_v24, %v6283_v41  ;;  %v12547_v60 = vmov %v12545_v24  ;;  %v10522_v42 = vmul.f32 %v10171_v0, %v6341_v53  ;;  %v10547_v50 = vld [vmem:[#allocation4 + $0xb8] ss:$8 sm:$0x1] }
 0x545   : > { %12536 = vst [vmem:[#allocation238_spill] sm:$0xff] %v10481_v6  ;;  %12538 = vst [vmem:[#allocation240_spill] sm:$0xff] %v10488_v43  ;;  %v10519_v1 = vmul.f32 %v12547_v60, %v6279_v13  ;;  %v4053_v9 = vrot.slane %v12551_v33, 1  ;;  %v10531_v34 = vmul.f32 %v10171_v0, %v6337_v18  ;;  %v10534_v32 = vmul.f32 %v10182_v12, %v6337_v18  ;;  %v10545_v60 = vpop.permute.xlu0 %6256  ;;  %v12601_v30 = vld [vmem:[#allocation121_spill] sm:$0xff] }
 0x546   : > { %12544 = vst [vmem:[#allocation244_spill] sm:$0xff] %v10510_v36  ;;  %12546 = vst [vmem:[#allocation245_spill] sm:$0xff] %v10515_v10  ;;  %v10537_v13 = vmul.f32 %v10208_v11, %v6337_v18  ;;  %v12555_v41 = vrot.slane %v12534_v7, 7  ;;  %v10554_v36 = vmul.f32 %v10208_v11, %v6341_v53  ;;  %v10558_v18 = vmul.f32 %v10195_v45, %v10087_v49  ;;  %v12565_v49 = vld [vmem:[#allocation83_spill] sm:$0xff] }
 0x547   : > { %12548 = vst [vmem:[#allocation246_spill] sm:$0xff] %v10519_v1  ;;  %12549 = vst [vmem:[#allocation247_spill] sm:$0xff] %v10522_v42  ;;  %6318 = vrot.lane.b32.xlu1 %v10296_v61, %s12253_s27  ;;  %v10551_v61 = vmul.f32 %v10130_v57, %v9656_v59  ;;  %v10571_v59 = vmul.f32 %v10149_v55, %v10226_v25  ;;  %v10575_v53 = vmul.f32 %v10152_v19, %v9713_v15  ;;  %v12570_v15 = vld [vmem:[#allocation123_spill] sm:$0xff]  ;;  %v12599_v42 = vld [vmem:[#allocation120_spill] sm:$0xff] }
 0x548   : > { %12550 = vst [vmem:[#allocation248_spill] sm:$0xff] %v10525_v52  ;;  %12552 = vst [vmem:[#allocation80_spill] sm:$0xff] %v10531_v34  ;;  %v10543_v24 = vsel %vm4348_vm7, %v12555_v41, %v12534_v7  ;;  %v10560_v52 = vpop.permute.xlu1 %5964  ;;  %v10564_v41 = vmul.f32 %v10139_v17, %v10076_v47  ;;  %5469 = vrot.lane.b32.xlu0 %v10307_v58, %s12264_s13  ;;  %v10582_v47 = vmul.f32 %v10233_v44, %v10279_v27  ;;  %v12567_v17 = vld [vmem:[#allocation218_spill] sm:$0xff]  ;;  %v12573_v58 = vld [vmem:[#allocation125_spill] sm:$0xff] }
 0x549   : > { %12553 = vst [vmem:[#allocation249_spill] sm:$0xff] %v10534_v32  ;;  %12554 = vst [vmem:[#allocation250_spill] sm:$0xff] %v10537_v13  ;;  %v10590_v25 = vmul.f32 %v10233_v44, %v10281_v4  ;;  %v6347_v27 = vmul.f32 %v10171_v0, %v10547_v50  ;;  %v12575_v55 = vld [vmem:[#allocation127_spill] sm:$0xff]  ;;  %v4050_v4 = vpop.permute.xlu0 %4049  ;;  %v12582_v0 = vld [vmem:[#allocation117_spill] sm:$0xff]  ;;  %v12600_v43 = vrot.slane %v12599_v42, 1 }
 0x54a   : > { %12556 = vst [vmem:[#allocation251_spill] sm:$0xff] %v10545_v60  ;;  %12557 = vst [vmem:[#allocation252_spill] sm:$0xff] %v10551_v61  ;;  %v7138_v60 = vld [vmem:[#allocation4 + $0x99] ss:$8 sm:$0x1]  ;;  %v4109_v61 = vrot.slane %v12565_v49, 1 }
 0x54b   : > { %12558 = vst [vmem:[#allocation253_spill] sm:$0xff] %v10554_v36  ;;  %12559 = vst [vmem:[#allocation254_spill] sm:$0xff] %v10558_v18  ;;  %v10567_v13 = vmul.f32 %v7138_v60, %v10130_v57  ;;  %v10586_v57 = vmul.f32 %v12567_v17, %v9675_v56  ;;  %6387 = vrot.lane.b32.xlu1 %v10300_v2, %s12254_s3  ;;  %v12574_v56 = vld [vmem:[#allocation126_spill] sm:$0xff]  ;;  %v4054_v11 = vrot.slane %v4050_v4, 1  ;;  %v12580_v2 = vld [vmem:[#allocation219_spill] sm:$0xff] }
 0x54c   : > { %12560 = vst [vmem:[#allocation255_spill] sm:$0xff] %v10560_v52  ;;  %12561 = vst [vmem:[#allocation256_spill] sm:$0xff] %v10564_v41  ;;  %v12571_v52 = vld [vmem:[#allocation84_spill] sm:$0xff]  ;;  %v10607_v41 = vpop.permute.xlu1 %6029  ;;  %v10611_v36 = vmul.f32 %v12580_v2, %v10366_v28  ;;  %v12586_v45 = vld [vmem:[#allocation75_spill] sm:$0xff]  ;;  %5523 = vrot.lane.b32.xlu0 %v10311_v22, %s12270_s1 }
 0x54d   : > { %12562 = vst [vmem:[#allocation257_spill] sm:$0xff] %v10567_v13  ;;  %12563 = vst [vmem:[#allocation258_spill] sm:$0xff] %v10571_v59  ;;  %v12572_v59 = vld [vmem:[#allocation73_spill] sm:$0xff]  ;;  %v4138_v34 = vrot.slane %v12586_v45, 1  ;;  %v12588_v44 = vld [vmem:[#allocation160_spill] sm:$0xff]  ;;  %v12590_v28 = vrot.slane %v12571_v52, 7  ;;  %v4057_v22 = vsel %vm4056_vm8, %v4053_v9, %v4054_v11 }
 0x54e   : > { %12564 = vst [vmem:[#allocation259_spill] sm:$0xff] %v10575_v53  ;;  %12566 = vst [vmem:[#allocation83_spill] sm:$0xff] %v10582_v47  ;;  %v4083_v19 = vrot.slane %v12572_v59, 1  ;;  %v12578_v53 = vld [vmem:[#allocation128_spill] sm:$0xff]  ;;  %v12595_v13 = vrot.slane %v12575_v55, 7  ;;  %v4059_v9 = vsel %vm675_vm2, %v12551_v33, %v4057_v22 }
 0x54f   : > { %12568 = vst [vmem:[#allocation260_spill] sm:$0xff] %v10586_v57  ;;  %12569 = vst [vmem:[#allocation261_spill] sm:$0xff] %v10590_v25  ;;  %v12576_v25 = vld [vmem:[#allocation43_spill] sm:$0xff]  ;;  %v12583_v47 = vld [vmem:[#allocation220_spill] sm:$0xff]  ;;  %6355 = vrot.lane.b32.xlu1 %v6347_v27, %s12254_s3  ;;  %v4106_v27 = vpop.permute.xlu0 %4105  ;;  %v4140_v33 = vsel %vm4056_vm8, %v12600_v43, %v4138_v34 }
 0x550   : > { %v10604_v60 = vmul.f32 %v12567_v17, %v12576_v25  ;;  %12579 = vst [vmem:[#allocation84_spill] sm:$0xff] %v10607_v41  ;;  %12581 = vst [vmem:[#allocation73_spill] sm:$0xff] %v10611_v36  ;;  %v10615_v18 = vmul.f32 %v12583_v47, %v12582_v0  ;;  %v12585_v57 = vld [vmem:[#allocation124_spill] sm:$0xff]  ;;  %v10623_v25 = vmul.f32 %v12580_v2, %v10368_v48  ;;  %v12592_v36 = vrot.slane %v12488_v5, 1  ;;  %v4052_v32 = vpop.permute.xlu1 %4051 }
 0x551   : > { %v10627_v41 = vmul.f32 %v12583_v47, %v12588_v44  ;;  %v4171_v0 = vsel %vm4170_vm4, %v12590_v28, %v12571_v52  ;;  %v12593_v48 = vrot.slane %v12573_v58, 7  ;;  %v12597_v47 = vld [vmem:[#allocation151_spill] sm:$0xff]  ;;  %v4110_v1 = vrot.slane %v4106_v27, 1  ;;  %5583 = vrot.lane.b32.xlu0 %v10327_v16, %s12253_s27 }
 0x552   : > { %12577 = vst [vmem:[#allocation123_spill] sm:$0xff] %v10604_v60  ;;  %12584 = vst [vmem:[#allocation125_spill] sm:$0xff] %v10615_v18  ;;  %v12591_v18 = vld [vmem:[#allocation129_spill] sm:$0xff]  ;;  %v4085_v60 = vsel %vm4056_vm8, %v12592_v36, %v4083_v19  ;;  %v10655_v36 = vsel %vm4295_vm6, %v12595_v13, %v12575_v55  ;;  %v4084_v2 = vrot.slane %v12597_v47, 1  ;;  %v4055_v22 = vrot.slane %v4052_v32, 1 }
 0x553   : > { %12587 = vst [vmem:[#allocation126_spill] sm:$0xff] %v10623_v25  ;;  %12589 = vst [vmem:[#allocation127_spill] sm:$0xff] %v10627_v41  ;;  %v10643_v44 = vsel %vm4234_vm5, %v12593_v48, %v12573_v58  ;;  %v12594_v41 = vrot.slane %v12574_v56, 7  ;;  %v12596_v48 = vrot.slane %v12578_v53, 7  ;;  %v4086_v13 = vsel %vm675_vm2, %v12488_v5, %v4085_v60  ;;  %v12604_v60 = vld [vmem:[#allocation31_spill] sm:$0xff]  ;;  %v4167_v6 = vpop.permute.xlu0 %4166 }
 0x554   : > { %v4067_v35 = vadd.f32 %v4052_v32, %v12601_v30  ;;  %v4112_v5 = vsel %vm4056_vm8, %v4109_v61, %v4110_v1  ;;  %6439 = vrot.lane.b32.xlu1 %v12604_v60, %s12257_s22  ;;  %v4087_v43 = vsel %vm4056_vm8, %v4083_v19, %v4084_v2  ;;  %v4060_v30 = vsel %vm4056_vm8, %v4054_v11, %v4055_v22  ;;  %v4108_v10 = vpop.permute.xlu1 %4107  ;;  %v12606_v60 = vld [vmem:[#allocation77_spill] sm:$0xff]  ;;  %v12607_v22 = vld [vmem:[#allocation38_spill] sm:$0xff] }
 0x555   : > { %v10649_v28 = vsel %vm4234_vm5, %v12594_v41, %v12574_v56  ;;  %v10663_v25 = vsel %vm4295_vm6, %v12596_v48, %v12578_v53  ;;  %v12598_v41 = vld [vmem:[#allocation96_spill] sm:$0xff]  ;;  %v12602_v48 = vrot.slane %v12591_v18, 7  ;;  %v4114_v16 = vsel %vm4113_vm9, %v12565_v49, %v4112_v5  ;;  %5643 = vrot.lane.b32.xlu0 %v12607_v22, %s12254_s3  ;;  %v12612_v5 = vld [vmem:[#allocation179_spill] sm:$0xff] }
 0x556   : > { %v4065_v17 = vadd.f32 %v4059_v9, %v12598_v41  ;;  %v12603_v41 = vld [vmem:[#allocation130_spill] sm:$0xff]  ;;  %v4094_v32 = vadd.f32 %v12597_v47, %v4067_v35  ;;  %v4061_v61 = vsel %vm675_vm2, %v4050_v4, %v4060_v30  ;;  %v4111_v19 = vrot.slane %v4108_v10, 1  ;;  %v12610_v47 = vld [vmem:[#allocation131_spill] sm:$0xff] }
 0x557   : > { %v10679_v9 = vsel %vm4348_vm7, %v12602_v48, %v12591_v18  ;;  %v12605_v48 = vld [vmem:[#allocation153_spill] sm:$0xff]  ;;  %v4066_v53 = vadd.f32 %v4061_v61, %v12606_v60  ;;  %v4169_v11 = vrot.slane %v4167_v6, 7  ;;  %v12608_v35 = vrot.slane %v12603_v41, 7  ;;  %v4229_v61 = vpop.permute.xlu0 %4228 }
 0x558   : > { %v4092_v31 = vadd.f32 %v4086_v13, %v4065_v17  ;;  %v4139_v46 = vrot.slane %v12605_v48, 1  ;;  %v4141_v17 = vsel %vm4113_vm9, %v12599_v42, %v4140_v33  ;;  %v4122_v2 = vadd.f32 %v4108_v10, %v4094_v32  ;;  %v12611_v33 = vld [vmem:[#allocation36_spill] sm:$0xff] }
 0x559   : > { %v10701_v49 = vsel %vm4348_vm7, %v12608_v35, %v12603_v41  ;;  %5581 = vrot.lane.b32.xlu1 %v12611_v33, %s12253_s27  ;;  %v4200_v30 = vrot.slane %v12612_v5, 7  ;;  %v4233_v33 = vrot.slane %v4229_v61, 7  ;;  %5701 = vrot.lane.b32.xlu0 %v10357_v62, %s12257_s22 }
 0x55a   : > { %v4120_v13 = vadd.f32 %v4114_v16, %v4092_v31  ;;  %12609 = vst [vmem:[#allocation43_spill] sm:$0xff] %v10701_v49  ;;  %v4088_v31 = vsel %vm675_vm2, %v12572_v59, %v4087_v43  ;;  %v4142_v10 = vsel %vm4056_vm8, %v4138_v34, %v4139_v46  ;;  %v4115_v16 = vsel %vm4056_vm8, %v4110_v1, %v4111_v19  ;;  %v10714_v59 = vpop.permute.xlu1 %5999  ;;  %v12615_v43 = vld [vmem:[#allocation171_spill] sm:$0xff]  ;;  %v12617_v1 = vld [vmem:[#allocation136_spill] sm:$0xff] }
 0x55b   : > { %v4093_v32 = vadd.f32 %v4088_v31, %v4066_v53  ;;  %v4149_v42 = vadd.f32 %v12605_v48, %v4122_v2  ;;  %v4116_v49 = vsel %vm4113_vm9, %v4106_v27, %v4115_v16  ;;  %12614 = vst [vmem:[#allocation117_spill] sm:$0xff] %v10714_v59  ;;  %v12616_v46 = vrot.slane %v12571_v52, 7  ;;  %v12619_v48 = vld [vmem:[#allocation30_spill] sm:$0xff]  ;;  %v12620_v31 = vld [vmem:[#allocation227_spill] sm:$0xff]  ;;  %v4290_v53 = vpop.permute.xlu0 %4289 }
 0x55c   : > { %v4147_v4 = vadd.f32 %v4141_v17, %v4120_v13  ;;  %v4268_v17 = vrot.slane %v12615_v43, 7  ;;  %v4143_v27 = vsel %vm4113_vm9, %v12586_v45, %v4142_v10  ;;  %v12625_v59 = vld [vmem:[#allocation134_spill] sm:$0xff] }
 0x55d   : > { %v4121_v13 = vadd.f32 %v4116_v49, %v4093_v32  ;;  %v4173_v34 = vsel %vm4172_vm10, %v12616_v46, %v4169_v11  ;;  %5641 = vrot.lane.b32.xlu1 %v12620_v31, %s12254_s3  ;;  %v12621_v49 = vld [vmem:[#allocation133_spill] sm:$0xff]  ;;  %v12623_v32 = vld [vmem:[#allocation119_spill] sm:$0xff]  ;;  %v4180_v10 = vadd.f32 %v4169_v11, %v4149_v42  ;;  %5753 = vrot.lane.b32.xlu0 %v10364_v14, %s12263_s24  ;;  %v12631_v14 = vld [vmem:[#allocation138_spill] sm:$0xff] }
 0x55e   : > { %v4178_v35 = vadd.f32 %v4171_v0, %v4147_v4  ;;  %v12618_v0 = vld [vmem:[#allocation135_spill] sm:$0xff]  ;;  %v12622_v4 = vld [vmem:[#allocation137_spill] sm:$0xff]  ;;  %v12624_v46 = vrot.slane %v12623_v32, 7  ;;  %v4174_v45 = vsel %vm4170_vm4, %v4173_v34, %v4167_v6  ;;  %v12627_v32 = vrot.slane %v12573_v58, 7 }
 0x55f   : > { %v12159_v16 = vrot.slane %v12622_v4, 7  ;;  %v4148_v22 = vadd.f32 %v4143_v27, %v4121_v13  ;;  %v4294_v13 = vrot.slane %v4290_v53, 7 }
 0x560   : > { %v4207_v2 = vadd.f32 %v12619_v48, %v4178_v35  ;;  %v4202_v62 = vsel %vm4172_vm10, %v12624_v46, %v4200_v30  ;;  %v10737_v35 = vpop.permute.xlu1 %6081  ;;  %v12626_v48 = vrot.slane %v9553_v51, 7  ;;  %v4236_v46 = vsel %vm4172_vm10, %v12627_v32, %v4233_v33  ;;  %v4343_v32 = vpop.permute.xlu0 %4342 }
 0x561   : > { %v4179_v52 = vadd.f32 %v4174_v45, %v4148_v22  ;;  %v12629_v51 = vrot.slane %v12618_v0, 7  ;;  %v4203_v58 = vsel %vm4170_vm4, %v4202_v62, %v12612_v5  ;;  %v12630_v22 = vld [vmem:[#allocation40_spill] sm:$0xff]  ;;  %v10769_v27 = vsel %vm4295_vm6, %v12159_v16, %v12622_v4  ;;  %6441 = vrot.lane.b32.xlu0 %v10378_v26, %s12257_s22 }
 0x562   : > { %v4242_v60 = vadd.f32 %v10643_v44, %v4207_v2  ;;  %v4270_v31 = vsel %vm4172_vm10, %v12626_v48, %v4268_v17  ;;  %v12628_v44 = vrot.slane %v12617_v1, 7  ;;  %5703 = vrot.lane.b32.xlu1 %v12630_v22, %s12257_s22  ;;  %v12632_v2 = vld [vmem:[#allocation81_spill] sm:$0xff]  ;;  %v4209_v62 = vadd.f32 %v4200_v30, %v4180_v10 }
 0x563   : > { %v10757_v11 = vsel %vm4234_vm5, %v12629_v51, %v12618_v0  ;;  %v4321_v45 = vrot.slane %v12632_v2, 7  ;;  %v4208_v48 = vadd.f32 %v4203_v58, %v4179_v52  ;;  %v4271_v5 = vsel %vm4234_vm5, %v4270_v31, %v12615_v43  ;;  %v12634_v52 = vld [vmem:[#allocation82_spill] sm:$0xff] }
 0x564   : > { %v10751_v6 = vsel %vm4170_vm4, %v12628_v44, %v12617_v1  ;;  %v4276_v42 = vadd.f32 %v10430_v54, %v4242_v60  ;;  %v4237_v54 = vsel %vm4234_vm5, %v4236_v46, %v4229_v61  ;;  %v4231_v60 = vpop.permute.xlu1 %4230  ;;  %v12633_v22 = vrot.slane %v12575_v55, 7  ;;  %v12635_v55 = vld [vmem:[#allocation139_spill] sm:$0xff] }
 0x565   : > { %v4243_v51 = vadd.f32 %v4237_v54, %v4208_v48  ;;  %v4238_v16 = vsel %vm4234_vm5, %v4233_v33, %v4231_v60  ;;  %v4347_v34 = vrot.slane %v4343_v32, 7  ;;  %v4374_v58 = vrot.slane %v12634_v52, 7  ;;  %v12637_v46 = vld [vmem:[#allocation155_spill] sm:$0xff]  ;;  %5823 = vrot.lane.b32.xlu0 %v10382_v29, %s12264_s13 }
 0x566   : > { %v4303_v44 = vadd.f32 %v10655_v36, %v4276_v42  ;;  %v4297_v19 = vsel %vm4172_vm10, %v12633_v22, %v4294_v13  ;;  %v4244_v43 = vadd.f32 %v4238_v16, %v4209_v62  ;;  %5755 = vrot.lane.b32.xlu1 %v10374_v21, %s12263_s24  ;;  %v6409_v36 = vmul.f32 %v10182_v12, %v10547_v50  ;;  %v10794_v42 = vpop.permute.xlu0 %6260  ;;  %v12639_v54 = vld [vmem:[#allocation87_spill] sm:$0xff] }
 0x567   : > { %v5081_v61 = vrot.slane %v12635_v55, 7  ;;  %v12636_v10 = vrot.slane %v9563_v38, 7  ;;  %v4277_v31 = vadd.f32 %v4271_v5, %v4243_v51  ;;  %v4272_v26 = vsel %vm4234_vm5, %v4268_v17, %v12637_v46 }
 0x568   : > { %v4329_v30 = vadd.f32 %v10500_v8, %v4303_v44  ;;  %v12638_v21 = vrot.slane %v12631_v14, 7  ;;  %v4298_v12 = vsel %vm4295_vm6, %v4297_v19, %v4290_v53  ;;  %v4292_v8 = vpop.permute.xlu1 %4291  ;;  %v4278_v48 = vadd.f32 %v4272_v26, %v4244_v43 }
 0x569   : > { %v4323_v33 = vsel %vm4172_vm10, %v12636_v10, %v4321_v45  ;;  %v4443_v60 = vrot.slane %v12639_v54, 1  ;;  %v4304_v5 = vadd.f32 %v4298_v12, %v4277_v31  ;;  %v12640_v62 = vrot.slane %v12591_v18, 7  ;;  %v12642_v18 = vld [vmem:[#allocation140_spill] sm:$0xff]  ;;  %5877 = vrot.lane.b32.xlu0 %v10401_v39, %s12270_s1  ;;  %v12649_v39 = vld [vmem:[#allocation159_spill] sm:$0xff] }
 0x56a   : > { %v10800_v16 = vsel %vm4234_vm5, %v12638_v21, %v12631_v14  ;;  %v4356_v38 = vadd.f32 %v10679_v9, %v4329_v30  ;;  %v4299_v44 = vsel %vm4295_vm6, %v4294_v13, %v4292_v8  ;;  %v4324_v51 = vsel %vm4295_vm6, %v4323_v33, %v12632_v2  ;;  %6417 = vrot.lane.b32.xlu1 %v6409_v36, %s12257_s22  ;;  %v12643_v30 = vld [vmem:[#allocation157_spill] sm:$0xff]  ;;  %v12644_v36 = vld [vmem:[#allocation86_spill] sm:$0xff] }
 0x56b   : > { %v4350_v17 = vsel %vm4172_vm10, %v12640_v62, %v4347_v34  ;;  %v12641_v53 = vrot.slane %v12534_v7, 7  ;;  %v4305_v9 = vadd.f32 %v4299_v44, %v4278_v48  ;;  %v4649_v43 = vrot.slane %v12642_v18, 7  ;;  %v4412_v7 = vpop.permute.xlu0 %4411 }
 0x56c   : > { %v4382_v22 = vadd.f32 %v10543_v24, %v4356_v38  ;;  %v10823_v13 = vsel %vm4348_vm7, %v5081_v61, %v12635_v55  ;;  %v4330_v29 = vadd.f32 %v4324_v51, %v4304_v5  ;;  %v4325_v2 = vsel %vm4295_vm6, %v4321_v45, %v12643_v30  ;;  %v4345_v33 = vpop.permute.xlu1 %4344  ;;  %v12646_v45 = vld [vmem:[#allocation176_spill] sm:$0xff]  ;;  %v12647_v5 = vld [vmem:[#allocation71_spill] sm:$0xff] }
 0x56d   : > { %v4376_v19 = vsel %vm4172_vm10, %v12641_v53, %v4374_v58  ;;  %v4351_v10 = vsel %vm4348_vm7, %v4350_v17, %v4343_v32  ;;  %v4331_v31 = vadd.f32 %v4325_v2, %v4305_v9  ;;  %v4416_v24 = vrot.slane %v4412_v7, 1  ;;  %v12650_v9 = vld [vmem:[#allocation39_spill] sm:$0xff]  ;;  %5937 = vrot.lane.b32.xlu0 %v10412_v37, %s12253_s27 }
 0x56e   : > { %v4390_v46 = vadd.f32 %v12644_v36, %v4382_v22  ;;  %v4377_v26 = vsel %vm4348_vm7, %v4376_v19, %v12634_v52  ;;  %v12645_v21 = vrot.slane %v12570_v15, 1  ;;  %v4357_v8 = vadd.f32 %v4351_v10, %v4330_v29  ;;  %5821 = vrot.lane.b32.xlu1 %v10397_v23, %s12264_s13  ;;  %v12651_v10 = vld [vmem:[#allocation162_spill] sm:$0xff] }
 0x56f   : > { %v4352_v48 = vsel %vm4348_vm7, %v4347_v34, %v4345_v33  ;;  %v4497_v32 = vrot.slane %v12646_v45, 1  ;;  %v12648_v17 = vrot.slane %v12610_v47, 1  ;;  %v10848_v34 = vsel %vm4295_vm6, %v4649_v43, %v12642_v18  ;;  %v4466_v19 = vpop.permute.xlu0 %4465  ;;  %v12652_v36 = vld [vmem:[#allocation226_spill] sm:$0xff] }
 0x570   : > { %v4445_v12 = vsel %vm4056_vm8, %v12645_v21, %v4443_v60  ;;  %v4358_v38 = vadd.f32 %v4352_v48, %v4331_v31  ;;  %v4398_v62 = vadd.f32 %v12647_v5, %v4390_v46  ;;  %v4383_v52 = vadd.f32 %v4377_v26, %v4357_v8  ;;  %v4414_v2 = vpop.permute.xlu1 %4413  ;;  %v12654_v21 = vld [vmem:[#allocation44_spill] sm:$0xff] }
 0x571   : > { %v4418_v44 = vsel %vm4056_vm8, %v12648_v17, %v4416_v24  ;;  %v4378_v51 = vsel %vm4348_vm7, %v4374_v58, %v12649_v39  ;;  %v4701_v22 = vrot.slane %v12650_v9, 7  ;;  %v4470_v23 = vrot.slane %v4466_v19, 1  ;;  %v12658_v39 = vld [vmem:[#allocation164_spill] sm:$0xff]  ;;  %5997 = vrot.lane.b32.xlu0 %v10436_v3, %s12254_s3 }
 0x572   : > { %v4419_v53 = vsel %vm675_vm2, %v12610_v47, %v4418_v44  ;;  %v4384_v29 = vadd.f32 %v4378_v51, %v4358_v38  ;;  %v4444_v33 = vrot.slane %v12651_v10, 1  ;;  %v4446_v31 = vsel %vm675_vm2, %v12570_v15, %v4445_v12  ;;  %v12657_v12 = vld [vmem:[#allocation221_spill] sm:$0xff] }
 0x573   : > { %v4425_v30 = vadd.f32 %v4419_v53, %v4398_v62  ;;  %v4391_v46 = vadd.f32 %v12652_v36, %v4383_v52  ;;  %v4417_v26 = vrot.slane %v4414_v2, 1  ;;  %v12653_v47 = vrot.slane %v12585_v57, 1  ;;  %v12656_v62 = vld [vmem:[#allocation46_spill] sm:$0xff]  ;;  %v4526_v52 = vpop.permute.xlu0 %4525  ;;  %v12659_v53 = vld [vmem:[#allocation223_spill] sm:$0xff] }
 0x574   : > { %v4392_v8 = vadd.f32 %v12654_v21, %v4384_v29  ;;  %v12655_v38 = vrot.slane %v12621_v49, 1  ;;  %5875 = vrot.lane.b32.xlu1 %v12656_v62, %s12270_s1  ;;  %v4447_v15 = vsel %vm4056_vm8, %v4443_v60, %v4444_v33  ;;  %v4498_v51 = vrot.slane %v12658_v39, 1  ;;  %v4468_v36 = vpop.permute.xlu1 %4467 }
 0x575   : > { %v4499_v58 = vsel %vm4056_vm8, %v12653_v47, %v4497_v32  ;;  %v4452_v48 = vadd.f32 %v4446_v31, %v4425_v30  ;;  %v4399_v17 = vadd.f32 %v12657_v12, %v4391_v46  ;;  %v4420_v37 = vsel %vm4056_vm8, %v4416_v24, %v4417_v26  ;;  %v12660_v24 = vld [vmem:[#allocation141_spill] sm:$0xff] }
 0x576   : > { %v4472_v5 = vsel %vm4056_vm8, %v12655_v38, %v4470_v23  ;;  %v4400_v29 = vadd.f32 %v12659_v53, %v4392_v8  ;;  %v4421_v30 = vsel %vm675_vm2, %v4412_v7, %v4420_v37  ;;  %v4500_v47 = vsel %vm4113_vm9, %v12585_v57, %v4499_v58  ;;  %v12661_v7 = vld [vmem:[#allocation229_spill] sm:$0xff]  ;;  %v12665_v53 = vld [vmem:[#allocation234_spill] sm:$0xff] }
 0x577   : > { %v4473_v44 = vsel %vm4113_vm9, %v12621_v49, %v4472_v5  ;;  %v4471_v60 = vrot.slane %v4468_v36, 1  ;;  %v4426_v33 = vadd.f32 %v4421_v30, %v4399_v17  ;;  %v4528_v46 = vrot.slane %v4526_v52, 7  ;;  %v12662_v38 = vld [vmem:[#allocation181_spill] sm:$0xff]  ;;  %v4586_v62 = vpop.permute.xlu0 %4585  ;;  %6055 = vrot.lane.b32.xlu0 %v12665_v53, %s12257_s22 }
 0x578   : > { %v4479_v31 = vadd.f32 %v4473_v44, %v4452_v48  ;;  %v5150_v49 = vrot.slane %v12660_v24, 1  ;;  %v4448_v26 = vsel %vm675_vm2, %v12639_v54, %v4447_v15  ;;  %v4427_v21 = vadd.f32 %v4414_v2, %v4400_v29  ;;  %5935 = vrot.lane.b32.xlu1 %v12661_v7, %s12253_s27  ;;  %v10899_v12 = vpop.permute.xlu1 %6059  ;;  %v12666_v29 = vld [vmem:[#allocation143_spill] sm:$0xff] }
 0x579   : > { %v4501_v48 = vsel %vm4056_vm8, %v4497_v32, %v4498_v51  ;;  %v4557_v57 = vrot.slane %v12662_v38, 7  ;;  %v4474_v58 = vsel %vm4056_vm8, %v4470_v23, %v4471_v60  ;;  %v4453_v5 = vadd.f32 %v4448_v26, %v4426_v33  ;;  %v12663_v32 = vld [vmem:[#allocation142_spill] sm:$0xff]  ;;  %v12669_v60 = vld [vmem:[#allocation41_spill] sm:$0xff] }
 0x57a   : > { %v4506_v8 = vadd.f32 %v4500_v47, %v4479_v31  ;;  %v10894_v3 = vsel %vm4348_vm7, %v4701_v22, %v12650_v9  ;;  %v4454_v2 = vadd.f32 %v12651_v10, %v4427_v21  ;;  %v4475_v15 = vsel %vm4113_vm9, %v4466_v19, %v4474_v58  ;;  %v12667_v10 = vld [vmem:[#allocation32_spill] sm:$0xff]  ;;  %v12668_v47 = vld [vmem:[#allocation233_spill] sm:$0xff]  ;;  %v12671_v21 = vld [vmem:[#allocation90_spill] sm:$0xff] }
 0x57b   : > { %v5204_v17 = vrot.slane %v12663_v32, 1  ;;  %v4480_v37 = vadd.f32 %v4475_v15, %v4453_v5  ;;  %v12664_v23 = vrot.slane %v12617_v1, 7  ;;  %v4590_v51 = vrot.slane %v4586_v62, 7  ;;  %v12670_v1 = vld [vmem:[#allocation88_spill] sm:$0xff]  ;;  %v4646_v5 = vpop.permute.xlu0 %4645  ;;  %6107 = vrot.lane.b32.xlu0 %v10456_v63, %s12263_s24 }
 0x57c   : > { %v4535_v54 = vadd.f32 %v10751_v6, %v4506_v8  ;;  %v12160_v30 = vrot.slane %v12666_v29, 7  ;;  %v4502_v6 = vsel %vm4113_vm9, %v12646_v45, %v4501_v48  ;;  %v4481_v31 = vadd.f32 %v4468_v36, %v4454_v2  ;;  %5995 = vrot.lane.b32.xlu1 %v12668_v47, %s12254_s3  ;;  %v12673_v15 = vld [vmem:[#allocation144_spill] sm:$0xff] }
 0x57d   : > { %v4530_v44 = vsel %vm4172_vm10, %v12664_v23, %v4528_v46  ;;  %v4769_v33 = vrot.slane %v12669_v60, 1  ;;  %v4624_v26 = vrot.slane %v12670_v1, 7  ;;  %v12672_v8 = vrot.slane %v12671_v21, 7 }
 0x57e   : > { %v4564_v19 = vadd.f32 %v12667_v10, %v4535_v54  ;;  %v4507_v58 = vadd.f32 %v4502_v6, %v4480_v37  ;;  %v4823_v23 = vrot.slane %v12673_v15, 1  ;;  %v4508_v48 = vadd.f32 %v12658_v39, %v4481_v31  ;;  %v10922_v54 = vpop.permute.xlu1 %6133  ;;  %v12675_v37 = vld [vmem:[#allocation207_spill] sm:$0xff] }
 0x57f   : > { %v4559_v7 = vsel %vm4172_vm10, %v12672_v8, %v4557_v57  ;;  %v4531_v36 = vsel %vm4170_vm4, %v4530_v44, %v4526_v52  ;;  %v12674_v53 = vrot.slane %v12631_v14, 7  ;;  %v4650_v47 = vrot.slane %v4646_v5, 7  ;;  %v12676_v44 = vld [vmem:[#allocation236_spill] sm:$0xff]  ;;  %v12679_v8 = vld [vmem:[#allocation89_spill] sm:$0xff] }
 0x580   : > { %v4598_v45 = vadd.f32 %v10800_v16, %v4564_v19  ;;  %v4536_v2 = vadd.f32 %v4531_v36, %v4507_v58  ;;  %v6435_v6 = vmul.f32 %v12675_v37, %v10408_v20  ;;  %v10935_v16 = vsel %vm4234_vm5, %v12160_v30, %v12666_v29  ;;  %6057 = vrot.lane.b32.xlu1 %v12676_v44, %s12257_s22  ;;  %v12677_v19 = vld [vmem:[#allocation145_spill] sm:$0xff] }
 0x581   : > { %v4592_v10 = vsel %vm4172_vm10, %v12674_v53, %v4590_v51  ;;  %v4560_v52 = vsel %vm4170_vm4, %v4559_v7, %v12662_v38  ;;  %v4537_v39 = vadd.f32 %v4528_v46, %v4508_v48  ;;  %v12162_v63 = vrot.slane %v12677_v19, 7  ;;  %v4698_v53 = vpop.permute.xlu0 %4697  ;;  %v12680_v37 = vld [vmem:[#allocation45_spill] sm:$0xff] }
 0x582   : > { %v4632_v14 = vadd.f32 %v10649_v28, %v4598_v45  ;;  %v12678_v31 = vrot.slane %v12574_v56, 7  ;;  %v4676_v58 = vrot.slane %v12679_v8, 7  ;;  %v4565_v36 = vadd.f32 %v4560_v52, %v4536_v2  ;;  %v4588_v7 = vpop.permute.xlu1 %4587  ;;  %6443 = vrot.lane.b32.xlu0 %v6435_v6, %s12257_s22  ;;  %v12681_v52 = vld [vmem:[#allocation180_spill] sm:$0xff] }
 0x583   : > { %v4881_v30 = vrot.slane %v12680_v37, 7  ;;  %v4593_v38 = vsel %vm4234_vm5, %v4592_v10, %v4586_v62  ;;  %v4566_v28 = vadd.f32 %v4557_v57, %v4537_v39  ;;  %v4652_v48 = vsel %vm4172_vm10, %v4649_v43, %v4650_v47  ;;  %v12682_v43 = vld [vmem:[#allocation128_spill] sm:$0xff] }
 0x584   : > { %v4626_v21 = vsel %vm4172_vm10, %v12678_v31, %v4624_v26  ;;  %v4658_v46 = vadd.f32 %v10848_v34, %v4632_v14  ;;  %v4599_v45 = vadd.f32 %v4593_v38, %v4565_v36  ;;  %v4594_v56 = vsel %vm4234_vm5, %v4590_v51, %v4588_v7  ;;  %6109 = vrot.lane.b32.xlu1 %v10466_v40, %s12263_s24  ;;  %v12685_v38 = vld [vmem:[#allocation182_spill] sm:$0xff] }
 0x585   : > { %v4702_v44 = vrot.slane %v4698_v53, 7  ;;  %v4627_v2 = vsel %vm4234_vm5, %v4626_v21, %v12670_v1  ;;  %v4728_v31 = vrot.slane %v12681_v52, 7  ;;  %v4600_v62 = vadd.f32 %v4594_v56, %v4566_v28  ;;  %v12684_v1 = vld [vmem:[#allocation166_spill] sm:$0xff]  ;;  %v10972_v14 = vpop.permute.xlu0 %6320 }
 0x586   : > { %v4684_v34 = vadd.f32 %v10663_v25, %v4658_v46  ;;  %v10965_v18 = vsel %vm4295_vm6, %v12162_v63, %v12677_v19  ;;  %v12683_v57 = vrot.slane %v12682_v43, 7  ;;  %v4633_v10 = vadd.f32 %v4627_v2, %v4599_v45  ;;  %v4648_v39 = vpop.permute.xlu1 %4647  ;;  %v12686_v45 = vld [vmem:[#allocation118_spill] sm:$0xff]  ;;  %v12688_v2 = vld [vmem:[#allocation231_spill] sm:$0xff] }
 0x587   : > { %v4628_v6 = vsel %vm4234_vm5, %v4624_v26, %v12684_v1  ;;  %v10978_v40 = vsel %vm4170_vm4, %v4881_v30, %v12680_v37  ;;  %v4653_v25 = vsel %vm4295_vm6, %v4652_v48, %v4646_v5  ;;  %v4797_v7 = vrot.slane %v12685_v38, 1  ;;  %6177 = vrot.lane.b32.xlu0 %v12686_v45, %s12264_s13  ;;  %v12691_v43 = vld [vmem:[#allocation146_spill] sm:$0xff] }
 0x588   : > { %v4678_v51 = vsel %vm4172_vm10, %v12683_v57, %v4676_v58  ;;  %v4634_v21 = vadd.f32 %v4628_v6, %v4600_v62  ;;  %v4710_v36 = vadd.f32 %v10894_v3, %v4684_v34  ;;  %v4659_v28 = vadd.f32 %v4653_v25, %v4633_v10  ;;  %6491 = vrot.lane.b32.xlu1 %v12688_v2, %s12263_s24  ;;  %v12689_v62 = vld [vmem:[#allocation43_spill] sm:$0xff]  ;;  %v12692_v10 = vld [vmem:[#allocation168_spill] sm:$0xff]  ;;  %v12693_v25 = vld [vmem:[#allocation209_spill] sm:$0xff] }
 0x589   : > { %v4704_v26 = vsel %vm4172_vm10, %v4701_v22, %v4702_v44  ;;  %v4654_v46 = vsel %vm4295_vm6, %v4650_v47, %v4648_v39  ;;  %v4679_v56 = vsel %vm4295_vm6, %v4678_v51, %v12679_v8  ;;  %v12687_v5 = vrot.slane %v12603_v41, 7  ;;  %v12690_v34 = vld [vmem:[#allocation47_spill] sm:$0xff]  ;;  %v4766_v6 = vpop.permute.xlu0 %4765 }
 0x58a   : > { %v4660_v3 = vadd.f32 %v4654_v46, %v4634_v21  ;;  %v4736_v9 = vadd.f32 %v12689_v62, %v4710_v36  ;;  %v4943_v22 = vrot.slane %v12690_v34, 7  ;;  %v12161_v47 = vrot.slane %v12691_v43, 7  ;;  %v4700_v41 = vpop.permute.xlu1 %4699  ;;  %v12694_v36 = vld [vmem:[#allocation132_spill] sm:$0xff] }
 0x58b   : > { %v4730_v48 = vsel %vm4172_vm10, %v12687_v5, %v4728_v31  ;;  %v4685_v57 = vadd.f32 %v4679_v56, %v4659_v28  ;;  %v4680_v1 = vsel %vm4295_vm6, %v4676_v58, %v12692_v10  ;;  %v4705_v8 = vsel %vm4348_vm7, %v4704_v26, %v4698_v53  ;;  %v12696_v58 = vld [vmem:[#allocation238_spill] sm:$0xff]  ;;  %v12697_v56 = vld [vmem:[#allocation184_spill] sm:$0xff] }
 0x58c   : > { %v4686_v51 = vadd.f32 %v4680_v1, %v4660_v3  ;;  %v4744_v39 = vadd.f32 %v12693_v25, %v4736_v9  ;;  %v4770_v21 = vrot.slane %v4766_v6, 1  ;;  %v4731_v46 = vsel %vm4348_vm7, %v4730_v48, %v12681_v52  ;;  %6231 = vrot.lane.b32.xlu0 %v12696_v58, %s12270_s1  ;;  %v12698_v3 = vld [vmem:[#allocation85_spill] sm:$0xff] }
 0x58d   : > { %v12695_v45 = vrot.slane %v12694_v36, 1  ;;  %v4711_v2 = vadd.f32 %v4705_v8, %v4685_v57  ;;  %v4706_v28 = vsel %vm4348_vm7, %v4702_v44, %v4700_v41  ;;  %v4851_v53 = vrot.slane %v12697_v56, 1  ;;  %v12699_v52 = vld [vmem:[#allocation237_spill] sm:$0xff]  ;;  %v4820_v8 = vpop.permute.xlu0 %4819 }
 0x58e   : > { %v4712_v26 = vadd.f32 %v4706_v28, %v4686_v51  ;;  %v4752_v62 = vadd.f32 %v12698_v3, %v4744_v39  ;;  %v4772_v9 = vsel %vm4056_vm8, %v4769_v33, %v4770_v21  ;;  %6175 = vrot.lane.b32.xlu1 %v12699_v52, %s12264_s13  ;;  %v11022_v44 = vsel %vm4348_vm7, %v12161_v47, %v12691_v43  ;;  %v12700_v57 = vld [vmem:[#allocation169_spill] sm:$0xff]  ;;  %v4768_v25 = vpop.permute.xlu1 %4767  ;;  %v12705_v52 = vld [vmem:[#allocation239_spill] sm:$0xff]  ;;  %s7030_s13 = sshll.u32 %s7349_s7, 12 }
 0x58f   : > { %v4799_v5 = vsel %vm4056_vm8, %v12695_v45, %v4797_v7  ;;  %v4737_v48 = vadd.f32 %v4731_v46, %v4711_v2  ;;  %v4732_v10 = vsel %vm4348_vm7, %v4728_v31, %v12700_v57  ;;  %v4773_v1 = vsel %vm675_vm2, %v12669_v60, %v4772_v9  ;;  %v12701_v45 = vld [vmem:[#allocation170_spill] sm:$0xff]  ;;  %v12703_v60 = vld [vmem:[#allocation245_spill] sm:$0xff]  ;;  %s11809_s7 = scalar_lea.hbm %s12884_s9, %s7030_s13 }
 0x590   : > { %v4945_v33 = vsel %vm4234_vm5, %v4943_v22, %v12690_v34  ;;  %v4738_v41 = vadd.f32 %v4732_v10, %v4712_v26  ;;  %v4779_v51 = vadd.f32 %v4773_v1, %v4752_v62  ;;  %v4824_v39 = vrot.slane %v4820_v8, 1  ;;  %v12702_v2 = vld [vmem:[#allocation230_spill] sm:$0xff]  ;;  %6291 = vrot.lane.b32.xlu0 %v12703_v60, %s12253_s27  ;;  %v12706_v10 = vld [vmem:[#allocation243_spill] sm:$0xff] }
 0x591   : > { %v4798_v28 = vrot.slane %v12701_v45, 1  ;;  %v4800_v46 = vsel %vm675_vm2, %v12694_v36, %v4799_v5  ;;  %v4745_v31 = vadd.f32 %v12702_v2, %v4737_v48  ;;  %v4771_v58 = vrot.slane %v4768_v25, 1  ;;  %v12707_v5 = vld [vmem:[#allocation224_spill] sm:$0xff]  ;;  %v4880_v60 = vpop.permute.xlu0 %4879 }
 0x592   : > { %v12704_v3 = vrot.slane %v12625_v59, 1  ;;  %v4746_v26 = vadd.f32 %v12705_v52, %v4738_v41  ;;  %v4806_v62 = vadd.f32 %v4800_v46, %v4779_v51  ;;  %v4826_v57 = vsel %vm4056_vm8, %v4823_v23, %v4824_v39  ;;  %6229 = vrot.lane.b32.xlu1 %v12706_v10, %s12270_s1  ;;  %v12709_v51 = vld [vmem:[#allocation240_spill] sm:$0xff]  ;;  %v4822_v47 = vpop.permute.xlu1 %4821 }
 0x593   : > { %v4801_v36 = vsel %vm4056_vm8, %v4797_v7, %v4798_v28  ;;  %v4753_v48 = vadd.f32 %v12707_v5, %v4745_v31  ;;  %v4774_v1 = vsel %vm4056_vm8, %v4770_v21, %v4771_v58  ;;  %v4827_v2 = vsel %vm4113_vm9, %v12673_v15, %v4826_v57  ;;  %v12710_v21 = vld [vmem:[#allocation247_spill] sm:$0xff]  ;;  %v12711_v58 = vld [vmem:[#allocation148_spill] sm:$0xff] }
 0x594   : > { %v4853_v9 = vsel %vm4056_vm8, %v12704_v3, %v4851_v53  ;;  %v12708_v3 = vld [vmem:[#allocation172_spill] sm:$0xff]  ;;  %v4754_v46 = vadd.f32 %v12709_v51, %v4746_v26  ;;  %v4775_v52 = vsel %vm675_vm2, %v4766_v6, %v4774_v1  ;;  %v4833_v23 = vadd.f32 %v4827_v2, %v4806_v62  ;;  %6353 = vrot.lane.b32.xlu0 %v12710_v21, %s12254_s3  ;;  %v12712_v6 = vld [vmem:[#allocation246_spill] sm:$0xff]  ;;  %v12713_v62 = vld [vmem:[#allocation183_spill] sm:$0xff] }
 0x595   : > { %v4852_v41 = vrot.slane %v12708_v3, 1  ;;  %v4854_v10 = vsel %vm4113_vm9, %v12625_v59, %v4853_v9  ;;  %v4780_v7 = vadd.f32 %v4775_v52, %v4753_v48  ;;  %v4825_v28 = vrot.slane %v4822_v47, 1  ;;  %v4940_v2 = vpop.permute.xlu0 %4939  ;;  %v12714_v51 = vld [vmem:[#allocation186_spill] sm:$0xff] }
 0x596   : > { %v4882_v31 = vrot.slane %v4880_v60, 7  ;;  %v5003_v15 = vrot.slane %v12711_v58, 7  ;;  %v4802_v57 = vsel %vm675_vm2, %v12685_v38, %v4801_v36  ;;  %v4781_v5 = vadd.f32 %v4768_v25, %v4754_v46  ;;  %6289 = vrot.lane.b32.xlu1 %v12712_v6, %s12253_s27  ;;  %v11071_v25 = vpop.permute.xlu1 %6111  ;;  %v12715_v36 = vld [vmem:[#allocation150_spill] sm:$0xff]  ;;  %s7276_s27 = smov 3  }
 0x597   : > { %v4860_v26 = vadd.f32 %v4854_v10, %v4833_v23  ;;  %v4911_v1 = vrot.slane %v12713_v62, 7  ;;  %v4855_v59 = vsel %vm4056_vm8, %v4851_v53, %v4852_v41  ;;  %v4828_v9 = vsel %vm4056_vm8, %v4824_v39, %v4825_v28  ;;  %v12716_v41 = vld [vmem:[#allocation249_spill] sm:$0xff]  ;;  %v12717_v10 = vld [vmem:[#allocation147_spill] sm:$0xff] }
 0x598   : > { %v4807_v48 = vadd.f32 %v4802_v57, %v4780_v7  ;;  %v4978_v52 = vrot.slane %v12714_v51, 7  ;;  %v4808_v63 = vadd.f32 %v12701_v45, %v4781_v5  ;;  %v4829_v38 = vsel %vm4113_vm9, %v4820_v8, %v4828_v9  ;;  %6413 = vrot.lane.b32.xlu0 %v12716_v41, %s12257_s22  ;;  %v12718_v45 = vld [vmem:[#allocation228_spill] sm:$0xff]  ;;  %v12720_v5 = vld [vmem:[#allocation149_spill] sm:$0xff] }
 0x599   : > { %v4889_v21 = vadd.f32 %v10978_v40, %v4860_v26  ;;  %v5055_v46 = vrot.slane %v12715_v36, 7  ;;  %v4884_v53 = vsel %vm4172_vm10, %v4881_v30, %v4882_v31  ;;  %v4944_v39 = vrot.slane %v4940_v2, 7  ;;  %v12719_v57 = vld [vmem:[#allocation80_spill] sm:$0xff]  ;;  %v12721_v26 = vld [vmem:[#allocation78_spill] sm:$0xff] }
 0x59a   : > { %v4834_v23 = vadd.f32 %v4829_v38, %v4807_v48  ;;  %v5500_v7 = vrot.slane %v12717_v10, 1  ;;  %v4856_v40 = vsel %vm4113_vm9, %v12697_v56, %v4855_v59  ;;  %v4835_v28 = vadd.f32 %v4822_v47, %v4808_v63  ;;  %6351 = vrot.lane.b32.xlu1 %v12719_v57, %s12254_s3  ;;  %v5000_v38 = vpop.permute.xlu0 %4999  ;;  %v12727_v57 = vld [vmem:[#allocation156_spill] sm:$0xff]  ;;  %s6509_s3 = sld [smem:[#allocation5]] }
 0x59b   : > { %v4918_v8 = vadd.f32 %v12718_v45, %v4889_v21  ;;  %v5005_v37 = vsel %vm4295_vm6, %v5003_v15, %v12711_v58  ;;  %v12722_v6 = vrot.slane %v12721_v26, 7  ;;  %v12723_v41 = vrot.slane %v12618_v0, 7  ;;  %v11096_v21 = vpop.permute.xlu1 %6179 }
 0x59c   : > { %v4861_v48 = vadd.f32 %v4856_v40, %v4834_v23  ;;  %v4862_v63 = vadd.f32 %v12708_v3, %v4835_v28  ;;  %v4885_v47 = vsel %vm4170_vm4, %v4884_v53, %v4880_v60  ;;  %v5057_v58 = vsel %vm4348_vm7, %v5055_v46, %v12715_v36  ;;  %v12724_v40 = vld [vmem:[#allocation250_spill] sm:$0xff]  ;;  %v12726_v28 = vld [vmem:[#allocation248_spill] sm:$0xff] }
 0x59d   : > { %v4913_v9 = vsel %vm4172_vm10, %v12722_v6, %v4911_v1  ;;  %v4980_v56 = vsel %vm4172_vm10, %v12723_v41, %v4978_v52  ;;  %v4952_v59 = vadd.f32 %v4945_v33, %v4918_v8  ;;  %v4946_v23 = vsel %vm4172_vm10, %v4943_v22, %v4944_v39  ;;  %6465 = vrot.lane.b32.xlu0 %v12724_v40, %s12263_s24  ;;  %v12725_v33 = vld [vmem:[#allocation152_spill] sm:$0xff] }
 0x59e   : > { %v4890_v45 = vadd.f32 %v4885_v47, %v4861_v48  ;;  %v5004_v0 = vrot.slane %v5000_v38, 7  ;;  %v5123_v3 = vrot.slane %v12725_v33, 1  ;;  %v4914_v60 = vsel %vm4170_vm4, %v4913_v9, %v12713_v62  ;;  %6415 = vrot.lane.b32.xlu1 %v12726_v28, %s12257_s22  ;;  %v12728_v22 = vld [vmem:[#allocation188_spill] sm:$0xff]  ;;  %v5052_v41 = vpop.permute.xlu0 %5051  ;;  %s6904_s22 = sshll.u32 %s7455_s11, 8 }
 0x59f   : > { %v4986_v53 = vadd.f32 %v10757_v11, %v4952_v59  ;;  %v4891_v8 = vadd.f32 %v4882_v31, %v4862_v63  ;;  %v5233_v26 = vrot.slane %v12727_v57, 7  ;;  %v4981_v34 = vsel %vm4234_vm5, %v4980_v56, %v12714_v51  ;;  %v4942_v40 = vpop.permute.xlu1 %4941  ;;  %v12729_v62 = vld [vmem:[#allocation208_spill] sm:$0xff]  ;;  %v12730_v51 = vld [vmem:[#allocation254_spill] sm:$0xff] }
 0x5a0   : > { %v5030_v6 = vrot.slane %v12728_v22, 7  ;;  %v4919_v48 = vadd.f32 %v4914_v60, %v4890_v45  ;;  %v4947_v47 = vsel %vm4234_vm5, %v4946_v23, %v4940_v2  ;;  %v6487_v11 = vmul.f32 %v12729_v62, %v10408_v20  ;;  %v12731_v56 = vld [vmem:[#allocation190_spill] sm:$0xff]  ;;  %v12732_v2 = vld [vmem:[#allocation253_spill] sm:$0xff] }
 0x5a1   : > { %v4920_v30 = vadd.f32 %v4911_v1, %v4891_v8  ;;  %v5012_v31 = vadd.f32 %v5005_v37, %v4986_v53  ;;  %v5006_v59 = vsel %vm4172_vm10, %v5003_v15, %v5004_v0  ;;  %v4948_v63 = vsel %vm4234_vm5, %v4944_v39, %v4942_v40  ;;  %6493 = vrot.lane.b32.xlu0 %v12730_v51, %s12263_s24  ;;  %v12733_v1 = vld [vmem:[#allocation210_spill] sm:$0xff] }
 0x5a2   : > { %v4953_v9 = vadd.f32 %v4947_v47, %v4919_v48  ;;  %v5056_v28 = vrot.slane %v5052_v41, 7  ;;  %v5082_v45 = vrot.slane %v12731_v56, 7  ;;  %6467 = vrot.lane.b32.xlu1 %v12732_v2, %s12263_s24  ;;  %v6461_v23 = vmul.f32 %v12733_v1, %v10547_v50  ;;  %v12734_v37 = vld [vmem:[#allocation154_spill] sm:$0xff]  ;;  %v12736_v48 = vld [vmem:[#allocation173_spill] sm:$0xff]  ;;  %v11136_v40 = vpop.permute.xlu0 %6389 }
 0x5a3   : > { %v4954_v60 = vadd.f32 %v4948_v63, %v4920_v30  ;;  %v5038_v20 = vadd.f32 %v10769_v27, %v5012_v31  ;;  %v5177_v53 = vrot.slane %v12734_v37, 1  ;;  %v12735_v15 = vrot.slane %v12622_v4, 7  ;;  %v5002_v27 = vpop.permute.xlu1 %5001  ;;  %v12737_v4 = vld [vmem:[#allocation192_spill] sm:$0xff]  ;;  %v12739_v2 = vld [vmem:[#allocation161_spill] sm:$0xff] }
 0x5a4   : > { %v4987_v8 = vadd.f32 %v4981_v34, %v4953_v9  ;;  %v4982_v47 = vsel %vm4234_vm5, %v4978_v52, %v12736_v48  ;;  %v11142_v30 = vsel %vm4170_vm4, %v5233_v26, %v12727_v57  ;;  %v5007_v50 = vsel %vm4295_vm6, %v5006_v59, %v5000_v38 }
 0x5a5   : > { %v5032_v39 = vsel %vm4172_vm10, %v12735_v15, %v5030_v6  ;;  %v4988_v62 = vadd.f32 %v4982_v47, %v4954_v60  ;;  %v5064_v31 = vadd.f32 %v5057_v58, %v5038_v20  ;;  %v5151_v63 = vrot.slane %v12737_v4, 1  ;;  %6495 = vrot.lane.b32.xlu0 %v6487_v11, %s12263_s24  ;;  %v12738_v60 = vld [vmem:[#allocation158_spill] sm:$0xff] }
 0x5a6   : > { %v5013_v51 = vadd.f32 %v5007_v50, %v4987_v8  ;;  %v5058_v52 = vsel %vm4172_vm10, %v5055_v46, %v5056_v28  ;;  %v5008_v34 = vsel %vm4295_vm6, %v5004_v0, %v5002_v27  ;;  %v5033_v9 = vsel %vm4295_vm6, %v5032_v39, %v12728_v22  ;;  %6469 = vrot.lane.b32.xlu1 %v6461_v23, %s12263_s24  ;;  %v12740_v0 = vld [vmem:[#allocation174_spill] sm:$0xff]  ;;  %v5120_v20 = vpop.permute.xlu0 %5119  ;;  %v12741_v39 = vld [vmem:[#allocation212_spill] sm:$0xff]  ;;  %s11703_s24 = scalar_lea.vmem [#allocation11], %s6904_s22 }
 0x5a7   : > { %v5084_v38 = vsel %vm4172_vm10, %v5081_v61, %v5082_v45  ;;  %v5014_v59 = vadd.f32 %v5008_v34, %v4988_v62  ;;  %v5090_v58 = vadd.f32 %v10823_v13, %v5064_v31  ;;  %v5293_v36 = vrot.slane %v12738_v60, 7  ;;  %v5054_v15 = vpop.permute.xlu1 %5053  ;;  %v12742_v50 = vld [vmem:[#allocation194_spill] sm:$0xff]  ;;  %v12743_v62 = vld [vmem:[#allocation213_spill] sm:$0xff]  ;;  %s6812_s1 = sshll.u32 %s11703_s24, 4  ;;  %s11811_s1 = int_to_ptr.vmem [resolvable:$true] %s6812_s1 }
 0x5a8   : > { %v5353_v46 = vrot.slane %v12739_v2, 7  ;;  %v5039_v1 = vadd.f32 %v5033_v9, %v5013_v51  ;;  %v5034_v11 = vsel %vm4295_vm6, %v5030_v6, %v12740_v0  ;;  %v5059_v22 = vsel %vm4348_vm7, %v5058_v52, %v5052_v41  ;;  %v12744_v51 = vld [vmem:[#allocation163_spill] sm:$0xff]  ;;  %s7190_s15 = scalar_lea.vmem %s11811_s1, 4096  ;;  %p7197_p10 = scmp.lt.s32.totalorder %s11811_s1, %s7195_s16 }
 0x5a9   : > { %v5040_v55 = vadd.f32 %v5034_v11, %v5014_v59  ;;  %v5098_v61 = vadd.f32 %v12741_v39, %v5090_v58  ;;  %v5124_v8 = vrot.slane %v5120_v20, 1  ;;  %v5085_v23 = vsel %vm4348_vm7, %v5084_v38, %v12731_v56  ;;  %v12745_v56 = vld [vmem:[#allocation175_spill] sm:$0xff]  ;;  %p7191_p5 = scmp.ne.s32.totalorder %s11811_s1, %s7190_s15  ;;  %p7198_p1 = scmp.lt.s32.totalorder %s7196_s17, %s7190_s15 }
 0x5aa   : > { %v5153_v13 = vsel %vm4056_vm8, %v5150_v49, %v5151_v63  ;;  %v5065_v48 = vadd.f32 %v5059_v22, %v5039_v1  ;;  %v5060_v47 = vsel %vm4348_vm7, %v5056_v28, %v5054_v15  ;;  %v5205_v6 = vrot.slane %v12742_v50, 1  ;;  %v5174_v38 = vpop.permute.xlu0 %5173  ;;  %v12746_v28 = vld [vmem:[#allocation177_spill] sm:$0xff]  ;;  %v12747_v22 = vld [vmem:[#allocation178_spill] sm:$0xff] }
 0x5ab   : > { %v5066_v27 = vadd.f32 %v5060_v47, %v5040_v55  ;;  %v5106_v41 = vadd.f32 %v12743_v62, %v5098_v61  ;;  %v5126_v31 = vsel %vm4056_vm8, %v5123_v3, %v5124_v8  ;;  %v5405_v52 = vrot.slane %v12744_v51, 7  ;;  %v5122_v0 = vpop.permute.xlu1 %5121  ;;  %v12748_v55 = vld [vmem:[#allocation244_spill] sm:$0xff]  ;;  %p7192_p8 = pnand %p7191_p5, %p12886_p12  ;;  %p7199_p4 = por %p7198_p1, %p7197_p10 }
 0x5ac   : > { %v5091_v34 = vadd.f32 %v5085_v23, %v5065_v48  ;;  %v5086_v9 = vsel %vm4348_vm7, %v5082_v45, %v12745_v56  ;;  %v5127_v49 = vsel %vm675_vm2, %v12725_v33, %v5126_v31  ;;  %v5152_v59 = vrot.slane %v12746_v28, 1  ;;  %v12749_v33 = vld [vmem:[#allocation256_spill] sm:$0xff] }
 0x5ad   : > { %v5092_v58 = vadd.f32 %v5086_v9, %v5066_v27  ;;  %v5133_v1 = vadd.f32 %v5127_v49, %v5106_v41  ;;  %v5178_v11 = vrot.slane %v5174_v38, 1  ;;  %v5206_v15 = vrot.slane %v12747_v22, 1  ;;  %v12750_v62 = vld [vmem:[#allocation252_spill] sm:$0xff]  ;;  %p7193_p9 = pneg %p7192_p8 }
 0x5ae   : > { %v5154_v3 = vsel %vm675_vm2, %v12660_v24, %v5153_v13  ;;  %v5099_v39 = vadd.f32 %v12748_v55, %v5091_v34  ;;  %v5125_v61 = vrot.slane %v5122_v0, 1  ;;  %v5207_v45 = vsel %vm4056_vm8, %v5204_v17, %v5205_v6  ;;  %v5232_v13 = vpop.permute.xlu0 %5231  ;;  %v12751_v34 = vld [vmem:[#allocation257_spill] sm:$0xff] }
 0x5af   : > { %v5100_v23 = vadd.f32 %v12749_v33, %v5092_v58  ;;  %v5160_v48 = vadd.f32 %v5154_v3, %v5133_v1  ;;  %v5180_v47 = vsel %vm4056_vm8, %v5177_v53, %v5178_v11  ;;  %v5155_v27 = vsel %vm4056_vm8, %v5151_v63, %v5152_v59  ;;  %v5176_v49 = vpop.permute.xlu1 %5175  ;;  %v12752_v1 = vld [vmem:[#allocation185_spill] sm:$0xff]  ;;  %p7200_p11 = pnand %p7199_p4, %p7193_p9 }
 0x5b0   : > { %v5107_v41 = vadd.f32 %v12750_v62, %v5099_v39  ;;  %v5128_v31 = vsel %vm4056_vm8, %v5124_v8, %v5125_v61  ;;  %v5181_v24 = vsel %vm4113_vm9, %v12734_v37, %v5180_v47  ;;  %v5234_v58 = vrot.slane %v5232_v13, 7 }
 0x5b1   : > { %v5108_v56 = vadd.f32 %v12751_v34, %v5100_v23  ;;  %v5129_v9 = vsel %vm675_vm2, %v5120_v20, %v5128_v31  ;;  %v5187_v17 = vadd.f32 %v5181_v24, %v5160_v48  ;;  %v5261_v3 = vrot.slane %v12752_v1, 7  ;;  %v12757_v24 = vld [vmem:[#allocation165_spill] sm:$0xff] }
 0x5b2   : > { %v5208_v53 = vsel %vm4113_vm9, %v12663_v32, %v5207_v45  ;;  %v5134_v63 = vadd.f32 %v5129_v9, %v5107_v41  ;;  %v5179_v59 = vrot.slane %v5176_v49, 1  ;;  %v5295_v37 = vsel %vm4234_vm5, %v5293_v36, %v12738_v60  ;;  %v5290_v45 = vpop.permute.xlu0 %5289 }
 0x5b3   : > { %v5156_v8 = vsel %vm675_vm2, %v12737_v4, %v5155_v27  ;;  %v5135_v55 = vadd.f32 %v5122_v0, %v5108_v56  ;;  %v5214_v20 = vadd.f32 %v5208_v53, %v5187_v17  ;;  %v5209_v39 = vsel %vm4056_vm8, %v5205_v6, %v5206_v15  ;;  %v11214_v62 = vpop.permute.xlu1 %6204  ;;  %v12756_v27 = vld [vmem:[#allocation241_spill] sm:$0xff]  ;;  %v12758_v56 = vld [vmem:[#allocation198_spill] sm:$0xff] }
 0x5b4   : > { %v5182_v61 = vsel %vm4056_vm8, %v5178_v11, %v5179_v59  ;;  %v5161_v33 = vadd.f32 %v5156_v8, %v5134_v63  ;;  %v5236_v32 = vsel %vm4172_vm10, %v5233_v26, %v5234_v58  ;;  %v5294_v4 = vrot.slane %v5290_v45, 7  ;;  %v12753_v26 = vld [vmem:[#allocation79_spill] sm:$0xff]  ;;  %v12755_v11 = vld [vmem:[#allocation196_spill] sm:$0xff] }
 0x5b5   : > { %v5241_v23 = vadd.f32 %v11142_v30, %v5214_v20  ;;  %v5162_v48 = vadd.f32 %v12746_v28, %v5135_v55  ;;  %v5183_v47 = vsel %vm4113_vm9, %v5174_v38, %v5182_v61  ;;  %v5355_v6 = vsel %vm4295_vm6, %v5353_v46, %v12739_v2 }
 0x5b6   : > { %v5407_v57 = vsel %vm4348_vm7, %v5405_v52, %v12744_v51  ;;  %v12754_v0 = vrot.slane %v12753_v26, 7  ;;  %v5188_v28 = vadd.f32 %v5183_v47, %v5161_v33  ;;  %v5210_v38 = vsel %vm4113_vm9, %v12742_v50, %v5209_v39  ;;  %v5350_v63 = vpop.permute.xlu0 %5349  ;;  %v12759_v39 = vld [vmem:[#allocation167_spill] sm:$0xff]  ;;  %v12760_v33 = vld [vmem:[#allocation189_spill] sm:$0xff]  ;;  %v12763_v47 = vld [vmem:[#allocation102_spill] sm:$0xff] }
 0x5b7   : > { %v5328_v15 = vrot.slane %v12755_v11, 7  ;;  %v5268_v41 = vadd.f32 %v12756_v27, %v5241_v23  ;;  %v5189_v31 = vadd.f32 %v5176_v49, %v5162_v48  ;;  %v5473_v34 = vrot.slane %v12757_v24, 1  ;;  %v11238_v55 = vpop.permute.xlu1 %6233 }
 0x5b8   : > { %v5263_v30 = vsel %vm4172_vm10, %v12754_v0, %v5261_v3  ;;  %v5380_v9 = vrot.slane %v12758_v56, 7  ;;  %v5215_v17 = vadd.f32 %v5210_v38, %v5188_v28  ;;  %v5237_v53 = vsel %vm4170_vm4, %v5236_v32, %v5232_v13  ;;  %v12761_v13 = vld [vmem:[#allocation191_spill] sm:$0xff] }
 0x5b9   : > { %v5302_v59 = vadd.f32 %v5295_v37, %v5268_v41  ;;  %v5216_v8 = vadd.f32 %v12747_v22, %v5189_v31  ;;  %v5296_v50 = vsel %vm4172_vm10, %v5293_v36, %v5294_v4  ;;  %v5354_v20 = vrot.slane %v5350_v63, 7  ;;  %v12765_v31 = vld [vmem:[#allocation104_spill] sm:$0xff] }
 0x5ba   : > { %v5527_v49 = vrot.slane %v12759_v39, 1  ;;  %v5264_v61 = vsel %vm4170_vm4, %v5263_v30, %v12752_v1  ;;  %v5682_v23 = vrot.slane %v12760_v33, 7  ;;  %v5242_v48 = vadd.f32 %v5237_v53, %v5215_v17  ;;  %v5402_v38 = vpop.permute.xlu0 %5401  ;;  %v12766_v17 = vld [vmem:[#allocation101_spill] sm:$0xff] }
 0x5bb   : > { %v5734_v32 = vrot.slane %v12761_v13, 7  ;;  %v12762_v37 = vrot.slane %v12666_v29, 7  ;;  %v5336_v60 = vadd.f32 %v10935_v16, %v5302_v59  ;;  %v5243_v36 = vadd.f32 %v5234_v58, %v5216_v8  ;;  %v11258_v41 = vpop.permute.xlu1 %6258  ;;  %v12767_v59 = vld [vmem:[#allocation200_spill] sm:$0xff] }
 0x5bc   : > { %v5332_v26 = vsel %vm4234_vm5, %v5328_v15, %v12763_v47  ;;  %v12764_v0 = vrot.slane %v12677_v19, 7  ;;  %v5269_v1 = vadd.f32 %v5264_v61, %v5242_v48  ;;  %v5297_v30 = vsel %vm4234_vm5, %v5296_v50, %v5290_v45  ;;  %v12768_v50 = vld [vmem:[#allocation202_spill] sm:$0xff] }
 0x5bd   : > { %v5330_v22 = vsel %vm4172_vm10, %v12762_v37, %v5328_v15  ;;  %v5270_v27 = vadd.f32 %v5261_v3, %v5243_v36  ;;  %v5356_v29 = vsel %vm4172_vm10, %v5353_v46, %v5354_v20  ;;  %v5406_v16 = vrot.slane %v5402_v38, 7 }
 0x5be   : > { %v5382_v28 = vsel %vm4172_vm10, %v12764_v0, %v5380_v9  ;;  %v5362_v58 = vadd.f32 %v5355_v6, %v5336_v60  ;;  %v5331_v15 = vsel %vm4234_vm5, %v5330_v22, %v12755_v11  ;;  %v5384_v19 = vsel %vm4295_vm6, %v5380_v9, %v12765_v31  ;;  %v6392_v9 = vpop.permute.xlu0 %6391  ;;  %v12772_v31 = vld [vmem:[#allocation215_spill] sm:$0xff] }
 0x5bf   : > { %v5298_v53 = vsel %vm4234_vm5, %v5294_v4, %v12766_v17  ;;  %v5303_v45 = vadd.f32 %v5297_v30, %v5269_v1  ;;  %v5432_v3 = vrot.slane %v12767_v59, 7  ;;  %v6394_v2 = vrot.slane %v11136_v40, 7  ;;  %v11276_v22 = vpop.permute.xlu1 %6318 }
 0x5c0   : > { %v5304_v8 = vadd.f32 %v5298_v53, %v5270_v27  ;;  %v5388_v46 = vadd.f32 %v10965_v18, %v5362_v58  ;;  %v5383_v6 = vsel %vm4295_vm6, %v5382_v28, %v12758_v56  ;;  %v5501_v61 = vrot.slane %v12768_v50, 1  ;;  %v12769_v56 = vld [vmem:[#allocation103_spill] sm:$0xff]  ;;  %v12771_v28 = vld [vmem:[#allocation106_spill] sm:$0xff]  ;;  %v12773_v53 = vld [vmem:[#allocation105_spill] sm:$0xff] }
 0x5c1   : > { %v5337_v11 = vadd.f32 %v5331_v15, %v5303_v45  ;;  %v5357_v48 = vsel %vm4295_vm6, %v5356_v29, %v5350_v63  ;;  %v5408_v4 = vsel %vm4172_vm10, %v5405_v52, %v5406_v16  ;;  %v11279_v60 = vsel %vm4234_vm5, %v6394_v2, %v6392_v9 }
 0x5c2   : > { %v5338_v37 = vadd.f32 %v5332_v26, %v5304_v8  ;;  %v5414_v18 = vadd.f32 %v5407_v57, %v5388_v46  ;;  %v12166_v36 = vrot.slane %v10972_v14, 7  ;;  %v5358_v47 = vsel %vm4295_vm6, %v5354_v20, %v12769_v56  ;;  %v5470_v29 = vpop.permute.xlu0 %5469  ;;  %v7139_v46 = vld [vmem:[#allocation4 + $0xa0] ss:$8 sm:$0x1] }
 0x5c3   : > { %v5363_v0 = vadd.f32 %v5357_v48, %v5337_v11  ;;  %v12167_v63 = vrot.slane %v11276_v22, 7  ;;  %v12770_v26 = vrot.slane %v12691_v43, 7  ;;  %v5436_v52 = vsel %vm4348_vm7, %v5432_v3, %v12771_v28  ;;  %v12775_v48 = vld [vmem:[#allocation217_spill] sm:$0xff] }
 0x5c4   : > { %v5364_v1 = vadd.f32 %v5358_v47, %v5338_v37  ;;  %v5440_v30 = vadd.f32 %v11022_v44, %v5414_v18  ;;  %v5503_v57 = vsel %vm4056_vm8, %v5500_v7, %v5501_v61  ;;  %v5409_v20 = vsel %vm4348_vm7, %v5408_v4, %v5402_v38  ;;  %v11304_v44 = vpop.permute.xlu1 %6387  ;;  %v7140_v47 = vld [vmem:[#allocation4 + $0xa1] ss:$8 sm:$0x1] }
 0x5c5   : > { %v5434_v51 = vsel %vm4172_vm10, %v12770_v26, %v5432_v3  ;;  %v5389_v27 = vadd.f32 %v5383_v6, %v5363_v0  ;;  %v6325_v43 = vsel %vm4172_vm10, %v12167_v63, %v12166_v36  ;;  %v5474_v7 = vrot.slane %v5470_v29, 1  ;;  %v12776_v0 = vld [vmem:[#allocation204_spill] sm:$0xff] }
 0x5c6   : > { %v5390_v58 = vadd.f32 %v5384_v19, %v5364_v1  ;;  %v11302_v15 = vsel %vm4170_vm4, %v6325_v43, %v10972_v14  ;;  %v5448_v17 = vadd.f32 %v12772_v31, %v5440_v30  ;;  %v5435_v38 = vsel %vm4348_vm7, %v5434_v51, %v12767_v59  ;;  %v12774_v19 = vld [vmem:[#allocation203_spill] sm:$0xff]  ;;  %v5524_v18 = vpop.permute.xlu0 %5523  ;;  %v12777_v30 = vld [vmem:[#allocation206_spill] sm:$0xff] }
 0x5c7   : > { %v5410_v45 = vsel %vm4348_vm7, %v5406_v16, %v12773_v53  ;;  %v5415_v3 = vadd.f32 %v5409_v20, %v5389_v27  ;;  %v12163_v8 = vrot.slane %v11304_v44, 7  ;;  %v5447_v6 = vmul.f32 %v7139_v46, %v12774_v19  ;;  %v12778_v20 = vld [vmem:[#allocation258_spill] sm:$0xff]  ;;  %v12784_v46 = vld [vmem:[#allocation193_spill] sm:$0xff] }
 0x5c8   : > { %v5416_v11 = vadd.f32 %v5410_v45, %v5390_v58  ;;  %v5456_v9 = vadd.f32 %v12775_v48, %v5448_v17  ;;  %v5476_v37 = vsel %vm4056_vm8, %v5473_v34, %v5474_v7  ;;  %v5504_v56 = vsel %vm675_vm2, %v12717_v10, %v5503_v57  ;;  %v11325_v1 = vpop.permute.xlu1 %6355  ;;  %v12781_v10 = vld [vmem:[#allocation108_spill] sm:$0xff]  ;;  %v12783_v45 = vld [vmem:[#allocation187_spill] sm:$0xff] }
 0x5c9   : > { %v5441_v4 = vadd.f32 %v5435_v38, %v5415_v3  ;;  %v6396_v59 = vsel %vm4172_vm10, %v12163_v8, %v6394_v2  ;;  %v5477_v16 = vsel %vm675_vm2, %v12757_v24, %v5476_v37  ;;  %v5455_v26 = vmul.f32 %v7140_v47, %v12776_v0  ;;  %v12779_v2 = vld [vmem:[#allocation107_spill] sm:$0xff] }
 0x5ca   : > { %v5442_v51 = vadd.f32 %v5436_v52, %v5416_v11  ;;  %v5483_v28 = vadd.f32 %v5477_v16, %v5456_v9  ;;  %v5528_v34 = vrot.slane %v5524_v18, 1  ;;  %v5555_v27 = vrot.slane %v12777_v30, 1  ;;  %v12785_v11 = vld [vmem:[#allocation259_spill] sm:$0xff]  ;;  %v5584_v48 = vpop.permute.xlu0 %5583  ;;  %v12786_v9 = vld [vmem:[#allocation37_spill] sm:$0xff] }
 0x5cb   : > { %v5449_v43 = vadd.f32 %v12778_v20, %v5441_v4  ;;  %v12780_v58 = vrot.slane %v12779_v2, 1  ;;  %v11334_v31 = vsel %vm4234_vm5, %v6396_v59, %v11136_v40  ;;  %v12782_v57 = vrot.slane %v12781_v10, 1  ;;  %v12788_v16 = vld [vmem:[#allocation109_spill] sm:$0xff] }
 0x5cc   : > { %v5450_v17 = vadd.f32 %v5447_v6, %v5442_v51  ;;  %v5530_v38 = vsel %vm4056_vm8, %v5527_v49, %v5528_v34  ;;  %v5510_v53 = vadd.f32 %v5504_v56, %v5483_v28  ;;  %v5615_v3 = vrot.slane %v12783_v45, 7  ;;  %v12787_v6 = vld [vmem:[#allocation111_spill] sm:$0xff]  ;;  %v11360_v59 = vpop.permute.xlu1 %6439  ;;  %v12790_v51 = vld [vmem:[#allocation33_spill] sm:$0xff] }
 0x5cd   : > { %v5478_v24 = vsel %vm4056_vm8, %v5474_v7, %v12780_v58  ;;  %v5505_v52 = vsel %vm4056_vm8, %v5501_v61, %v12782_v57  ;;  %v5786_v19 = vrot.slane %v12784_v46, 7  ;;  %v5457_v7 = vadd.f32 %v12785_v11, %v5449_v43  ;;  %v12792_v43 = vld [vmem:[#allocation214_spill] sm:$0xff]  ;;  %v12796_v11 = vld [vmem:[#allocation225_spill] sm:$0xff] }
 0x5ce   : > { %v5531_v40 = vsel %vm4113_vm9, %v12759_v39, %v5530_v38  ;;  %v11351_v61 = vsel %vm4234_vm5, %v5682_v23, %v12786_v9  ;;  %v11357_v49 = vsel %vm4295_vm6, %v5734_v32, %v12787_v6  ;;  %v5458_v37 = vadd.f32 %v5455_v26, %v5450_v17  ;;  %v12794_v17 = vld [vmem:[#allocation113_spill] sm:$0xff]  ;;  %v5644_v9 = vpop.permute.xlu0 %5643 }
 0x5cf   : > { %v5479_v4 = vsel %vm675_vm2, %v5470_v29, %v5478_v24  ;;  %v5506_v39 = vsel %vm675_vm2, %v12768_v50, %v5505_v52  ;;  %v12789_v56 = vrot.slane %v12788_v16, 1  ;;  %v12791_v28 = vrot.slane %v12790_v51, 1  ;;  %v12795_v52 = vld [vmem:[#allocation195_spill] sm:$0xff]  ;;  %v12797_v6 = vld [vmem:[#allocation197_spill] sm:$0xff] }
 0x5d0   : > { %v5484_v0 = vadd.f32 %v5479_v4, %v5457_v7  ;;  %v5614_v58 = vrot.slane %v12792_v43, 7  ;;  %v5485_v26 = vadd.f32 %v12779_v2, %v5458_v37  ;;  %v12793_v29 = vrot.slane %v12720_v5, 1 }
 0x5d1   : > { %v5559_v47 = vsel %vm4056_vm8, %v5555_v27, %v12789_v56  ;;  %v5532_v20 = vsel %vm4056_vm8, %v5528_v34, %v12791_v28  ;;  %v5537_v57 = vadd.f32 %v5531_v40, %v5510_v53  ;;  %v11379_v50 = vsel %vm4348_vm7, %v5786_v19, %v12794_v17  ;;  %v5582_v40 = vpop.permute.xlu1 %5581 }
 0x5d2   : > { %v5557_v24 = vsel %vm4056_vm8, %v12793_v29, %v5555_v27  ;;  %v5854_v38 = vrot.slane %v12795_v52, 1  ;;  %v5681_v7 = vrot.slane %v12796_v11, 7  ;;  %v5511_v34 = vadd.f32 %v5506_v39, %v5484_v0 }
 0x5d3   : > { %v5908_v4 = vrot.slane %v12797_v6, 1  ;;  %v5560_v2 = vsel %vm4113_vm9, %v12777_v30, %v5559_v47  ;;  %v5533_v27 = vsel %vm4113_vm9, %v5524_v18, %v5532_v20  ;;  %v5512_v53 = vadd.f32 %v12781_v10, %v5485_v26  ;;  %v5702_v47 = vpop.permute.xlu0 %5701 }
 0x5d4   : > { %v5538_v37 = vadd.f32 %v5533_v27, %v5511_v34  ;;  %v5586_v56 = vrot.slane %v5584_v48, 7  ;;  %v5558_v28 = vsel %vm4113_vm9, %v12720_v5, %v5557_v24  ;;  %v5585_v29 = vrot.slane %v5582_v40, 7  ;;  %v12798_v5 = vld [vmem:[#allocation34_spill] sm:$0xff] }
 0x5d5   : > { %v5616_v39 = vsel %vm4170_vm4, %v5614_v58, %v12792_v43  ;;  %v5617_v0 = vsel %vm4172_vm10, %v5614_v58, %v5615_v3  ;;  %v5539_v17 = vadd.f32 %v12790_v51, %v5512_v53  ;;  %v5564_v8 = vadd.f32 %v5558_v28, %v5537_v57  ;;  %v5642_v34 = vpop.permute.xlu1 %5641 }
 0x5d6   : > { %v5565_v30 = vadd.f32 %v5560_v2, %v5538_v37  ;;  %v5587_v18 = vsel %vm4170_vm4, %v5585_v29, %v5582_v40  ;;  %v5588_v10 = vsel %vm4172_vm10, %v5585_v29, %v5586_v56  ;;  %v5684_v20 = vsel %vm4172_vm10, %v5681_v7, %v5682_v23 }
 0x5d7   : > { %v5733_v26 = vrot.slane %v12798_v5, 7  ;;  %v5566_v24 = vadd.f32 %v12788_v16, %v5539_v17  ;;  %v5589_v43 = vsel %vm4170_vm4, %v5588_v10, %v5584_v48  ;;  %v5593_v58 = vadd.f32 %v5587_v18, %v5564_v8  ;;  %v5754_v29 = vpop.permute.xlu0 %5753  ;;  %v12800_v10 = vld [vmem:[#allocation42_spill] sm:$0xff] }
 0x5d8   : > { %v5594_v51 = vadd.f32 %v5589_v43, %v5565_v30  ;;  %v5648_v57 = vrot.slane %v5644_v9, 7  ;;  %v5647_v2 = vrot.slane %v5642_v34, 7  ;;  %v5618_v27 = vsel %vm4170_vm4, %v5617_v0, %v12783_v45 }
 0x5d9   : > { %v5683_v53 = vsel %vm4234_vm5, %v5681_v7, %v12796_v11  ;;  %v5595_v40 = vadd.f32 %v5586_v56, %v5566_v24  ;;  %v5622_v37 = vadd.f32 %v5616_v39, %v5593_v58  ;;  %v5685_v23 = vsel %vm4234_vm5, %v5684_v20, %v12760_v33  ;;  %v5704_v0 = vpop.permute.xlu1 %5703  ;;  %v12799_v7 = vld [vmem:[#allocation35_spill] sm:$0xff] }
 0x5da   : > { %v5649_v16 = vsel %vm4234_vm5, %v5647_v2, %v5642_v34  ;;  %v5650_v48 = vsel %vm4172_vm10, %v5647_v2, %v5648_v57  ;;  %v5707_v8 = vrot.slane %v5702_v47, 7  ;;  %v5623_v28 = vadd.f32 %v5618_v27, %v5594_v51 }
 0x5db   : > { %v5735_v17 = vsel %vm4295_vm6, %v5733_v26, %v12798_v5  ;;  %v5624_v30 = vadd.f32 %v5615_v3, %v5595_v40  ;;  %v5656_v45 = vadd.f32 %v5649_v16, %v5622_v37  ;;  %v5651_v11 = vsel %vm4234_vm5, %v5650_v48, %v5644_v9  ;;  %v11422_v51 = vpop.permute.xlu0 %6441  ;;  %v12801_v40 = vld [vmem:[#allocation110_spill] sm:$0xff] }
 0x5dc   : > { %v5652_v56 = vsel %vm4234_vm5, %v5648_v57, %v12799_v7  ;;  %v5657_v39 = vadd.f32 %v5651_v11, %v5623_v28  ;;  %v5708_v33 = vrot.slane %v5704_v0, 7  ;;  %v5736_v18 = vsel %vm4172_vm10, %v5733_v26, %v5734_v32 }
 0x5dd   : > { %v5785_v20 = vrot.slane %v12800_v10, 7  ;;  %v12165_v24 = vrot.slane %v11360_v59, 7  ;;  %v5658_v43 = vadd.f32 %v5652_v56, %v5624_v30  ;;  %v5690_v5 = vadd.f32 %v5683_v53, %v5656_v45  ;;  %v5756_v32 = vpop.permute.xlu1 %5755 }
 0x5de   : > { %v5709_v3 = vsel %vm4295_vm6, %v5707_v8, %v5702_v47  ;;  %v5691_v58 = vadd.f32 %v5685_v23, %v5657_v39  ;;  %v5710_v9 = vsel %vm4172_vm10, %v5707_v8, %v5708_v33  ;;  %v5759_v34 = vrot.slane %v5754_v29, 7 }
 0x5df   : > { %v5716_v57 = vadd.f32 %v5709_v3, %v5690_v5  ;;  %v5692_v2 = vadd.f32 %v11351_v61, %v5658_v43  ;;  %v5711_v27 = vsel %vm4295_vm6, %v5710_v9, %v5704_v0  ;;  %v12164_v26 = vrot.slane %v11422_v51, 7  ;;  %v12802_v0 = vld [vmem:[#allocation199_spill] sm:$0xff] }
 0x5e0   : > { %v5712_v37 = vsel %vm4295_vm6, %v5708_v33, %v12801_v40  ;;  %v5717_v53 = vadd.f32 %v5711_v27, %v5691_v58  ;;  %v5737_v47 = vsel %vm4295_vm6, %v5736_v18, %v12761_v13  ;;  %v5760_v23 = vrot.slane %v5756_v32, 7  ;;  %v12803_v33 = vld [vmem:[#allocation112_spill] sm:$0xff] }
 0x5e1   : > { %v5718_v16 = vadd.f32 %v5712_v37, %v5692_v2  ;;  %v5742_v48 = vadd.f32 %v5735_v17, %v5716_v57  ;;  %v5788_v8 = vsel %vm4172_vm10, %v5785_v20, %v5786_v19  ;;  %v6448_v61 = vsel %vm4172_vm10, %v12165_v24, %v12164_v26  ;;  %v5824_v17 = vpop.permute.xlu0 %5823  ;;  %v11448_v39 = vpop.permute.xlu1 %6417  ;;  %v12804_v57 = vld [vmem:[#allocation216_spill] sm:$0xff]  ;;  %v12805_v2 = vld [vmem:[#allocation201_spill] sm:$0xff]  ;;  %v12807_v37 = vld [vmem:[#allocation235_spill] sm:$0xff] }
 0x5e2   : > { %v5761_v28 = vsel %vm4348_vm7, %v5759_v34, %v5754_v29  ;;  %v5743_v30 = vadd.f32 %v5737_v47, %v5717_v53  ;;  %v5762_v45 = vsel %vm4172_vm10, %v5759_v34, %v5760_v23  ;;  %v11443_v13 = vsel %vm4295_vm6, %v6448_v61, %v11422_v51  ;;  %v7141_v34 = vld [vmem:[#allocation4 + $0xa8] ss:$8 sm:$0x1]  ;;  %v12808_v47 = vld [vmem:[#allocation242_spill] sm:$0xff] }
 0x5e3   : > { %v5969_v11 = vrot.slane %v12802_v0, 7  ;;  %v5768_v7 = vadd.f32 %v5761_v28, %v5742_v48  ;;  %v5744_v19 = vadd.f32 %v11357_v49, %v5718_v16  ;;  %v5763_v56 = vsel %vm4348_vm7, %v5762_v45, %v5756_v32  ;;  %v12806_v32 = vld [vmem:[#allocation211_spill] sm:$0xff]  ;;  %v12809_v61 = vld [vmem:[#allocation218_spill] sm:$0xff] }
 0x5e4   : > { %v5787_v29 = vsel %vm4348_vm7, %v5785_v20, %v12800_v10  ;;  %v5764_v18 = vsel %vm4348_vm7, %v5760_v23, %v12803_v33  ;;  %v5769_v43 = vadd.f32 %v5763_v56, %v5743_v30  ;;  %v5828_v5 = vrot.slane %v5824_v17, 1  ;;  %v7142_v48 = vld [vmem:[#allocation4 + $0xa9] ss:$8 sm:$0x1]  ;;  %v12820_v24 = vld [vmem:[#allocation74_spill] sm:$0xff] }
 0x5e5   : > { %v5794_v3 = vadd.f32 %v5787_v29, %v5768_v7  ;;  %v5789_v58 = vsel %vm4348_vm7, %v5788_v8, %v12784_v46  ;;  %v5770_v9 = vadd.f32 %v5764_v18, %v5744_v19  ;;  %v5801_v49 = vmul.f32 %v7141_v34, %v12804_v57  ;;  %v5878_v20 = vpop.permute.xlu0 %5877  ;;  %v5822_v46 = vpop.permute.xlu1 %5821  ;;  %v12810_v8 = vld [vmem:[#allocation261_spill] sm:$0xff]  ;;  %v12811_v45 = vld [vmem:[#allocation83_spill] sm:$0xff]  ;;  %v12812_v19 = vld [vmem:[#allocation114_spill] sm:$0xff] }
 0x5e6   : > { %v6036_v27 = vrot.slane %v12805_v2, 7  ;;  %v12168_v40 = vrot.slane %v12806_v32, 7  ;;  %v5855_v53 = vrot.slane %v12807_v37, 1  ;;  %v5795_v10 = vadd.f32 %v5789_v58, %v5769_v43  ;;  %v12814_v43 = vld [vmem:[#allocation205_spill] sm:$0xff]  ;;  %v12816_v34 = vld [vmem:[#allocation123_spill] sm:$0xff] }
 0x5e7   : > { %v5909_v23 = vrot.slane %v12808_v47, 1  ;;  %v5796_v16 = vadd.f32 %v11379_v50, %v5770_v9  ;;  %v5809_v28 = vmul.f32 %v7142_v48, %v12809_v61  ;;  %v5802_v30 = vadd.f32 %v12810_v8, %v5794_v3  ;;  %v12815_v50 = vld [vmem:[#allocation222_spill] sm:$0xff]  ;;  %v12819_v8 = vld [vmem:[#allocation260_spill] sm:$0xff] }
 0x5e8   : > { %v5803_v7 = vadd.f32 %v12811_v45, %v5795_v10  ;;  %v12813_v56 = vrot.slane %v12812_v19, 1  ;;  %v5827_v33 = vrot.slane %v5822_v46, 1  ;;  %v5882_v18 = vrot.slane %v5878_v20, 1  ;;  %v12817_v10 = vld [vmem:[#allocation115_spill] sm:$0xff] }
 0x5e9   : > { %v11472_v58 = vsel %vm4234_vm5, %v6036_v27, %v12814_v43  ;;  %v11478_v9 = vsel %vm4295_vm6, %v12168_v40, %v12815_v50  ;;  %v5804_v3 = vadd.f32 %v5801_v49, %v5796_v16  ;;  %v5810_v57 = vadd.f32 %v12816_v34, %v5802_v30  ;;  %v5938_v26 = vpop.permute.xlu0 %5937  ;;  %v5876_v34 = vpop.permute.xlu1 %5875 }
 0x5ea   : > { %v5832_v29 = vsel %vm4056_vm8, %v5828_v5, %v12813_v56  ;;  %v12818_v48 = vrot.slane %v12817_v10, 1  ;;  %v5811_v45 = vadd.f32 %v12819_v8, %v5803_v7  ;;  %v5830_v56 = vsel %vm4056_vm8, %v5827_v33, %v5828_v5  ;;  %v12822_v7 = vld [vmem:[#allocation116_spill] sm:$0xff] }
 0x5eb   : > { %v5857_v43 = vsel %vm4056_vm8, %v5854_v38, %v5855_v53  ;;  %v12821_v36 = vrot.slane %v12820_v24, 1  ;;  %v5812_v49 = vadd.f32 %v5809_v28, %v5804_v3  ;;  %v5833_v16 = vsel %vm675_vm2, %v5824_v17, %v5832_v29 }
 0x5ec   : > { %v5859_v61 = vsel %vm4056_vm8, %v5855_v53, %v12818_v48  ;;  %v5831_v30 = vsel %vm675_vm2, %v5822_v46, %v5830_v56  ;;  %v5838_v48 = vadd.f32 %v5833_v16, %v5811_v45  ;;  %v12823_v8 = vrot.slane %v12822_v7, 1  ;;  %v12824_v53 = vld [vmem:[#allocation255_spill] sm:$0xff] }
 0x5ed   : > { %v5913_v50 = vsel %vm4056_vm8, %v5909_v23, %v12821_v36  ;;  %v5837_v63 = vadd.f32 %v5831_v30, %v5810_v57  ;;  %v5881_v33 = vrot.slane %v5876_v34, 1  ;;  %v5860_v38 = vsel %vm675_vm2, %v12807_v37, %v5859_v61  ;;  %v5998_v57 = vpop.permute.xlu0 %5997  ;;  %v5936_v56 = vpop.permute.xlu1 %5935 }
 0x5ee   : > { %v5886_v5 = vsel %vm4056_vm8, %v5882_v18, %v12823_v8  ;;  %v5968_v40 = vrot.slane %v12824_v53, 7  ;;  %v5858_v36 = vsel %vm675_vm2, %v12795_v52, %v5857_v43  ;;  %v5839_v17 = vadd.f32 %v12812_v19, %v5812_v49 }
 0x5ef   : > { %v5865_v28 = vadd.f32 %v5860_v38, %v5838_v48  ;;  %v5864_v46 = vadd.f32 %v5858_v36, %v5837_v63  ;;  %v5884_v29 = vsel %vm4056_vm8, %v5881_v33, %v5882_v18  ;;  %v5911_v3 = vsel %vm4056_vm8, %v5908_v4, %v5909_v23  ;;  %v12825_v4 = vld [vmem:[#allocation84_spill] sm:$0xff]  ;;  %v12826_v48 = vld [vmem:[#allocation91_spill] sm:$0xff] }
 0x5f0   : > { %v5914_v45 = vsel %vm4113_vm9, %v12808_v47, %v5913_v50  ;;  %v5887_v37 = vsel %vm4113_vm9, %v5878_v20, %v5886_v5  ;;  %v5885_v61 = vsel %vm4113_vm9, %v5876_v34, %v5884_v29  ;;  %v5866_v52 = vadd.f32 %v12817_v10, %v5839_v17 }
 0x5f1   : > { %v5892_v19 = vadd.f32 %v5887_v37, %v5865_v28  ;;  %v5891_v43 = vadd.f32 %v5885_v61, %v5864_v46  ;;  %v5940_v63 = vrot.slane %v5938_v26, 7  ;;  %v5939_v49 = vrot.slane %v5936_v56, 7  ;;  %v6056_v34 = vpop.permute.xlu0 %6055  ;;  %v12827_v61 = vld [vmem:[#allocation76_spill] sm:$0xff] }
 0x5f2   : > { %v5971_v18 = vsel %vm4172_vm10, %v5968_v40, %v5969_v11  ;;  %v6035_v23 = vrot.slane %v12825_v4, 7  ;;  %v5893_v16 = vadd.f32 %v12822_v7, %v5866_v52  ;;  %v5912_v20 = vsel %vm4113_vm9, %v12797_v6, %v5911_v3  ;;  %v5996_v7 = vpop.permute.xlu1 %5995 }
 0x5f3   : > { %v5919_v47 = vadd.f32 %v5914_v45, %v5892_v19  ;;  %v5918_v50 = vadd.f32 %v5912_v20, %v5891_v43  ;;  %v5941_v10 = vsel %vm4170_vm4, %v5939_v49, %v5936_v56  ;;  %v5942_v30 = vsel %vm4172_vm10, %v5939_v49, %v5940_v63  ;;  %v12828_v49 = vld [vmem:[#allocation117_spill] sm:$0xff] }
 0x5f4   : > { %v6140_v8 = vrot.slane %v12826_v48, 7  ;;  %v5970_v5 = vsel %vm4170_vm4, %v5968_v40, %v12824_v53  ;;  %v5920_v33 = vadd.f32 %v12820_v24, %v5893_v16  ;;  %v5943_v38 = vsel %vm4170_vm4, %v5942_v30, %v5938_v26 }
 0x5f5   : > { %v5947_v36 = vadd.f32 %v5941_v10, %v5918_v50  ;;  %v5948_v17 = vadd.f32 %v5943_v38, %v5919_v47  ;;  %v6002_v6 = vrot.slane %v5998_v57, 7  ;;  %v6001_v28 = vrot.slane %v5996_v7, 7  ;;  %v6108_v37 = vpop.permute.xlu0 %6107 }
 0x5f6   : > { %v6087_v46 = vrot.slane %v10737_v35, 7  ;;  %v5949_v29 = vadd.f32 %v5940_v63, %v5920_v33  ;;  %v5972_v3 = vsel %vm4170_vm4, %v5971_v18, %v12802_v0  ;;  %v6038_v45 = vsel %vm4172_vm10, %v6035_v23, %v6036_v27  ;;  %v6058_v43 = vpop.permute.xlu1 %6057 }
 0x5f7   : > { %v5976_v40 = vadd.f32 %v5970_v5, %v5947_v36  ;;  %v6003_v24 = vsel %vm4234_vm5, %v6001_v28, %v5996_v7  ;;  %v6004_v26 = vsel %vm4172_vm10, %v6001_v28, %v6002_v6  ;;  %v5977_v53 = vadd.f32 %v5972_v3, %v5948_v17 }
 0x5f8   : > { %v6144_v52 = vsel %vm4348_vm7, %v6140_v8, %v12827_v61  ;;  %v5978_v56 = vadd.f32 %v5969_v11, %v5949_v29  ;;  %v6061_v19 = vrot.slane %v6056_v34, 7  ;;  %v6005_v63 = vsel %vm4234_vm5, %v6004_v26, %v5998_v57 }
 0x5f9   : > { %v6006_v27 = vsel %vm4234_vm5, %v6002_v6, %v12828_v49  ;;  %v6010_v18 = vadd.f32 %v6003_v24, %v5976_v40  ;;  %v6011_v16 = vadd.f32 %v6005_v63, %v5977_v53  ;;  %v6062_v20 = vrot.slane %v6058_v43, 7  ;;  %v11550_v38 = vpop.permute.xlu0 %6443  ;;  %v12830_v24 = vld [vmem:[#allocation219_spill] sm:$0xff] }
 0x5fa   : > { %v6037_v47 = vsel %vm4234_vm5, %v6035_v23, %v12825_v4  ;;  %v6012_v50 = vadd.f32 %v6006_v27, %v5978_v56  ;;  %v6039_v10 = vsel %vm4234_vm5, %v6038_v45, %v12805_v2  ;;  %v12829_v0 = vrot.slane %v12806_v32, 7  ;;  %v6110_v2 = vpop.permute.xlu1 %6109 }
 0x5fb   : > { %v6139_v30 = vrot.slane %v10922_v54, 7  ;;  %v6044_v57 = vadd.f32 %v6037_v47, %v6010_v18  ;;  %v6045_v5 = vadd.f32 %v6039_v10, %v6011_v16  ;;  %v6064_v33 = vsel %vm4172_vm10, %v6061_v19, %v6062_v20 }
 0x5fc   : > { %v6090_v11 = vsel %vm4172_vm10, %v6087_v46, %v12829_v0  ;;  %v6063_v7 = vsel %vm4295_vm6, %v6061_v19, %v6056_v34  ;;  %v6046_v4 = vadd.f32 %v11472_v58, %v6012_v50  ;;  %v6065_v23 = vsel %vm4295_vm6, %v6064_v33, %v6058_v43  ;;  %v7143_v34 = vld [vmem:[#allocation4 + $0xb0] ss:$8 sm:$0x1]  ;;  %v12832_v50 = vld [vmem:[#allocation122_spill] sm:$0xff] }
 0x5fd   : > { %v6113_v36 = vrot.slane %v6108_v37, 7  ;;  %v6070_v17 = vadd.f32 %v6063_v7, %v6044_v57  ;;  %v6066_v6 = vsel %vm4295_vm6, %v6062_v20, %v10899_v12  ;;  %v6071_v28 = vadd.f32 %v6065_v23, %v6045_v5  ;;  %v6178_v19 = vpop.permute.xlu0 %6177  ;;  %v12831_v20 = vld [vmem:[#allocation232_spill] sm:$0xff] }
 0x5fe   : > { %v6114_v29 = vrot.slane %v6110_v2, 7  ;;  %v6089_v3 = vsel %vm4295_vm6, %v6087_v46, %v10737_v35  ;;  %v6072_v45 = vadd.f32 %v6066_v6, %v6046_v4  ;;  %v6091_v40 = vsel %vm4295_vm6, %v6090_v11, %v12806_v32  ;;  %v11567_v46 = vpop.permute.xlu1 %6491  ;;  %v12834_v33 = vld [vmem:[#allocation220_spill] sm:$0xff] }
 0x5ff   : > { %v6155_v58 = vmul.f32 %v7143_v34, %v12830_v24  ;;  %v6142_v26 = vsel %vm4172_vm10, %v6139_v30, %v6140_v8  ;;  %v6096_v53 = vadd.f32 %v6089_v3, %v6070_v17  ;;  %v6097_v61 = vadd.f32 %v6091_v40, %v6071_v28  ;;  %v12837_v34 = vld [vmem:[#allocation125_spill] sm:$0xff] }
 0x600   : > { %v6116_v56 = vsel %vm4172_vm10, %v6113_v36, %v6114_v29  ;;  %v6115_v12 = vsel %vm4348_vm7, %v6113_v36, %v6108_v37  ;;  %v6098_v43 = vadd.f32 %v11478_v9, %v6072_v45  ;;  %v6182_v63 = vrot.slane %v6178_v19, 1  ;;  %v12835_v36 = vld [vmem:[#allocation73_spill] sm:$0xff] }
 0x601   : > { %v6117_v35 = vsel %vm4348_vm7, %v6116_v56, %v6110_v2  ;;  %v6141_v32 = vsel %vm4348_vm7, %v6139_v30, %v10922_v54  ;;  %v6122_v49 = vadd.f32 %v6115_v12, %v6096_v53  ;;  %v6118_v8 = vsel %vm4348_vm7, %v6114_v29, %v11071_v25  ;;  %v6232_v54 = vpop.permute.xlu0 %6231  ;;  %v12833_v30 = vld [vmem:[#allocation251_spill] sm:$0xff]  ;;  %v7144_v25 = vld [vmem:[#allocation4 + $0xb1] ss:$8 sm:$0x1] }
 0x602   : > { %v6123_v27 = vadd.f32 %v6117_v35, %v6097_v61  ;;  %v6183_v18 = vrot.slane %v11096_v21, 1  ;;  %v6209_v16 = vrot.slane %v11214_v62, 1  ;;  %v6143_v9 = vsel %vm4348_vm7, %v6142_v26, %v12826_v48  ;;  %v6176_v23 = vpop.permute.xlu1 %6175  ;;  %v12836_v48 = vld [vmem:[#allocation126_spill] sm:$0xff]  ;;  %v12838_v26 = vld [vmem:[#allocation127_spill] sm:$0xff] }
 0x603   : > { %v6124_v37 = vadd.f32 %v6118_v8, %v6098_v43  ;;  %v6208_v47 = vrot.slane %v12831_v20, 1  ;;  %v6210_v10 = vrot.slane %v12832_v50, 1  ;;  %v6148_v0 = vadd.f32 %v6141_v32, %v6122_v49 }
 0x604   : > { %v6149_v11 = vadd.f32 %v6143_v9, %v6123_v27  ;;  %v6262_v57 = vrot.slane %v12833_v30, 1  ;;  %v6163_v7 = vmul.f32 %v7144_v25, %v12834_v33  ;;  %v6186_v4 = vsel %vm4056_vm8, %v6182_v63, %v6183_v18 }
 0x605   : > { %v6150_v5 = vadd.f32 %v6144_v52, %v6124_v37  ;;  %v6156_v17 = vadd.f32 %v12836_v48, %v6148_v0  ;;  %v6181_v6 = vrot.slane %v6176_v23, 1  ;;  %v6236_v28 = vrot.slane %v6232_v54, 1  ;;  %v6292_v56 = vpop.permute.xlu0 %6291 }
 0x606   : > { %v6157_v2 = vadd.f32 %v12835_v36, %v6149_v11  ;;  %v6211_v29 = vsel %vm4056_vm8, %v6208_v47, %v6209_v16  ;;  %v6213_v3 = vsel %vm4056_vm8, %v6209_v16, %v6210_v10  ;;  %v6263_v45 = vrot.slane %v11258_v41, 1  ;;  %v6230_v49 = vpop.permute.xlu1 %6229 }
 0x607   : > { %v6158_v40 = vadd.f32 %v6155_v58, %v6150_v5  ;;  %v6237_v52 = vrot.slane %v11238_v55, 1  ;;  %v6164_v53 = vadd.f32 %v12838_v26, %v6156_v17  ;;  %v6184_v61 = vsel %vm4056_vm8, %v6181_v6, %v6182_v63 }
 0x608   : > { %v6165_v24 = vadd.f32 %v12837_v34, %v6157_v2  ;;  %v6264_v12 = vrot.slane %v10794_v42, 1  ;;  %v6187_v35 = vsel %vm675_vm2, %v6178_v19, %v6186_v4  ;;  %v6185_v32 = vsel %vm675_vm2, %v6176_v23, %v6184_v61 }
 0x609   : > { %v6166_v43 = vadd.f32 %v6163_v7, %v6158_v40  ;;  %v6191_v27 = vadd.f32 %v6185_v32, %v6164_v53  ;;  %v6240_v58 = vsel %vm4056_vm8, %v6236_v28, %v6237_v52  ;;  %v6235_v18 = vrot.slane %v6230_v49, 1  ;;  %v6354_v11 = vpop.permute.xlu0 %6353 }
 0x60a   : > { %v6192_v8 = vadd.f32 %v6187_v35, %v6165_v24  ;;  %v6214_v16 = vsel %vm675_vm2, %v11214_v62, %v6213_v3  ;;  %v6265_v9 = vsel %vm4056_vm8, %v6262_v57, %v6263_v45  ;;  %v6212_v63 = vsel %vm675_vm2, %v12831_v20, %v6211_v29  ;;  %v6290_v33 = vpop.permute.xlu1 %6289 }
 0x60b   : > { %v6193_v37 = vadd.f32 %v11096_v21, %v6166_v43  ;;  %v6267_v19 = vsel %vm4056_vm8, %v6263_v45, %v6264_v12  ;;  %v6218_v10 = vadd.f32 %v6212_v63, %v6191_v27  ;;  %v6238_v0 = vsel %vm4056_vm8, %v6235_v18, %v6236_v28 }
 0x60c   : > { %v6219_v47 = vadd.f32 %v6214_v16, %v6192_v8  ;;  %v6241_v5 = vsel %vm4113_vm9, %v6232_v54, %v6240_v58  ;;  %v6239_v25 = vsel %vm4113_vm9, %v6230_v49, %v6238_v0  ;;  %v6294_v4 = vrot.slane %v6292_v56, 7 }
 0x60d   : > { %v6220_v62 = vadd.f32 %v12832_v50, %v6193_v37  ;;  %v6245_v7 = vadd.f32 %v6239_v25, %v6218_v10  ;;  %v6293_v20 = vrot.slane %v6290_v33, 7  ;;  %v6268_v21 = vsel %vm4113_vm9, %v11258_v41, %v6267_v19  ;;  %v6414_v50 = vpop.permute.xlu0 %6413 }
 0x60e   : > { %v6246_v57 = vadd.f32 %v6241_v5, %v6219_v47  ;;  %v6266_v36 = vsel %vm4113_vm9, %v12833_v30, %v6265_v9  ;;  %v6352_v29 = vpop.permute.xlu1 %6351  ;;  %v6358_v41 = vrot.slane %v6354_v11, 7  ;;  %v12840_v61 = vrot.slane %v10972_v14, 7 }
 0x60f   : > { %v6247_v23 = vadd.f32 %v11238_v55, %v6220_v62  ;;  %v6272_v48 = vadd.f32 %v6266_v36, %v6245_v7  ;;  %v6295_v54 = vsel %vm4170_vm4, %v6293_v20, %v6290_v33  ;;  %v6296_v17 = vsel %vm4172_vm10, %v6293_v20, %v6294_v4 }
 0x610   : > { %v6273_v2 = vadd.f32 %v6268_v21, %v6246_v57  ;;  %v6297_v28 = vsel %vm4170_vm4, %v6296_v17, %v6292_v56  ;;  %v6357_v40 = vrot.slane %v6352_v29, 7  ;;  %v12839_v55 = vrot.slane %v11276_v22, 7 }
 0x611   : > { %v6274_v6 = vadd.f32 %v10794_v42, %v6247_v23  ;;  %v6301_v3 = vadd.f32 %v6295_v54, %v6272_v48  ;;  %v6466_v53 = vpop.permute.xlu0 %6465  ;;  %v6419_v12 = vrot.slane %v6414_v50, 7  ;;  %v6362_v32 = vsel %vm4234_vm5, %v6358_v41, %v11325_v1 }
 0x612   : > { %v6302_v45 = vadd.f32 %v6297_v28, %v6273_v2  ;;  %v6324_v30 = vsel %vm4170_vm4, %v12839_v55, %v11276_v22  ;;  %v6359_v24 = vsel %vm4234_vm5, %v6357_v40, %v6352_v29  ;;  %v6360_v26 = vsel %vm4172_vm10, %v6357_v40, %v6358_v41  ;;  %v6416_v43 = vpop.permute.xlu1 %6415 }
 0x613   : > { %v6303_v52 = vadd.f32 %v6294_v4, %v6274_v6  ;;  %v6330_v34 = vadd.f32 %v6324_v30, %v6301_v3  ;;  %v6361_v35 = vsel %vm4234_vm5, %v6360_v26, %v6354_v11  ;;  %v6420_v8 = vrot.slane %v6416_v43, 7 }
 0x614   : > { %v6331_v42 = vadd.f32 %v11302_v15, %v6302_v45  ;;  %v12841_v27 = vrot.slane %v11304_v44, 7  ;;  %v6421_v9 = vsel %vm4295_vm6, %v6419_v12, %v6414_v50  ;;  %v6471_v1 = vrot.slane %v6466_v53, 7 }
 0x615   : > { %v6332_v56 = vadd.f32 %v12840_v61, %v6303_v52  ;;  %v6366_v22 = vadd.f32 %v6359_v24, %v6330_v34  ;;  %v6422_v16 = vsel %vm4172_vm10, %v6419_v12, %v6420_v8  ;;  %v6494_v19 = vpop.permute.xlu0 %6493  ;;  %v12843_v25 = vrot.slane %v11422_v51, 7 }
 0x616   : > { %v6367_v49 = vadd.f32 %v6361_v35, %v6331_v42  ;;  %v6395_v58 = vsel %vm4234_vm5, %v12841_v27, %v11304_v44  ;;  %v6423_v63 = vsel %vm4295_vm6, %v6422_v16, %v6416_v43  ;;  %v6468_v37 = vpop.permute.xlu1 %6467  ;;  %v6424_v44 = vsel %vm4295_vm6, %v6420_v8, %v11448_v39  ;;  %v12846_v43 = vld [vmem:[#allocation25_spill] sm:$0xff]  ;;  %v12849_v27 = vld [vmem:[#allocation26_spill] sm:$0xff]  ;;  %v12851_v16 = vld [vmem:[#allocation28_spill] sm:$0xff] }
 0x617   : > { %v6368_v15 = vadd.f32 %v6362_v32, %v6332_v56  ;;  %v6402_v18 = vadd.f32 %v6395_v58, %v6366_v22  ;;  %v6472_v11 = vrot.slane %v6468_v37, 7  ;;  %v6450_v62 = vsel %vm4295_vm6, %v12843_v25, %v11550_v38  ;;  %v12845_v56 = vld [vmem:[#allocation22_spill] sm:$0xff]  ;;  %v12847_v32 = vld [vmem:[#allocation24_spill] sm:$0xff] }
 0x618   : > { %v6403_v14 = vadd.f32 %v11334_v31, %v6367_v49  ;;  %v12842_v31 = vrot.slane %v11360_v59, 7  ;;  %v6497_v33 = vrot.slane %v11567_v46, 7  ;;  %v6498_v4 = vrot.slane %v6494_v19, 7  ;;  %v12848_v49 = vld [vmem:[#allocation27_spill] sm:$0xff] }
 0x619   : > { %v6404_v47 = vadd.f32 %v11279_v60, %v6368_v15  ;;  %v6428_v10 = vadd.f32 %v6421_v9, %v6402_v18  ;;  %v6474_v39 = vsel %vm4172_vm10, %v6471_v1, %v6472_v11  ;;  %v6473_v20 = vsel %vm4348_vm7, %v6471_v1, %v6466_v53  ;;  %v12844_v53 = vld [vmem:[#allocation23_spill] sm:$0xff]  ;;  %v12850_v18 = vld [vmem:[#allocation29_spill] sm:$0xff] }
 0x61a   : > { %v6429_v0 = vadd.f32 %v6423_v63, %v6403_v14  ;;  %v6447_v5 = vsel %vm4295_vm6, %v12842_v31, %v11360_v59  ;;  %v6475_v21 = vsel %vm4348_vm7, %v6474_v39, %v6468_v37  ;;  %v6499_v51 = vsel %vm4348_vm7, %v6497_v33, %v11567_v46  ;;  %v6470_v28 = vpop.permute.xlu1 %6469  ;;  %v6496_v46 = vpop.permute.xlu0 %6495  ;;  %v12852_v39 = vld [vmem:[#allocation48_spill] sm:$0xff] }
 0x61b   : > { %v6430_v57 = vadd.f32 %v6424_v44, %v6404_v47  ;;  %v6454_v60 = vadd.f32 %v6447_v5, %v6428_v10  ;;  %v6510_v36 = vstv %s6509_s3  ;;  %v6500_v48 = vsel %vm4172_vm10, %v6497_v33, %v6498_v4 }
 0x61c   : > { %v6455_v7 = vadd.f32 %v11443_v13, %v6429_v0  ;;  %v6501_v13 = vsel %vm4348_vm7, %v6500_v48, %v6494_v19  ;;  %v6476_v3 = vsel %vm4348_vm7, %v6472_v11, %v6470_v28  ;;  %v6502_v55 = vsel %vm4348_vm7, %v6498_v4, %v6496_v46  ;;  %v12855_v28 = vld [vmem:[#allocation51_spill] sm:$0xff] }
 0x61d   : > { %v6456_v23 = vadd.f32 %v6450_v62, %v6430_v57  ;;  %v6480_v59 = vadd.f32 %v6473_v20, %v6454_v60  ;;  %v6702_v57 = vld [vmem:[%s7459_s25 + $0x20] sm:$0xff] }
 0x61e   : > { %v6481_v2 = vadd.f32 %v6475_v21, %v6455_v7  ;;  %v6718_v60 = vld [vmem:[%s7459_s25 + $0xe0] sm:$0xff] }
 0x61f   : > { %v6506_v38 = vadd.f32 %v6499_v51, %v6480_v59  ;;  %v6482_v41 = vadd.f32 %v6476_v3, %v6456_v23  ;;  %v12853_v20 = vld [vmem:[#allocation50_spill] sm:$0xff]  ;;  %v6703_v51 = vld [vmem:[%s7459_s25 + $0x28] sm:$0xff]  ;;  %v12856_v3 = vld [vmem:[#allocation52_spill] sm:$0xff] }
 0x620   : > { %v6507_v50 = vadd.f32 %v6501_v13, %v6481_v2  ;;  %v6719_v2 = vld [vmem:[%s7459_s25 + $0xe8] sm:$0xff]  ;;  %v6720_v13 = vld [vmem:[%s7459_s25 + $0xf0] sm:$0xff] }
 0x621   : > { %v6511_v54 = vadd.f32 %v6510_v36, %v6506_v38  ;;  %v6508_v30 = vadd.f32 %v6502_v55, %v6482_v41  ;;  %v12857_v41 = vld [vmem:[#allocation54_spill] sm:$0xff] }
 0x622   : > { %v6512_v6 = vadd.f32 %v6510_v36, %v6507_v50  ;;  %v12854_v50 = vld [vmem:[#allocation49_spill] sm:$0xff] }
 0x623   : > { %v7022_v17 = vmul.f32 -1.442695, %v6511_v54  ;;  %v6513_v52 = vadd.f32 %v6510_v36, %v6508_v30  ;;  %v6704_v54 = vld [vmem:[%s7459_s25 + $0x30] sm:$0xff] }
 0x624   : > { %v7023_v29 = vmul.f32 -1.442695, %v6512_v6 }
 0x625   : > { %7124 = vpow2.f32 %v7022_v17  ;;  %v7024_v24 = vmul.f32 -1.442695, %v6513_v52 }
 0x626   : > { %7126 = vpow2.f32 %v7023_v29 }
 0x62f   : > { %v7125_v45 = vpop.eup %7124 }
 0x630   : > { %v6523_v40 = vadd.f32 1.0, %v7125_v45  ;;  %v7127_v34 = vpop.eup %7126 }
 0x631   : > { %v6524_v42 = vadd.f32 1.0, %v7127_v34  ;;  %v6705_v34 = vld [vmem:[%s7459_s25 + $0x38] sm:$0xff] }
 0x632   : > { %7128 = vrcp.f32 %v6523_v40 }
 0x633   : > { %7130 = vpow2.f32 %v7024_v24 }
 0x634   : > { %7132 = vrcp.f32 %v6524_v42  ;;  %v6721_v42 = vld [vmem:[%s7459_s25 + $0xf8] sm:$0xff] }
 0x63c   : > { %v7129_v26 = vpop.eup %7128 }
 0x63d   : > { %v6542_v61 = vrot.slane %v7129_v26, %v12844_v53  ;;  %v6538_v12 = vrot.slane %v7129_v26, %v12845_v56  ;;  %v6550_v35 = vrot.slane %v7129_v26, %v12846_v43  ;;  %v6546_v22 = vrot.slane %v7129_v26, %v12847_v32  ;;  %v7131_v15 = vpop.eup %7130 }
 0x63e   : > { %v6558_v8 = vrot.slane %v7129_v26, %v12848_v49  ;;  %v6554_v58 = vrot.slane %v7129_v26, %v12849_v27  ;;  %v6566_v14 = vrot.slane %v7129_v26, %v12850_v18  ;;  %v6562_v9 = vrot.slane %v7129_v26, %v12851_v16  ;;  %v7133_v63 = vpop.eup %7132 }
 0x63f   : > { %6605 = vrot.lane.b32.xlu0 %v6542_v61, %s7276_s27  ;;  %6603 = vrot.lane.b32.xlu1 %v6538_v12, %s7276_s27  ;;  %v6525_v1 = vadd.f32 1.0, %v7131_v15  ;;  %v6574_v37 = vrot.slane %v7133_v63, %v12844_v53  ;;  %v6570_v19 = vrot.slane %v7133_v63, %v12845_v56  ;;  %v6582_v47 = vrot.slane %v7133_v63, %v12846_v43  ;;  %v6706_v61 = vld [vmem:[%s7459_s25 + $0x40] sm:$0xff]  ;;  %v12858_v43 = vld [vmem:[#allocation53_spill] sm:$0xff] }
 0x640   : > { %v6578_v10 = vrot.slane %v7133_v63, %v12847_v32  ;;  %v6590_v44 = vrot.slane %v7133_v63, %v12848_v49  ;;  %v6586_v0 = vrot.slane %v7133_v63, %v12849_v27  ;;  %v6598_v11 = vrot.slane %v7133_v63, %v12850_v18  ;;  %v12859_v32 = vld [vmem:[#allocation55_spill] sm:$0xff]  ;;  %v12860_v49 = vld [vmem:[#allocation56_spill] sm:$0xff]  ;;  %v12861_v27 = vld [vmem:[#allocation58_spill] sm:$0xff] }
 0x641   : > { %7134 = vrcp.f32 %v6525_v1  ;;  %v6594_v31 = vrot.slane %v7133_v63, %v12851_v16 }
 0x643   : > { %6609 = vrot.lane.b32.xlu0 %v6550_v35, %s7276_s27  ;;  %6607 = vrot.lane.b32.xlu1 %v6546_v22, %s7276_s27 }
 0x647   : > { %6613 = vrot.lane.b32.xlu0 %v6558_v8, %s7276_s27  ;;  %6611 = vrot.lane.b32.xlu1 %v6554_v58, %s7276_s27 }
 0x64b   : > { %6617 = vrot.lane.b32.xlu0 %v6566_v14, %s7276_s27  ;;  %6615 = vrot.lane.b32.xlu1 %v6562_v9, %s7276_s27  ;;  %v7135_v5 = vpop.eup %7134  ;;  %v6707_v9 = vld [vmem:[%s7459_s25 + $0x48] sm:$0xff] }
 0x64c   : > { %v6602_v25 = vrot.slane %v7135_v5, %v12845_v56  ;;  %v6722_v56 = vld [vmem:[%s7459_s25 + $0x100] sm:$0xff] }
 0x64f   : > { %6621 = vrot.lane.b32.xlu0 %v6574_v37, %s7276_s27  ;;  %6619 = vrot.lane.b32.xlu1 %v6570_v19, %s7276_s27  ;;  %v6723_v37 = vld [vmem:[%s7459_s25 + $0x108] sm:$0xff] }
 0x653   : > { %6625 = vrot.lane.b32.xlu0 %v6582_v47, %s7276_s27  ;;  %6623 = vrot.lane.b32.xlu1 %v6578_v10, %s7276_s27  ;;  %v6708_v47 = vld [vmem:[%s7459_s25 + $0x50] sm:$0xff] }
 0x654   : > { %v6724_v10 = vld [vmem:[%s7459_s25 + $0x110] sm:$0xff] }
 0x657   : > { %6629 = vrot.lane.b32.xlu0 %v6590_v44, %s7276_s27  ;;  %6627 = vrot.lane.b32.xlu1 %v6586_v0, %s7276_s27  ;;  %v12862_v0 = vld [vmem:[#allocation57_spill] sm:$0xff] }
 0x65b   : > { %6633 = vrot.lane.b32.xlu0 %v6598_v11, %s7276_s27  ;;  %6631 = vrot.lane.b32.xlu1 %v6594_v31, %s7276_s27  ;;  %v12863_v31 = vld [vmem:[#allocation59_spill] sm:$0xff] }
 0x65f   : > { %6635 = vrot.lane.b32.xlu1 %v6602_v25, %s7276_s27  ;;  %v12864_v25 = vld [vmem:[#allocation60_spill] sm:$0xff] }
 0x6b1   : > { %v6604_v62 = vpop.permute.xlu1 %6603  ;;  %v6606_v33 = vpop.permute.xlu0 %6605 }
 0x6b2   : > { %v6638_v7 = vsel %vm6637_vm11, %v6604_v62, %v6606_v33 }
 0x6b3   : > { %v6670_v4 = vmul.f32 %v6638_v7, %v12852_v39  ;;  %v6686_v21 = vmul.f32 %v6638_v7, %v12853_v20 }
 0x6b5   : > { %v6734_v23 = vadd.f32 %v6702_v57, %v6670_v4  ;;  %v6750_v59 = vadd.f32 %v6718_v60, %v6686_v21  ;;  %v6608_v36 = vpop.permute.xlu1 %6607  ;;  %v6610_v38 = vpop.permute.xlu0 %6609  ;;  %v6709_v21 = vld [vmem:[%s7459_s25 + $0x58] sm:$0xff] }
 0x6b6   : > { %v6639_v48 = vsel %vm6637_vm11, %v6606_v33, %v6608_v36  ;;  %v6640_v17 = vsel %vm6637_vm11, %v6608_v36, %v6610_v38  ;;  %v12865_v33 = vld [vmem:[#allocation62_spill] sm:$0xff] }
 0x6b7   : > { %6766 = vst [vmem:[%s11703_s24] sm:$0xff] %v6734_v23  ;;  %6782 = vst [vmem:[%s11703_s24 + $0x80] sm:$0xff] %v6750_v59  ;;  %v6671_v6 = vmul.f32 %v6639_v48, %v12854_v50  ;;  %v6687_v29 = vmul.f32 %v6639_v48, %v12855_v28  ;;  %v6672_v45 = vmul.f32 %v6640_v17, %v12856_v3  ;;  %v6710_v59 = vld [vmem:[%s7459_s25 + $0x60] sm:$0xff]  ;;  %v12866_v48 = vld [vmem:[#allocation61_spill] sm:$0xff] }
 0x6b8   : > { %v6688_v46 = vmul.f32 %v6640_v17, %v12857_v41  ;;  %v6726_v36 = vld [vmem:[%s7459_s25 + $0x120] sm:$0xff]  ;;  %v12868_v50 = vld [vmem:[#allocation63_spill] sm:$0xff] }
 0x6b9   : > { %v6735_v40 = vadd.f32 %v6703_v51, %v6671_v6  ;;  %v6751_v55 = vadd.f32 %v6719_v2, %v6687_v29  ;;  %v6736_v30 = vadd.f32 %v6704_v54, %v6672_v45  ;;  %v6612_v24 = vpop.permute.xlu1 %6611  ;;  %v6614_v26 = vpop.permute.xlu0 %6613  ;;  %v6725_v51 = vld [vmem:[%s7459_s25 + $0x118] sm:$0xff]  ;;  %v12869_v28 = vld [vmem:[#allocation66_spill] sm:$0xff] }
 0x6ba   : > { %v6752_v52 = vadd.f32 %v6720_v13, %v6688_v46  ;;  %v6641_v53 = vsel %vm6637_vm11, %v6610_v38, %v6612_v24  ;;  %v6642_v12 = vsel %vm6637_vm11, %v6612_v24, %v6614_v26  ;;  %v12867_v13 = vld [vmem:[#allocation64_spill] sm:$0xff] }
 0x6bb   : > { %6767 = vst [vmem:[%s11703_s24 + $0x8] sm:$0xff] %v6735_v40  ;;  %6783 = vst [vmem:[%s11703_s24 + $0x88] sm:$0xff] %v6751_v55  ;;  %v6673_v35 = vmul.f32 %v6641_v53, %v12858_v43  ;;  %v6689_v22 = vmul.f32 %v6641_v53, %v12859_v32  ;;  %v6674_v8 = vmul.f32 %v6642_v12, %v12860_v49  ;;  %v6711_v55 = vld [vmem:[%s7459_s25 + $0x68] sm:$0xff]  ;;  %v6728_v24 = vld [vmem:[%s7459_s25 + $0x130] sm:$0xff] }
 0x6bc   : > { %6768 = vst [vmem:[%s11703_s24 + $0x10] sm:$0xff] %v6736_v30  ;;  %6784 = vst [vmem:[%s11703_s24 + $0x90] sm:$0xff] %v6752_v52  ;;  %v6690_v58 = vmul.f32 %v6642_v12, %v12861_v27  ;;  %v6712_v52 = vld [vmem:[%s7459_s25 + $0x70] sm:$0xff]  ;;  %v12870_v53 = vld [vmem:[#allocation65_spill] sm:$0xff] }
 0x6bd   : > { %v6737_v15 = vadd.f32 %v6705_v34, %v6673_v35  ;;  %v6753_v18 = vadd.f32 %v6721_v42, %v6689_v22  ;;  %v6738_v14 = vadd.f32 %v6706_v61, %v6674_v8  ;;  %v6616_v63 = vpop.permute.xlu1 %6615  ;;  %v6618_v1 = vpop.permute.xlu0 %6617  ;;  %v6727_v34 = vld [vmem:[%s7459_s25 + $0x128] sm:$0xff]  ;;  %v12873_v32 = vld [vmem:[#allocation70_spill] sm:$0xff] }
 0x6be   : > { %v6754_v16 = vadd.f32 %v6722_v56, %v6690_v58  ;;  %v6643_v19 = vsel %vm6637_vm11, %v6614_v26, %v6616_v63  ;;  %v6644_v44 = vsel %vm6637_vm11, %v6616_v63, %v6618_v1  ;;  %v12871_v56 = vld [vmem:[#allocation68_spill] sm:$0xff]  ;;  %v12872_v43 = vld [vmem:[#allocation67_spill] sm:$0xff]  ;;  %v6730_v63 = vld [vmem:[%s7459_s25 + $0x140] sm:$0xff] }
 0x6bf   : > { %6769 = vst [vmem:[%s11703_s24 + $0x18] sm:$0xff] %v6737_v15  ;;  %6785 = vst [vmem:[%s11703_s24 + $0x98] sm:$0xff] %v6753_v18  ;;  %v6675_v11 = vmul.f32 %v6643_v19, %v12862_v0  ;;  %v6691_v5 = vmul.f32 %v6643_v19, %v12863_v31  ;;  %v6676_v62 = vmul.f32 %v6644_v44, %v12864_v25  ;;  %v6713_v18 = vld [vmem:[%s7459_s25 + $0x78] sm:$0xff]  ;;  %v12876_v0 = vld [vmem:[#allocation72_spill] sm:$0xff] }
 0x6c0   : > { %6770 = vst [vmem:[%s11703_s24 + $0x20] sm:$0xff] %v6738_v14  ;;  %6786 = vst [vmem:[%s11703_s24 + $0xa0] sm:$0xff] %v6754_v16  ;;  %v6692_v57 = vmul.f32 %v6644_v44, %v12865_v33  ;;  %v6714_v16 = vld [vmem:[%s7459_s25 + $0x80] sm:$0xff]  ;;  %v12874_v19 = vld [vmem:[#allocation69_spill] sm:$0xff] }
 0x6c1   : > { %v6739_v60 = vadd.f32 %v6707_v9, %v6675_v11  ;;  %v6755_v7 = vadd.f32 %v6723_v37, %v6691_v5  ;;  %v6740_v39 = vadd.f32 %v6708_v47, %v6676_v62  ;;  %v6622_v20 = vpop.permute.xlu0 %6621  ;;  %v6620_v23 = vpop.permute.xlu1 %6619  ;;  %v6729_v9 = vld [vmem:[%s7459_s25 + $0x138] sm:$0xff]  ;;  %v12877_v31 = vld [vmem:[#allocation94_spill] sm:$0xff] }
 0x6c2   : > { %v6756_v4 = vadd.f32 %v6724_v10, %v6692_v57  ;;  %v6645_v38 = vsel %vm6637_vm11, %v6618_v1, %v6620_v23  ;;  %v6646_v2 = vsel %vm6637_vm11, %v6620_v23, %v6622_v20  ;;  %v12875_v10 = vld [vmem:[#allocation92_spill] sm:$0xff] }
 0x6c3   : > { %6771 = vst [vmem:[%s11703_s24 + $0x28] sm:$0xff] %v6739_v60  ;;  %6787 = vst [vmem:[%s11703_s24 + $0xa8] sm:$0xff] %v6755_v7  ;;  %v6677_v54 = vmul.f32 %v6645_v38, %v12866_v48  ;;  %v6678_v17 = vmul.f32 %v6646_v2, %v12867_v13  ;;  %v6693_v6 = vmul.f32 %v6645_v38, %v12868_v50  ;;  %v6715_v7 = vld [vmem:[%s7459_s25 + $0x88] sm:$0xff]  ;;  %v12879_v38 = vld [vmem:[#allocation97_spill] sm:$0xff] }
 0x6c4   : > { %6772 = vst [vmem:[%s11703_s24 + $0x30] sm:$0xff] %v6740_v39  ;;  %6788 = vst [vmem:[%s11703_s24 + $0xb0] sm:$0xff] %v6756_v4  ;;  %v6694_v29 = vmul.f32 %v6646_v2, %v12869_v28  ;;  %v6716_v4 = vld [vmem:[%s7459_s25 + $0x90] sm:$0xff]  ;;  %v12880_v48 = vld [vmem:[#allocation95_spill] sm:$0xff] }
 0x6c5   : > { %v6741_v3 = vadd.f32 %v6709_v21, %v6677_v54  ;;  %v6742_v45 = vadd.f32 %v6710_v59, %v6678_v17  ;;  %v6757_v41 = vadd.f32 %v6725_v51, %v6693_v6  ;;  %v6626_v40 = vpop.permute.xlu0 %6625  ;;  %v6624_v30 = vpop.permute.xlu1 %6623  ;;  %v6732_v21 = vld [vmem:[%s7459_s25 + $0x150] sm:$0xff]  ;;  %v12878_v51 = vld [vmem:[#allocation93_spill] sm:$0xff]  ;;  %v12881_v13 = vld [vmem:[#allocation99_spill] sm:$0xff] }
 0x6c6   : > { %v6758_v46 = vadd.f32 %v6726_v36, %v6694_v29  ;;  %v6647_v26 = vsel %vm6637_vm11, %v6622_v20, %v6624_v30  ;;  %v6648_v42 = vsel %vm6637_vm11, %v6624_v30, %v6626_v40  ;;  %v6731_v20 = vld [vmem:[%s7459_s25 + $0x148] sm:$0xff]  ;;  %v12883_v30 = vld [vmem:[#allocation100_spill] sm:$0xff] }
 0x6c7   : > { %6773 = vst [vmem:[%s11703_s24 + $0x38] sm:$0xff] %v6741_v3  ;;  %6774 = vst [vmem:[%s11703_s24 + $0x40] sm:$0xff] %v6742_v45  ;;  %v6679_v61 = vmul.f32 %v6647_v26, %v12870_v53  ;;  %v6680_v12 = vmul.f32 %v6648_v42, %v12871_v56  ;;  %v6695_v35 = vmul.f32 %v6647_v26, %v12872_v43  ;;  %v6717_v45 = vld [vmem:[%s7459_s25 + $0x98] sm:$0xff] }
 0x6c8   : > { %6789 = vst [vmem:[%s11703_s24 + $0xb8] sm:$0xff] %v6757_v41  ;;  %6790 = vst [vmem:[%s11703_s24 + $0xc0] sm:$0xff] %v6758_v46  ;;  %v6696_v22 = vmul.f32 %v6648_v42, %v12873_v32  ;;  %v6733_v41 = vld [vmem:[%s7459_s25 + $0x158] sm:$0xff]  ;;  %s6799_s25 = scalar_lea.sflag [#allocation8], %s7455_s11 }
 0x6c9   : > { %v6743_v49 = vadd.f32 %v6711_v55, %v6679_v61  ;;  %v6744_v8 = vadd.f32 %v6712_v52, %v6680_v12  ;;  %v6759_v27 = vadd.f32 %v6727_v34, %v6695_v35  ;;  %v6630_v15 = vpop.permute.xlu0 %6629  ;;  %v6628_v14 = vpop.permute.xlu1 %6627 }
 0x6ca   : > { %v6760_v58 = vadd.f32 %v6728_v24, %v6696_v22  ;;  %v6649_v1 = vsel %vm6637_vm11, %v6626_v40, %v6628_v14  ;;  %v6650_v37 = vsel %vm6637_vm11, %v6628_v14, %v6630_v15  ;;  %v12882_v40 = vld [vmem:[#allocation98_spill] sm:$0xff] }
 0x6cb   : > { %6775 = vst [vmem:[%s11703_s24 + $0x48] sm:$0xff] %v6743_v49  ;;  %6776 = vst [vmem:[%s11703_s24 + $0x50] sm:$0xff] %v6744_v8  ;;  %v6681_v47 = vmul.f32 %v6649_v1, %v12874_v19  ;;  %v6682_v44 = vmul.f32 %v6650_v37, %v12875_v10  ;;  %v6697_v11 = vmul.f32 %v6649_v1, %v12876_v0 }
 0x6cc   : > { %6791 = vst [vmem:[%s11703_s24 + $0xc8] sm:$0xff] %v6759_v27  ;;  %6792 = vst [vmem:[%s11703_s24 + $0xd0] sm:$0xff] %v6760_v58  ;;  %v6698_v5 = vmul.f32 %v6650_v37, %v12877_v31 }
 0x6cd   : > { %v6745_v25 = vadd.f32 %v6713_v18, %v6681_v47  ;;  %v6746_v62 = vadd.f32 %v6714_v16, %v6682_v44  ;;  %v6761_v33 = vadd.f32 %v6729_v9, %v6697_v11  ;;  %v6634_v60 = vpop.permute.xlu0 %6633  ;;  %v6632_v39 = vpop.permute.xlu1 %6631 }
 0x6ce   : > { %v6762_v57 = vadd.f32 %v6730_v63, %v6698_v5  ;;  %v6651_v23 = vsel %vm6637_vm11, %v6630_v15, %v6632_v39  ;;  %v6652_v59 = vsel %vm6637_vm11, %v6632_v39, %v6634_v60 }
 0x6cf   : > { %6777 = vst [vmem:[%s11703_s24 + $0x58] sm:$0xff] %v6745_v25  ;;  %6778 = vst [vmem:[%s11703_s24 + $0x60] sm:$0xff] %v6746_v62  ;;  %v6683_v36 = vmul.f32 %v6651_v23, %v12878_v51  ;;  %v6684_v2 = vmul.f32 %v6652_v59, %v12879_v38  ;;  %v6699_v54 = vmul.f32 %v6651_v23, %v12880_v48 }
 0x6d0   : > { %6793 = vst [vmem:[%s11703_s24 + $0xd8] sm:$0xff] %v6761_v33  ;;  %6794 = vst [vmem:[%s11703_s24 + $0xe0] sm:$0xff] %v6762_v57  ;;  %v6700_v17 = vmul.f32 %v6652_v59, %v12881_v13 }
 0x6d1   : > { %v6747_v50 = vadd.f32 %v6715_v7, %v6683_v36  ;;  %v6748_v6 = vadd.f32 %v6716_v4, %v6684_v2  ;;  %v6763_v28 = vadd.f32 %v6731_v20, %v6699_v54  ;;  %v6636_v3 = vpop.permute.xlu1 %6635 }
 0x6d2   : > { %v6764_v29 = vadd.f32 %v6732_v21, %v6700_v17  ;;  %v6653_v46 = vsel %vm6637_vm11, %v6634_v60, %v6636_v3 }
 0x6d3   : > { %6779 = vst [vmem:[%s11703_s24 + $0x68] sm:$0xff] %v6747_v50  ;;  %6780 = vst [vmem:[%s11703_s24 + $0x70] sm:$0xff] %v6748_v6  ;;  %v6685_v55 = vmul.f32 %v6653_v46, %v12882_v40  ;;  %v6701_v52 = vmul.f32 %v6653_v46, %v12883_v30 }
 0x6d4   : > { %6795 = vst [vmem:[%s11703_s24 + $0xe8] sm:$0xff] %v6763_v28  ;;  %6796 = vst [vmem:[%s11703_s24 + $0xf0] sm:$0xff] %v6764_v29 }
 0x6d5   : > { %v6749_v34 = vadd.f32 %v6717_v45, %v6685_v55  ;;  %v6765_v24 = vadd.f32 %v6733_v41, %v6701_v52 }
 0x6d7   : > { %6781 = vst [vmem:[%s11703_s24 + $0x78] sm:$0xff] %v6749_v34  ;;  %6797 = vst [vmem:[%s11703_s24 + $0xf8] sm:$0xff] %v6765_v24 }
 0x6d8   : > { %7203 = shalt.err (!%p7200_p11)
}
 0x6d9   : > { %s7204_s6 = scalar_lea.hbm %s11809_s7, 4096  ;;  %s7208_s23 = scalar_lea.hbm %s12885_s12, 8192 }
 0x6da   : > { %p7205_p0 = scmp.ne.s32.totalorder %s11809_s7, %s7204_s6  ;;  %p7209_p6 = scmp.lt.u32.totalorder %s11809_s7, %s12885_s12 }
 0x6db   : > { %p7210_p3 = scmp.lt.u32.totalorder %s7208_s23, %s7204_s6  ;;  %p7212_p5 = scmp.lt.u32.totalorder %s7204_s6, %s11809_s7 }
 0x6dc   : > { %p7206_p2 = pnand %p7205_p0, %p12886_p12 }
 0x6dd   : > { %p7211_p13 = por %p7210_p3, %p7209_p6 }
 0x6de   : > { %p7207_p7 = pneg %p7206_p2 }
 0x6df   : > { %p7213_p8 = por %p7212_p5, %p7211_p13 }
 0x6e1   : > { %p7214_p9 = pnand %p7213_p8, %p7207_p7 }
 0x6e3   : > { %7217 = shalt.err (!%p7214_p9)
}
 0x6e4   : > { %s7278_s2 = smov 2048   ;;  %s7279_s26 = smov 128  }
 0x6e5   : > { %7040 = dma.vmem_to_hbm [thread:$0]  (%p12886_p12), %s11811_s1, 4096, %s11809_s7, %s6799_s25, %s7278_s2, %s7278_s2, %s7279_s26  }
 0x6e6 PF: > { %s12887_s4 = sld [smem:[#allocation15_spill]]  ;;  %s12888_s5 = sld [smem:[#allocation21_spill]] }
 0x6e7   : > { %s12889_s8 = sld [smem:[#allocation18_spill]] }
 0x6ec   : > { %s6827_s29 = sand.u32 1, %s12887_s4   ;;  %p12890_p10 = scmp.ne.s32.totalorder %s12888_s5, 0 }
 0x6ed   : > { %p12891_p1 = scmp.ge.s32.totalorder %s12889_s8, 2  ;;  %s6828_s30 = scalar_lea.sflag [#allocation8], %s6827_s29 }
 0x6ef   : > { %p7051_p4 = pnand %p12891_p1, %p12890_p10 }
 0x6f1   : > { %7243 = dma.done.wait (!%p7051_p4), %s6828_s30, 4096  }
 0x6f2   : > { %7245 = vsyncadd (!%p7051_p4), %s6828_s30, 4294963200  ;;  %s12892_s10 = sld [smem:[#allocation19_spill]]  ;;  %s12893_s29 = sld [smem:[#allocation16_spill]] }
 0x6f3   : > { %s12894_s30 = sld [smem:[#allocation17_spill]]  ;;  %s12895_s9 = sld [smem:[#allocation20_spill]] }
 0x6f8   : > { %p23_p11 = scmp.ge.s32.totalorder %s12892_s10, 4  }
 0x6fa   :  { %25 = sbr.rel (!%p23_p11) target bundleno = 16 (0x10), region = 153 }
 0x701   :  { %6833 = vsyncpa [#allocation7], 1 }
 0x702   :  { %6835 = vsyncpa [#allocation7 + $0x1], 1 }
 0x703   :  { %6836 = vsyncpa [#allocation8], 1 }
 0x704   :  { %6838 = vsyncpa [#allocation8 + $0x1], 1 }
 0x705   :  { %6839 = vsyncpa [#allocation9], 1 }
 0x706   :  { %6841 = vsyncpa [#allocation9 + $0x1], 1 }

</bundles_post_ra>
